<compile_context>
chip_gen: v7x
topology: tpu7x:2x2x1
jax: 0.10.0
libtpu: 0.0.40
codegen_flags: <defaults>
</compile_context>

<pallas_src>
import functools

import jax
import jax.numpy as jnp
from jax import lax
from jax.experimental import pallas as pl
from jax.experimental.pallas import tpu as pltpu

LEAKY_SLOPE = 0.1   # matches nn.LeakyReLU(0.1) in the reference module
BN_EPS = 1e-5


# ----------------------------------------------------------------------------
# Helpers
# ----------------------------------------------------------------------------
def _pick_row_tile(r, cap=2048):
    """Largest power-of-two row tile <= cap dividing r.

    When r >= 16 the cap is clamped to r//2 so the 'parallel' grid axis has at
    least two steps (lets v7x's two TensorCores both participate); on v5e/v6e the
    larger cap just amortizes the ~0.35us per-step overhead."""
    if r >= 16:
        cap = min(cap, r // 2)
    for t in (2048, 1024, 512, 256, 128, 64, 32, 16, 8):
        if t <= cap and r % t == 0:
            return t
    return r


# ----------------------------------------------------------------------------
# Pallas kernels
# ----------------------------------------------------------------------------
def _conv_taps_kernel(x_ref, w_ref, y_ref, sum_ref, ssq_ref, *,
                      oh, ow, taps, row_chunk):
    """Conv2d(k=4, s=2, p=1) for one image as per-tap matmuls, with fused per-image
    BatchNorm partial statistics.

    x_ref   : (1, Hs, Ws, K)   bf16  space-to-depth (K=4*Cin, 4 taps) or full
                                     im2col (K=16*Cin, 1 tap) view of one image
    w_ref   : (T, K, Cout)     bf16  one (K, Cout) matrix per tap
    y_ref   : (1, oh*ow, Cout) bf16  conv output for this image (no bias: BN cancels it)
    sum_ref : (1, 1, Cout)     f32   per-image per-channel sum   (partial BN stats)
    ssq_ref : (1, 1, Cout)     f32   per-image per-channel sumsq (partial BN stats)
    """
    cout = w_ref.shape[-1]
    n_chunks = oh // row_chunk

    def body(ci, carry):
        csum, cssq = carry
        r0 = ci * row_chunk                    # output-row offset of this chunk
        # Chunked accumulator: at most ~(256, Cout) f32 live at a time.
        acc = jnp.zeros((row_chunk * ow, cout), jnp.float32)
        for t, (ty, tx) in enumerate(taps):
            xt = x_ref[0, pl.ds(r0 + ty, row_chunk), pl.ds(tx, ow), :]
            xt = xt.reshape(row_chunk * ow, xt.shape[-1])
            acc = acc + jnp.dot(xt, w_ref[t], preferred_element_type=jnp.float32)
        yb = acc.astype(y_ref.dtype)
        y_ref[0, pl.ds(r0 * ow, row_chunk * ow), :] = yb
        # Stats on the same (bf16-rounded) values that will be normalized.
        yf = yb.astype(jnp.float32)
        csum = csum + jnp.sum(yf, axis=0, keepdims=True)
        cssq = cssq + jnp.sum(yf * yf, axis=0, keepdims=True)
        return csum, cssq

    init = (jnp.zeros((1, cout), jnp.float32), jnp.zeros((1, cout), jnp.float32))
    csum, cssq = lax.fori_loop(0, n_chunks, body, init, unroll=True)
    sum_ref[0] = csum
    ssq_ref[0] = cssq


def _bn_lrelu_kernel(x_ref, scale_ref, shift_ref, o_ref):
    """Apply precomputed per-channel affine (BatchNorm, training-mode batch stats)
    followed by LeakyReLU(0.1)."""
    y = x_ref[...].astype(jnp.float32) * scale_ref[...] + shift_ref[...]
    o_ref[...] = jnp.where(y >= 0.0, y, LEAKY_SLOPE * y).astype(o_ref.dtype)


# ----------------------------------------------------------------------------
# Layer wrappers
# ----------------------------------------------------------------------------
def bn_leakyrelu_apply(y_flat, scale, shift):
    """y_flat: (M, C) bf16; scale/shift: (C,) f32 -> (M, C) bf16."""
    M, C = y_flat.shape
    # Present a lane-dense slab to the load/store path when C < 128 (unmasked vst).
    if C < 128 and 128 % C == 0 and (M * C) % 128 == 0:
        reps = 128 // C
        x2 = y_flat.reshape((M * C) // 128, 128)
        prep = lambda v: jnp.tile(v.reshape(1, C).astype(jnp.float32), (1, reps))
    else:
        x2 = y_flat
        prep = lambda v: v.reshape(1, C).astype(jnp.float32)
    R, L = x2.shape
    tm = _pick_row_tile(R)

    out = pl.pallas_call(
        _bn_lrelu_kernel,
        grid=(R // tm,),
        in_specs=[pl.BlockSpec((tm, L), lambda i: (i, 0)),
                  pl.BlockSpec((1, L), lambda i: (0, 0)),
                  pl.BlockSpec((1, L), lambda i: (0, 0))],
        out_specs=pl.BlockSpec((tm, L), lambda i: (i, 0)),
        out_shape=jax.ShapeDtypeStruct((R, L), jnp.bfloat16),
        compiler_params=pltpu.CompilerParams(dimension_semantics=("parallel",)),
    )(x2, prep(scale), prep(shift))
    return out.reshape(M, C)


def conv4x4s2_bn_lrelu(x_nhwc, w_taps, gamma, beta):
    """Conv2d(k=4,s=2,p=1) + BatchNorm2d(train) + LeakyReLU(0.1).  x: (N,H,W,Cin) bf16."""
    N, H, W, Cin = x_nhwc.shape
    OH, OW = H // 2, W // 2
    T, K, cout = w_taps.shape

    xp = jnp.pad(x_nhwc, ((0, 0), (1, 1), (1, 1), (0, 0)))
    if T == 1:
        # Cin == 1: full 4x4 im2col (K = 16) so the kernel does ONE matmul per chunk
        # instead of four K=4 matmuls (fills the MXU contract dim, 1 acc pass).
        cols = [xp[:, ky:ky + 2 * OH:2, kx:kx + 2 * OW:2, 0]
                for ky in range(4) for kx in range(4)]
        xs = jnp.stack(cols, axis=-1)                         # (N, OH, OW, 16) bf16
        Hs, Ws = OH, OW
        taps = ((0, 0),)
    else:
        # pad=1 + space-to-depth(2): the 4x4/s2 conv becomes a 2x2/s1 conv.
        Hs, Ws = (H + 2) // 2, (W + 2) // 2
        xs = (xp.reshape(N, Hs, 2, Ws, 2, Cin)
                .transpose(0, 1, 3, 2, 4, 5)
                .reshape(N, Hs, Ws, 4 * Cin))                 # (N, Hs, Ws, 4*Cin) bf16
        taps = ((0, 0), (0, 1), (1, 0), (1, 1))

    # Spatial chunk: ~256 output positions per accumulator (whole output rows).
    row_chunk = max(1, min(OH, 256 // OW))
    while OH % row_chunk:
        row_chunk -= 1

    y, psum, pssq = pl.pallas_call(
        functools.partial(_conv_taps_kernel, oh=OH, ow=OW, taps=taps,
                          row_chunk=row_chunk),
        grid=(N,),
        in_specs=[
            pl.BlockSpec((1, Hs, Ws, K), lambda n: (n, 0, 0, 0)),
            pl.BlockSpec((T, K, cout), lambda n: (0, 0, 0)),
        ],
        out_specs=(
            pl.BlockSpec((1, OH * OW, cout), lambda n: (n, 0, 0)),
            pl.BlockSpec((1, 1, cout), lambda n: (n, 0, 0)),
            pl.BlockSpec((1, 1, cout), lambda n: (n, 0, 0)),
        ),
        out_shape=(
            jax.ShapeDtypeStruct((N, OH * OW, cout), jnp.bfloat16),
            jax.ShapeDtypeStruct((N, 1, cout), jnp.float32),   # per-image partial sums
            jax.ShapeDtypeStruct((N, 1, cout), jnp.float32),   # per-image partial sumsq
        ),
        # Per-image partial stats -> every grid step writes its own blocks, so the
        # batch axis can be split across both v7x TensorCores.
        compiler_params=pltpu.CompilerParams(dimension_semantics=("parallel",)),
    )(xs, w_taps)

    # Finalize batch statistics (tiny (N, C) reduction + scalar math; left to XLA).
    M = N * OH * OW
    csum = jnp.sum(psum, axis=(0, 1))
    cssq = jnp.sum(pssq, axis=(0, 1))
    mean = csum / M
    var = jnp.maximum(cssq / M - mean * mean, 0.0)          # biased var (PyTorch train mode)
    scale = gamma * lax.rsqrt(var + BN_EPS)
    shift = beta - mean * scale

    out = bn_leakyrelu_apply(y.reshape(M, cout), scale, shift)
    return out.reshape(N, OH, OW, cout)


# ----------------------------------------------------------------------------
# Parameters (deterministic synthetic init, mirroring the PyTorch module shapes)
# ----------------------------------------------------------------------------
def conv_weight_to_taps(w):
    """(Cout, Cin, 4, 4) PyTorch conv weight -> (T, K, Cout) tap matrices.

    Cin == 1 -> single tap (K=16) matching the (ky, kx) im2col channel order.
    Cin  > 1 -> four 2x2 taps (K=4*Cin) matching the space-to-depth (dy, dx, cin) order."""
    cout, cin = w.shape[0], w.shape[1]
    if cin == 1:
        mat = jnp.transpose(w, (2, 3, 1, 0)).reshape(16 * cin, cout)
        return mat[None]                                       # (1, 16, Cout)
    taps = []
    for ty in range(2):
        for tx in range(2):
            wt = w[:, :, 2 * ty:2 * ty + 2, 2 * tx:2 * tx + 2]  # (Cout, Cin, 2, 2)
            wt = jnp.transpose(wt, (2, 3, 1, 0))                # (dy, dx, cin, cout)
            taps.append(wt.reshape(4 * cin, cout))
    return jnp.stack(taps, axis=0)                              # (4, 4*Cin, Cout)


def _head_mat(w):
    """(Cout, Cin, 4, 4) -> (4*4*Cin, Cout) flattened in (kh, kw, cin) order."""
    return jnp.transpose(w, (2, 3, 1, 0)).reshape(-1, w.shape[0])


def init_params(key, image_size, num_classes):
    c1, c2 = image_size, image_size * 2
    layer_defs = [("layer1", 1, c1), ("layer2", c1, c1),
                  ("layer3", c1, c2), ("layer4", c2, c2)]
    params = {}
    for name, cin, cout in layer_defs:
        key, kw_ = jax.random.split(key)
        w = jax.random.normal(kw_, (cout, cin, 4, 4), jnp.float32) * 0.05
        # NOTE: the conv bias of these layers is omitted on purpose — training-mode
        # BatchNorm subtracts the batch mean, so the bias cancels exactly.
        params[name] = dict(
            w_taps=conv_weight_to_taps(w).astype(jnp.bfloat16),
            gamma=jnp.ones((cout,), jnp.float32),    # BatchNorm2d default init
            beta=jnp.zeros((cout,), jnp.float32),
        )
    key, ksw, ksb, kuw, kub = jax.random.split(key, 5)
    w_sup = jax.random.normal(ksw, (num_classes, c2, 4, 4), jnp.float32) * 0.05
    w_unsup = jax.random.normal(kuw, (1, c2, 4, 4), jnp.float32) * 0.05
    b_sup = jax.random.normal(ksb, (num_classes,), jnp.float32) * 0.05
    b_unsup = jax.random.normal(kub, (1,), jnp.float32) * 0.05
    # Fuse the two heads: column 0 = unsupervised, columns 1.. = supervised.
    params["head"] = dict(
        w=jnp.concatenate([_head_mat(w_unsup), _head_mat(w_sup)], axis=1).astype(jnp.bfloat16),
        b=jnp.concatenate([b_unsup, b_sup], axis=0),
    )
    return params


# ----------------------------------------------------------------------------
# Forward pass (semantics of SemiSupervisedDiscriminator.forward)
# ----------------------------------------------------------------------------
@jax.jit
def forward(params, x_nchw):
    N = x_nchw.shape[0]
    x = jnp.transpose(x_nchw, (0, 2, 3, 1)).astype(jnp.bfloat16)   # NCHW -> NHWC

    out = x
    for name in ("layer1", "layer2", "layer3", "layer4"):
        p = params[name]
        out = conv4x4s2_bn_lrelu(out, p["w_taps"], p["gamma"], p["beta"])

    # Heads: 4x4 valid conv on a 4x4 map == matmul over the flattened (kh,kw,cin)
    # window.  (N, 16*C) x (16*C, 1+num_classes) is a few kFLOPs; per the perf review
    # a dedicated Pallas call is pure launch overhead, so it is left to XLA.
    a = out.reshape(N, -1)                                          # bf16, (kh,kw,cin) order
    head = params["head"]
    fused = jnp.dot(a, head["w"], preferred_element_type=jnp.float32) + head["b"]

    out_unsup = fused[:, :1].reshape(N, 1, 1, 1)
    out_sup = fused[:, 1:].reshape(N, -1, 1, 1)
    return out_unsup, out_sup


if __name__ == "__main__":
    # Small config: image_size controls channel widths (16 / 32 here instead of 64 / 128);
    # spatial input must be 64x64 so the final 4x4 valid convs produce 1x1 outputs.
    image_size = 16
    num_classes = 10
    batch = 2

    x = jax.random.normal(jax.random.PRNGKey(0), (batch, 1, 64, 64), jnp.float32)
    params = init_params(jax.random.PRNGKey(1), image_size, num_classes)

    out_unsup, out_sup = forward(params, x)
    jax.block_until_ready((out_unsup, out_sup))

    assert out_unsup.shape == (batch, 1, 1, 1), out_unsup.shape
    assert out_sup.shape == (batch, num_classes, 1, 1), out_sup.shape
    assert bool(jnp.all(jnp.isfinite(out_unsup))) and bool(jnp.all(jnp.isfinite(out_sup)))

    print("KERNEL_OK")
</pallas_src>

<mosaic_0001>
module attributes {stable_mosaic.version = 11 : i64} {
  func.func @_conv_taps_kernel(%arg0: i32, %arg1: memref<1x32x32x16xbf16, #tpu.memory_space<vmem>>, %arg2: memref<1x16x16xbf16, #tpu.memory_space<vmem>>, %arg3: memref<1x1024x16xbf16, #tpu.memory_space<vmem>>, %arg4: memref<1x1x16xf32, #tpu.memory_space<vmem>>, %arg5: memref<1x1x16xf32, #tpu.memory_space<vmem>>) attributes {dimension_semantics = [#tpu.dimension_semantics<parallel>], iteration_bounds = array<i64: 2>, scalar_prefetch = 0 : i64, scratch_operands = 0 : i64, tpu.core_type = #tpu.core_type<tc>, window_params = [{transform_indices = @transform_0, window_bounds = array<i64: 1, 32, 32, 16>}, {pipeline_mode = #tpu.pipeline_mode<synchronous>, transform_indices = @transform_1, window_bounds = array<i64: 1, 16, 16>}, {transform_indices = @transform_2, window_bounds = array<i64: 1, 1024, 16>}, {transform_indices = @transform_3, window_bounds = array<i64: 1, 1, 16>}, {transform_indices = @transform_4, window_bounds = array<i64: 1, 1, 16>}]} {
    %cst = arith.constant 0.000000e+00 : f32
    %0 = vector.broadcast %cst : f32 to vector<1x16xf32>
    %cst_0 = arith.constant 0.000000e+00 : f32
    %1 = vector.broadcast %cst_0 : f32 to vector<1x16xf32>
    %c0_i32 = arith.constant 0 : i32
    %c8_i32 = arith.constant 8 : i32
    %2 = arith.muli %c0_i32, %c8_i32 : i32
    %cst_1 = arith.constant 0.000000e+00 : f32
    %3 = vector.broadcast %cst_1 : f32 to vector<256x16xf32>
    %c0_i32_2 = arith.constant 0 : i32
    %4 = arith.addi %2, %c0_i32_2 : i32
    %c0 = arith.constant 0 : index
    %5 = arith.index_cast %4 : i32 to index
    %c0_3 = arith.constant 0 : index
    %c0_4 = arith.constant 0 : index
    %6 = vector.load %arg1[%c0, %5, %c0_3, %c0_4] : memref<1x32x32x16xbf16, #tpu.memory_space<vmem>>, vector<1x8x32x16xbf16>
    %7 = vector.shape_cast %6 : vector<1x8x32x16xbf16> to vector<8x32x16xbf16>
    %8 = vector.shape_cast %7 : vector<8x32x16xbf16> to vector<256x16xbf16>
    %c0_5 = arith.constant 0 : index
    %c0_6 = arith.constant 0 : index
    %c0_7 = arith.constant 0 : index
    %9 = vector.load %arg2[%c0_5, %c0_6, %c0_7] : memref<1x16x16xbf16, #tpu.memory_space<vmem>>, vector<1x16x16xbf16>
    %10 = vector.shape_cast %9 : vector<1x16x16xbf16> to vector<16x16xbf16>
    %cst_8 = arith.constant dense<0.000000e+00> : vector<256x16xf32>
    %11 = tpu.matmul %8, %10, %cst_8 {dimension_numbers = #tpu.dot_dimension_numbers<[1], [0], [0], [1], [0, 0, 1, 1], [], []>} : vector<256x16xbf16>, vector<16x16xbf16>, vector<256x16xf32> -> vector<256x16xf32>
    %12 = arith.addf %3, %11 : vector<256x16xf32>
    %13 = arith.truncf %12 : vector<256x16xf32> to vector<256x16xbf16>
    %c32_i32 = arith.constant 32 : i32
    %14 = arith.muli %2, %c32_i32 : i32
    %c0_9 = arith.constant 0 : index
    %15 = arith.index_cast %14 : i32 to index
    %c0_10 = arith.constant 0 : index
    %16 = vector.load %arg3[%c0_9, %15, %c0_10] : memref<1x1024x16xbf16, #tpu.memory_space<vmem>>, vector<1x256x16xbf16>
    %17 = vector.shape_cast %16 : vector<1x256x16xbf16> to vector<256x16xbf16>
    %18 = vector.shape_cast %13 : vector<256x16xbf16> to vector<1x256x16xbf16>
    tpu.vector_store %arg3[%c0_9, %15, %c0_10], %18 {strides = array<i32>} : memref<1x1024x16xbf16, #tpu.memory_space<vmem>>, vector<1x256x16xbf16>,
    %19 = arith.extf %13 : vector<256x16xbf16> to vector<256x16xf32>
    %cst_11 = arith.constant dense<0.000000e+00> : vector<16xf32>
    %20 = vector.multi_reduction <add>, %19, %cst_11 [0] : vector<256x16xf32> to vector<16xf32>
    %21 = vector.shape_cast %20 : vector<16xf32> to vector<1x16xf32>
    %22 = arith.addf %0, %21 : vector<1x16xf32>
    %23 = arith.mulf %19, %19 : vector<256x16xf32>
    %cst_12 = arith.constant dense<0.000000e+00> : vector<16xf32>
    %24 = vector.multi_reduction <add>, %23, %cst_12 [0] : vector<256x16xf32> to vector<16xf32>
    %25 = vector.shape_cast %24 : vector<16xf32> to vector<1x16xf32>
    %26 = arith.addf %1, %25 : vector<1x16xf32>
    %c1_i32 = arith.constant 1 : i32
    %c8_i32_13 = arith.constant 8 : i32
    %27 = arith.muli %c1_i32, %c8_i32_13 : i32
    %cst_14 = arith.constant 0.000000e+00 : f32
    %28 = vector.broadcast %cst_14 : f32 to vector<256x16xf32>
    %c0_i32_15 = arith.constant 0 : i32
    %29 = arith.addi %27, %c0_i32_15 : i32
    %c0_16 = arith.constant 0 : index
    %30 = arith.index_cast %29 : i32 to index
    %c0_17 = arith.constant 0 : index
    %c0_18 = arith.constant 0 : index
    %31 = vector.load %arg1[%c0_16, %30, %c0_17, %c0_18] : memref<1x32x32x16xbf16, #tpu.memory_space<vmem>>, vector<1x8x32x16xbf16>
    %32 = vector.shape_cast %31 : vector<1x8x32x16xbf16> to vector<8x32x16xbf16>
    %33 = vector.shape_cast %32 : vector<8x32x16xbf16> to vector<256x16xbf16>
    %c0_19 = arith.constant 0 : index
    %c0_20 = arith.constant 0 : index
    %c0_21 = arith.constant 0 : index
    %34 = vector.load %arg2[%c0_19, %c0_20, %c0_21] : memref<1x16x16xbf16, #tpu.memory_space<vmem>>, vector<1x16x16xbf16>
    %35 = vector.shape_cast %34 : vector<1x16x16xbf16> to vector<16x16xbf16>
    %cst_22 = arith.constant dense<0.000000e+00> : vector<256x16xf32>
    %36 = tpu.matmul %33, %35, %cst_22 {dimension_numbers = #tpu.dot_dimension_numbers<[1], [0], [0], [1], [0, 0, 1, 1], [], []>} : vector<256x16xbf16>, vector<16x16xbf16>, vector<256x16xf32> -> vector<256x16xf32>
    %37 = arith.addf %28, %36 : vector<256x16xf32>
    %38 = arith.truncf %37 : vector<256x16xf32> to vector<256x16xbf16>
    %c32_i32_23 = arith.constant 32 : i32
    %39 = arith.muli %27, %c32_i32_23 : i32
    %c0_24 = arith.constant 0 : index
    %40 = arith.index_cast %39 : i32 to index
    %c0_25 = arith.constant 0 : index
    %41 = vector.load %arg3[%c0_24, %40, %c0_25] : memref<1x1024x16xbf16, #tpu.memory_space<vmem>>, vector<1x256x16xbf16>
    %42 = vector.shape_cast %41 : vector<1x256x16xbf16> to vector<256x16xbf16>
    %43 = vector.shape_cast %38 : vector<256x16xbf16> to vector<1x256x16xbf16>
    tpu.vector_store %arg3[%c0_24, %40, %c0_25], %43 {strides = array<i32>} : memref<1x1024x16xbf16, #tpu.memory_space<vmem>>, vector<1x256x16xbf16>,
    %44 = arith.extf %38 : vector<256x16xbf16> to vector<256x16xf32>
    %cst_26 = arith.constant dense<0.000000e+00> : vector<16xf32>
    %45 = vector.multi_reduction <add>, %44, %cst_26 [0] : vector<256x16xf32> to vector<16xf32>
    %46 = vector.shape_cast %45 : vector<16xf32> to vector<1x16xf32>
    %47 = arith.addf %22, %46 : vector<1x16xf32>
    %48 = arith.mulf %44, %44 : vector<256x16xf32>
    %cst_27 = arith.constant dense<0.000000e+00> : vector<16xf32>
    %49 = vector.multi_reduction <add>, %48, %cst_27 [0] : vector<256x16xf32> to vector<16xf32>
    %50 = vector.shape_cast %49 : vector<16xf32> to vector<1x16xf32>
    %51 = arith.addf %26, %50 : vector<1x16xf32>
    %c2_i32 = arith.constant 2 : i32
    %c8_i32_28 = arith.constant 8 : i32
    %52 = arith.muli %c2_i32, %c8_i32_28 : i32
    %cst_29 = arith.constant 0.000000e+00 : f32
    %53 = vector.broadcast %cst_29 : f32 to vector<256x16xf32>
    %c0_i32_30 = arith.constant 0 : i32
    %54 = arith.addi %52, %c0_i32_30 : i32
    %c0_31 = arith.constant 0 : index
    %55 = arith.index_cast %54 : i32 to index
    %c0_32 = arith.constant 0 : index
    %c0_33 = arith.constant 0 : index
    %56 = vector.load %arg1[%c0_31, %55, %c0_32, %c0_33] : memref<1x32x32x16xbf16, #tpu.memory_space<vmem>>, vector<1x8x32x16xbf16>
    %57 = vector.shape_cast %56 : vector<1x8x32x16xbf16> to vector<8x32x16xbf16>
    %58 = vector.shape_cast %57 : vector<8x32x16xbf16> to vector<256x16xbf16>
    %c0_34 = arith.constant 0 : index
    %c0_35 = arith.constant 0 : index
    %c0_36 = arith.constant 0 : index
    %59 = vector.load %arg2[%c0_34, %c0_35, %c0_36] : memref<1x16x16xbf16, #tpu.memory_space<vmem>>, vector<1x16x16xbf16>
    %60 = vector.shape_cast %59 : vector<1x16x16xbf16> to vector<16x16xbf16>
    %cst_37 = arith.constant dense<0.000000e+00> : vector<256x16xf32>
    %61 = tpu.matmul %58, %60, %cst_37 {dimension_numbers = #tpu.dot_dimension_numbers<[1], [0], [0], [1], [0, 0, 1, 1], [], []>} : vector<256x16xbf16>, vector<16x16xbf16>, vector<256x16xf32> -> vector<256x16xf32>
    %62 = arith.addf %53, %61 : vector<256x16xf32>
    %63 = arith.truncf %62 : vector<256x16xf32> to vector<256x16xbf16>
    %c32_i32_38 = arith.constant 32 : i32
    %64 = arith.muli %52, %c32_i32_38 : i32
    %c0_39 = arith.constant 0 : index
    %65 = arith.index_cast %64 : i32 to index
    %c0_40 = arith.constant 0 : index
    %66 = vector.load %arg3[%c0_39, %65, %c0_40] : memref<1x1024x16xbf16, #tpu.memory_space<vmem>>, vector<1x256x16xbf16>
    %67 = vector.shape_cast %66 : vector<1x256x16xbf16> to vector<256x16xbf16>
    %68 = vector.shape_cast %63 : vector<256x16xbf16> to vector<1x256x16xbf16>
    tpu.vector_store %arg3[%c0_39, %65, %c0_40], %68 {strides = array<i32>} : memref<1x1024x16xbf16, #tpu.memory_space<vmem>>, vector<1x256x16xbf16>,
    %69 = arith.extf %63 : vector<256x16xbf16> to vector<256x16xf32>
    %cst_41 = arith.constant dense<0.000000e+00> : vector<16xf32>
    %70 = vector.multi_reduction <add>, %69, %cst_41 [0] : vector<256x16xf32> to vector<16xf32>
    %71 = vector.shape_cast %70 : vector<16xf32> to vector<1x16xf32>
    %72 = arith.addf %47, %71 : vector<1x16xf32>
    %73 = arith.mulf %69, %69 : vector<256x16xf32>
    %cst_42 = arith.constant dense<0.000000e+00> : vector<16xf32>
    %74 = vector.multi_reduction <add>, %73, %cst_42 [0] : vector<256x16xf32> to vector<16xf32>
    %75 = vector.shape_cast %74 : vector<16xf32> to vector<1x16xf32>
    %76 = arith.addf %51, %75 : vector<1x16xf32>
    %c3_i32 = arith.constant 3 : i32
    %c8_i32_43 = arith.constant 8 : i32
    %77 = arith.muli %c3_i32, %c8_i32_43 : i32
    %cst_44 = arith.constant 0.000000e+00 : f32
    %78 = vector.broadcast %cst_44 : f32 to vector<256x16xf32>
    %c0_i32_45 = arith.constant 0 : i32
    %79 = arith.addi %77, %c0_i32_45 : i32
    %c0_46 = arith.constant 0 : index
    %80 = arith.index_cast %79 : i32 to index
    %c0_47 = arith.constant 0 : index
    %c0_48 = arith.constant 0 : index
    %81 = vector.load %arg1[%c0_46, %80, %c0_47, %c0_48] : memref<1x32x32x16xbf16, #tpu.memory_space<vmem>>, vector<1x8x32x16xbf16>
    %82 = vector.shape_cast %81 : vector<1x8x32x16xbf16> to vector<8x32x16xbf16>
    %83 = vector.shape_cast %82 : vector<8x32x16xbf16> to vector<256x16xbf16>
    %c0_49 = arith.constant 0 : index
    %c0_50 = arith.constant 0 : index
    %c0_51 = arith.constant 0 : index
    %84 = vector.load %arg2[%c0_49, %c0_50, %c0_51] : memref<1x16x16xbf16, #tpu.memory_space<vmem>>, vector<1x16x16xbf16>
    %85 = vector.shape_cast %84 : vector<1x16x16xbf16> to vector<16x16xbf16>
    %cst_52 = arith.constant dense<0.000000e+00> : vector<256x16xf32>
    %86 = tpu.matmul %83, %85, %cst_52 {dimension_numbers = #tpu.dot_dimension_numbers<[1], [0], [0], [1], [0, 0, 1, 1], [], []>} : vector<256x16xbf16>, vector<16x16xbf16>, vector<256x16xf32> -> vector<256x16xf32>
    %87 = arith.addf %78, %86 : vector<256x16xf32>
    %88 = arith.truncf %87 : vector<256x16xf32> to vector<256x16xbf16>
    %c32_i32_53 = arith.constant 32 : i32
    %89 = arith.muli %77, %c32_i32_53 : i32
    %c0_54 = arith.constant 0 : index
    %90 = arith.index_cast %89 : i32 to index
    %c0_55 = arith.constant 0 : index
    %91 = vector.load %arg3[%c0_54, %90, %c0_55] : memref<1x1024x16xbf16, #tpu.memory_space<vmem>>, vector<1x256x16xbf16>
    %92 = vector.shape_cast %91 : vector<1x256x16xbf16> to vector<256x16xbf16>
    %93 = vector.shape_cast %88 : vector<256x16xbf16> to vector<1x256x16xbf16>
    tpu.vector_store %arg3[%c0_54, %90, %c0_55], %93 {strides = array<i32>} : memref<1x1024x16xbf16, #tpu.memory_space<vmem>>, vector<1x256x16xbf16>,
    %94 = arith.extf %88 : vector<256x16xbf16> to vector<256x16xf32>
    %cst_56 = arith.constant dense<0.000000e+00> : vector<16xf32>
    %95 = vector.multi_reduction <add>, %94, %cst_56 [0] : vector<256x16xf32> to vector<16xf32>
    %96 = vector.shape_cast %95 : vector<16xf32> to vector<1x16xf32>
    %97 = arith.addf %72, %96 : vector<1x16xf32>
    %98 = arith.mulf %94, %94 : vector<256x16xf32>
    %cst_57 = arith.constant dense<0.000000e+00> : vector<16xf32>
    %99 = vector.multi_reduction <add>, %98, %cst_57 [0] : vector<256x16xf32> to vector<16xf32>
    %100 = vector.shape_cast %99 : vector<16xf32> to vector<1x16xf32>
    %101 = arith.addf %76, %100 : vector<1x16xf32>
    %c4_i32 = arith.constant 4 : i32
    %c0_58 = arith.constant 0 : index
    %c0_59 = arith.constant 0 : index
    %c0_60 = arith.constant 0 : index
    %102 = vector.load %arg4[%c0_58, %c0_59, %c0_60] : memref<1x1x16xf32, #tpu.memory_space<vmem>>, vector<1x1x16xf32>
    %103 = vector.shape_cast %102 : vector<1x1x16xf32> to vector<1x16xf32>
    %104 = vector.shape_cast %97 : vector<1x16xf32> to vector<1x1x16xf32>
    tpu.vector_store %arg4[%c0_58, %c0_59, %c0_60], %104 {strides = array<i32>} : memref<1x1x16xf32, #tpu.memory_space<vmem>>, vector<1x1x16xf32>,
    %c0_61 = arith.constant 0 : index
    %c0_62 = arith.constant 0 : index
    %c0_63 = arith.constant 0 : index
    %105 = vector.load %arg5[%c0_61, %c0_62, %c0_63] : memref<1x1x16xf32, #tpu.memory_space<vmem>>, vector<1x1x16xf32>
    %106 = vector.shape_cast %105 : vector<1x1x16xf32> to vector<1x16xf32>
    %107 = vector.shape_cast %101 : vector<1x16xf32> to vector<1x1x16xf32>
    tpu.vector_store %arg5[%c0_61, %c0_62, %c0_63], %107 {strides = array<i32>} : memref<1x1x16xf32, #tpu.memory_space<vmem>>, vector<1x1x16xf32>,
    return
  }
  func.func @transform_0(%arg0: i32) -> (i32, i32, i32, i32) {
    %c0_i32 = arith.constant 0 : i32
    %c0_i32_0 = arith.constant 0 : i32
    %c0_i32_1 = arith.constant 0 : i32
    %c0_i32_2 = arith.constant 0 : i32
    return %arg0, %c0_i32, %c0_i32_0, %c0_i32_1 : i32, i32, i32, i32
  }
  func.func @transform_1(%arg0: i32) -> (i32, i32, i32) {
    %c0_i32 = arith.constant 0 : i32
    %c0_i32_0 = arith.constant 0 : i32
    %c0_i32_1 = arith.constant 0 : i32
    %c0_i32_2 = arith.constant 0 : i32
    return %c0_i32, %c0_i32_0, %c0_i32_1 : i32, i32, i32
  }
  func.func @transform_2(%arg0: i32) -> (i32, i32, i32) {
    %c0_i32 = arith.constant 0 : i32
    %c0_i32_0 = arith.constant 0 : i32
    %c0_i32_1 = arith.constant 0 : i32
    return %arg0, %c0_i32, %c0_i32_0 : i32, i32, i32
  }
  func.func @transform_3(%arg0: i32) -> (i32, i32, i32) {
    %c0_i32 = arith.constant 0 : i32
    %c0_i32_0 = arith.constant 0 : i32
    %c0_i32_1 = arith.constant 0 : i32
    return %arg0, %c0_i32, %c0_i32_0 : i32, i32, i32
  }
  func.func @transform_4(%arg0: i32) -> (i32, i32, i32) {
    %c0_i32 = arith.constant 0 : i32
    %c0_i32_0 = arith.constant 0 : i32
    %c0_i32_1 = arith.constant 0 : i32
    return %arg0, %c0_i32, %c0_i32_0 : i32, i32, i32
  }
}

module attributes {stable_mosaic.version = 11 : i64} {
  func.func @_bn_lrelu_kernel(%arg0: i32, %arg1: memref<128x128xbf16, #tpu.memory_space<vmem>>, %arg2: memref<1x128xf32, #tpu.memory_space<vmem>>, %arg3: memref<1x128xf32, #tpu.memory_space<vmem>>, %arg4: memref<128x128xbf16, #tpu.memory_space<vmem>>) attributes {dimension_semantics = [#tpu.dimension_semantics<parallel>], iteration_bounds = array<i64: 2>, scalar_prefetch = 0 : i64, scratch_operands = 0 : i64, tpu.core_type = #tpu.core_type<tc>, window_params = [{transform_indices = @transform_0, window_bounds = array<i64: 128, 128>}, {pipeline_mode = #tpu.pipeline_mode<synchronous>, transform_indices = @transform_1, window_bounds = array<i64: 1, 128>}, {pipeline_mode = #tpu.pipeline_mode<synchronous>, transform_indices = @transform_2, window_bounds = array<i64: 1, 128>}, {transform_indices = @transform_3, window_bounds = array<i64: 128, 128>}]} {
    %c0 = arith.constant 0 : index
    %c0_0 = arith.constant 0 : index
    %0 = vector.load %arg1[%c0, %c0_0] : memref<128x128xbf16, #tpu.memory_space<vmem>>, vector<128x128xbf16>
    %1 = arith.extf %0 : vector<128x128xbf16> to vector<128x128xf32>
    %c0_1 = arith.constant 0 : index
    %c0_2 = arith.constant 0 : index
    %2 = vector.load %arg2[%c0_1, %c0_2] : memref<1x128xf32, #tpu.memory_space<vmem>>, vector<1x128xf32>
    %3 = vector.broadcast %2 : vector<1x128xf32> to vector<128x128xf32>
    %4 = arith.mulf %1, %3 : vector<128x128xf32>
    %c0_3 = arith.constant 0 : index
    %c0_4 = arith.constant 0 : index
    %5 = vector.load %arg3[%c0_3, %c0_4] : memref<1x128xf32, #tpu.memory_space<vmem>>, vector<1x128xf32>
    %6 = vector.broadcast %5 : vector<1x128xf32> to vector<128x128xf32>
    %7 = arith.addf %4, %6 : vector<128x128xf32>
    %cst = arith.constant 0.000000e+00 : f32
    %8 = vector.broadcast %cst : f32 to vector<128x128xf32>
    %9 = arith.cmpf oge, %7, %8 : vector<128x128xf32>
    %cst_5 = arith.constant 1.000000e-01 : f32
    %10 = vector.broadcast %cst_5 : f32 to vector<128x128xf32>
    %11 = arith.mulf %10, %7 : vector<128x128xf32>
    %12 = arith.select %9, %7, %11 : vector<128x128xi1>, vector<128x128xf32>
    %13 = arith.truncf %12 : vector<128x128xf32> to vector<128x128xbf16>
    %c0_6 = arith.constant 0 : index
    %c0_7 = arith.constant 0 : index
    %14 = vector.load %arg4[%c0_6, %c0_7] : memref<128x128xbf16, #tpu.memory_space<vmem>>, vector<128x128xbf16>
    tpu.vector_store %arg4[%c0_6, %c0_7], %13 {strides = array<i32>} : memref<128x128xbf16, #tpu.memory_space<vmem>>, vector<128x128xbf16>,
    return
  }
  func.func @transform_0(%arg0: i32) -> (i32, i32) {
    %c0_i32 = arith.constant 0 : i32
    %c0_i32_0 = arith.constant 0 : i32
    return %arg0, %c0_i32 : i32, i32
  }
  func.func @transform_1(%arg0: i32) -> (i32, i32) {
    %c0_i32 = arith.constant 0 : i32
    %c0_i32_0 = arith.constant 0 : i32
    %c0_i32_1 = arith.constant 0 : i32
    return %c0_i32, %c0_i32_0 : i32, i32
  }
  func.func @transform_2(%arg0: i32) -> (i32, i32) {
    %c0_i32 = arith.constant 0 : i32
    %c0_i32_0 = arith.constant 0 : i32
    %c0_i32_1 = arith.constant 0 : i32
    return %c0_i32, %c0_i32_0 : i32, i32
  }
  func.func @transform_3(%arg0: i32) -> (i32, i32) {
    %c0_i32 = arith.constant 0 : i32
    %c0_i32_0 = arith.constant 0 : i32
    return %arg0, %c0_i32 : i32, i32
  }
}

module attributes {stable_mosaic.version = 11 : i64} {
  func.func @_conv_taps_kernel(%arg0: i32, %arg1: memref<1x17x17x64xbf16, #tpu.memory_space<vmem>>, %arg2: memref<4x64x16xbf16, #tpu.memory_space<vmem>>, %arg3: memref<1x256x16xbf16, #tpu.memory_space<vmem>>, %arg4: memref<1x1x16xf32, #tpu.memory_space<vmem>>, %arg5: memref<1x1x16xf32, #tpu.memory_space<vmem>>) attributes {dimension_semantics = [#tpu.dimension_semantics<parallel>], iteration_bounds = array<i64: 2>, scalar_prefetch = 0 : i64, scratch_operands = 0 : i64, tpu.core_type = #tpu.core_type<tc>, window_params = [{transform_indices = @transform_0, window_bounds = array<i64: 1, 17, 17, 64>}, {pipeline_mode = #tpu.pipeline_mode<synchronous>, transform_indices = @transform_1, window_bounds = array<i64: 4, 64, 16>}, {transform_indices = @transform_2, window_bounds = array<i64: 1, 256, 16>}, {transform_indices = @transform_3, window_bounds = array<i64: 1, 1, 16>}, {transform_indices = @transform_4, window_bounds = array<i64: 1, 1, 16>}]} {
    %cst = arith.constant 0.000000e+00 : f32
    %0 = vector.broadcast %cst : f32 to vector<1x16xf32>
    %cst_0 = arith.constant 0.000000e+00 : f32
    %1 = vector.broadcast %cst_0 : f32 to vector<1x16xf32>
    %c0_i32 = arith.constant 0 : i32
    %c16_i32 = arith.constant 16 : i32
    %2 = arith.muli %c0_i32, %c16_i32 : i32
    %cst_1 = arith.constant 0.000000e+00 : f32
    %3 = vector.broadcast %cst_1 : f32 to vector<256x16xf32>
    %c0_i32_2 = arith.constant 0 : i32
    %4 = arith.addi %2, %c0_i32_2 : i32
    %c0 = arith.constant 0 : index
    %5 = arith.index_cast %4 : i32 to index
    %c0_3 = arith.constant 0 : index
    %c0_4 = arith.constant 0 : index
    %6 = vector.load %arg1[%c0, %5, %c0_3, %c0_4] : memref<1x17x17x64xbf16, #tpu.memory_space<vmem>>, vector<1x16x16x64xbf16>
    %7 = vector.shape_cast %6 : vector<1x16x16x64xbf16> to vector<16x16x64xbf16>
    %8 = vector.shape_cast %7 : vector<16x16x64xbf16> to vector<256x64xbf16>
    %c0_5 = arith.constant 0 : index
    %c0_6 = arith.constant 0 : index
    %c0_7 = arith.constant 0 : index
    %9 = vector.load %arg2[%c0_5, %c0_6, %c0_7] : memref<4x64x16xbf16, #tpu.memory_space<vmem>>, vector<1x64x16xbf16>
    %10 = vector.shape_cast %9 : vector<1x64x16xbf16> to vector<64x16xbf16>
    %cst_8 = arith.constant dense<0.000000e+00> : vector<256x16xf32>
    %11 = tpu.matmul %8, %10, %cst_8 {dimension_numbers = #tpu.dot_dimension_numbers<[1], [0], [0], [1], [0, 0, 1, 1], [], []>} : vector<256x64xbf16>, vector<64x16xbf16>, vector<256x16xf32> -> vector<256x16xf32>
    %12 = arith.addf %3, %11 : vector<256x16xf32>
    %c0_i32_9 = arith.constant 0 : i32
    %13 = arith.addi %2, %c0_i32_9 : i32
    %c0_10 = arith.constant 0 : index
    %14 = arith.index_cast %13 : i32 to index
    %c1 = arith.constant 1 : index
    %c0_11 = arith.constant 0 : index
    %15 = vector.load %arg1[%c0_10, %14, %c1, %c0_11] : memref<1x17x17x64xbf16, #tpu.memory_space<vmem>>, vector<1x16x16x64xbf16>
    %16 = vector.shape_cast %15 : vector<1x16x16x64xbf16> to vector<16x16x64xbf16>
    %17 = vector.shape_cast %16 : vector<16x16x64xbf16> to vector<256x64xbf16>
    %c1_12 = arith.constant 1 : index
    %c0_13 = arith.constant 0 : index
    %c0_14 = arith.constant 0 : index
    %18 = vector.load %arg2[%c1_12, %c0_13, %c0_14] : memref<4x64x16xbf16, #tpu.memory_space<vmem>>, vector<1x64x16xbf16>
    %19 = vector.shape_cast %18 : vector<1x64x16xbf16> to vector<64x16xbf16>
    %cst_15 = arith.constant dense<0.000000e+00> : vector<256x16xf32>
    %20 = tpu.matmul %17, %19, %cst_15 {dimension_numbers = #tpu.dot_dimension_numbers<[1], [0], [0], [1], [0, 0, 1, 1], [], []>} : vector<256x64xbf16>, vector<64x16xbf16>, vector<256x16xf32> -> vector<256x16xf32>
    %21 = arith.addf %12, %20 : vector<256x16xf32>
    %c1_i32 = arith.constant 1 : i32
    %22 = arith.addi %2, %c1_i32 : i32
    %c0_16 = arith.constant 0 : index
    %23 = arith.index_cast %22 : i32 to index
    %c0_17 = arith.constant 0 : index
    %c0_18 = arith.constant 0 : index
    %24 = vector.load %arg1[%c0_16, %23, %c0_17, %c0_18] : memref<1x17x17x64xbf16, #tpu.memory_space<vmem>>, vector<1x16x16x64xbf16>
    %25 = vector.shape_cast %24 : vector<1x16x16x64xbf16> to vector<16x16x64xbf16>
    %26 = vector.shape_cast %25 : vector<16x16x64xbf16> to vector<256x64xbf16>
    %c2 = arith.constant 2 : index
    %c0_19 = arith.constant 0 : index
    %c0_20 = arith.constant 0 : index
    %27 = vector.load %arg2[%c2, %c0_19, %c0_20] : memref<4x64x16xbf16, #tpu.memory_space<vmem>>, vector<1x64x16xbf16>
    %28 = vector.shape_cast %27 : vector<1x64x16xbf16> to vector<64x16xbf16>
    %cst_21 = arith.constant dense<0.000000e+00> : vector<256x16xf32>
    %29 = tpu.matmul %26, %28, %cst_21 {dimension_numbers = #tpu.dot_dimension_numbers<[1], [0], [0], [1], [0, 0, 1, 1], [], []>} : vector<256x64xbf16>, vector<64x16xbf16>, vector<256x16xf32> -> vector<256x16xf32>
    %30 = arith.addf %21, %29 : vector<256x16xf32>
    %c1_i32_22 = arith.constant 1 : i32
    %31 = arith.addi %2, %c1_i32_22 : i32
    %c0_23 = arith.constant 0 : index
    %32 = arith.index_cast %31 : i32 to index
    %c1_24 = arith.constant 1 : index
    %c0_25 = arith.constant 0 : index
    %33 = vector.load %arg1[%c0_23, %32, %c1_24, %c0_25] : memref<1x17x17x64xbf16, #tpu.memory_space<vmem>>, vector<1x16x16x64xbf16>
    %34 = vector.shape_cast %33 : vector<1x16x16x64xbf16> to vector<16x16x64xbf16>
    %35 = vector.shape_cast %34 : vector<16x16x64xbf16> to vector<256x64xbf16>
    %c3 = arith.constant 3 : index
    %c0_26 = arith.constant 0 : index
    %c0_27 = arith.constant 0 : index
    %36 = vector.load %arg2[%c3, %c0_26, %c0_27] : memref<4x64x16xbf16, #tpu.memory_space<vmem>>, vector<1x64x16xbf16>
    %37 = vector.shape_cast %36 : vector<1x64x16xbf16> to vector<64x16xbf16>
    %cst_28 = arith.constant dense<0.000000e+00> : vector<256x16xf32>
    %38 = tpu.matmul %35, %37, %cst_28 {dimension_numbers = #tpu.dot_dimension_numbers<[1], [0], [0], [1], [0, 0, 1, 1], [], []>} : vector<256x64xbf16>, vector<64x16xbf16>, vector<256x16xf32> -> vector<256x16xf32>
    %39 = arith.addf %30, %38 : vector<256x16xf32>
    %40 = arith.truncf %39 : vector<256x16xf32> to vector<256x16xbf16>
    %c16_i32_29 = arith.constant 16 : i32
    %41 = arith.muli %2, %c16_i32_29 : i32
    %c0_30 = arith.constant 0 : index
    %42 = arith.index_cast %41 : i32 to index
    %c0_31 = arith.constant 0 : index
    %43 = vector.load %arg3[%c0_30, %42, %c0_31] : memref<1x256x16xbf16, #tpu.memory_space<vmem>>, vector<1x256x16xbf16>
    %44 = vector.shape_cast %43 : vector<1x256x16xbf16> to vector<256x16xbf16>
    %45 = vector.shape_cast %40 : vector<256x16xbf16> to vector<1x256x16xbf16>
    tpu.vector_store %arg3[%c0_30, %42, %c0_31], %45 {strides = array<i32>} : memref<1x256x16xbf16, #tpu.memory_space<vmem>>, vector<1x256x16xbf16>,
    %46 = arith.extf %40 : vector<256x16xbf16> to vector<256x16xf32>
    %cst_32 = arith.constant dense<0.000000e+00> : vector<16xf32>
    %47 = vector.multi_reduction <add>, %46, %cst_32 [0] : vector<256x16xf32> to vector<16xf32>
    %48 = vector.shape_cast %47 : vector<16xf32> to vector<1x16xf32>
    %49 = arith.addf %0, %48 : vector<1x16xf32>
    %50 = arith.mulf %46, %46 : vector<256x16xf32>
    %cst_33 = arith.constant dense<0.000000e+00> : vector<16xf32>
    %51 = vector.multi_reduction <add>, %50, %cst_33 [0] : vector<256x16xf32> to vector<16xf32>
    %52 = vector.shape_cast %51 : vector<16xf32> to vector<1x16xf32>
    %53 = arith.addf %1, %52 : vector<1x16xf32>
    %c1_i32_34 = arith.constant 1 : i32
    %c0_35 = arith.constant 0 : index
    %c0_36 = arith.constant 0 : index
    %c0_37 = arith.constant 0 : index
    %54 = vector.load %arg4[%c0_35, %c0_36, %c0_37] : memref<1x1x16xf32, #tpu.memory_space<vmem>>, vector<1x1x16xf32>
    %55 = vector.shape_cast %54 : vector<1x1x16xf32> to vector<1x16xf32>
    %56 = vector.shape_cast %49 : vector<1x16xf32> to vector<1x1x16xf32>
    tpu.vector_store %arg4[%c0_35, %c0_36, %c0_37], %56 {strides = array<i32>} : memref<1x1x16xf32, #tpu.memory_space<vmem>>, vector<1x1x16xf32>,
    %c0_38 = arith.constant 0 : index
    %c0_39 = arith.constant 0 : index
    %c0_40 = arith.constant 0 : index
    %57 = vector.load %arg5[%c0_38, %c0_39, %c0_40] : memref<1x1x16xf32, #tpu.memory_space<vmem>>, vector<1x1x16xf32>
    %58 = vector.shape_cast %57 : vector<1x1x16xf32> to vector<1x16xf32>
    %59 = vector.shape_cast %53 : vector<1x16xf32> to vector<1x1x16xf32>
    tpu.vector_store %arg5[%c0_38, %c0_39, %c0_40], %59 {strides = array<i32>} : memref<1x1x16xf32, #tpu.memory_space<vmem>>, vector<1x1x16xf32>,
    return
  }
  func.func @transform_0(%arg0: i32) -> (i32, i32, i32, i32) {
    %c0_i32 = arith.constant 0 : i32
    %c0_i32_0 = arith.constant 0 : i32
    %c0_i32_1 = arith.constant 0 : i32
    %c0_i32_2 = arith.constant 0 : i32
    return %arg0, %c0_i32, %c0_i32_0, %c0_i32_1 : i32, i32, i32, i32
  }
  func.func @transform_1(%arg0: i32) -> (i32, i32, i32) {
    %c0_i32 = arith.constant 0 : i32
    %c0_i32_0 = arith.constant 0 : i32
    %c0_i32_1 = arith.constant 0 : i32
    %c0_i32_2 = arith.constant 0 : i32
    return %c0_i32, %c0_i32_0, %c0_i32_1 : i32, i32, i32
  }
  func.func @transform_2(%arg0: i32) -> (i32, i32, i32) {
    %c0_i32 = arith.constant 0 : i32
    %c0_i32_0 = arith.constant 0 : i32
    %c0_i32_1 = arith.constant 0 : i32
    return %arg0, %c0_i32, %c0_i32_0 : i32, i32, i32
  }
  func.func @transform_3(%arg0: i32) -> (i32, i32, i32) {
    %c0_i32 = arith.constant 0 : i32
    %c0_i32_0 = arith.constant 0 : i32
    %c0_i32_1 = arith.constant 0 : i32
    return %arg0, %c0_i32, %c0_i32_0 : i32, i32, i32
  }
  func.func @transform_4(%arg0: i32) -> (i32, i32, i32) {
    %c0_i32 = arith.constant 0 : i32
    %c0_i32_0 = arith.constant 0 : i32
    %c0_i32_1 = arith.constant 0 : i32
    return %arg0, %c0_i32, %c0_i32_0 : i32, i32, i32
  }
}

module attributes {stable_mosaic.version = 11 : i64} {
  func.func @_bn_lrelu_kernel(%arg0: i32, %arg1: memref<32x128xbf16, #tpu.memory_space<vmem>>, %arg2: memref<1x128xf32, #tpu.memory_space<vmem>>, %arg3: memref<1x128xf32, #tpu.memory_space<vmem>>, %arg4: memref<32x128xbf16, #tpu.memory_space<vmem>>) attributes {dimension_semantics = [#tpu.dimension_semantics<parallel>], iteration_bounds = array<i64: 2>, scalar_prefetch = 0 : i64, scratch_operands = 0 : i64, tpu.core_type = #tpu.core_type<tc>, window_params = [{transform_indices = @transform_0, window_bounds = array<i64: 32, 128>}, {pipeline_mode = #tpu.pipeline_mode<synchronous>, transform_indices = @transform_1, window_bounds = array<i64: 1, 128>}, {pipeline_mode = #tpu.pipeline_mode<synchronous>, transform_indices = @transform_2, window_bounds = array<i64: 1, 128>}, {transform_indices = @transform_3, window_bounds = array<i64: 32, 128>}]} {
    %c0 = arith.constant 0 : index
    %c0_0 = arith.constant 0 : index
    %0 = vector.load %arg1[%c0, %c0_0] : memref<32x128xbf16, #tpu.memory_space<vmem>>, vector<32x128xbf16>
    %1 = arith.extf %0 : vector<32x128xbf16> to vector<32x128xf32>
    %c0_1 = arith.constant 0 : index
    %c0_2 = arith.constant 0 : index
    %2 = vector.load %arg2[%c0_1, %c0_2] : memref<1x128xf32, #tpu.memory_space<vmem>>, vector<1x128xf32>
    %3 = vector.broadcast %2 : vector<1x128xf32> to vector<32x128xf32>
    %4 = arith.mulf %1, %3 : vector<32x128xf32>
    %c0_3 = arith.constant 0 : index
    %c0_4 = arith.constant 0 : index
    %5 = vector.load %arg3[%c0_3, %c0_4] : memref<1x128xf32, #tpu.memory_space<vmem>>, vector<1x128xf32>
    %6 = vector.broadcast %5 : vector<1x128xf32> to vector<32x128xf32>
    %7 = arith.addf %4, %6 : vector<32x128xf32>
    %cst = arith.constant 0.000000e+00 : f32
    %8 = vector.broadcast %cst : f32 to vector<32x128xf32>
    %9 = arith.cmpf oge, %7, %8 : vector<32x128xf32>
    %cst_5 = arith.constant 1.000000e-01 : f32
    %10 = vector.broadcast %cst_5 : f32 to vector<32x128xf32>
    %11 = arith.mulf %10, %7 : vector<32x128xf32>
    %12 = arith.select %9, %7, %11 : vector<32x128xi1>, vector<32x128xf32>
    %13 = arith.truncf %12 : vector<32x128xf32> to vector<32x128xbf16>
    %c0_6 = arith.constant 0 : index
    %c0_7 = arith.constant 0 : index
    %14 = vector.load %arg4[%c0_6, %c0_7] : memref<32x128xbf16, #tpu.memory_space<vmem>>, vector<32x128xbf16>
    tpu.vector_store %arg4[%c0_6, %c0_7], %13 {strides = array<i32>} : memref<32x128xbf16, #tpu.memory_space<vmem>>, vector<32x128xbf16>,
    return
  }
  func.func @transform_0(%arg0: i32) -> (i32, i32) {
    %c0_i32 = arith.constant 0 : i32
    %c0_i32_0 = arith.constant 0 : i32
    return %arg0, %c0_i32 : i32, i32
  }
  func.func @transform_1(%arg0: i32) -> (i32, i32) {
    %c0_i32 = arith.constant 0 : i32
    %c0_i32_0 = arith.constant 0 : i32
    %c0_i32_1 = arith.constant 0 : i32
    return %c0_i32, %c0_i32_0 : i32, i32
  }
  func.func @transform_2(%arg0: i32) -> (i32, i32) {
    %c0_i32 = arith.constant 0 : i32
    %c0_i32_0 = arith.constant 0 : i32
    %c0_i32_1 = arith.constant 0 : i32
    return %c0_i32, %c0_i32_0 : i32, i32
  }
  func.func @transform_3(%arg0: i32) -> (i32, i32) {
    %c0_i32 = arith.constant 0 : i32
    %c0_i32_0 = arith.constant 0 : i32
    return %arg0, %c0_i32 : i32, i32
  }
}

module attributes {stable_mosaic.version = 11 : i64} {
  func.func @_conv_taps_kernel(%arg0: i32, %arg1: memref<1x9x9x64xbf16, #tpu.memory_space<vmem>>, %arg2: memref<4x64x32xbf16, #tpu.memory_space<vmem>>, %arg3: memref<1x64x32xbf16, #tpu.memory_space<vmem>>, %arg4: memref<1x1x32xf32, #tpu.memory_space<vmem>>, %arg5: memref<1x1x32xf32, #tpu.memory_space<vmem>>) attributes {dimension_semantics = [#tpu.dimension_semantics<parallel>], iteration_bounds = array<i64: 2>, scalar_prefetch = 0 : i64, scratch_operands = 0 : i64, tpu.core_type = #tpu.core_type<tc>, window_params = [{transform_indices = @transform_0, window_bounds = array<i64: 1, 9, 9, 64>}, {pipeline_mode = #tpu.pipeline_mode<synchronous>, transform_indices = @transform_1, window_bounds = array<i64: 4, 64, 32>}, {transform_indices = @transform_2, window_bounds = array<i64: 1, 64, 32>}, {transform_indices = @transform_3, window_bounds = array<i64: 1, 1, 32>}, {transform_indices = @transform_4, window_bounds = array<i64: 1, 1, 32>}]} {
    %cst = arith.constant 0.000000e+00 : f32
    %0 = vector.broadcast %cst : f32 to vector<1x32xf32>
    %cst_0 = arith.constant 0.000000e+00 : f32
    %1 = vector.broadcast %cst_0 : f32 to vector<1x32xf32>
    %c0_i32 = arith.constant 0 : i32
    %c8_i32 = arith.constant 8 : i32
    %2 = arith.muli %c0_i32, %c8_i32 : i32
    %cst_1 = arith.constant 0.000000e+00 : f32
    %3 = vector.broadcast %cst_1 : f32 to vector<64x32xf32>
    %c0_i32_2 = arith.constant 0 : i32
    %4 = arith.addi %2, %c0_i32_2 : i32
    %c0 = arith.constant 0 : index
    %5 = arith.index_cast %4 : i32 to index
    %c0_3 = arith.constant 0 : index
    %c0_4 = arith.constant 0 : index
    %6 = vector.load %arg1[%c0, %5, %c0_3, %c0_4] : memref<1x9x9x64xbf16, #tpu.memory_space<vmem>>, vector<1x8x8x64xbf16>
    %7 = vector.shape_cast %6 : vector<1x8x8x64xbf16> to vector<8x8x64xbf16>
    %8 = vector.shape_cast %7 : vector<8x8x64xbf16> to vector<64x64xbf16>
    %c0_5 = arith.constant 0 : index
    %c0_6 = arith.constant 0 : index
    %c0_7 = arith.constant 0 : index
    %9 = vector.load %arg2[%c0_5, %c0_6, %c0_7] : memref<4x64x32xbf16, #tpu.memory_space<vmem>>, vector<1x64x32xbf16>
    %10 = vector.shape_cast %9 : vector<1x64x32xbf16> to vector<64x32xbf16>
    %cst_8 = arith.constant dense<0.000000e+00> : vector<64x32xf32>
    %11 = tpu.matmul %8, %10, %cst_8 {dimension_numbers = #tpu.dot_dimension_numbers<[1], [0], [0], [1], [0, 0, 1, 1], [], []>} : vector<64x64xbf16>, vector<64x32xbf16>, vector<64x32xf32> -> vector<64x32xf32>
    %12 = arith.addf %3, %11 : vector<64x32xf32>
    %c0_i32_9 = arith.constant 0 : i32
    %13 = arith.addi %2, %c0_i32_9 : i32
    %c0_10 = arith.constant 0 : index
    %14 = arith.index_cast %13 : i32 to index
    %c1 = arith.constant 1 : index
    %c0_11 = arith.constant 0 : index
    %15 = vector.load %arg1[%c0_10, %14, %c1, %c0_11] : memref<1x9x9x64xbf16, #tpu.memory_space<vmem>>, vector<1x8x8x64xbf16>
    %16 = vector.shape_cast %15 : vector<1x8x8x64xbf16> to vector<8x8x64xbf16>
    %17 = vector.shape_cast %16 : vector<8x8x64xbf16> to vector<64x64xbf16>
    %c1_12 = arith.constant 1 : index
    %c0_13 = arith.constant 0 : index
    %c0_14 = arith.constant 0 : index
    %18 = vector.load %arg2[%c1_12, %c0_13, %c0_14] : memref<4x64x32xbf16, #tpu.memory_space<vmem>>, vector<1x64x32xbf16>
    %19 = vector.shape_cast %18 : vector<1x64x32xbf16> to vector<64x32xbf16>
    %cst_15 = arith.constant dense<0.000000e+00> : vector<64x32xf32>
    %20 = tpu.matmul %17, %19, %cst_15 {dimension_numbers = #tpu.dot_dimension_numbers<[1], [0], [0], [1], [0, 0, 1, 1], [], []>} : vector<64x64xbf16>, vector<64x32xbf16>, vector<64x32xf32> -> vector<64x32xf32>
    %21 = arith.addf %12, %20 : vector<64x32xf32>
    %c1_i32 = arith.constant 1 : i32
    %22 = arith.addi %2, %c1_i32 : i32
    %c0_16 = arith.constant 0 : index
    %23 = arith.index_cast %22 : i32 to index
    %c0_17 = arith.constant 0 : index
    %c0_18 = arith.constant 0 : index
    %24 = vector.load %arg1[%c0_16, %23, %c0_17, %c0_18] : memref<1x9x9x64xbf16, #tpu.memory_space<vmem>>, vector<1x8x8x64xbf16>
    %25 = vector.shape_cast %24 : vector<1x8x8x64xbf16> to vector<8x8x64xbf16>
    %26 = vector.shape_cast %25 : vector<8x8x64xbf16> to vector<64x64xbf16>
    %c2 = arith.constant 2 : index
    %c0_19 = arith.constant 0 : index
    %c0_20 = arith.constant 0 : index
    %27 = vector.load %arg2[%c2, %c0_19, %c0_20] : memref<4x64x32xbf16, #tpu.memory_space<vmem>>, vector<1x64x32xbf16>
    %28 = vector.shape_cast %27 : vector<1x64x32xbf16> to vector<64x32xbf16>
    %cst_21 = arith.constant dense<0.000000e+00> : vector<64x32xf32>
    %29 = tpu.matmul %26, %28, %cst_21 {dimension_numbers = #tpu.dot_dimension_numbers<[1], [0], [0], [1], [0, 0, 1, 1], [], []>} : vector<64x64xbf16>, vector<64x32xbf16>, vector<64x32xf32> -> vector<64x32xf32>
    %30 = arith.addf %21, %29 : vector<64x32xf32>
    %c1_i32_22 = arith.constant 1 : i32
    %31 = arith.addi %2, %c1_i32_22 : i32
    %c0_23 = arith.constant 0 : index
    %32 = arith.index_cast %31 : i32 to index
    %c1_24 = arith.constant 1 : index
    %c0_25 = arith.constant 0 : index
    %33 = vector.load %arg1[%c0_23, %32, %c1_24, %c0_25] : memref<1x9x9x64xbf16, #tpu.memory_space<vmem>>, vector<1x8x8x64xbf16>
    %34 = vector.shape_cast %33 : vector<1x8x8x64xbf16> to vector<8x8x64xbf16>
    %35 = vector.shape_cast %34 : vector<8x8x64xbf16> to vector<64x64xbf16>
    %c3 = arith.constant 3 : index
    %c0_26 = arith.constant 0 : index
    %c0_27 = arith.constant 0 : index
    %36 = vector.load %arg2[%c3, %c0_26, %c0_27] : memref<4x64x32xbf16, #tpu.memory_space<vmem>>, vector<1x64x32xbf16>
    %37 = vector.shape_cast %36 : vector<1x64x32xbf16> to vector<64x32xbf16>
    %cst_28 = arith.constant dense<0.000000e+00> : vector<64x32xf32>
    %38 = tpu.matmul %35, %37, %cst_28 {dimension_numbers = #tpu.dot_dimension_numbers<[1], [0], [0], [1], [0, 0, 1, 1], [], []>} : vector<64x64xbf16>, vector<64x32xbf16>, vector<64x32xf32> -> vector<64x32xf32>
    %39 = arith.addf %30, %38 : vector<64x32xf32>
    %40 = arith.truncf %39 : vector<64x32xf32> to vector<64x32xbf16>
    %c8_i32_29 = arith.constant 8 : i32
    %41 = arith.muli %2, %c8_i32_29 : i32
    %c0_30 = arith.constant 0 : index
    %42 = arith.index_cast %41 : i32 to index
    %c0_31 = arith.constant 0 : index
    %43 = vector.load %arg3[%c0_30, %42, %c0_31] : memref<1x64x32xbf16, #tpu.memory_space<vmem>>, vector<1x64x32xbf16>
    %44 = vector.shape_cast %43 : vector<1x64x32xbf16> to vector<64x32xbf16>
    %45 = vector.shape_cast %40 : vector<64x32xbf16> to vector<1x64x32xbf16>
    tpu.vector_store %arg3[%c0_30, %42, %c0_31], %45 {strides = array<i32>} : memref<1x64x32xbf16, #tpu.memory_space<vmem>>, vector<1x64x32xbf16>,
    %46 = arith.extf %40 : vector<64x32xbf16> to vector<64x32xf32>
    %cst_32 = arith.constant dense<0.000000e+00> : vector<32xf32>
    %47 = vector.multi_reduction <add>, %46, %cst_32 [0] : vector<64x32xf32> to vector<32xf32>
    %48 = vector.shape_cast %47 : vector<32xf32> to vector<1x32xf32>
    %49 = arith.addf %0, %48 : vector<1x32xf32>
    %50 = arith.mulf %46, %46 : vector<64x32xf32>
    %cst_33 = arith.constant dense<0.000000e+00> : vector<32xf32>
    %51 = vector.multi_reduction <add>, %50, %cst_33 [0] : vector<64x32xf32> to vector<32xf32>
    %52 = vector.shape_cast %51 : vector<32xf32> to vector<1x32xf32>
    %53 = arith.addf %1, %52 : vector<1x32xf32>
    %c1_i32_34 = arith.constant 1 : i32
    %c0_35 = arith.constant 0 : index
    %c0_36 = arith.constant 0 : index
    %c0_37 = arith.constant 0 : index
    %54 = vector.load %arg4[%c0_35, %c0_36, %c0_37] : memref<1x1x32xf32, #tpu.memory_space<vmem>>, vector<1x1x32xf32>
    %55 = vector.shape_cast %54 : vector<1x1x32xf32> to vector<1x32xf32>
    %56 = vector.shape_cast %49 : vector<1x32xf32> to vector<1x1x32xf32>
    tpu.vector_store %arg4[%c0_35, %c0_36, %c0_37], %56 {strides = array<i32>} : memref<1x1x32xf32, #tpu.memory_space<vmem>>, vector<1x1x32xf32>,
    %c0_38 = arith.constant 0 : index
    %c0_39 = arith.constant 0 : index
    %c0_40 = arith.constant 0 : index
    %57 = vector.load %arg5[%c0_38, %c0_39, %c0_40] : memref<1x1x32xf32, #tpu.memory_space<vmem>>, vector<1x1x32xf32>
    %58 = vector.shape_cast %57 : vector<1x1x32xf32> to vector<1x32xf32>
    %59 = vector.shape_cast %53 : vector<1x32xf32> to vector<1x1x32xf32>
    tpu.vector_store %arg5[%c0_38, %c0_39, %c0_40], %59 {strides = array<i32>} : memref<1x1x32xf32, #tpu.memory_space<vmem>>, vector<1x1x32xf32>,
    return
  }
  func.func @transform_0(%arg0: i32) -> (i32, i32, i32, i32) {
    %c0_i32 = arith.constant 0 : i32
    %c0_i32_0 = arith.constant 0 : i32
    %c0_i32_1 = arith.constant 0 : i32
    %c0_i32_2 = arith.constant 0 : i32
    return %arg0, %c0_i32, %c0_i32_0, %c0_i32_1 : i32, i32, i32, i32
  }
  func.func @transform_1(%arg0: i32) -> (i32, i32, i32) {
    %c0_i32 = arith.constant 0 : i32
    %c0_i32_0 = arith.constant 0 : i32
    %c0_i32_1 = arith.constant 0 : i32
    %c0_i32_2 = arith.constant 0 : i32
    return %c0_i32, %c0_i32_0, %c0_i32_1 : i32, i32, i32
  }
  func.func @transform_2(%arg0: i32) -> (i32, i32, i32) {
    %c0_i32 = arith.constant 0 : i32
    %c0_i32_0 = arith.constant 0 : i32
    %c0_i32_1 = arith.constant 0 : i32
    return %arg0, %c0_i32, %c0_i32_0 : i32, i32, i32
  }
  func.func @transform_3(%arg0: i32) -> (i32, i32, i32) {
    %c0_i32 = arith.constant 0 : i32
    %c0_i32_0 = arith.constant 0 : i32
    %c0_i32_1 = arith.constant 0 : i32
    return %arg0, %c0_i32, %c0_i32_0 : i32, i32, i32
  }
  func.func @transform_4(%arg0: i32) -> (i32, i32, i32) {
    %c0_i32 = arith.constant 0 : i32
    %c0_i32_0 = arith.constant 0 : i32
    %c0_i32_1 = arith.constant 0 : i32
    return %arg0, %c0_i32, %c0_i32_0 : i32, i32, i32
  }
}

module attributes {stable_mosaic.version = 11 : i64} {
  func.func @_bn_lrelu_kernel(%arg0: i32, %arg1: memref<16x128xbf16, #tpu.memory_space<vmem>>, %arg2: memref<1x128xf32, #tpu.memory_space<vmem>>, %arg3: memref<1x128xf32, #tpu.memory_space<vmem>>, %arg4: memref<16x128xbf16, #tpu.memory_space<vmem>>) attributes {dimension_semantics = [#tpu.dimension_semantics<parallel>], iteration_bounds = array<i64: 2>, scalar_prefetch = 0 : i64, scratch_operands = 0 : i64, tpu.core_type = #tpu.core_type<tc>, window_params = [{transform_indices = @transform_0, window_bounds = array<i64: 16, 128>}, {pipeline_mode = #tpu.pipeline_mode<synchronous>, transform_indices = @transform_1, window_bounds = array<i64: 1, 128>}, {pipeline_mode = #tpu.pipeline_mode<synchronous>, transform_indices = @transform_2, window_bounds = array<i64: 1, 128>}, {transform_indices = @transform_3, window_bounds = array<i64: 16, 128>}]} {
    %c0 = arith.constant 0 : index
    %c0_0 = arith.constant 0 : index
    %0 = vector.load %arg1[%c0, %c0_0] : memref<16x128xbf16, #tpu.memory_space<vmem>>, vector<16x128xbf16>
    %1 = arith.extf %0 : vector<16x128xbf16> to vector<16x128xf32>
    %c0_1 = arith.constant 0 : index
    %c0_2 = arith.constant 0 : index
    %2 = vector.load %arg2[%c0_1, %c0_2] : memref<1x128xf32, #tpu.memory_space<vmem>>, vector<1x128xf32>
    %3 = vector.broadcast %2 : vector<1x128xf32> to vector<16x128xf32>
    %4 = arith.mulf %1, %3 : vector<16x128xf32>
    %c0_3 = arith.constant 0 : index
    %c0_4 = arith.constant 0 : index
    %5 = vector.load %arg3[%c0_3, %c0_4] : memref<1x128xf32, #tpu.memory_space<vmem>>, vector<1x128xf32>
    %6 = vector.broadcast %5 : vector<1x128xf32> to vector<16x128xf32>
    %7 = arith.addf %4, %6 : vector<16x128xf32>
    %cst = arith.constant 0.000000e+00 : f32
    %8 = vector.broadcast %cst : f32 to vector<16x128xf32>
    %9 = arith.cmpf oge, %7, %8 : vector<16x128xf32>
    %cst_5 = arith.constant 1.000000e-01 : f32
    %10 = vector.broadcast %cst_5 : f32 to vector<16x128xf32>
    %11 = arith.mulf %10, %7 : vector<16x128xf32>
    %12 = arith.select %9, %7, %11 : vector<16x128xi1>, vector<16x128xf32>
    %13 = arith.truncf %12 : vector<16x128xf32> to vector<16x128xbf16>
    %c0_6 = arith.constant 0 : index
    %c0_7 = arith.constant 0 : index
    %14 = vector.load %arg4[%c0_6, %c0_7] : memref<16x128xbf16, #tpu.memory_space<vmem>>, vector<16x128xbf16>
    tpu.vector_store %arg4[%c0_6, %c0_7], %13 {strides = array<i32>} : memref<16x128xbf16, #tpu.memory_space<vmem>>, vector<16x128xbf16>,
    return
  }
  func.func @transform_0(%arg0: i32) -> (i32, i32) {
    %c0_i32 = arith.constant 0 : i32
    %c0_i32_0 = arith.constant 0 : i32
    return %arg0, %c0_i32 : i32, i32
  }
  func.func @transform_1(%arg0: i32) -> (i32, i32) {
    %c0_i32 = arith.constant 0 : i32
    %c0_i32_0 = arith.constant 0 : i32
    %c0_i32_1 = arith.constant 0 : i32
    return %c0_i32, %c0_i32_0 : i32, i32
  }
  func.func @transform_2(%arg0: i32) -> (i32, i32) {
    %c0_i32 = arith.constant 0 : i32
    %c0_i32_0 = arith.constant 0 : i32
    %c0_i32_1 = arith.constant 0 : i32
    return %c0_i32, %c0_i32_0 : i32, i32
  }
  func.func @transform_3(%arg0: i32) -> (i32, i32) {
    %c0_i32 = arith.constant 0 : i32
    %c0_i32_0 = arith.constant 0 : i32
    return %arg0, %c0_i32 : i32, i32
  }
}

module attributes {stable_mosaic.version = 11 : i64} {
  func.func @_conv_taps_kernel(%arg0: i32, %arg1: memref<1x5x5x128xbf16, #tpu.memory_space<vmem>>, %arg2: memref<4x128x32xbf16, #tpu.memory_space<vmem>>, %arg3: memref<1x16x32xbf16, #tpu.memory_space<vmem>>, %arg4: memref<1x1x32xf32, #tpu.memory_space<vmem>>, %arg5: memref<1x1x32xf32, #tpu.memory_space<vmem>>) attributes {dimension_semantics = [#tpu.dimension_semantics<parallel>], iteration_bounds = array<i64: 2>, scalar_prefetch = 0 : i64, scratch_operands = 0 : i64, tpu.core_type = #tpu.core_type<tc>, window_params = [{transform_indices = @transform_0, window_bounds = array<i64: 1, 5, 5, 128>}, {pipeline_mode = #tpu.pipeline_mode<synchronous>, transform_indices = @transform_1, window_bounds = array<i64: 4, 128, 32>}, {transform_indices = @transform_2, window_bounds = array<i64: 1, 16, 32>}, {transform_indices = @transform_3, window_bounds = array<i64: 1, 1, 32>}, {transform_indices = @transform_4, window_bounds = array<i64: 1, 1, 32>}]} {
    %cst = arith.constant 0.000000e+00 : f32
    %0 = vector.broadcast %cst : f32 to vector<1x32xf32>
    %cst_0 = arith.constant 0.000000e+00 : f32
    %1 = vector.broadcast %cst_0 : f32 to vector<1x32xf32>
    %c0_i32 = arith.constant 0 : i32
    %c4_i32 = arith.constant 4 : i32
    %2 = arith.muli %c0_i32, %c4_i32 : i32
    %cst_1 = arith.constant 0.000000e+00 : f32
    %3 = vector.broadcast %cst_1 : f32 to vector<16x32xf32>
    %c0_i32_2 = arith.constant 0 : i32
    %4 = arith.addi %2, %c0_i32_2 : i32
    %c0 = arith.constant 0 : index
    %5 = arith.index_cast %4 : i32 to index
    %c0_3 = arith.constant 0 : index
    %c0_4 = arith.constant 0 : index
    %6 = vector.load %arg1[%c0, %5, %c0_3, %c0_4] : memref<1x5x5x128xbf16, #tpu.memory_space<vmem>>, vector<1x4x4x128xbf16>
    %7 = vector.shape_cast %6 : vector<1x4x4x128xbf16> to vector<4x4x128xbf16>
    %8 = vector.shape_cast %7 : vector<4x4x128xbf16> to vector<16x128xbf16>
    %c0_5 = arith.constant 0 : index
    %c0_6 = arith.constant 0 : index
    %c0_7 = arith.constant 0 : index
    %9 = vector.load %arg2[%c0_5, %c0_6, %c0_7] : memref<4x128x32xbf16, #tpu.memory_space<vmem>>, vector<1x128x32xbf16>
    %10 = vector.shape_cast %9 : vector<1x128x32xbf16> to vector<128x32xbf16>
    %cst_8 = arith.constant dense<0.000000e+00> : vector<16x32xf32>
    %11 = tpu.matmul %8, %10, %cst_8 {dimension_numbers = #tpu.dot_dimension_numbers<[1], [0], [0], [1], [0, 0, 1, 1], [], []>} : vector<16x128xbf16>, vector<128x32xbf16>, vector<16x32xf32> -> vector<16x32xf32>
    %12 = arith.addf %3, %11 : vector<16x32xf32>
    %c0_i32_9 = arith.constant 0 : i32
    %13 = arith.addi %2, %c0_i32_9 : i32
    %c0_10 = arith.constant 0 : index
    %14 = arith.index_cast %13 : i32 to index
    %c1 = arith.constant 1 : index
    %c0_11 = arith.constant 0 : index
    %15 = vector.load %arg1[%c0_10, %14, %c1, %c0_11] : memref<1x5x5x128xbf16, #tpu.memory_space<vmem>>, vector<1x4x4x128xbf16>
    %16 = vector.shape_cast %15 : vector<1x4x4x128xbf16> to vector<4x4x128xbf16>
    %17 = vector.shape_cast %16 : vector<4x4x128xbf16> to vector<16x128xbf16>
    %c1_12 = arith.constant 1 : index
    %c0_13 = arith.constant 0 : index
    %c0_14 = arith.constant 0 : index
    %18 = vector.load %arg2[%c1_12, %c0_13, %c0_14] : memref<4x128x32xbf16, #tpu.memory_space<vmem>>, vector<1x128x32xbf16>
    %19 = vector.shape_cast %18 : vector<1x128x32xbf16> to vector<128x32xbf16>
    %cst_15 = arith.constant dense<0.000000e+00> : vector<16x32xf32>
    %20 = tpu.matmul %17, %19, %cst_15 {dimension_numbers = #tpu.dot_dimension_numbers<[1], [0], [0], [1], [0, 0, 1, 1], [], []>} : vector<16x128xbf16>, vector<128x32xbf16>, vector<16x32xf32> -> vector<16x32xf32>
    %21 = arith.addf %12, %20 : vector<16x32xf32>
    %c1_i32 = arith.constant 1 : i32
    %22 = arith.addi %2, %c1_i32 : i32
    %c0_16 = arith.constant 0 : index
    %23 = arith.index_cast %22 : i32 to index
    %c0_17 = arith.constant 0 : index
    %c0_18 = arith.constant 0 : index
    %24 = vector.load %arg1[%c0_16, %23, %c0_17, %c0_18] : memref<1x5x5x128xbf16, #tpu.memory_space<vmem>>, vector<1x4x4x128xbf16>
    %25 = vector.shape_cast %24 : vector<1x4x4x128xbf16> to vector<4x4x128xbf16>
    %26 = vector.shape_cast %25 : vector<4x4x128xbf16> to vector<16x128xbf16>
    %c2 = arith.constant 2 : index
    %c0_19 = arith.constant 0 : index
    %c0_20 = arith.constant 0 : index
    %27 = vector.load %arg2[%c2, %c0_19, %c0_20] : memref<4x128x32xbf16, #tpu.memory_space<vmem>>, vector<1x128x32xbf16>
    %28 = vector.shape_cast %27 : vector<1x128x32xbf16> to vector<128x32xbf16>
    %cst_21 = arith.constant dense<0.000000e+00> : vector<16x32xf32>
    %29 = tpu.matmul %26, %28, %cst_21 {dimension_numbers = #tpu.dot_dimension_numbers<[1], [0], [0], [1], [0, 0, 1, 1], [], []>} : vector<16x128xbf16>, vector<128x32xbf16>, vector<16x32xf32> -> vector<16x32xf32>
    %30 = arith.addf %21, %29 : vector<16x32xf32>
    %c1_i32_22 = arith.constant 1 : i32
    %31 = arith.addi %2, %c1_i32_22 : i32
    %c0_23 = arith.constant 0 : index
    %32 = arith.index_cast %31 : i32 to index
    %c1_24 = arith.constant 1 : index
    %c0_25 = arith.constant 0 : index
    %33 = vector.load %arg1[%c0_23, %32, %c1_24, %c0_25] : memref<1x5x5x128xbf16, #tpu.memory_space<vmem>>, vector<1x4x4x128xbf16>
    %34 = vector.shape_cast %33 : vector<1x4x4x128xbf16> to vector<4x4x128xbf16>
    %35 = vector.shape_cast %34 : vector<4x4x128xbf16> to vector<16x128xbf16>
    %c3 = arith.constant 3 : index
    %c0_26 = arith.constant 0 : index
    %c0_27 = arith.constant 0 : index
    %36 = vector.load %arg2[%c3, %c0_26, %c0_27] : memref<4x128x32xbf16, #tpu.memory_space<vmem>>, vector<1x128x32xbf16>
    %37 = vector.shape_cast %36 : vector<1x128x32xbf16> to vector<128x32xbf16>
    %cst_28 = arith.constant dense<0.000000e+00> : vector<16x32xf32>
    %38 = tpu.matmul %35, %37, %cst_28 {dimension_numbers = #tpu.dot_dimension_numbers<[1], [0], [0], [1], [0, 0, 1, 1], [], []>} : vector<16x128xbf16>, vector<128x32xbf16>, vector<16x32xf32> -> vector<16x32xf32>
    %39 = arith.addf %30, %38 : vector<16x32xf32>
    %40 = arith.truncf %39 : vector<16x32xf32> to vector<16x32xbf16>
    %c4_i32_29 = arith.constant 4 : i32
    %41 = arith.muli %2, %c4_i32_29 : i32
    %c0_30 = arith.constant 0 : index
    %42 = arith.index_cast %41 : i32 to index
    %c0_31 = arith.constant 0 : index
    %43 = vector.load %arg3[%c0_30, %42, %c0_31] : memref<1x16x32xbf16, #tpu.memory_space<vmem>>, vector<1x16x32xbf16>
    %44 = vector.shape_cast %43 : vector<1x16x32xbf16> to vector<16x32xbf16>
    %45 = vector.shape_cast %40 : vector<16x32xbf16> to vector<1x16x32xbf16>
    tpu.vector_store %arg3[%c0_30, %42, %c0_31], %45 {strides = array<i32>} : memref<1x16x32xbf16, #tpu.memory_space<vmem>>, vector<1x16x32xbf16>,
    %46 = arith.extf %40 : vector<16x32xbf16> to vector<16x32xf32>
    %cst_32 = arith.constant dense<0.000000e+00> : vector<32xf32>
    %47 = vector.multi_reduction <add>, %46, %cst_32 [0] : vector<16x32xf32> to vector<32xf32>
    %48 = vector.shape_cast %47 : vector<32xf32> to vector<1x32xf32>
    %49 = arith.addf %0, %48 : vector<1x32xf32>
    %50 = arith.mulf %46, %46 : vector<16x32xf32>
    %cst_33 = arith.constant dense<0.000000e+00> : vector<32xf32>
    %51 = vector.multi_reduction <add>, %50, %cst_33 [0] : vector<16x32xf32> to vector<32xf32>
    %52 = vector.shape_cast %51 : vector<32xf32> to vector<1x32xf32>
    %53 = arith.addf %1, %52 : vector<1x32xf32>
    %c1_i32_34 = arith.constant 1 : i32
    %c0_35 = arith.constant 0 : index
    %c0_36 = arith.constant 0 : index
    %c0_37 = arith.constant 0 : index
    %54 = vector.load %arg4[%c0_35, %c0_36, %c0_37] : memref<1x1x32xf32, #tpu.memory_space<vmem>>, vector<1x1x32xf32>
    %55 = vector.shape_cast %54 : vector<1x1x32xf32> to vector<1x32xf32>
    %56 = vector.shape_cast %49 : vector<1x32xf32> to vector<1x1x32xf32>
    tpu.vector_store %arg4[%c0_35, %c0_36, %c0_37], %56 {strides = array<i32>} : memref<1x1x32xf32, #tpu.memory_space<vmem>>, vector<1x1x32xf32>,
    %c0_38 = arith.constant 0 : index
    %c0_39 = arith.constant 0 : index
    %c0_40 = arith.constant 0 : index
    %57 = vector.load %arg5[%c0_38, %c0_39, %c0_40] : memref<1x1x32xf32, #tpu.memory_space<vmem>>, vector<1x1x32xf32>
    %58 = vector.shape_cast %57 : vector<1x1x32xf32> to vector<1x32xf32>
    %59 = vector.shape_cast %53 : vector<1x32xf32> to vector<1x1x32xf32>
    tpu.vector_store %arg5[%c0_38, %c0_39, %c0_40], %59 {strides = array<i32>} : memref<1x1x32xf32, #tpu.memory_space<vmem>>, vector<1x1x32xf32>,
    return
  }
  func.func @transform_0(%arg0: i32) -> (i32, i32, i32, i32) {
    %c0_i32 = arith.constant 0 : i32
    %c0_i32_0 = arith.constant 0 : i32
    %c0_i32_1 = arith.constant 0 : i32
    %c0_i32_2 = arith.constant 0 : i32
    return %arg0, %c0_i32, %c0_i32_0, %c0_i32_1 : i32, i32, i32, i32
  }
  func.func @transform_1(%arg0: i32) -> (i32, i32, i32) {
    %c0_i32 = arith.constant 0 : i32
    %c0_i32_0 = arith.constant 0 : i32
    %c0_i32_1 = arith.constant 0 : i32
    %c0_i32_2 = arith.constant 0 : i32
    return %c0_i32, %c0_i32_0, %c0_i32_1 : i32, i32, i32
  }
  func.func @transform_2(%arg0: i32) -> (i32, i32, i32) {
    %c0_i32 = arith.constant 0 : i32
    %c0_i32_0 = arith.constant 0 : i32
    %c0_i32_1 = arith.constant 0 : i32
    return %arg0, %c0_i32, %c0_i32_0 : i32, i32, i32
  }
  func.func @transform_3(%arg0: i32) -> (i32, i32, i32) {
    %c0_i32 = arith.constant 0 : i32
    %c0_i32_0 = arith.constant 0 : i32
    %c0_i32_1 = arith.constant 0 : i32
    return %arg0, %c0_i32, %c0_i32_0 : i32, i32, i32
  }
  func.func @transform_4(%arg0: i32) -> (i32, i32, i32) {
    %c0_i32 = arith.constant 0 : i32
    %c0_i32_0 = arith.constant 0 : i32
    %c0_i32_1 = arith.constant 0 : i32
    return %arg0, %c0_i32, %c0_i32_0 : i32, i32, i32
  }
}

module attributes {stable_mosaic.version = 11 : i64} {
  func.func @_bn_lrelu_kernel(%arg0: i32, %arg1: memref<8x128xbf16, #tpu.memory_space<vmem>>, %arg2: memref<1x128xf32, #tpu.memory_space<vmem>>, %arg3: memref<1x128xf32, #tpu.memory_space<vmem>>, %arg4: memref<8x128xbf16, #tpu.memory_space<vmem>>) attributes {dimension_semantics = [#tpu.dimension_semantics<parallel>], iteration_bounds = array<i64: 1>, scalar_prefetch = 0 : i64, scratch_operands = 0 : i64, tpu.core_type = #tpu.core_type<tc>, window_params = [{transform_indices = @transform_0, window_bounds = array<i64: 8, 128>}, {pipeline_mode = #tpu.pipeline_mode<synchronous>, transform_indices = @transform_1, window_bounds = array<i64: 1, 128>}, {pipeline_mode = #tpu.pipeline_mode<synchronous>, transform_indices = @transform_2, window_bounds = array<i64: 1, 128>}, {transform_indices = @transform_3, window_bounds = array<i64: 8, 128>}]} {
    %c0 = arith.constant 0 : index
    %c0_0 = arith.constant 0 : index
    %0 = vector.load %arg1[%c0, %c0_0] : memref<8x128xbf16, #tpu.memory_space<vmem>>, vector<8x128xbf16>
    %1 = arith.extf %0 : vector<8x128xbf16> to vector<8x128xf32>
    %c0_1 = arith.constant 0 : index
    %c0_2 = arith.constant 0 : index
    %2 = vector.load %arg2[%c0_1, %c0_2] : memref<1x128xf32, #tpu.memory_space<vmem>>, vector<1x128xf32>
    %3 = vector.broadcast %2 : vector<1x128xf32> to vector<8x128xf32>
    %4 = arith.mulf %1, %3 : vector<8x128xf32>
    %c0_3 = arith.constant 0 : index
    %c0_4 = arith.constant 0 : index
    %5 = vector.load %arg3[%c0_3, %c0_4] : memref<1x128xf32, #tpu.memory_space<vmem>>, vector<1x128xf32>
    %6 = vector.broadcast %5 : vector<1x128xf32> to vector<8x128xf32>
    %7 = arith.addf %4, %6 : vector<8x128xf32>
    %cst = arith.constant 0.000000e+00 : f32
    %8 = vector.broadcast %cst : f32 to vector<8x128xf32>
    %9 = arith.cmpf oge, %7, %8 : vector<8x128xf32>
    %cst_5 = arith.constant 1.000000e-01 : f32
    %10 = vector.broadcast %cst_5 : f32 to vector<8x128xf32>
    %11 = arith.mulf %10, %7 : vector<8x128xf32>
    %12 = arith.select %9, %7, %11 : vector<8x128xi1>, vector<8x128xf32>
    %13 = arith.truncf %12 : vector<8x128xf32> to vector<8x128xbf16>
    %c0_6 = arith.constant 0 : index
    %c0_7 = arith.constant 0 : index
    %14 = vector.load %arg4[%c0_6, %c0_7] : memref<8x128xbf16, #tpu.memory_space<vmem>>, vector<8x128xbf16>
    tpu.vector_store %arg4[%c0_6, %c0_7], %13 {strides = array<i32>} : memref<8x128xbf16, #tpu.memory_space<vmem>>, vector<8x128xbf16>,
    return
  }
  func.func @transform_0(%arg0: i32) -> (i32, i32) {
    %c0_i32 = arith.constant 0 : i32
    %c0_i32_0 = arith.constant 0 : i32
    return %arg0, %c0_i32 : i32, i32
  }
  func.func @transform_1(%arg0: i32) -> (i32, i32) {
    %c0_i32 = arith.constant 0 : i32
    %c0_i32_0 = arith.constant 0 : i32
    %c0_i32_1 = arith.constant 0 : i32
    return %c0_i32, %c0_i32_0 : i32, i32
  }
  func.func @transform_2(%arg0: i32) -> (i32, i32) {
    %c0_i32 = arith.constant 0 : i32
    %c0_i32_0 = arith.constant 0 : i32
    %c0_i32_1 = arith.constant 0 : i32
    return %c0_i32, %c0_i32_0 : i32, i32
  }
  func.func @transform_3(%arg0: i32) -> (i32, i32) {
    %c0_i32 = arith.constant 0 : i32
    %c0_i32_0 = arith.constant 0 : i32
    return %arg0, %c0_i32 : i32, i32
  }
}

</mosaic_0001>

<bundles_post_ra>
// kernel: forward.8
= control target key start
LH: loop header
LB: loop body
LE: loop exit
PB: predicated region body
PF: predicated region fallthrough
CT: control target
= control target key end

     0   :  { %s3911_s15 = smov 0   ;;  %s5346_s0 = inlined_call_operand.vmem [shape: bf16[2,32,32,16], index: 0, kind: input, shape index: {}]   ;;  %s5347_s1 = inlined_call_operand.vmem [shape: bf16[1,16,16], index: 1, kind: input, shape index: {}]   ;;  %s5348_s2 = inlined_call_operand.vmem [shape: bf16[2,1024,16], index: 2, kind: output, shape index: {0}]   ;;  %s5349_s3 = inlined_call_operand.vmem [shape: f32[2,1,16], index: 3, kind: output, shape index: {1}]   ;;  %s5350_s4 = inlined_call_operand.vmem [shape: f32[2,1,16], index: 4, kind: output, shape index: {2}]  }
   0x1 LB: > { %s3101_s16 = sadd.s32 4294967295, %s3884_s15   ;;  %p3105_p0 = scmp.ge.s32.totalorder %s3884_s15, 1  ;;  %s3884_s15 = sphi %s3911_s15, %s15_s15  }
   0x2   : > { %p167_p1 = scmp.lt.s32.totalorder %s3884_s15, 3 }
   0x4   : > { %p168_p2 = pnand %p3105_p0, %p167_p1 }
   0x6   : > { %171 = sbr.rel (%p168_p2) target bundleno = 499 (0x1f3), region = 28 }
   0xd   : > { %v3810_v0 = vld [vmem:[%s5347_s1] sm:$0xff]   ;;  %p199_p3 = scmp.lt.s32.totalorder %s3101_s16, 1  ;;  %vm336_vm0 = vcmask 130048   ;;  %vm674_vm1 = vcmask 125952   ;;  %vm2993_vm2 = vcmask 122880  }
   0xe   : > { %v3811_v1 = vld [vmem:[%s5347_s1] sm:$0xff]   ;;  %3666 = vmatprep.subr.bf16.mxu0 %v3810_v0 }
   0xf   : > { %s5430_s16 = smov (!%p199_p3, %s3101_s16), 1  ;;  %v3814_v2 = vld [vmem:[%s5347_s1] sm:$0xff]   ;;  %3667 = vmatpush3.bf16.msra.mxu0 %v3810_v0  ;;  %3700 = vmatprep.subr.bf16.mxu1 %v3811_v1 }
  0x10   : > { %v3817_v3 = vld [vmem:[%s5347_s1] sm:$0xff]   ;;  %3701 = vmatpush3.bf16.msra.mxu1 %v3811_v1  ;;  %s3468_s25 = sshll.u32 %s5430_s16, 9  ;;  %3734 = vmatprep.subr.bf16.mxu0 %v3814_v2  ;;  %s211_s8 = scalar_lea.vmem %s5349_s3, %s5430_s16 }
  0x11   : > { %s3939_s28 = scalar_lea.vmem %s5346_s0, %s3468_s25  ;;  %3768 = vmatprep.subr.bf16.mxu1 %v3817_v3  ;;  %s4074_s5 = scalar_lea.vmem %s5348_s2, %s3468_s25 }
  0x12   : > { %v3812_v4 = vld [vmem:[%s3939_s28] sm:$0xff]   ;;  %v3815_v6 = vld [vmem:[%s3939_s28 + $0x8] sm:$0xff]   ;;  %v3818_v8 = vld [vmem:[%s3939_s28 + $0x10] sm:$0xff]   ;;  %s214_s11 = scalar_lea.vmem %s5350_s4, %s5430_s16 }
  0x13   : > { %v3813_v5 = vld [vmem:[%s3939_s28 + $0x80] sm:$0xff]   ;;  %3668 = vmatprep.mubr.msk.bf16.mxu0 %vm336_vm0, %v3812_v4  ;;  %v3816_v7 = vld [vmem:[%s3939_s28 + $0x88] sm:$0xff]   ;;  %v3819_v9 = vld [vmem:[%s3939_s28 + $0x90] sm:$0xff]  }
  0x14   : > { %3702 = vmatprep.mubr.msk.bf16.mxu1 %vm336_vm0, %v3813_v5  ;;  %3669 = vmatmul.mubr.msk.bf16.vlgmr.msra.gmra.mrb[0].mxu0 %vm336_vm0, %v3815_v6  ;;  %v3820_v10 = vld [vmem:[%s3939_s28 + $0x18] sm:$0xff]   ;;  %v3822_v12 = vld [vmem:[%s3939_s28 + $0x20] sm:$0xff]   ;;  %v3824_v14 = vld [vmem:[%s3939_s28 + $0x28] sm:$0xff]  }
  0x15   : > { %3703 = vmatmul.mubr.msk.bf16.vlgmr.msra.gmra.mrb[0].mxu1 %vm336_vm0, %v3816_v7  ;;  %3735 = vmatpush3.bf16.msra.mxu0 %v3814_v2  ;;  %v3821_v11 = vld [vmem:[%s3939_s28 + $0x98] sm:$0xff]   ;;  %v3823_v13 = vld [vmem:[%s3939_s28 + $0xa0] sm:$0xff]   ;;  %v3825_v15 = vld [vmem:[%s3939_s28 + $0xa8] sm:$0xff]  }
  0x16   : > { %3769 = vmatpush3.bf16.msra.mxu1 %v3817_v3  ;;  %3672 = vmatprep.mubr.msk.bf16.mxu0 %vm336_vm0, %v3818_v8  ;;  %v3826_v16 = vld [vmem:[%s3939_s28 + $0x30] sm:$0xff]   ;;  %v3828_v18 = vld [vmem:[%s3939_s28 + $0x38] sm:$0xff]   ;;  %v3830_v20 = vld [vmem:[%s3939_s28 + $0x40] sm:$0xff]  }
  0x17   : > { %3706 = vmatprep.mubr.msk.bf16.mxu1 %vm336_vm0, %v3819_v9  ;;  %v3827_v17 = vld [vmem:[%s3939_s28 + $0xb0] sm:$0xff]   ;;  %v3829_v19 = vld [vmem:[%s3939_s28 + $0xb8] sm:$0xff]   ;;  %v3831_v21 = vld [vmem:[%s3939_s28 + $0xc0] sm:$0xff]  }
  0x18   : > { %v3832_v22 = vld [vmem:[%s3939_s28 + $0x48] sm:$0xff]   ;;  %v3834_v24 = vld [vmem:[%s3939_s28 + $0x50] sm:$0xff]   ;;  %v3836_v26 = vld [vmem:[%s3939_s28 + $0x58] sm:$0xff]  }
  0x19   : > { %v3833_v23 = vld [vmem:[%s3939_s28 + $0xc8] sm:$0xff]   ;;  %v3835_v25 = vld [vmem:[%s3939_s28 + $0xd0] sm:$0xff]   ;;  %v3837_v27 = vld [vmem:[%s3939_s28 + $0xd8] sm:$0xff]  }
  0x1a   : > { %v3838_v28 = vld [vmem:[%s3939_s28 + $0x60] sm:$0xff]   ;;  %v3840_v30 = vld [vmem:[%s3939_s28 + $0x68] sm:$0xff]   ;;  %v3842_v32 = vld [vmem:[%s3939_s28 + $0x70] sm:$0xff]  }
  0x1b   : > { %v3839_v29 = vld [vmem:[%s3939_s28 + $0xe0] sm:$0xff]   ;;  %v3841_v31 = vld [vmem:[%s3939_s28 + $0xe8] sm:$0xff]   ;;  %v3843_v33 = vld [vmem:[%s3939_s28 + $0xf0] sm:$0xff]  }
  0x1c   : > { %3673 = vmatmul.mubr.msk.bf16.gmra.mrb[4].mxu0 %vm336_vm0, %v3820_v10  ;;  %v3844_v34 = vld [vmem:[%s3939_s28 + $0x78] sm:$0xff]   ;;  %v3846_v36 = vld [vmem:[%s3939_s28 + $0x100] sm:$0xff]   ;;  %v3848_v38 = vld [vmem:[%s3939_s28 + $0x108] sm:$0xff]  }
  0x1d   : > { %3707 = vmatmul.mubr.msk.bf16.gmra.mrb[4].mxu1 %vm336_vm0, %v3821_v11  ;;  %3676 = vmatprep.mubr.msk.bf16.mxu0 %vm336_vm0, %v3822_v12  ;;  %v3845_v35 = vld [vmem:[%s3939_s28 + $0xf8] sm:$0xff]   ;;  %v3847_v37 = vld [vmem:[%s3939_s28 + $0x180] sm:$0xff]   ;;  %v3849_v39 = vld [vmem:[%s3939_s28 + $0x188] sm:$0xff]  }
  0x1e   : > { %3710 = vmatprep.mubr.msk.bf16.mxu1 %vm336_vm0, %v3823_v13  ;;  %v3850_v40 = vld [vmem:[%s3939_s28 + $0x110] sm:$0xff]   ;;  %v3852_v42 = vld [vmem:[%s3939_s28 + $0x118] sm:$0xff]   ;;  %v3854_v44 = vld [vmem:[%s3939_s28 + $0x120] sm:$0xff]  }
  0x1f   : > { %v3851_v41 = vld [vmem:[%s3939_s28 + $0x190] sm:$0xff]   ;;  %v3853_v43 = vld [vmem:[%s3939_s28 + $0x198] sm:$0xff]   ;;  %v3855_v45 = vld [vmem:[%s3939_s28 + $0x1a0] sm:$0xff]  }
  0x20   : > { %v3856_v46 = vld [vmem:[%s3939_s28 + $0x128] sm:$0xff]   ;;  %v3858_v48 = vld [vmem:[%s3939_s28 + $0x130] sm:$0xff]   ;;  %v3860_v50 = vld [vmem:[%s3939_s28 + $0x138] sm:$0xff]  }
  0x21   : > { %v3857_v47 = vld [vmem:[%s3939_s28 + $0x1a8] sm:$0xff]   ;;  %v3859_v49 = vld [vmem:[%s3939_s28 + $0x1b0] sm:$0xff]   ;;  %v3861_v51 = vld [vmem:[%s3939_s28 + $0x1b8] sm:$0xff]  }
  0x22   : > { %v3862_v52 = vld [vmem:[%s3939_s28 + $0x140] sm:$0xff]   ;;  %v3864_v54 = vld [vmem:[%s3939_s28 + $0x148] sm:$0xff]   ;;  %v3866_v56 = vld [vmem:[%s3939_s28 + $0x150] sm:$0xff]  }
  0x23   : > { %v3863_v53 = vld [vmem:[%s3939_s28 + $0x1c0] sm:$0xff]   ;;  %v3865_v55 = vld [vmem:[%s3939_s28 + $0x1c8] sm:$0xff]   ;;  %v3867_v57 = vld [vmem:[%s3939_s28 + $0x1d0] sm:$0xff]  }
  0x24   : > { %3677 = vmatmul.mubr.msk.bf16.gmra.mrb[8].mxu0 %vm336_vm0, %v3824_v14  ;;  %v3868_v58 = vld [vmem:[%s3939_s28 + $0x158] sm:$0xff]   ;;  %v3870_v60 = vld [vmem:[%s3939_s28 + $0x160] sm:$0xff]   ;;  %v3872_v62 = vld [vmem:[%s3939_s28 + $0x168] sm:$0xff]  }
  0x25   : > { %3711 = vmatmul.mubr.msk.bf16.gmra.mrb[8].mxu1 %vm336_vm0, %v3825_v15  ;;  %3680 = vmatprep.mubr.msk.bf16.mxu0 %vm336_vm0, %v3826_v16  ;;  %v3869_v59 = vld [vmem:[%s3939_s28 + $0x1d8] sm:$0xff]   ;;  %v3871_v61 = vld [vmem:[%s3939_s28 + $0x1e0] sm:$0xff]   ;;  %v3873_v63 = vld [vmem:[%s3939_s28 + $0x1e8] sm:$0xff]  }
  0x26   : > { %3714 = vmatprep.mubr.msk.bf16.mxu1 %vm336_vm0, %v3827_v17  ;;  %v3874_v0 = vld [vmem:[%s3939_s28 + $0x170] sm:$0xff]   ;;  %v3876_v2 = vld [vmem:[%s3939_s28 + $0x178] sm:$0xff]  }
  0x27   : > { %v3875_v1 = vld [vmem:[%s3939_s28 + $0x1f0] sm:$0xff]   ;;  %v3877_v3 = vld [vmem:[%s3939_s28 + $0x1f8] sm:$0xff]  }
  0x2c   : > { %3681 = vmatmul.mubr.msk.bf16.gmra.mrb[12].mxu0 %vm336_vm0, %v3828_v18 }
  0x2d   : > { %3715 = vmatmul.mubr.msk.bf16.gmra.mrb[12].mxu1 %vm336_vm0, %v3829_v19  ;;  %3684 = vmatprep.mubr.msk.bf16.mxu0 %vm336_vm0, %v3830_v20 }
  0x2e   : > { %3718 = vmatprep.mubr.msk.bf16.mxu1 %vm336_vm0, %v3831_v21 }
  0x34   : > { %3685 = vmatmul.mubr.msk.bf16.gmra.mrb[16].mxu0 %vm336_vm0, %v3832_v22 }
  0x35   : > { %3719 = vmatmul.mubr.msk.bf16.gmra.mrb[16].mxu1 %vm336_vm0, %v3833_v23  ;;  %3688 = vmatprep.mubr.msk.bf16.mxu0 %vm336_vm0, %v3834_v24 }
  0x36   : > { %3722 = vmatprep.mubr.msk.bf16.mxu1 %vm336_vm0, %v3835_v25 }
  0x3c   : > { %3689 = vmatmul.mubr.msk.bf16.gmra.mrb[20].mxu0 %vm336_vm0, %v3836_v26 }
  0x3d   : > { %3723 = vmatmul.mubr.msk.bf16.gmra.mrb[20].mxu1 %vm336_vm0, %v3837_v27  ;;  %3692 = vmatprep.mubr.msk.bf16.mxu0 %vm336_vm0, %v3838_v28 }
  0x3e   : > { %3726 = vmatprep.mubr.msk.bf16.mxu1 %vm336_vm0, %v3839_v29 }
  0x44   : > { %3693 = vmatmul.mubr.msk.bf16.gmra.mrb[24].mxu0 %vm336_vm0, %v3840_v30 }
  0x45   : > { %3727 = vmatmul.mubr.msk.bf16.gmra.mrb[24].mxu1 %vm336_vm0, %v3841_v31  ;;  %3696 = vmatprep.mubr.msk.bf16.mxu0 %vm336_vm0, %v3842_v32 }
  0x46   : > { %3730 = vmatprep.mubr.msk.bf16.mxu1 %vm336_vm0, %v3843_v33 }
  0x4c   : > { %3697 = vmatmul.mubr.msk.bf16.gmra.mrb[28].mxu0 %vm336_vm0, %v3844_v34 }
  0x4d   : > { %3731 = vmatmul.mubr.msk.bf16.gmra.mrb[28].mxu1 %vm336_vm0, %v3845_v35  ;;  %3736 = vmatprep.mubr.msk.bf16.mxu0 %vm336_vm0, %v3846_v36 }
  0x4e   : > { %3770 = vmatprep.mubr.msk.bf16.mxu1 %vm336_vm0, %v3847_v37 }
  0x54   : > { %3737 = vmatmul.mubr.msk.bf16.vlgmr.msra.gmra.mrb[32].mxu0 %vm336_vm0, %v3848_v38 }
  0x55   : > { %3771 = vmatmul.mubr.msk.bf16.vlgmr.msra.gmra.mrb[32].mxu1 %vm336_vm0, %v3849_v39  ;;  %3740 = vmatprep.mubr.msk.bf16.mxu0 %vm336_vm0, %v3850_v40 }
  0x56   : > { %3774 = vmatprep.mubr.msk.bf16.mxu1 %vm336_vm0, %v3851_v41 }
  0x5c   : > { %3741 = vmatmul.mubr.msk.bf16.gmra.mrb[36].mxu0 %vm336_vm0, %v3852_v42 }
  0x5d   : > { %3775 = vmatmul.mubr.msk.bf16.gmra.mrb[36].mxu1 %vm336_vm0, %v3853_v43  ;;  %3744 = vmatprep.mubr.msk.bf16.mxu0 %vm336_vm0, %v3854_v44 }
  0x5e   : > { %3778 = vmatprep.mubr.msk.bf16.mxu1 %vm336_vm0, %v3855_v45 }
  0x64   : > { %3745 = vmatmul.mubr.msk.bf16.gmra.mrb[40].mxu0 %vm336_vm0, %v3856_v46 }
  0x65   : > { %3779 = vmatmul.mubr.msk.bf16.gmra.mrb[40].mxu1 %vm336_vm0, %v3857_v47  ;;  %3748 = vmatprep.mubr.msk.bf16.mxu0 %vm336_vm0, %v3858_v48 }
  0x66   : > { %3782 = vmatprep.mubr.msk.bf16.mxu1 %vm336_vm0, %v3859_v49 }
  0x6c   : > { %3749 = vmatmul.mubr.msk.bf16.gmra.mrb[44].mxu0 %vm336_vm0, %v3860_v50 }
  0x6d   : > { %3783 = vmatmul.mubr.msk.bf16.gmra.mrb[44].mxu1 %vm336_vm0, %v3861_v51  ;;  %3752 = vmatprep.mubr.msk.bf16.mxu0 %vm336_vm0, %v3862_v52 }
  0x6e   : > { %3786 = vmatprep.mubr.msk.bf16.mxu1 %vm336_vm0, %v3863_v53 }
  0x74   : > { %3753 = vmatmul.mubr.msk.bf16.gmra.mrb[48].mxu0 %vm336_vm0, %v3864_v54 }
  0x75   : > { %3787 = vmatmul.mubr.msk.bf16.gmra.mrb[48].mxu1 %vm336_vm0, %v3865_v55  ;;  %3756 = vmatprep.mubr.msk.bf16.mxu0 %vm336_vm0, %v3866_v56 }
  0x76   : > { %3790 = vmatprep.mubr.msk.bf16.mxu1 %vm336_vm0, %v3867_v57 }
  0x7c   : > { %3757 = vmatmul.mubr.msk.bf16.gmra.mrb[52].mxu0 %vm336_vm0, %v3868_v58 }
  0x7d   : > { %3791 = vmatmul.mubr.msk.bf16.gmra.mrb[52].mxu1 %vm336_vm0, %v3869_v59  ;;  %3760 = vmatprep.mubr.msk.bf16.mxu0 %vm336_vm0, %v3870_v60 }
  0x7e   : > { %3794 = vmatprep.mubr.msk.bf16.mxu1 %vm336_vm0, %v3871_v61 }
  0x84   : > { %3761 = vmatmul.mubr.msk.bf16.gmra.mrb[56].mxu0 %vm336_vm0, %v3872_v62 }
  0x85   : > { %3795 = vmatmul.mubr.msk.bf16.gmra.mrb[56].mxu1 %vm336_vm0, %v3873_v63  ;;  %3764 = vmatprep.mubr.msk.bf16.mxu0 %vm336_vm0, %v3874_v0 }
  0x86   : > { %3798 = vmatprep.mubr.msk.bf16.mxu1 %vm336_vm0, %v3875_v1 }
  0x8c   : > { %3765 = vmatmul.mubr.msk.bf16.gmra.mrb[60].mxu0 %vm336_vm0, %v3876_v2 }
  0x8d   : > { %3799 = vmatmul.mubr.msk.bf16.gmra.mrb[60].mxu1 %vm336_vm0, %v3877_v3 }
  0xe7   : > { %v3670_v4 = vpop.f32.mrb[0].mxu0 }
  0xe8   : > { %v3472_v5 = vpack.c.bf16 %v3670_v4, %v3670_v4  ;;  %v3704_v6 = vpop.f32.mrb[0].mxu1  ;;  %v419_v7 = vpop.f32.mrb[1].mxu0 }
  0xe9   : > { %v3504_v8 = vpack.c.bf16 %v3704_v6, %v3704_v6  ;;  %v3470_v9 = vpack.c.bf16 %v419_v7, %v419_v7  ;;  %v1114_v10 = vpop.f32.mrb[1].mxu1  ;;  %v3671_v11 = vpop.f32.mrb[2].mxu0 }
  0xea   : > { %677 = vst.msk [vmem:[%s4074_s5 + $0x8] sm:$0xf] %vm674_vm1, %v3472_v5  ;;  %v3502_v12 = vpack.c.bf16 %v1114_v10, %v1114_v10  ;;  %v547_v13 = vpack.c.bf16 %v3671_v11, %v3670_v4  ;;  %v3473_v14 = vpack.c.bf16 %v3671_v11, %v3671_v11  ;;  %v3705_v15 = vpop.f32.mrb[2].mxu1  ;;  %v422_v16 = vpop.f32.mrb[3].mxu0 }
  0xeb   : > { %1371 = vst.msk [vmem:[%s4074_s5 + $0x88] sm:$0xf] %vm674_vm1, %v3504_v8  ;;  %675 = vst.msk [vmem:[%s4074_s5] sm:$0xf] %vm674_vm1, %v3470_v9  ;;  %v1242_v17 = vpack.c.bf16 %v3705_v15, %v3704_v6  ;;  %v3505_v18 = vpack.c.bf16 %v3705_v15, %v3705_v15  ;;  %v546_v19 = vpack.c.bf16 %v422_v16, %v419_v7  ;;  %v1117_v21 = vpop.f32.mrb[3].mxu1 }
  0xec   : > { %v3471_v20 = vpack.c.bf16 %v422_v16, %v422_v16  ;;  %1369 = vst.msk [vmem:[%s4074_s5 + $0x80] sm:$0xf] %vm674_vm1, %v3502_v12  ;;  %678 = vst.msk [vmem:[%s4074_s5 + $0xc] sm:$0xf] %vm674_vm1, %v3473_v14  ;;  %v709_v22 = vunpack.c.l.bf16 %v547_v13  ;;  %v710_v23 = vunpack.c.h.bf16 %v547_v13  ;;  %v1241_v24 = vpack.c.bf16 %v1117_v21, %v1114_v10 }
  0xed   : > { %v3503_v25 = vpack.c.bf16 %v1117_v21, %v1117_v21  ;;  %1372 = vst.msk [vmem:[%s4074_s5 + $0x8c] sm:$0xf] %vm674_vm1, %v3505_v18  ;;  %v1403_v26 = vunpack.c.l.bf16 %v1242_v17  ;;  %v1404_v27 = vunpack.c.h.bf16 %v1242_v17  ;;  %v707_v28 = vunpack.c.l.bf16 %v546_v19 }
  0xee   : > { %676 = vst.msk [vmem:[%s4074_s5 + $0x4] sm:$0xf] %vm674_vm1, %v3471_v20  ;;  %v708_v29 = vunpack.c.h.bf16 %v546_v19  ;;  %v742_v30 = vsel %vm336_vm0, %v709_v22, 0.0  ;;  %v811_v31 = vmul.f32 %v709_v22, %v709_v22  ;;  %v744_v32 = vsel %vm336_vm0, %v710_v23, 0.0 }
  0xef   : > { %1370 = vst.msk [vmem:[%s4074_s5 + $0x84] sm:$0xf] %vm674_vm1, %v3503_v25  ;;  %v812_v33 = vmul.f32 %v710_v23, %v710_v23  ;;  %v1436_v34 = vsel %vm336_vm0, %v1403_v26, 0.0  ;;  %v1505_v35 = vmul.f32 %v1403_v26, %v1403_v26  ;;  %v3674_v36 = vpop.f32.mrb[4].mxu0  ;;  %v4096_v37 = vsel %vm336_vm0, %v1404_v27, 0.0 }
  0xf0   : > { %v1506_v38 = vmul.f32 %v1404_v27, %v1404_v27  ;;  %v739_v39 = vsel %vm336_vm0, %v707_v28, 0.0  ;;  %v740_v40 = vsel %vm336_vm0, %v708_v29, 0.0  ;;  %v3708_v41 = vpop.f32.mrb[4].mxu1  ;;  %v435_v42 = vpop.f32.mrb[5].mxu0  ;;  %v844_v43 = vsel %vm336_vm0, %v811_v31, 0.0 }
  0xf1   : > { %v1538_v44 = vsel %vm336_vm0, %v1505_v35, 0.0  ;;  %v741_v45 = vadd.f32 %v740_v40, %v739_v39  ;;  %v809_v46 = vmul.f32 %v707_v28, %v707_v28  ;;  %v4102_v47 = vpop.f32.mrb[5].mxu1  ;;  %v3675_v48 = vpop.f32.mrb[6].mxu0  ;;  %v810_v49 = vmul.f32 %v708_v29, %v708_v29 }
  0xf2   : > { %v1401_v50 = vunpack.c.l.bf16 %v1241_v24  ;;  %v1402_v51 = vunpack.c.h.bf16 %v1241_v24  ;;  %v3476_v52 = vpack.c.bf16 %v3674_v36, %v3674_v36  ;;  %v3709_v53 = vpop.f32.mrb[6].mxu1  ;;  %v438_v54 = vpop.f32.mrb[7].mxu0  ;;  %v3508_v57 = vpack.c.bf16 %v3708_v41, %v3708_v41 }
  0xf3   : > { %v743_v55 = vadd.f32 %v742_v30, %v741_v45  ;;  %v841_v56 = vsel %vm336_vm0, %v809_v46, 0.0  ;;  %v3474_v58 = vpack.c.bf16 %v435_v42, %v435_v42  ;;  %v4105_v59 = vpop.f32.mrb[7].mxu1  ;;  %v842_v60 = vsel %vm336_vm0, %v810_v49, 0.0 }
  0xf4   : > { %v1433_v61 = vsel %vm336_vm0, %v1401_v50, 0.0  ;;  %v1434_v62 = vsel %vm336_vm0, %v1402_v51, 0.0  ;;  %v1503_v63 = vmul.f32 %v1401_v50, %v1401_v50  ;;  %681 = vst.msk [vmem:[%s4074_s5 + $0x18] sm:$0xf] %vm674_vm1, %v3476_v52  ;;  %v843_v0 = vadd.f32 %v842_v60, %v841_v56  ;;  %1375 = vst.msk [vmem:[%s4074_s5 + $0x98] sm:$0xf] %vm674_vm1, %v3508_v57 }
  0xf5   : > { %v1435_v1 = vadd.f32 %v1434_v62, %v1433_v61  ;;  %v1504_v2 = vmul.f32 %v1402_v51, %v1402_v51  ;;  %679 = vst.msk [vmem:[%s4074_s5 + $0x10] sm:$0xf] %vm674_vm1, %v3474_v58  ;;  %v3506_v3 = vpack.c.bf16 %v4102_v47, %v4102_v47  ;;  %v549_v5 = vpack.c.bf16 %v3675_v48, %v3674_v36 }
  0xf6   : > { %v1535_v4 = vsel %vm336_vm0, %v1503_v63, 0.0  ;;  %v3477_v6 = vpack.c.bf16 %v3675_v48, %v3675_v48  ;;  %v1244_v7 = vpack.c.bf16 %v3709_v53, %v3708_v41  ;;  %v845_v8 = vadd.f32 %v844_v43, %v843_v0 }
  0xf7   : > { %v1437_v9 = vadd.f32 %v1436_v34, %v1435_v1  ;;  %v1536_v10 = vsel %vm336_vm0, %v1504_v2, 0.0  ;;  %1373 = vst.msk [vmem:[%s4074_s5 + $0x90] sm:$0xf] %vm674_vm1, %v3506_v3  ;;  %v3509_v11 = vpack.c.bf16 %v3709_v53, %v3709_v53  ;;  %v4122_v12 = vpop.f32.mrb[8].mxu0  ;;  %v713_v14 = vunpack.c.l.bf16 %v549_v5 }
  0xf8   : > { %v1537_v13 = vadd.f32 %v1536_v10, %v1535_v4  ;;  %682 = vst.msk [vmem:[%s4074_s5 + $0x1c] sm:$0xf] %vm674_vm1, %v3477_v6  ;;  %v714_v15 = vunpack.c.h.bf16 %v549_v5  ;;  %v1407_v16 = vunpack.c.l.bf16 %v1244_v7  ;;  %v4126_v17 = vpop.f32.mrb[8].mxu1  ;;  %v4128_v18 = vpop.f32.mrb[9].mxu0  ;;  %v1408_v19 = vunpack.c.h.bf16 %v1244_v7 }
  0xf9   : > { %1376 = vst.msk [vmem:[%s4074_s5 + $0x9c] sm:$0xf] %vm674_vm1, %v3509_v11  ;;  %v548_v20 = vpack.c.bf16 %v438_v54, %v435_v42  ;;  %v3475_v21 = vpack.c.bf16 %v438_v54, %v438_v54  ;;  %v745_v22 = vadd.f32 %v744_v32, %v743_v55  ;;  %v4132_v23 = vpop.f32.mrb[9].mxu1  ;;  %v4134_v24 = vpop.f32.mrb[10].mxu0  ;;  %v846_v25 = vsel %vm336_vm0, %v812_v33, 0.0 }
  0xfa   : > { %v1540_v26 = vsel %vm336_vm0, %v1506_v38, 0.0  ;;  %v1539_v27 = vadd.f32 %v1538_v44, %v1537_v13  ;;  %v815_v28 = vmul.f32 %v713_v14, %v713_v14  ;;  %v4138_v29 = vpop.f32.mrb[10].mxu1  ;;  %v4140_v30 = vpop.f32.mrb[11].mxu0  ;;  %v750_v31 = vsel %vm336_vm0, %v713_v14, 0.0 }
  0xfb   : > { %v4144_v34 = vsel %vm336_vm0, %v714_v15, 0.0  ;;  %v4146_v32 = vmul.f32 %v714_v15, %v714_v15  ;;  %v1509_v35 = vmul.f32 %v1407_v16, %v1407_v16  ;;  %680 = vst.msk [vmem:[%s4074_s5 + $0x14] sm:$0xf] %vm674_vm1, %v3475_v21  ;;  %v4150_v36 = vpop.f32.mrb[11].mxu1  ;;  %v1444_v33 = vsel %vm336_vm0, %v1407_v16, 0.0 }
  0xfc   : > { %v4154_v38 = vsel %vm336_vm0, %v1408_v19, 0.0  ;;  %v711_v39 = vunpack.c.l.bf16 %v548_v20  ;;  %v712_v40 = vunpack.c.h.bf16 %v548_v20  ;;  %v852_v41 = vsel %vm336_vm0, %v815_v28, 0.0 }
  0xfd   : > { %v4157_v42 = vmul.f32 %v1408_v19, %v1408_v19  ;;  %v847_v43 = vadd.f32 %v846_v25, %v845_v8  ;;  %v1243_v44 = vpack.c.bf16 %v4105_v59, %v4102_v47  ;;  %v4162_v45 = vsel %vm336_vm0, %v1509_v35, 0.0 }
  0xfe   : > { %v746_v46 = vsel %vm336_vm0, %v711_v39, 0.0  ;;  %v748_v48 = vsel %vm336_vm0, %v712_v40, 0.0  ;;  %v813_v49 = vmul.f32 %v711_v39, %v711_v39  ;;  %v814_v51 = vmul.f32 %v712_v40, %v712_v40 }
  0xff   : > { %v747_v50 = vadd.f32 %v746_v46, %v745_v22  ;;  %v3507_v52 = vpack.c.bf16 %v4105_v59, %v4105_v59  ;;  %v1405_v53 = vunpack.c.l.bf16 %v1243_v44  ;;  %v4168_v54 = vpop.f32.mrb[12].mxu0  ;;  %v1406_v47 = vunpack.c.h.bf16 %v1243_v44 }
 0x100   : > { %v848_v55 = vsel %vm336_vm0, %v813_v49, 0.0  ;;  %v1439_v56 = vadd.f32 %v4096_v37, %v1437_v9  ;;  %v1541_v57 = vadd.f32 %v1540_v26, %v1539_v27  ;;  %v4172_v58 = vpop.f32.mrb[12].mxu1  ;;  %v4174_v60 = vpop.f32.mrb[13].mxu0  ;;  %v850_v63 = vsel %vm336_vm0, %v814_v51, 0.0 }
 0x101   : > { %v749_v61 = vadd.f32 %v748_v48, %v747_v50  ;;  %v849_v62 = vadd.f32 %v848_v55, %v847_v43  ;;  %1374 = vst.msk [vmem:[%s4074_s5 + $0x94] sm:$0xf] %vm674_vm1, %v3507_v52  ;;  %v1440_v59 = vsel %vm336_vm0, %v1405_v53, 0.0  ;;  %v4180_v0 = vpop.f32.mrb[13].mxu1  ;;  %v4182_v1 = vpop.f32.mrb[14].mxu0  ;;  %v1442_v37 = vsel %vm336_vm0, %v1406_v47, 0.0 }
 0x102   : > { %v1441_v2 = vadd.f32 %v1440_v59, %v1439_v56  ;;  %v1507_v3 = vmul.f32 %v1405_v53, %v1405_v53  ;;  %v1508_v4 = vmul.f32 %v1406_v47, %v1406_v47  ;;  %v4185_v5 = vpop.f32.mrb[14].mxu1  ;;  %v4187_v6 = vpop.f32.mrb[15].mxu0  ;;  %v3480_v9 = vpack.c.bf16 %v4122_v12, %v4122_v12 }
 0x103   : > { %v751_v7 = vadd.f32 %v750_v31, %v749_v61  ;;  %v851_v8 = vadd.f32 %v850_v63, %v849_v62  ;;  %v3512_v10 = vpack.c.bf16 %v4126_v17, %v4126_v17  ;;  %v4193_v11 = vpop.f32.mrb[15].mxu1  ;;  %v3478_v16 = vpack.c.bf16 %v4128_v18, %v4128_v18 }
 0x104   : > { %v1443_v13 = vadd.f32 %v1442_v37, %v1441_v2  ;;  %v1542_v14 = vsel %vm336_vm0, %v1507_v3, 0.0  ;;  %v1544_v15 = vsel %vm336_vm0, %v1508_v4, 0.0  ;;  %685 = vst.msk [vmem:[%s4074_s5 + $0x28] sm:$0xf] %vm674_vm1, %v3480_v9  ;;  %v3510_v21 = vpack.c.bf16 %v4132_v23, %v4132_v23 }
 0x105   : > { %v853_v19 = vadd.f32 %v852_v41, %v851_v8  ;;  %v1543_v20 = vadd.f32 %v1542_v14, %v1541_v57  ;;  %1379 = vst.msk [vmem:[%s4074_s5 + $0xa8] sm:$0xf] %vm674_vm1, %v3512_v10  ;;  %v551_v22 = vpack.c.bf16 %v4134_v24, %v4122_v12  ;;  %683 = vst.msk [vmem:[%s4074_s5 + $0x20] sm:$0xf] %vm674_vm1, %v3478_v16  ;;  %v1548_v44 = vsel %vm336_vm0, %v4157_v42, 0.0 }
 0x106   : > { %v1445_v25 = vadd.f32 %v1444_v33, %v1443_v13  ;;  %v3481_v26 = vpack.c.bf16 %v4134_v24, %v4134_v24  ;;  %v1246_v27 = vpack.c.bf16 %v4138_v29, %v4126_v17  ;;  %v3513_v28 = vpack.c.bf16 %v4138_v29, %v4138_v29  ;;  %1377 = vst.msk [vmem:[%s4074_s5 + $0xa0] sm:$0xf] %vm674_vm1, %v3510_v21 }
 0x107   : > { %v1545_v31 = vadd.f32 %v1544_v15, %v1543_v20  ;;  %v717_v35 = vunpack.c.l.bf16 %v551_v22  ;;  %v718_v39 = vunpack.c.h.bf16 %v551_v22  ;;  %v550_v12 = vpack.c.bf16 %v4140_v30, %v4128_v18  ;;  %v4219_v33 = vpop.f32.mrb[16].mxu0 }
 0x108   : > { %686 = vst.msk [vmem:[%s4074_s5 + $0x2c] sm:$0xf] %vm674_vm1, %v3481_v26  ;;  %1380 = vst.msk [vmem:[%s4074_s5 + $0xac] sm:$0xf] %vm674_vm1, %v3513_v28  ;;  %v1411_v24 = vunpack.c.l.bf16 %v1246_v27  ;;  %v1412_v17 = vunpack.c.h.bf16 %v1246_v27  ;;  %v3479_v29 = vpack.c.bf16 %v4140_v30, %v4140_v30  ;;  %v753_v40 = vadd.f32 %v4144_v34, %v751_v7  ;;  %v4228_v41 = vpop.f32.mrb[16].mxu1  ;;  %v4230_v43 = vpop.f32.mrb[17].mxu0 }
 0x109   : > { %v854_v18 = vsel %vm336_vm0, %v4146_v32, 0.0  ;;  %v1547_v46 = vadd.f32 %v4162_v45, %v1545_v31  ;;  %v819_v48 = vmul.f32 %v717_v35, %v717_v35  ;;  %v4237_v49 = vpop.f32.mrb[17].mxu1  ;;  %v4239_v50 = vpop.f32.mrb[18].mxu0  ;;  %v758_v30 = vsel %vm336_vm0, %v717_v35, 0.0 }
 0x10a   : > { %v4243_v34 = vsel %vm336_vm0, %v718_v39, 0.0  ;;  %v4245_v51 = vmul.f32 %v718_v39, %v718_v39  ;;  %v1513_v52 = vmul.f32 %v1411_v24, %v1411_v24  ;;  %684 = vst.msk [vmem:[%s4074_s5 + $0x24] sm:$0xf] %vm674_vm1, %v3479_v29  ;;  %v4249_v32 = vpop.f32.mrb[18].mxu1  ;;  %v4251_v42 = vpop.f32.mrb[19].mxu0  ;;  %v1452_v45 = vsel %vm336_vm0, %v1411_v24, 0.0 }
 0x10b   : > { %v4255_v53 = vsel %vm336_vm0, %v1412_v17, 0.0  ;;  %v715_v55 = vunpack.c.l.bf16 %v550_v12  ;;  %v716_v47 = vunpack.c.h.bf16 %v550_v12  ;;  %v4257_v56 = vpop.f32.mrb[19].mxu1  ;;  %v860_v57 = vsel %vm336_vm0, %v819_v48, 0.0 }
 0x10c   : > { %v4260_v61 = vmul.f32 %v1412_v17, %v1412_v17  ;;  %v855_v62 = vadd.f32 %v854_v18, %v853_v19  ;;  %v1245_v63 = vpack.c.bf16 %v4150_v36, %v4132_v23  ;;  %v1554_v59 = vsel %vm336_vm0, %v1513_v52, 0.0 }
 0x10d   : > { %v754_v2 = vsel %vm336_vm0, %v715_v55, 0.0  ;;  %v756_v37 = vsel %vm336_vm0, %v716_v47, 0.0  ;;  %v817_v3 = vmul.f32 %v715_v55, %v715_v55  ;;  %v818_v7 = vmul.f32 %v716_v47, %v716_v47 }
 0x10e   : > { %v755_v4 = vadd.f32 %v754_v2, %v753_v40  ;;  %v3511_v8 = vpack.c.bf16 %v4150_v36, %v4150_v36  ;;  %v1409_v9 = vunpack.c.l.bf16 %v1245_v63  ;;  %v1410_v13 = vunpack.c.h.bf16 %v1245_v63 }
 0x10f   : > { %v856_v10 = vsel %vm336_vm0, %v817_v3, 0.0  ;;  %v1447_v14 = vadd.f32 %v4154_v38, %v1445_v25  ;;  %v1549_v23 = vadd.f32 %v1548_v44, %v1547_v46  ;;  %v4271_v15 = vpop.f32.mrb[20].mxu0  ;;  %v858_v20 = vsel %vm336_vm0, %v818_v7, 0.0 }
 0x110   : > { %v757_v16 = vadd.f32 %v756_v37, %v755_v4  ;;  %v857_v19 = vadd.f32 %v856_v10, %v855_v62  ;;  %1378 = vst.msk [vmem:[%s4074_s5 + $0xa4] sm:$0xf] %vm674_vm1, %v3511_v8  ;;  %v1448_v21 = vsel %vm336_vm0, %v1409_v9, 0.0  ;;  %v4277_v22 = vpop.f32.mrb[20].mxu1  ;;  %v4279_v36 = vpop.f32.mrb[21].mxu0  ;;  %v1450_v27 = vsel %vm336_vm0, %v1410_v13, 0.0 }
 0x111   : > { %v1449_v26 = vadd.f32 %v1448_v21, %v1447_v14  ;;  %v1511_v28 = vmul.f32 %v1409_v9, %v1409_v9  ;;  %v1512_v38 = vmul.f32 %v1410_v13, %v1410_v13  ;;  %v4282_v25 = vpop.f32.mrb[21].mxu1  ;;  %v4284_v31 = vpop.f32.mrb[22].mxu0  ;;  %v3484_v12 = vpack.c.bf16 %v4168_v54, %v4168_v54 }
 0x112   : > { %v759_v35 = vadd.f32 %v758_v30, %v757_v16  ;;  %v859_v39 = vadd.f32 %v858_v20, %v857_v19  ;;  %v3516_v24 = vpack.c.bf16 %v4172_v58, %v4172_v58  ;;  %v4290_v17 = vpop.f32.mrb[22].mxu1  ;;  %v4292_v29 = vpop.f32.mrb[23].mxu0  ;;  %v3482_v46 = vpack.c.bf16 %v4174_v60, %v4174_v60 }
 0x113   : > { %v1451_v40 = vadd.f32 %v1450_v27, %v1449_v26  ;;  %v1550_v18 = vsel %vm336_vm0, %v1511_v28, 0.0  ;;  %v1552_v44 = vsel %vm336_vm0, %v1512_v38, 0.0  ;;  %v4298_v48 = vpop.f32.mrb[23].mxu1  ;;  %689 = vst.msk [vmem:[%s4074_s5 + $0x38] sm:$0xf] %vm674_vm1, %v3484_v12  ;;  %v3514_v55 = vpack.c.bf16 %v4180_v0, %v4180_v0 }
 0x114   : > { %v861_v30 = vadd.f32 %v860_v57, %v859_v39  ;;  %v1551_v52 = vadd.f32 %v1550_v18, %v1549_v23  ;;  %1383 = vst.msk [vmem:[%s4074_s5 + $0xb8] sm:$0xf] %vm674_vm1, %v3516_v24  ;;  %v553_v47 = vpack.c.bf16 %v4182_v1, %v4168_v54  ;;  %687 = vst.msk [vmem:[%s4074_s5 + $0x30] sm:$0xf] %vm674_vm1, %v3482_v46  ;;  %v862_v8 = vsel %vm336_vm0, %v4245_v51, 0.0 }
 0x115   : > { %v1453_v62 = vadd.f32 %v1452_v45, %v1451_v40  ;;  %v3485_v63 = vpack.c.bf16 %v4182_v1, %v4182_v1  ;;  %v1248_v57 = vpack.c.bf16 %v4185_v5, %v4172_v58  ;;  %v3517_v2 = vpack.c.bf16 %v4185_v5, %v4185_v5  ;;  %1381 = vst.msk [vmem:[%s4074_s5 + $0xb0] sm:$0xf] %vm674_vm1, %v3514_v55 }
 0x116   : > { %v1553_v37 = vadd.f32 %v1552_v44, %v1551_v52  ;;  %v721_v3 = vunpack.c.l.bf16 %v553_v47  ;;  %v722_v4 = vunpack.c.h.bf16 %v553_v47  ;;  %v552_v54 = vpack.c.bf16 %v4187_v6, %v4174_v60 }
 0x117   : > { %690 = vst.msk [vmem:[%s4074_s5 + $0x3c] sm:$0xf] %vm674_vm1, %v3485_v63  ;;  %1384 = vst.msk [vmem:[%s4074_s5 + $0xbc] sm:$0xf] %vm674_vm1, %v3517_v2  ;;  %v1415_v1 = vunpack.c.l.bf16 %v1248_v57  ;;  %v1416_v45 = vunpack.c.h.bf16 %v1248_v57  ;;  %v3483_v58 = vpack.c.bf16 %v4187_v6, %v4187_v6  ;;  %v761_v5 = vadd.f32 %v4243_v34, %v759_v35  ;;  %v4327_v7 = vpop.f32.mrb[24].mxu0 }
 0x118   : > { %v1556_v60 = vsel %vm336_vm0, %v4260_v61, 0.0  ;;  %v1555_v9 = vadd.f32 %v1554_v59, %v1553_v37  ;;  %v823_v10 = vmul.f32 %v721_v3, %v721_v3  ;;  %v4333_v13 = vpop.f32.mrb[24].mxu1  ;;  %v4335_v14 = vpop.f32.mrb[25].mxu0  ;;  %v766_v23 = vsel %vm336_vm0, %v721_v3, 0.0 }
 0x119   : > { %v4339_v6 = vsel %vm336_vm0, %v722_v4, 0.0  ;;  %v4341_v34 = vmul.f32 %v722_v4, %v722_v4  ;;  %v1517_v16 = vmul.f32 %v1415_v1, %v1415_v1  ;;  %688 = vst.msk [vmem:[%s4074_s5 + $0x34] sm:$0xf] %vm674_vm1, %v3483_v58  ;;  %v4345_v51 = vpop.f32.mrb[25].mxu1  ;;  %v4347_v19 = vpop.f32.mrb[26].mxu0  ;;  %v1460_v61 = vsel %vm336_vm0, %v1415_v1, 0.0 }
 0x11a   : > { %v4351_v59 = vsel %vm336_vm0, %v1416_v45, 0.0  ;;  %v719_v20 = vunpack.c.l.bf16 %v552_v54  ;;  %v720_v21 = vunpack.c.h.bf16 %v552_v54  ;;  %v4353_v26 = vpop.f32.mrb[26].mxu1  ;;  %v4355_v27 = vpop.f32.mrb[27].mxu0  ;;  %v868_v28 = vsel %vm336_vm0, %v823_v10, 0.0 }
 0x11b   : > { %v4358_v38 = vmul.f32 %v1416_v45, %v1416_v45  ;;  %v863_v35 = vadd.f32 %v862_v8, %v861_v30  ;;  %v1247_v39 = vpack.c.bf16 %v4193_v11, %v4180_v0  ;;  %v4362_v12 = vpop.f32.mrb[27].mxu1  ;;  %v1562_v24 = vsel %vm336_vm0, %v1517_v16, 0.0 }
 0x11c   : > { %v762_v40 = vsel %vm336_vm0, %v719_v20, 0.0  ;;  %v764_v18 = vsel %vm336_vm0, %v720_v21, 0.0  ;;  %v821_v44 = vmul.f32 %v719_v20, %v719_v20  ;;  %v822_v52 = vmul.f32 %v720_v21, %v720_v21 }
 0x11d   : > { %v763_v46 = vadd.f32 %v762_v40, %v761_v5  ;;  %v3515_v55 = vpack.c.bf16 %v4193_v11, %v4193_v11  ;;  %v1413_v47 = vunpack.c.l.bf16 %v1247_v39  ;;  %v1414_v63 = vunpack.c.h.bf16 %v1247_v39 }
 0x11e   : > { %v864_v30 = vsel %vm336_vm0, %v821_v44, 0.0  ;;  %v1455_v0 = vadd.f32 %v4255_v53, %v1453_v62  ;;  %v1557_v57 = vadd.f32 %v1556_v60, %v1555_v9  ;;  %v866_v3 = vsel %vm336_vm0, %v822_v52, 0.0 }
 0x11f   : > { %v765_v2 = vadd.f32 %v764_v18, %v763_v46  ;;  %v865_v37 = vadd.f32 %v864_v30, %v863_v35  ;;  %1382 = vst.msk [vmem:[%s4074_s5 + $0xb4] sm:$0xf] %vm674_vm1, %v3515_v55  ;;  %v1456_v4 = vsel %vm336_vm0, %v1413_v47, 0.0  ;;  %v4375_v54 = vpop.f32.mrb[28].mxu0  ;;  %v1458_v11 = vsel %vm336_vm0, %v1414_v63, 0.0 }
 0x120   : > { %v1457_v1 = vadd.f32 %v1456_v4, %v1455_v0  ;;  %v1515_v45 = vmul.f32 %v1413_v47, %v1413_v47  ;;  %v1516_v58 = vmul.f32 %v1414_v63, %v1414_v63  ;;  %v4378_v5 = vpop.f32.mrb[28].mxu1  ;;  %v4380_v53 = vpop.f32.mrb[29].mxu0  ;;  %v3488_v60 = vpack.c.bf16 %v4219_v33, %v4219_v33 }
 0x121   : > { %v767_v62 = vadd.f32 %v766_v23, %v765_v2  ;;  %v867_v8 = vadd.f32 %v866_v3, %v865_v37  ;;  %v3520_v9 = vpack.c.bf16 %v4228_v41, %v4228_v41  ;;  %v4386_v10 = vpop.f32.mrb[29].mxu1  ;;  %v4388_v16 = vpop.f32.mrb[30].mxu0  ;;  %v3486_v23 = vpack.c.bf16 %v4230_v43, %v4230_v43 }
 0x122   : > { %v1459_v20 = vadd.f32 %v1458_v11, %v1457_v1  ;;  %v1558_v21 = vsel %vm336_vm0, %v1515_v45, 0.0  ;;  %v1560_v35 = vsel %vm336_vm0, %v1516_v58, 0.0  ;;  %v4394_v39 = vpop.f32.mrb[30].mxu1  ;;  %v4396_v40 = vpop.f32.mrb[31].mxu0  ;;  %693 = vst.msk [vmem:[%s4074_s5 + $0x48] sm:$0xf] %vm674_vm1, %v3488_v60  ;;  %v3518_v46 = vpack.c.bf16 %v4237_v49, %v4237_v49 }
 0x123   : > { %v869_v18 = vadd.f32 %v868_v28, %v867_v8  ;;  %v1559_v44 = vadd.f32 %v1558_v21, %v1557_v57  ;;  %1387 = vst.msk [vmem:[%s4074_s5 + $0xc8] sm:$0xf] %vm674_vm1, %v3520_v9  ;;  %v555_v52 = vpack.c.bf16 %v4239_v50, %v4219_v33  ;;  %v4406_v55 = vpop.f32.mrb[31].mxu1  ;;  %691 = vst.msk [vmem:[%s4074_s5 + $0x40] sm:$0xf] %vm674_vm1, %v3486_v23  ;;  %v870_v37 = vsel %vm336_vm0, %v4341_v34, 0.0 }
 0x124   : > { %v1461_v47 = vadd.f32 %v1460_v61, %v1459_v20  ;;  %v3489_v28 = vpack.c.bf16 %v4239_v50, %v4239_v50  ;;  %v1250_v30 = vpack.c.bf16 %v4249_v32, %v4228_v41  ;;  %v3521_v63 = vpack.c.bf16 %v4249_v32, %v4249_v32  ;;  %1385 = vst.msk [vmem:[%s4074_s5 + $0xc0] sm:$0xf] %vm674_vm1, %v3518_v46 }
 0x125   : > { %v1561_v0 = vadd.f32 %v1560_v35, %v1559_v44  ;;  %v725_v57 = vunpack.c.l.bf16 %v555_v52  ;;  %v726_v2 = vunpack.c.h.bf16 %v555_v52  ;;  %v554_v33 = vpack.c.bf16 %v4251_v42, %v4230_v43 }
 0x126   : > { %694 = vst.msk [vmem:[%s4074_s5 + $0x4c] sm:$0xf] %vm674_vm1, %v3489_v28  ;;  %1388 = vst.msk [vmem:[%s4074_s5 + $0xcc] sm:$0xf] %vm674_vm1, %v3521_v63  ;;  %v1419_v50 = vunpack.c.l.bf16 %v1250_v30  ;;  %v1420_v61 = vunpack.c.h.bf16 %v1250_v30  ;;  %v3487_v41 = vpack.c.bf16 %v4251_v42, %v4251_v42  ;;  %v769_v32 = vadd.f32 %v4339_v6, %v767_v62 }
 0x127   : > { %v1564_v3 = vsel %vm336_vm0, %v4358_v38, 0.0  ;;  %v1563_v4 = vadd.f32 %v1562_v24, %v1561_v0  ;;  %v827_v43 = vmul.f32 %v725_v57, %v725_v57  ;;  %v4431_v1 = vpop.f32.mrb[32].mxu0  ;;  %v774_v11 = vsel %vm336_vm0, %v725_v57, 0.0 }
 0x128   : > { %v4435_v45 = vsel %vm336_vm0, %v726_v2, 0.0  ;;  %v4437_v58 = vmul.f32 %v726_v2, %v726_v2  ;;  %v1521_v42 = vmul.f32 %v1419_v50, %v1419_v50  ;;  %692 = vst.msk [vmem:[%s4074_s5 + $0x44] sm:$0xf] %vm674_vm1, %v3487_v41  ;;  %v4441_v6 = vpop.f32.mrb[32].mxu1  ;;  %v4443_v34 = vpop.f32.mrb[33].mxu0  ;;  %v1468_v38 = vsel %vm336_vm0, %v1419_v50, 0.0 }
 0x129   : > { %v4447_v24 = vsel %vm336_vm0, %v1420_v61, 0.0  ;;  %v723_v62 = vunpack.c.l.bf16 %v554_v33  ;;  %v724_v8 = vunpack.c.h.bf16 %v554_v33  ;;  %v4449_v60 = vpop.f32.mrb[33].mxu1  ;;  %v4451_v9 = vpop.f32.mrb[34].mxu0  ;;  %v876_v20 = vsel %vm336_vm0, %v827_v43, 0.0 }
 0x12a   : > { %v4454_v21 = vmul.f32 %v1420_v61, %v1420_v61  ;;  %v871_v35 = vadd.f32 %v870_v37, %v869_v18  ;;  %v1249_v23 = vpack.c.bf16 %v4257_v56, %v4237_v49  ;;  %v4458_v44 = vpop.f32.mrb[34].mxu1  ;;  %v4460_v46 = vpop.f32.mrb[35].mxu0  ;;  %v1570_v52 = vsel %vm336_vm0, %v1521_v42, 0.0 }
 0x12b   : > { %v770_v28 = vsel %vm336_vm0, %v723_v62, 0.0  ;;  %v772_v30 = vsel %vm336_vm0, %v724_v8, 0.0  ;;  %v825_v63 = vmul.f32 %v723_v62, %v723_v62  ;;  %v4465_v0 = vpop.f32.mrb[35].mxu1  ;;  %v826_v2 = vmul.f32 %v724_v8, %v724_v8 }
 0x12c   : > { %5377 = vst [vmem:[#allocation2_spill] sm:$0xff] %v4465_v0  ;;  %v771_v57 = vadd.f32 %v770_v28, %v769_v32  ;;  %v3519_v18 = vpack.c.bf16 %v4257_v56, %v4257_v56  ;;  %v1417_v49 = vunpack.c.l.bf16 %v1249_v23  ;;  %v1418_v50 = vunpack.c.h.bf16 %v1249_v23 }
 0x12d   : > { %v872_v33 = vsel %vm336_vm0, %v825_v63, 0.0  ;;  %v1463_v61 = vadd.f32 %v4351_v59, %v1461_v47  ;;  %v1565_v41 = vadd.f32 %v1564_v3, %v1563_v4  ;;  %v874_v42 = vsel %vm336_vm0, %v826_v2, 0.0 }
 0x12e   : > { %v773_v37 = vadd.f32 %v772_v30, %v771_v57  ;;  %v873_v43 = vadd.f32 %v872_v33, %v871_v35  ;;  %1386 = vst.msk [vmem:[%s4074_s5 + $0xc4] sm:$0xf] %vm674_vm1, %v3519_v18  ;;  %v1464_v62 = vsel %vm336_vm0, %v1417_v49, 0.0  ;;  %v1466_v8 = vsel %vm336_vm0, %v1418_v50, 0.0 }
 0x12f   : > { %v1465_v32 = vadd.f32 %v1464_v62, %v1463_v61  ;;  %v1519_v28 = vmul.f32 %v1417_v49, %v1417_v49  ;;  %v1520_v56 = vmul.f32 %v1418_v50, %v1418_v50  ;;  %v4476_v0 = vpop.f32.mrb[36].mxu0  ;;  %v3492_v47 = vpack.c.bf16 %v4271_v15, %v4271_v15 }
 0x130   : > { %v775_v23 = vadd.f32 %v774_v11, %v773_v37  ;;  %v875_v59 = vadd.f32 %v874_v42, %v873_v43  ;;  %v3524_v3 = vpack.c.bf16 %v4277_v22, %v4277_v22  ;;  %v4482_v4 = vpop.f32.mrb[36].mxu1  ;;  %v4484_v35 = vpop.f32.mrb[37].mxu0  ;;  %v3490_v11 = vpack.c.bf16 %v4279_v36, %v4279_v36 }
 0x131   : > { %v1467_v30 = vadd.f32 %v1466_v8, %v1465_v32  ;;  %v1566_v63 = vsel %vm336_vm0, %v1519_v28, 0.0  ;;  %v1568_v57 = vsel %vm336_vm0, %v1520_v56, 0.0  ;;  %v4490_v2 = vpop.f32.mrb[37].mxu1  ;;  %v4492_v18 = vpop.f32.mrb[38].mxu0  ;;  %697 = vst.msk [vmem:[%s4074_s5 + $0x58] sm:$0xf] %vm674_vm1, %v3492_v47  ;;  %v3522_v50 = vpack.c.bf16 %v4282_v25, %v4282_v25 }
 0x132   : > { %v877_v49 = vadd.f32 %v876_v20, %v875_v59  ;;  %v1567_v33 = vadd.f32 %v1566_v63, %v1565_v41  ;;  %1391 = vst.msk [vmem:[%s4074_s5 + $0xd8] sm:$0xf] %vm674_vm1, %v3524_v3  ;;  %v557_v61 = vpack.c.bf16 %v4284_v31, %v4271_v15  ;;  %v4502_v37 = vpop.f32.mrb[38].mxu1  ;;  %v4504_v43 = vpop.f32.mrb[39].mxu0  ;;  %695 = vst.msk [vmem:[%s4074_s5 + $0x50] sm:$0xf] %vm674_vm1, %v3490_v11 }
 0x133   : > { %v1469_v42 = vadd.f32 %v1468_v38, %v1467_v30  ;;  %v3493_v20 = vpack.c.bf16 %v4284_v31, %v4284_v31  ;;  %v1252_v41 = vpack.c.bf16 %v4290_v17, %v4277_v22  ;;  %v3525_v62 = vpack.c.bf16 %v4290_v17, %v4290_v17  ;;  %v4514_v32 = vpop.f32.mrb[39].mxu1  ;;  %1389 = vst.msk [vmem:[%s4074_s5 + $0xd0] sm:$0xf] %vm674_vm1, %v3522_v50 }
 0x134   : > { %v1569_v8 = vadd.f32 %v1568_v57, %v1567_v33  ;;  %v729_v15 = vunpack.c.l.bf16 %v557_v61  ;;  %v730_v28 = vunpack.c.h.bf16 %v557_v61  ;;  %v556_v38 = vpack.c.bf16 %v4292_v29, %v4279_v36 }
 0x135   : > { %698 = vst.msk [vmem:[%s4074_s5 + $0x5c] sm:$0xf] %vm674_vm1, %v3493_v20  ;;  %1392 = vst.msk [vmem:[%s4074_s5 + $0xdc] sm:$0xf] %vm674_vm1, %v3525_v62  ;;  %v1423_v31 = vunpack.c.l.bf16 %v1252_v41  ;;  %v1424_v22 = vunpack.c.h.bf16 %v1252_v41  ;;  %v3491_v17 = vpack.c.bf16 %v4292_v29, %v4292_v29  ;;  %v777_v56 = vadd.f32 %v4435_v45, %v775_v23 }
 0x136   : > { %v878_v59 = vsel %vm336_vm0, %v4437_v58, 0.0  ;;  %v1572_v47 = vsel %vm336_vm0, %v4454_v21, 0.0  ;;  %v1571_v3 = vadd.f32 %v1570_v52, %v1569_v8  ;;  %v831_v30 = vmul.f32 %v729_v15, %v729_v15 }
 0x137   : > { %v782_v36 = vsel %vm336_vm0, %v729_v15, 0.0  ;;  %v4533_v63 = vsel %vm336_vm0, %v730_v28, 0.0  ;;  %v4535_v57 = vmul.f32 %v730_v28, %v730_v28  ;;  %v1525_v11 = vmul.f32 %v1423_v31, %v1423_v31  ;;  %696 = vst.msk [vmem:[%s4074_s5 + $0x54] sm:$0xf] %vm674_vm1, %v3491_v17  ;;  %v4539_v29 = vpop.f32.mrb[40].mxu0 }
 0x138   : > { %5378 = vst [vmem:[#allocation3_spill] sm:$0xff] %v4539_v29  ;;  %v1476_v45 = vsel %vm336_vm0, %v1423_v31, 0.0  ;;  %v4543_v58 = vsel %vm336_vm0, %v1424_v22, 0.0  ;;  %v727_v21 = vunpack.c.l.bf16 %v556_v38  ;;  %v728_v52 = vunpack.c.h.bf16 %v556_v38  ;;  %v4545_v23 = vpop.f32.mrb[40].mxu1  ;;  %v4547_v33 = vpop.f32.mrb[41].mxu0 }
 0x139   : > { %5379 = vst [vmem:[#allocation4_spill] sm:$0xff] %v4545_v23  ;;  %5380 = vst [vmem:[#allocation5_spill] sm:$0xff] %v4547_v33  ;;  %v884_v50 = vsel %vm336_vm0, %v831_v30, 0.0  ;;  %v4550_v61 = vmul.f32 %v1424_v22, %v1424_v22  ;;  %v879_v20 = vadd.f32 %v878_v59, %v877_v49  ;;  %v1251_v41 = vpack.c.bf16 %v4298_v48, %v4282_v25  ;;  %v4554_v62 = vpop.f32.mrb[41].mxu1  ;;  %v4556_v8 = vpop.f32.mrb[42].mxu0 }
 0x13a   : > { %5381 = vst [vmem:[#allocation6_spill] sm:$0xff] %v4554_v62  ;;  %5382 = vst [vmem:[#allocation7_spill] sm:$0xff] %v4556_v8  ;;  %v4559_v15 = vsel %vm336_vm0, %v1525_v11, 0.0  ;;  %v778_v28 = vsel %vm336_vm0, %v727_v21, 0.0  ;;  %v780_v38 = vsel %vm336_vm0, %v728_v52, 0.0  ;;  %v829_v31 = vmul.f32 %v727_v21, %v727_v21  ;;  %v4563_v17 = vpop.f32.mrb[42].mxu1 }
 0x13b   : > { %5383 = vst [vmem:[#allocation8_spill] sm:$0xff] %v4563_v17  ;;  %v4565_v22 = vpop.f32.mrb[43].mxu0  ;;  %v779_v49 = vadd.f32 %v778_v28, %v777_v56  ;;  %v830_v59 = vmul.f32 %v728_v52, %v728_v52  ;;  %v3523_v25 = vpack.c.bf16 %v4298_v48, %v4298_v48  ;;  %v1421_v30 = vunpack.c.l.bf16 %v1251_v41  ;;  %v4569_v8 = vpop.f32.mrb[43].mxu1 }
 0x13c   : > { %5384 = vst [vmem:[#allocation9_spill] sm:$0xff] %v4569_v8  ;;  %v880_v11 = vsel %vm336_vm0, %v829_v31, 0.0  ;;  %v1422_v62 = vunpack.c.h.bf16 %v1251_v41  ;;  %v1471_v33 = vadd.f32 %v4447_v24, %v1469_v42  ;;  %v1573_v23 = vadd.f32 %v1572_v47, %v1571_v3 }
 0x13d   : > { %v781_v29 = vadd.f32 %v780_v38, %v779_v49  ;;  %v881_v21 = vadd.f32 %v880_v11, %v879_v20  ;;  %v882_v17 = vsel %vm336_vm0, %v830_v59, 0.0  ;;  %1390 = vst.msk [vmem:[%s4074_s5 + $0xd4] sm:$0xf] %vm674_vm1, %v3523_v25  ;;  %v1472_v56 = vsel %vm336_vm0, %v1421_v30, 0.0 }
 0x13e   : > { %v1473_v52 = vadd.f32 %v1472_v56, %v1471_v33  ;;  %v1474_v48 = vsel %vm336_vm0, %v1422_v62, 0.0  ;;  %v1523_v28 = vmul.f32 %v1421_v30, %v1421_v30  ;;  %v1524_v8 = vmul.f32 %v1422_v62, %v1422_v62 }
 0x13f   : > { %v783_v31 = vadd.f32 %v782_v36, %v781_v29  ;;  %v883_v41 = vadd.f32 %v882_v17, %v881_v21  ;;  %v3496_v24 = vpack.c.bf16 %v4327_v7, %v4327_v7  ;;  %v3528_v42 = vpack.c.bf16 %v4333_v13, %v4333_v13  ;;  %v4582_v47 = vpop.f32.mrb[44].mxu0 }
 0x140   : > { %v1475_v3 = vadd.f32 %v1474_v48, %v1473_v52  ;;  %v1574_v33 = vsel %vm336_vm0, %v1523_v28, 0.0  ;;  %v1576_v20 = vsel %vm336_vm0, %v1524_v8, 0.0  ;;  %v3494_v38 = vpack.c.bf16 %v4335_v14, %v4335_v14  ;;  %v4588_v62 = vpop.f32.mrb[44].mxu1  ;;  %v4590_v36 = vpop.f32.mrb[45].mxu0 }
 0x141   : > { %v885_v29 = vadd.f32 %v884_v50, %v883_v41  ;;  %v1575_v17 = vadd.f32 %v1574_v33, %v1573_v23  ;;  %701 = vst.msk [vmem:[%s4074_s5 + $0x68] sm:$0xf] %vm674_vm1, %v3496_v24  ;;  %1395 = vst.msk [vmem:[%s4074_s5 + $0xe8] sm:$0xf] %vm674_vm1, %v3528_v42  ;;  %v3526_v49 = vpack.c.bf16 %v4345_v51, %v4345_v51  ;;  %v4600_v59 = vpop.f32.mrb[45].mxu1  ;;  %v4602_v25 = vpop.f32.mrb[46].mxu0 }
 0x142   : > { %v559_v8 = vpack.c.bf16 %v4347_v19, %v4327_v7  ;;  %v1477_v30 = vadd.f32 %v1476_v45, %v1475_v3  ;;  %699 = vst.msk [vmem:[%s4074_s5 + $0x60] sm:$0xf] %vm674_vm1, %v3494_v38  ;;  %v3497_v23 = vpack.c.bf16 %v4347_v19, %v4347_v19  ;;  %v1254_v50 = vpack.c.bf16 %v4353_v26, %v4333_v13  ;;  %v4612_v21 = vpop.f32.mrb[46].mxu1  ;;  %v4614_v7 = vpop.f32.mrb[47].mxu0 }
 0x143   : > { %v3529_v11 = vpack.c.bf16 %v4353_v26, %v4353_v26  ;;  %v1577_v56 = vadd.f32 %v1576_v20, %v1575_v17  ;;  %1393 = vst.msk [vmem:[%s4074_s5 + $0xe0] sm:$0xf] %vm674_vm1, %v3526_v49  ;;  %v558_v48 = vpack.c.bf16 %v4355_v27, %v4335_v14  ;;  %v4620_v19 = vpop.f32.mrb[47].mxu1  ;;  %v3495_v28 = vpack.c.bf16 %v4355_v27, %v4355_v27 }
 0x144   : > { %v733_v52 = vunpack.c.l.bf16 %v559_v8  ;;  %v734_v45 = vunpack.c.h.bf16 %v559_v8  ;;  %5385 = vst [vmem:[#allocation10_spill] sm:$0xff] %v4620_v19  ;;  %702 = vst.msk [vmem:[%s4074_s5 + $0x6c] sm:$0xf] %vm674_vm1, %v3497_v23  ;;  %v1427_v13 = vunpack.c.l.bf16 %v1254_v50  ;;  %v1428_v26 = vunpack.c.h.bf16 %v1254_v50 }
 0x145   : > { %1396 = vst.msk [vmem:[%s4074_s5 + $0xec] sm:$0xf] %vm674_vm1, %v3529_v11  ;;  %v785_v41 = vadd.f32 %v4533_v63, %v783_v31  ;;  %v886_v24 = vsel %vm336_vm0, %v4535_v57, 0.0  ;;  %v1580_v14 = vsel %vm336_vm0, %v4550_v61, 0.0  ;;  %v1579_v42 = vadd.f32 %v4559_v15, %v1577_v56  ;;  %700 = vst.msk [vmem:[%s4074_s5 + $0x64] sm:$0xf] %vm674_vm1, %v3495_v28 }
 0x146   : > { %v835_v3 = vmul.f32 %v733_v52, %v733_v52  ;;  %v790_v33 = vsel %vm336_vm0, %v733_v52, 0.0  ;;  %v4636_v20 = vsel %vm336_vm0, %v734_v45, 0.0  ;;  %v4638_v38 = vmul.f32 %v734_v45, %v734_v45 }
 0x147   : > { %v1529_v17 = vmul.f32 %v1427_v13, %v1427_v13  ;;  %v1484_v27 = vsel %vm336_vm0, %v1427_v13, 0.0  ;;  %v4644_v63 = vsel %vm336_vm0, %v1428_v26, 0.0  ;;  %v731_v57 = vunpack.c.l.bf16 %v558_v48  ;;  %v4646_v31 = vpop.f32.mrb[48].mxu0 }
 0x148   : > { %v732_v61 = vunpack.c.h.bf16 %v558_v48  ;;  %5386 = vst [vmem:[#allocation11_spill] sm:$0xff] %v4646_v31  ;;  %v892_v15 = vsel %vm336_vm0, %v835_v3, 0.0  ;;  %v4649_v49 = vmul.f32 %v1428_v26, %v1428_v26  ;;  %v887_v8 = vadd.f32 %v886_v24, %v885_v29  ;;  %v4653_v50 = vpop.f32.mrb[48].mxu1  ;;  %v4655_v11 = vpop.f32.mrb[49].mxu0 }
 0x149   : > { %v1253_v23 = vpack.c.bf16 %v4362_v12, %v4345_v51  ;;  %5387 = vst [vmem:[#allocation12_spill] sm:$0xff] %v4653_v50  ;;  %5388 = vst [vmem:[#allocation13_spill] sm:$0xff] %v4655_v11  ;;  %v4658_v56 = vsel %vm336_vm0, %v1529_v17, 0.0  ;;  %v786_v52 = vsel %vm336_vm0, %v731_v57, 0.0  ;;  %v833_v48 = vmul.f32 %v731_v57, %v731_v57  ;;  %v4662_v13 = vpop.f32.mrb[49].mxu1  ;;  %v4664_v26 = vpop.f32.mrb[50].mxu0 }
 0x14a   : > { %v788_v45 = vsel %vm336_vm0, %v732_v61, 0.0  ;;  %5389 = vst [vmem:[#allocation14_spill] sm:$0xff] %v4662_v13  ;;  %5390 = vst [vmem:[#allocation15_spill] sm:$0xff] %v4664_v26  ;;  %v787_v29 = vadd.f32 %v786_v52, %v785_v41  ;;  %v834_v28 = vmul.f32 %v732_v61, %v732_v61  ;;  %v3527_v51 = vpack.c.bf16 %v4362_v12, %v4362_v12  ;;  %v4668_v3 = vpop.f32.mrb[50].mxu1  ;;  %v4670_v17 = vpop.f32.mrb[51].mxu0 }
 0x14b   : > { %v1425_v24 = vunpack.c.l.bf16 %v1253_v23  ;;  %5391 = vst [vmem:[#allocation16_spill] sm:$0xff] %v4670_v17  ;;  %v888_v11 = vsel %vm336_vm0, %v833_v48, 0.0  ;;  %v1426_v50 = vunpack.c.h.bf16 %v1253_v23  ;;  %v1479_v57 = vadd.f32 %v4543_v58, %v1477_v30  ;;  %v4674_v13 = vpop.f32.mrb[51].mxu1 }
 0x14c   : > { %v1581_v31 = vadd.f32 %v1580_v14, %v1579_v42  ;;  %v789_v19 = vadd.f32 %v788_v45, %v787_v29  ;;  %v889_v26 = vadd.f32 %v888_v11, %v887_v8  ;;  %v890_v41 = vsel %vm336_vm0, %v834_v28, 0.0  ;;  %1394 = vst.msk [vmem:[%s4074_s5 + $0xe4] sm:$0xf] %vm674_vm1, %v3527_v51 }
 0x14d   : > { %v1480_v12 = vsel %vm336_vm0, %v1425_v24, 0.0  ;;  %v1482_v52 = vsel %vm336_vm0, %v1426_v50, 0.0  ;;  %v1527_v48 = vmul.f32 %v1425_v24, %v1425_v24  ;;  %v1528_v23 = vmul.f32 %v1426_v50, %v1426_v50 }
 0x14e   : > { %v1481_v61 = vadd.f32 %v1480_v12, %v1479_v57  ;;  %v791_v17 = vadd.f32 %v790_v33, %v789_v19  ;;  %v891_v58 = vadd.f32 %v890_v41, %v889_v26  ;;  %v3500_v30 = vpack.c.bf16 %v4375_v54, %v4375_v54 }
 0x14f   : > { %v3532_v14 = vpack.c.bf16 %v4378_v5, %v4378_v5  ;;  %v1582_v8 = vsel %vm336_vm0, %v1527_v48, 0.0  ;;  %v1584_v11 = vsel %vm336_vm0, %v1528_v23, 0.0  ;;  %v3498_v45 = vpack.c.bf16 %v4380_v53, %v4380_v53  ;;  %v4689_v29 = vpop.f32.mrb[52].mxu0 }
 0x150   : > { %v1483_v42 = vadd.f32 %v1482_v52, %v1481_v61  ;;  %v893_v50 = vadd.f32 %v892_v15, %v891_v58  ;;  %v1583_v19 = vadd.f32 %v1582_v8, %v1581_v31  ;;  %705 = vst.msk [vmem:[%s4074_s5 + $0x78] sm:$0xf] %vm674_vm1, %v3500_v30  ;;  %v3530_v33 = vpack.c.bf16 %v4386_v10, %v4386_v10  ;;  %v4699_v28 = vpop.f32.mrb[52].mxu1  ;;  %v4701_v51 = vpop.f32.mrb[53].mxu0 }
 0x151   : > { %1399 = vst.msk [vmem:[%s4074_s5 + $0xf8] sm:$0xf] %vm674_vm1, %v3532_v14  ;;  %v561_v26 = vpack.c.bf16 %v4388_v16, %v4375_v54  ;;  %703 = vst.msk [vmem:[%s4074_s5 + $0x70] sm:$0xf] %vm674_vm1, %v3498_v45  ;;  %v3501_v31 = vpack.c.bf16 %v4388_v16, %v4388_v16  ;;  %v1256_v15 = vpack.c.bf16 %v4394_v39, %v4378_v5  ;;  %v4711_v41 = vpop.f32.mrb[53].mxu1  ;;  %v4713_v54 = vpop.f32.mrb[54].mxu0 }
 0x152   : > { %v1485_v24 = vadd.f32 %v1484_v27, %v1483_v42  ;;  %v3533_v57 = vpack.c.bf16 %v4394_v39, %v4394_v39  ;;  %v1585_v12 = vadd.f32 %v1584_v11, %v1583_v19  ;;  %1397 = vst.msk [vmem:[%s4074_s5 + $0xf0] sm:$0xf] %vm674_vm1, %v3530_v33  ;;  %v560_v52 = vpack.c.bf16 %v4396_v40, %v4380_v53  ;;  %v4719_v48 = vpop.f32.mrb[54].mxu1  ;;  %v4721_v16 = vpop.f32.mrb[55].mxu0 }
 0x153   : > { %v737_v61 = vunpack.c.l.bf16 %v561_v26  ;;  %v738_v27 = vunpack.c.h.bf16 %v561_v26  ;;  %706 = vst.msk [vmem:[%s4074_s5 + $0x7c] sm:$0xf] %vm674_vm1, %v3501_v31  ;;  %v1431_v5 = vunpack.c.l.bf16 %v1256_v15  ;;  %v1432_v39 = vunpack.c.h.bf16 %v1256_v15  ;;  %v4730_v30 = vpop.f32.mrb[55].mxu1 }
 0x154   : > { %1400 = vst.msk [vmem:[%s4074_s5 + $0xfc] sm:$0xf] %vm674_vm1, %v3533_v57  ;;  %v3499_v23 = vpack.c.bf16 %v4396_v40, %v4396_v40  ;;  %v793_v58 = vadd.f32 %v4636_v20, %v791_v17  ;;  %5392 = vst [vmem:[#allocation17_spill] sm:$0xff] %v4730_v30  ;;  %v894_v53 = vsel %vm336_vm0, %v4638_v38, 0.0  ;;  %v1588_v14 = vsel %vm336_vm0, %v4649_v49, 0.0 }
 0x155   : > { %v1587_v42 = vadd.f32 %v4658_v56, %v1585_v12  ;;  %v839_v8 = vmul.f32 %v737_v61, %v737_v61  ;;  %v798_v11 = vsel %vm336_vm0, %v737_v61, 0.0  ;;  %v800_v45 = vsel %vm336_vm0, %v738_v27, 0.0 }
 0x156   : > { %v840_v19 = vmul.f32 %v738_v27, %v738_v27  ;;  %v1492_v40 = vsel %vm336_vm0, %v1431_v5, 0.0  ;;  %704 = vst.msk [vmem:[%s4074_s5 + $0x74] sm:$0xf] %vm674_vm1, %v3499_v23  ;;  %v4743_v20 = vsel %vm336_vm0, %v1432_v39, 0.0  ;;  %v4745_v17 = vmul.f32 %v1431_v5, %v1431_v5 }
 0x157   : > { %v735_v38 = vunpack.c.l.bf16 %v560_v52  ;;  %v736_v33 = vunpack.c.h.bf16 %v560_v52  ;;  %v900_v49 = vsel %vm336_vm0, %v839_v8, 0.0  ;;  %v4748_v56 = vmul.f32 %v1432_v39, %v1432_v39  ;;  %v4752_v15 = vpop.f32.mrb[56].mxu0 }
 0x158   : > { %v895_v26 = vadd.f32 %v894_v53, %v893_v50  ;;  %v1255_v31 = vpack.c.bf16 %v4406_v55, %v4386_v10  ;;  %5393 = vst [vmem:[#allocation18_spill] sm:$0xff] %v4752_v15  ;;  %v902_v57 = vsel %vm336_vm0, %v840_v19, 0.0  ;;  %v4757_v5 = vpop.f32.mrb[56].mxu1  ;;  %v4759_v52 = vpop.f32.mrb[57].mxu0  ;;  %v3531_v50 = vpack.c.bf16 %v4406_v55, %v4406_v55 }
 0x159   : > { %v794_v12 = vsel %vm336_vm0, %v735_v38, 0.0  ;;  %v796_v61 = vsel %vm336_vm0, %v736_v33, 0.0  ;;  %v837_v27 = vmul.f32 %v735_v38, %v735_v38  ;;  %5394 = vst [vmem:[#allocation19_spill] sm:$0xff] %v4757_v5  ;;  %5395 = vst [vmem:[#allocation20_spill] sm:$0xff] %v4759_v52  ;;  %v838_v23 = vmul.f32 %v736_v33, %v736_v33  ;;  %v4763_v53 = vpop.f32.mrb[57].mxu1  ;;  %v4765_v8 = vpop.f32.mrb[58].mxu0 }
 0x15a   : > { %v795_v39 = vadd.f32 %v794_v12, %v793_v58  ;;  %v1429_v10 = vunpack.c.l.bf16 %v1255_v31  ;;  %5396 = vst [vmem:[#allocation21_spill] sm:$0xff] %v4763_v53  ;;  %v1430_v15 = vunpack.c.h.bf16 %v1255_v31  ;;  %v1487_v38 = vadd.f32 %v4644_v63, %v1485_v24  ;;  %v4769_v5 = vpop.f32.mrb[58].mxu1  ;;  %v4771_v52 = vpop.f32.mrb[59].mxu0  ;;  %1398 = vst.msk [vmem:[%s4074_s5 + $0xf4] sm:$0xf] %vm674_vm1, %v3531_v50 }
 0x15b   : > { %v896_v19 = vsel %vm336_vm0, %v837_v27, 0.0  ;;  %v1589_v30 = vadd.f32 %v1588_v14, %v1587_v42  ;;  %v898_v12 = vsel %vm336_vm0, %v838_v23, 0.0  ;;  %v4777_v53 = vpop.f32.mrb[59].mxu1 }
 0x15c   : > { %v797_v58 = vadd.f32 %v796_v61, %v795_v39  ;;  %v897_v33 = vadd.f32 %v896_v19, %v895_v26  ;;  %v1488_v55 = vsel %vm336_vm0, %v1429_v10, 0.0  ;;  %v1490_v63 = vsel %vm336_vm0, %v1430_v15, 0.0 }
 0x15d   : > { %v1489_v27 = vadd.f32 %v1488_v55, %v1487_v38  ;;  %v1531_v24 = vmul.f32 %v1429_v10, %v1429_v10  ;;  %v1532_v14 = vmul.f32 %v1430_v15, %v1430_v15  ;;  %v3536_v26 = vpack.c.bf16 %v4431_v1, %v4431_v1 }
 0x15e   : > { %v799_v42 = vadd.f32 %v798_v11, %v797_v58  ;;  %v899_v31 = vadd.f32 %v898_v12, %v897_v33  ;;  %v3568_v61 = vpack.c.bf16 %v4441_v6, %v4441_v6  ;;  %v3534_v19 = vpack.c.bf16 %v4443_v34, %v4443_v34 }
 0x15f   : > { %v1491_v39 = vadd.f32 %v1490_v63, %v1489_v27  ;;  %v1590_v23 = vsel %vm336_vm0, %v1531_v24, 0.0  ;;  %v1592_v50 = vsel %vm336_vm0, %v1532_v14, 0.0  ;;  %2065 = vst.msk [vmem:[%s4074_s5 + $0x108] sm:$0xf] %vm674_vm1, %v3536_v26  ;;  %v3566_v15 = vpack.c.bf16 %v4449_v60, %v4449_v60  ;;  %v4794_v58 = vpop.f32.mrb[60].mxu0 }
 0x160   : > { %v801_v38 = vadd.f32 %v800_v45, %v799_v42  ;;  %v901_v10 = vadd.f32 %v900_v49, %v899_v31  ;;  %v1591_v11 = vadd.f32 %v1590_v23, %v1589_v30  ;;  %2759 = vst.msk [vmem:[%s4074_s5 + $0x188] sm:$0xf] %vm674_vm1, %v3568_v61  ;;  %2063 = vst.msk [vmem:[%s4074_s5 + $0x100] sm:$0xf] %vm674_vm1, %v3534_v19  ;;  %v4804_v49 = vpop.f32.mrb[60].mxu1  ;;  %v4806_v55 = vpop.f32.mrb[61].mxu0 }
 0x161   : > { %v1493_v33 = vadd.f32 %v1492_v40, %v1491_v39  ;;  %v1936_v12 = vpack.c.bf16 %v4451_v9, %v4431_v1  ;;  %v3537_v45 = vpack.c.bf16 %v4451_v9, %v4451_v9  ;;  %v2630_v30 = vpack.c.bf16 %v4458_v44, %v4441_v6  ;;  %5397 = vst [vmem:[#allocation22_spill] sm:$0xff] %v4806_v55  ;;  %v4812_v1 = vpop.f32.mrb[61].mxu1  ;;  %v4814_v14 = vpop.f32.mrb[62].mxu0 }
 0x162   : > { %v802_v27 = vrot.slane %v801_v38, 4  ;;  %v903_v63 = vadd.f32 %v902_v57, %v901_v10  ;;  %v1593_v40 = vadd.f32 %v1592_v50, %v1591_v11  ;;  %2757 = vst.msk [vmem:[%s4074_s5 + $0x180] sm:$0xf] %vm674_vm1, %v3566_v15  ;;  %v3569_v24 = vpack.c.bf16 %v4458_v44, %v4458_v44  ;;  %5398 = vst [vmem:[#allocation23_spill] sm:$0xff] %v4812_v1  ;;  %v4821_v31 = vpop.f32.mrb[62].mxu1  ;;  %v4823_v26 = vpop.f32.mrb[63].mxu0 }
 0x163   : > { %5399 = vst [vmem:[#allocation24_spill] sm:$0xff] %v4814_v14  ;;  %v1594_v6 = vsel %vm336_vm0, %v4745_v17, 0.0  ;;  %v1495_v9 = vadd.f32 %v4743_v20, %v1493_v33  ;;  %2066 = vst.msk [vmem:[%s4074_s5 + $0x10c] sm:$0xf] %vm674_vm1, %v3537_v45  ;;  %v2097_v42 = vunpack.c.l.bf16 %v1936_v12  ;;  %v2098_v57 = vunpack.c.h.bf16 %v1936_v12  ;;  %v4827_v23 = vpop.f32.mrb[63].mxu1 }
 0x164   : > { %5400 = vst [vmem:[#allocation25_spill] sm:$0xff] %v4821_v31  ;;  %5401 = vst [vmem:[#allocation26_spill] sm:$0xff] %v4823_v26  ;;  %v803_v61 = vadd.f32 %v802_v27, %v801_v38  ;;  %v904_v39 = vrot.slane %v903_v63, 4  ;;  %v1595_v44 = vadd.f32 %v1594_v6, %v1593_v40  ;;  %v1596_v17 = vsel %vm336_vm0, %v4748_v56, 0.0 }
 0x165   : > { %2760 = vst.msk [vmem:[%s4074_s5 + $0x18c] sm:$0xf] %vm674_vm1, %v3569_v24  ;;  %5402 = vst [vmem:[#allocation27_spill] sm:$0xff] %v4827_v23  ;;  %v1496_v50 = vrot.slane %v1495_v9, 4  ;;  %v2199_v20 = vmul.f32 %v2097_v42, %v2097_v42  ;;  %v2791_v19 = vunpack.c.l.bf16 %v2630_v30  ;;  %v4831_v33 = vunpack.c.h.bf16 %v2630_v30 }
 0x166   : > { %v804_v10 = vrot.slane %v803_v61, 2  ;;  %v905_v11 = vadd.f32 %v904_v39, %v903_v63  ;;  %v1597_v15 = vadd.f32 %v1596_v17, %v1595_v44  ;;  %v2130_v38 = vsel %vm336_vm0, %v2097_v42, 0.0 }
 0x167   : > { %v1497_v12 = vadd.f32 %v1496_v50, %v1495_v9  ;;  %v4835_v45 = vsel %vm336_vm0, %v2098_v57, 0.0  ;;  %v4837_v27 = vmul.f32 %v2098_v57, %v2098_v57  ;;  %v2232_v56 = vsel %vm336_vm0, %v2199_v20, 0.0 }
 0x168   : > { %v805_v40 = vadd.f32 %v804_v10, %v803_v61  ;;  %v906_v24 = vrot.slane %v905_v11, 2  ;;  %v1598_v6 = vrot.slane %v1597_v15, 4  ;;  %v2824_v63 = vsel %vm336_vm0, %v2791_v19, 0.0 }
 0x169   : > { %v1498_v23 = vrot.slane %v1497_v12, 2  ;;  %v2893_v39 = vmul.f32 %v2791_v19, %v2791_v19  ;;  %v1935_v30 = vpack.c.bf16 %v4460_v46, %v4443_v34  ;;  %v3535_v57 = vpack.c.bf16 %v4460_v46, %v4460_v46  ;;  %v5403_v46 = vld [vmem:[#allocation2_spill] sm:$0xff] }
 0x16a   : > { %v806_v9 = vrot.slane %v805_v40, 1  ;;  %v907_v42 = vadd.f32 %v906_v24, %v905_v11  ;;  %v1599_v44 = vadd.f32 %v1598_v6, %v1597_v15  ;;  %v4847_v61 = vmul.f32 %v4831_v33, %v4831_v33 }
 0x16b   : > { %v1499_v17 = vadd.f32 %v1498_v23, %v1497_v12  ;;  %v2926_v50 = vsel %vm336_vm0, %v2893_v39, 0.0  ;;  %v2095_v20 = vunpack.c.l.bf16 %v1935_v30  ;;  %2064 = vst.msk [vmem:[%s4074_s5 + $0x104] sm:$0xf] %vm674_vm1, %v3535_v57  ;;  %v2096_v34 = vunpack.c.h.bf16 %v1935_v30 }
 0x16c   : > { %v807_v10 = vadd.f32 %v806_v9, %v805_v40  ;;  %v908_v26 = vrot.slane %v907_v42, 1  ;;  %v1600_v19 = vrot.slane %v1599_v44, 2  ;;  %v2629_v23 = vpack.c.bf16 %v5403_v46, %v4449_v60 }
 0x16d   : > { %v1500_v31 = vrot.slane %v1499_v17, 1  ;;  %v2127_v11 = vsel %vm336_vm0, %v2095_v20, 0.0  ;;  %v2197_v15 = vmul.f32 %v2095_v20, %v2095_v20  ;;  %v2128_v6 = vsel %vm336_vm0, %v2096_v34, 0.0 }
 0x16e   : > { %v909_v12 = vadd.f32 %v908_v26, %v907_v42  ;;  %v1601_v24 = vadd.f32 %v1600_v19, %v1599_v44  ;;  %v2198_v39 = vmul.f32 %v2096_v34, %v2096_v34  ;;  %v2129_v40 = vadd.f32 %v2128_v6, %v2127_v11 }
 0x16f   : > { %v1501_v14 = vadd.f32 %v1500_v31, %v1499_v17  ;;  %v2229_v9 = vsel %vm336_vm0, %v2197_v15, 0.0  ;;  %v3567_v30 = vpack.c.bf16 %v5403_v46, %v5403_v46  ;;  %v2789_v1 = vunpack.c.l.bf16 %v2629_v23 }
 0x170   : > { %v1602_v57 = vrot.slane %v1601_v24, 1  ;;  %v2230_v20 = vsel %vm336_vm0, %v2198_v39, 0.0  ;;  %v2790_v55 = vunpack.c.h.bf16 %v2629_v23  ;;  %v2131_v26 = vadd.f32 %v2130_v38, %v2129_v40 }
 0x171   : > { %v4860_v60 = vadd.f32 %v1501_v14, %v807_v10  ;;  %v2231_v42 = vadd.f32 %v2230_v20, %v2229_v9  ;;  %2758 = vst.msk [vmem:[%s4074_s5 + $0x184] sm:$0xf] %vm674_vm1, %v3567_v30  ;;  %v3540_v31 = vpack.c.bf16 %v4476_v0, %v4476_v0  ;;  %v2821_v17 = vsel %vm336_vm0, %v2789_v1, 0.0 }
 0x172   : > { %v1603_v44 = vadd.f32 %v1602_v57, %v1601_v24  ;;  %v2822_v19 = vsel %vm336_vm0, %v2790_v55, 0.0  ;;  %v2891_v34 = vmul.f32 %v2789_v1, %v2789_v1  ;;  %v2892_v14 = vmul.f32 %v2790_v55, %v2790_v55 }
 0x173   : > { %v2233_v11 = vadd.f32 %v2232_v56, %v2231_v42  ;;  %v2823_v15 = vadd.f32 %v2822_v19, %v2821_v17  ;;  %2069 = vst.msk [vmem:[%s4074_s5 + $0x118] sm:$0xf] %vm674_vm1, %v3540_v31  ;;  %v3572_v38 = vpack.c.bf16 %v4482_v4, %v4482_v4  ;;  %v3538_v23 = vpack.c.bf16 %v4484_v35, %v4484_v35 }
 0x174   : > { %v4872_v10 = vadd.f32 %v1603_v44, %v909_v12  ;;  %v2923_v46 = vsel %vm336_vm0, %v2891_v34, 0.0  ;;  %v3570_v1 = vpack.c.bf16 %v4490_v2, %v4490_v2  ;;  %v2924_v24 = vsel %vm336_vm0, %v2892_v14, 0.0 }
 0x175   : > { %v2825_v56 = vadd.f32 %v2824_v63, %v2823_v15  ;;  %2763 = vst.msk [vmem:[%s4074_s5 + $0x198] sm:$0xf] %vm674_vm1, %v3572_v38  ;;  %v1938_v55 = vpack.c.bf16 %v4492_v18, %v4476_v0  ;;  %v3541_v12 = vpack.c.bf16 %v4492_v18, %v4492_v18  ;;  %v2925_v6 = vadd.f32 %v2924_v24, %v2923_v46 }
 0x176   : > { %2067 = vst.msk [vmem:[%s4074_s5 + $0x110] sm:$0xf] %vm674_vm1, %v3538_v23  ;;  %2761 = vst.msk [vmem:[%s4074_s5 + $0x190] sm:$0xf] %vm674_vm1, %v3570_v1  ;;  %v2632_v63 = vpack.c.bf16 %v4502_v37, %v4482_v4  ;;  %v3573_v39 = vpack.c.bf16 %v4502_v37, %v4502_v37  ;;  %v1937_v40 = vpack.c.bf16 %v4504_v43, %v4484_v35  ;;  %v2826_v35 = vsel %vm336_vm0, %v4831_v33, 0.0 }
 0x177   : > { %2070 = vst.msk [vmem:[%s4074_s5 + $0x11c] sm:$0xf] %vm674_vm1, %v3541_v12  ;;  %v2101_v0 = vunpack.c.l.bf16 %v1938_v55  ;;  %v4898_v9 = vunpack.c.h.bf16 %v1938_v55  ;;  %v3539_v18 = vpack.c.bf16 %v4504_v43, %v4504_v43  ;;  %v2133_v30 = vadd.f32 %v4835_v45, %v2131_v26 }
 0x178   : > { %v2927_v57 = vadd.f32 %v2926_v50, %v2925_v6  ;;  %2764 = vst.msk [vmem:[%s4074_s5 + $0x19c] sm:$0xf] %vm674_vm1, %v3573_v39  ;;  %v2795_v4 = vunpack.c.l.bf16 %v2632_v63  ;;  %v4905_v20 = vunpack.c.h.bf16 %v2632_v63  ;;  %v2099_v37 = vunpack.c.l.bf16 %v1937_v40 }
 0x179   : > { %v2203_v42 = vmul.f32 %v2101_v0, %v2101_v0  ;;  %2068 = vst.msk [vmem:[%s4074_s5 + $0x114] sm:$0xf] %vm674_vm1, %v3539_v18  ;;  %v2234_v31 = vsel %vm336_vm0, %v4837_v27, 0.0  ;;  %v2928_v43 = vsel %vm336_vm0, %v4847_v61, 0.0  ;;  %v2138_v45 = vsel %vm336_vm0, %v2101_v0, 0.0  ;;  %v5404_v0 = vld [vmem:[#allocation3_spill] sm:$0xff] }
 0x17a   : > { %v2204_v50 = vmul.f32 %v4898_v9, %v4898_v9  ;;  %v2832_v26 = vsel %vm336_vm0, %v2795_v4, 0.0  ;;  %v2897_v44 = vmul.f32 %v2795_v4, %v2795_v4  ;;  %v2100_v17 = vunpack.c.h.bf16 %v1937_v40  ;;  %v5405_v18 = vld [vmem:[#allocation4_spill] sm:$0xff] }
 0x17b   : > { %v2134_v33 = vsel %vm336_vm0, %v2099_v37, 0.0  ;;  %v2240_v19 = vsel %vm336_vm0, %v2203_v42, 0.0  ;;  %v2898_v34 = vmul.f32 %v4905_v20, %v4905_v20  ;;  %v2201_v15 = vmul.f32 %v2099_v37, %v2099_v37 }
 0x17c   : > { %v2135_v27 = vadd.f32 %v2134_v33, %v2133_v30  ;;  %v2136_v61 = vsel %vm336_vm0, %v2100_v17, 0.0  ;;  %v2202_v14 = vmul.f32 %v2100_v17, %v2100_v17  ;;  %v2235_v38 = vadd.f32 %v2234_v31, %v2233_v11 }
 0x17d   : > { %v2631_v46 = vpack.c.bf16 %v4514_v32, %v4490_v2  ;;  %v2236_v1 = vsel %vm336_vm0, %v2201_v15, 0.0  ;;  %v3571_v24 = vpack.c.bf16 %v4514_v32, %v4514_v32  ;;  %v2827_v55 = vadd.f32 %v2826_v35, %v2825_v56 }
 0x17e   : > { %v2137_v23 = vadd.f32 %v2136_v61, %v2135_v27  ;;  %v2237_v12 = vadd.f32 %v2236_v1, %v2235_v38  ;;  %v2238_v6 = vsel %vm336_vm0, %v2202_v14, 0.0  ;;  %v2929_v11 = vadd.f32 %v2928_v43, %v2927_v57  ;;  %v5406_v57 = vld [vmem:[#allocation5_spill] sm:$0xff]  ;;  %v5407_v43 = vld [vmem:[#allocation6_spill] sm:$0xff]  ;;  %v5408_v27 = vld [vmem:[#allocation7_spill] sm:$0xff] }
 0x17f   : > { %v2793_v63 = vunpack.c.l.bf16 %v2631_v46  ;;  %v2794_v39 = vunpack.c.h.bf16 %v2631_v46  ;;  %2762 = vst.msk [vmem:[%s4074_s5 + $0x194] sm:$0xf] %vm674_vm1, %v3571_v24  ;;  %v3544_v2 = vpack.c.bf16 %v5404_v0, %v5404_v0  ;;  %v3576_v30 = vpack.c.bf16 %v5405_v18, %v5405_v18 }
 0x180   : > { %v2139_v40 = vadd.f32 %v2138_v45, %v2137_v23  ;;  %v2239_v4 = vadd.f32 %v2238_v6, %v2237_v12  ;;  %v3542_v31 = vpack.c.bf16 %v5406_v57, %v5406_v57  ;;  %v3574_v45 = vpack.c.bf16 %v5407_v43, %v5407_v43  ;;  %v5409_v23 = vld [vmem:[#allocation8_spill] sm:$0xff] }
 0x181   : > { %v2828_v32 = vsel %vm336_vm0, %v2793_v63, 0.0  ;;  %v2830_v56 = vsel %vm336_vm0, %v2794_v39, 0.0  ;;  %v2895_v37 = vmul.f32 %v2793_v63, %v2793_v63  ;;  %v2896_v42 = vmul.f32 %v2794_v39, %v2794_v39  ;;  %2073 = vst.msk [vmem:[%s4074_s5 + $0x128] sm:$0xf] %vm674_vm1, %v3544_v2  ;;  %2767 = vst.msk [vmem:[%s4074_s5 + $0x1a8] sm:$0xf] %vm674_vm1, %v3576_v30 }
 0x182   : > { %v2829_v35 = vadd.f32 %v2828_v32, %v2827_v55  ;;  %v2241_v17 = vadd.f32 %v2240_v19, %v2239_v4  ;;  %v1940_v15 = vpack.c.bf16 %v5408_v27, %v5404_v0  ;;  %v3545_v61 = vpack.c.bf16 %v5408_v27, %v5408_v27  ;;  %2071 = vst.msk [vmem:[%s4074_s5 + $0x120] sm:$0xf] %vm674_vm1, %v3542_v31 }
 0x183   : > { %v2930_v33 = vsel %vm336_vm0, %v2895_v37, 0.0  ;;  %v2932_v46 = vsel %vm336_vm0, %v2896_v42, 0.0  ;;  %2765 = vst.msk [vmem:[%s4074_s5 + $0x1a0] sm:$0xf] %vm674_vm1, %v3574_v45  ;;  %v2634_v19 = vpack.c.bf16 %v5409_v23, %v5405_v18  ;;  %v3577_v55 = vpack.c.bf16 %v5409_v23, %v5409_v23  ;;  %v5410_v45 = vld [vmem:[#allocation9_spill] sm:$0xff] }
 0x184   : > { %v2831_v14 = vadd.f32 %v2830_v56, %v2829_v35  ;;  %v2931_v38 = vadd.f32 %v2930_v33, %v2929_v11  ;;  %2074 = vst.msk [vmem:[%s4074_s5 + $0x12c] sm:$0xf] %vm674_vm1, %v3545_v61  ;;  %v2105_v1 = vunpack.c.l.bf16 %v1940_v15  ;;  %v4960_v24 = vunpack.c.h.bf16 %v1940_v15 }
 0x185   : > { %v1939_v12 = vpack.c.bf16 %v4565_v22, %v5406_v57  ;;  %v2140_v6 = vsel %vm336_vm0, %v4898_v9, 0.0  ;;  %v2799_v11 = vunpack.c.l.bf16 %v2634_v19  ;;  %v2834_v0 = vsel %vm336_vm0, %v4905_v20, 0.0  ;;  %2768 = vst.msk [vmem:[%s4074_s5 + $0x1ac] sm:$0xf] %vm674_vm1, %v3577_v55 }
 0x186   : > { %v2833_v63 = vadd.f32 %v2832_v26, %v2831_v14  ;;  %v2933_v39 = vadd.f32 %v2932_v46, %v2931_v38  ;;  %v2934_v2 = vsel %vm336_vm0, %v2897_v44, 0.0  ;;  %v2207_v18 = vmul.f32 %v2105_v1, %v2105_v1 }
 0x187   : > { %v4973_v30 = vunpack.c.h.bf16 %v2634_v19  ;;  %v2242_v4 = vsel %vm336_vm0, %v2204_v50, 0.0  ;;  %v2936_v32 = vsel %vm336_vm0, %v2898_v34, 0.0  ;;  %v2146_v9 = vsel %vm336_vm0, %v2105_v1, 0.0 }
 0x188   : > { %v2935_v56 = vadd.f32 %v2934_v2, %v2933_v39  ;;  %v4980_v26 = vmul.f32 %v4960_v24, %v4960_v24  ;;  %v2840_v20 = vsel %vm336_vm0, %v2799_v11, 0.0  ;;  %v2901_v44 = vmul.f32 %v2799_v11, %v2799_v11 }
 0x189   : > { %v3543_v37 = vpack.c.bf16 %v4565_v22, %v4565_v22  ;;  %v2248_v35 = vsel %vm336_vm0, %v2207_v18, 0.0  ;;  %v2103_v42 = vunpack.c.l.bf16 %v1939_v12  ;;  %v2104_v50 = vunpack.c.h.bf16 %v1939_v12 }
 0x18a   : > { %v2141_v57 = vadd.f32 %v2140_v6, %v2139_v40  ;;  %v2902_v34 = vmul.f32 %v4973_v30, %v4973_v30  ;;  %v2243_v31 = vadd.f32 %v2242_v4, %v2241_v17  ;;  %v2633_v33 = vpack.c.bf16 %v5410_v45, %v5407_v43 }
 0x18b   : > { %2072 = vst.msk [vmem:[%s4074_s5 + $0x124] sm:$0xf] %vm674_vm1, %v3543_v37  ;;  %v3575_v27 = vpack.c.bf16 %v5410_v45, %v5410_v45  ;;  %v2142_v15 = vsel %vm336_vm0, %v2103_v42, 0.0  ;;  %v2144_v22 = vsel %vm336_vm0, %v2104_v50, 0.0  ;;  %v2205_v61 = vmul.f32 %v2103_v42, %v2103_v42 }
 0x18c   : > { %v2206_v14 = vmul.f32 %v2104_v50, %v2104_v50  ;;  %v2143_v38 = vadd.f32 %v2142_v15, %v2141_v57  ;;  %v2797_v40 = vunpack.c.l.bf16 %v2633_v33  ;;  %v2798_v46 = vunpack.c.h.bf16 %v2633_v33 }
 0x18d   : > { %2766 = vst.msk [vmem:[%s4074_s5 + $0x1a4] sm:$0xf] %vm674_vm1, %v3575_v27  ;;  %v2835_v23 = vadd.f32 %v2834_v0, %v2833_v63  ;;  %v2244_v17 = vsel %vm336_vm0, %v2205_v61, 0.0  ;;  %v2937_v19 = vadd.f32 %v2936_v32, %v2935_v56  ;;  %v3548_v1 = vpack.c.bf16 %v4582_v47, %v4582_v47 }
 0x18e   : > { %v2246_v43 = vsel %vm336_vm0, %v2206_v14, 0.0  ;;  %v2145_v55 = vadd.f32 %v2144_v22, %v2143_v38  ;;  %v2245_v12 = vadd.f32 %v2244_v17, %v2243_v31  ;;  %v2836_v6 = vsel %vm336_vm0, %v2797_v40, 0.0 }
 0x18f   : > { %v2838_v39 = vsel %vm336_vm0, %v2798_v46, 0.0  ;;  %v2837_v11 = vadd.f32 %v2836_v6, %v2835_v23  ;;  %v2899_v2 = vmul.f32 %v2797_v40, %v2797_v40  ;;  %v2900_v63 = vmul.f32 %v2798_v46, %v2798_v46  ;;  %2077 = vst.msk [vmem:[%s4074_s5 + $0x138] sm:$0xf] %vm674_vm1, %v3548_v1 }
 0x190   : > { %v3580_v0 = vpack.c.bf16 %v4588_v62, %v4588_v62  ;;  %v2147_v18 = vadd.f32 %v2146_v9, %v2145_v55  ;;  %v2247_v4 = vadd.f32 %v2246_v43, %v2245_v12  ;;  %v3546_v32 = vpack.c.bf16 %v4590_v36, %v4590_v36  ;;  %v5411_v12 = vld [vmem:[#allocation10_spill] sm:$0xff] }
 0x191   : > { %v3578_v56 = vpack.c.bf16 %v4600_v59, %v4600_v59  ;;  %v2839_v37 = vadd.f32 %v2838_v39, %v2837_v11  ;;  %v2938_v42 = vsel %vm336_vm0, %v2899_v2, 0.0  ;;  %v2940_v50 = vsel %vm336_vm0, %v2900_v63, 0.0 }
 0x192   : > { %2771 = vst.msk [vmem:[%s4074_s5 + $0x1b8] sm:$0xf] %vm674_vm1, %v3580_v0  ;;  %v1942_v57 = vpack.c.bf16 %v4602_v25, %v4582_v47  ;;  %v2249_v31 = vadd.f32 %v2248_v35, %v2247_v4  ;;  %v2939_v9 = vadd.f32 %v2938_v42, %v2937_v19  ;;  %2075 = vst.msk [vmem:[%s4074_s5 + $0x130] sm:$0xf] %vm674_vm1, %v3546_v32  ;;  %v2148_v35 = vsel %vm336_vm0, %v4960_v24, 0.0  ;;  %v5412_v42 = vld [vmem:[#allocation11_spill] sm:$0xff] }
 0x193   : > { %2769 = vst.msk [vmem:[%s4074_s5 + $0x1b0] sm:$0xf] %vm674_vm1, %v3578_v56  ;;  %v3549_v45 = vpack.c.bf16 %v4602_v25, %v4602_v25  ;;  %v2636_v33 = vpack.c.bf16 %v4612_v21, %v4588_v62  ;;  %v2841_v27 = vadd.f32 %v2840_v20, %v2839_v37  ;;  %v3581_v47 = vpack.c.bf16 %v4612_v21, %v4612_v21 }
 0x194   : > { %v2109_v15 = vunpack.c.l.bf16 %v1942_v57  ;;  %v5026_v22 = vunpack.c.h.bf16 %v1942_v57  ;;  %v2941_v61 = vadd.f32 %v2940_v50, %v2939_v9  ;;  %v1941_v25 = vpack.c.bf16 %v4614_v7, %v4590_v36 }
 0x195   : > { %2078 = vst.msk [vmem:[%s4074_s5 + $0x13c] sm:$0xf] %vm674_vm1, %v3549_v45  ;;  %v2803_v14 = vunpack.c.l.bf16 %v2636_v33  ;;  %v2842_v62 = vsel %vm336_vm0, %v4973_v30, 0.0  ;;  %v2942_v20 = vsel %vm336_vm0, %v2901_v44, 0.0  ;;  %2772 = vst.msk [vmem:[%s4074_s5 + $0x1bc] sm:$0xf] %vm674_vm1, %v3581_v47  ;;  %v5041_v21 = vunpack.c.h.bf16 %v2636_v33 }
 0x196   : > { %v2211_v38 = vmul.f32 %v2109_v15, %v2109_v15  ;;  %v2250_v24 = vsel %vm336_vm0, %v4980_v26, 0.0  ;;  %v2944_v40 = vsel %vm336_vm0, %v2902_v34, 0.0  ;;  %v2943_v46 = vadd.f32 %v2942_v20, %v2941_v61  ;;  %v5413_v47 = vld [vmem:[#allocation12_spill] sm:$0xff]  ;;  %v5415_v20 = vld [vmem:[#allocation14_spill] sm:$0xff] }
 0x197   : > { %v2154_v23 = vsel %vm336_vm0, %v2109_v15, 0.0  ;;  %v5049_v36 = vmul.f32 %v5026_v22, %v5026_v22  ;;  %v2848_v30 = vsel %vm336_vm0, %v2803_v14, 0.0  ;;  %v2905_v44 = vmul.f32 %v2803_v14, %v2803_v14 }
 0x198   : > { %v3547_v17 = vpack.c.bf16 %v4614_v7, %v4614_v7  ;;  %v2256_v43 = vsel %vm336_vm0, %v2211_v38, 0.0  ;;  %v2107_v19 = vunpack.c.l.bf16 %v1941_v25  ;;  %v2108_v26 = vunpack.c.h.bf16 %v1941_v25  ;;  %v5414_v25 = vld [vmem:[#allocation13_spill] sm:$0xff] }
 0x199   : > { %v2149_v1 = vadd.f32 %v2148_v35, %v2147_v18  ;;  %v2906_v34 = vmul.f32 %v5041_v21, %v5041_v21  ;;  %v2251_v55 = vadd.f32 %v2250_v24, %v2249_v31  ;;  %v2635_v6 = vpack.c.bf16 %v5411_v12, %v4600_v59 }
 0x19a   : > { %2076 = vst.msk [vmem:[%s4074_s5 + $0x134] sm:$0xf] %vm674_vm1, %v3547_v17  ;;  %v3579_v39 = vpack.c.bf16 %v5411_v12, %v5411_v12  ;;  %v2150_v11 = vsel %vm336_vm0, %v2107_v19, 0.0  ;;  %v2152_v7 = vsel %vm336_vm0, %v2108_v26, 0.0  ;;  %v2209_v2 = vmul.f32 %v2107_v19, %v2107_v19  ;;  %v5416_v17 = vld [vmem:[#allocation15_spill] sm:$0xff] }
 0x19b   : > { %v2210_v63 = vmul.f32 %v2108_v26, %v2108_v26  ;;  %v2151_v0 = vadd.f32 %v2150_v11, %v2149_v1  ;;  %v2801_v18 = vunpack.c.l.bf16 %v2635_v6  ;;  %v2802_v4 = vunpack.c.h.bf16 %v2635_v6 }
 0x19c   : > { %2770 = vst.msk [vmem:[%s4074_s5 + $0x1b4] sm:$0xf] %vm674_vm1, %v3579_v39  ;;  %v2843_v32 = vadd.f32 %v2842_v62, %v2841_v27  ;;  %v2252_v56 = vsel %vm336_vm0, %v2209_v2, 0.0  ;;  %v2945_v37 = vadd.f32 %v2944_v40, %v2943_v46  ;;  %v3552_v50 = vpack.c.bf16 %v5412_v42, %v5412_v42 }
 0x19d   : > { %v2254_v59 = vsel %vm336_vm0, %v2210_v63, 0.0  ;;  %v2153_v57 = vadd.f32 %v2152_v7, %v2151_v0  ;;  %v2253_v31 = vadd.f32 %v2252_v56, %v2251_v55  ;;  %v2844_v9 = vsel %vm336_vm0, %v2801_v18, 0.0  ;;  %v5417_v63 = vld [vmem:[#allocation16_spill] sm:$0xff] }
 0x19e   : > { %v2846_v45 = vsel %vm336_vm0, %v2802_v4, 0.0  ;;  %v2845_v33 = vadd.f32 %v2844_v9, %v2843_v32  ;;  %v2903_v15 = vmul.f32 %v2801_v18, %v2801_v18  ;;  %v2904_v27 = vmul.f32 %v2802_v4, %v2802_v4  ;;  %2081 = vst.msk [vmem:[%s4074_s5 + $0x148] sm:$0xf] %vm674_vm1, %v3552_v50 }
 0x19f   : > { %v3584_v35 = vpack.c.bf16 %v5413_v47, %v5413_v47  ;;  %v2155_v61 = vadd.f32 %v2154_v23, %v2153_v57  ;;  %v2255_v14 = vadd.f32 %v2254_v59, %v2253_v31  ;;  %v3550_v62 = vpack.c.bf16 %v5414_v25, %v5414_v25 }
 0x1a0   : > { %v3582_v38 = vpack.c.bf16 %v5415_v20, %v5415_v20  ;;  %v2847_v24 = vadd.f32 %v2846_v45, %v2845_v33  ;;  %v2946_v40 = vsel %vm336_vm0, %v2903_v15, 0.0  ;;  %v2948_v46 = vsel %vm336_vm0, %v2904_v27, 0.0 }
 0x1a1   : > { %2775 = vst.msk [vmem:[%s4074_s5 + $0x1c8] sm:$0xf] %vm674_vm1, %v3584_v35  ;;  %v1944_v19 = vpack.c.bf16 %v5416_v17, %v5412_v42  ;;  %v2257_v26 = vadd.f32 %v2256_v43, %v2255_v14  ;;  %v2947_v23 = vadd.f32 %v2946_v40, %v2945_v37  ;;  %2079 = vst.msk [vmem:[%s4074_s5 + $0x140] sm:$0xf] %vm674_vm1, %v3550_v62  ;;  %v2156_v43 = vsel %vm336_vm0, %v5026_v22, 0.0 }
 0x1a2   : > { %2773 = vst.msk [vmem:[%s4074_s5 + $0x1c0] sm:$0xf] %vm674_vm1, %v3582_v38  ;;  %v3553_v1 = vpack.c.bf16 %v5416_v17, %v5416_v17  ;;  %v2638_v55 = vpack.c.bf16 %v4668_v3, %v5413_v47  ;;  %v2849_v12 = vadd.f32 %v2848_v30, %v2847_v24  ;;  %v3585_v11 = vpack.c.bf16 %v4668_v3, %v4668_v3 }
 0x1a3   : > { %v2113_v6 = vunpack.c.l.bf16 %v1944_v19  ;;  %v5095_v39 = vunpack.c.h.bf16 %v1944_v19  ;;  %v2949_v7 = vadd.f32 %v2948_v46, %v2947_v23  ;;  %v1943_v0 = vpack.c.bf16 %v5417_v63, %v5414_v25 }
 0x1a4   : > { %2082 = vst.msk [vmem:[%s4074_s5 + $0x14c] sm:$0xf] %vm674_vm1, %v3553_v1  ;;  %v2807_v2 = vunpack.c.l.bf16 %v2638_v55  ;;  %v2850_v18 = vsel %vm336_vm0, %v5041_v21, 0.0  ;;  %v2950_v30 = vsel %vm336_vm0, %v2905_v44, 0.0  ;;  %2776 = vst.msk [vmem:[%s4074_s5 + $0x1cc] sm:$0xf] %vm674_vm1, %v3585_v11  ;;  %v5110_v3 = vunpack.c.h.bf16 %v2638_v55 }
 0x1a5   : > { %v2215_v4 = vmul.f32 %v2113_v6, %v2113_v6  ;;  %v2258_v22 = vsel %vm336_vm0, %v5049_v36, 0.0  ;;  %v2952_v32 = vsel %vm336_vm0, %v2906_v34, 0.0  ;;  %v2951_v56 = vadd.f32 %v2950_v30, %v2949_v7 }
 0x1a6   : > { %v2162_v59 = vsel %vm336_vm0, %v2113_v6, 0.0  ;;  %v5118_v37 = vmul.f32 %v5095_v39, %v5095_v39  ;;  %v2856_v21 = vsel %vm336_vm0, %v2807_v2, 0.0  ;;  %v2909_v44 = vmul.f32 %v2807_v2, %v2807_v2 }
 0x1a7   : > { %v3551_v42 = vpack.c.bf16 %v5417_v63, %v5417_v63  ;;  %v2264_v50 = vsel %vm336_vm0, %v2215_v4, 0.0  ;;  %v2111_v57 = vunpack.c.l.bf16 %v1943_v0  ;;  %v2112_v36 = vunpack.c.h.bf16 %v1943_v0 }
 0x1a8   : > { %v2157_v31 = vadd.f32 %v2156_v43, %v2155_v61  ;;  %v2910_v34 = vmul.f32 %v5110_v3, %v5110_v3  ;;  %v2259_v9 = vadd.f32 %v2258_v22, %v2257_v26  ;;  %v2637_v45 = vpack.c.bf16 %v4674_v13, %v5415_v20 }
 0x1a9   : > { %2080 = vst.msk [vmem:[%s4074_s5 + $0x144] sm:$0xf] %vm674_vm1, %v3551_v42  ;;  %v3583_v33 = vpack.c.bf16 %v4674_v13, %v4674_v13  ;;  %v2158_v15 = vsel %vm336_vm0, %v2111_v57, 0.0  ;;  %v2160_v27 = vsel %vm336_vm0, %v2112_v36, 0.0  ;;  %v2213_v47 = vmul.f32 %v2111_v57, %v2111_v57 }
 0x1aa   : > { %v2214_v35 = vmul.f32 %v2112_v36, %v2112_v36  ;;  %v2159_v14 = vadd.f32 %v2158_v15, %v2157_v31  ;;  %v2805_v61 = vunpack.c.l.bf16 %v2637_v45  ;;  %v2806_v25 = vunpack.c.h.bf16 %v2637_v45 }
 0x1ab   : > { %2774 = vst.msk [vmem:[%s4074_s5 + $0x1c4] sm:$0xf] %vm674_vm1, %v3583_v33  ;;  %v2851_v62 = vadd.f32 %v2850_v18, %v2849_v12  ;;  %v2260_v38 = vsel %vm336_vm0, %v2213_v47, 0.0  ;;  %v2953_v24 = vadd.f32 %v2952_v32, %v2951_v56  ;;  %v3556_v13 = vpack.c.bf16 %v4689_v29, %v4689_v29 }
 0x1ac   : > { %v2262_v20 = vsel %vm336_vm0, %v2214_v35, 0.0  ;;  %v2161_v40 = vadd.f32 %v2160_v27, %v2159_v14  ;;  %v2261_v46 = vadd.f32 %v2260_v38, %v2259_v9  ;;  %v2852_v17 = vsel %vm336_vm0, %v2805_v61, 0.0  ;;  %v5418_v14 = vld [vmem:[#allocation17_spill] sm:$0xff] }
 0x1ad   : > { %v2854_v19 = vsel %vm336_vm0, %v2806_v25, 0.0  ;;  %v2853_v26 = vadd.f32 %v2852_v17, %v2851_v62  ;;  %v2907_v23 = vmul.f32 %v2805_v61, %v2805_v61  ;;  %v2908_v1 = vmul.f32 %v2806_v25, %v2806_v25  ;;  %2085 = vst.msk [vmem:[%s4074_s5 + $0x158] sm:$0xf] %vm674_vm1, %v3556_v13 }
 0x1ae   : > { %v3588_v55 = vpack.c.bf16 %v4699_v28, %v4699_v28  ;;  %v2163_v12 = vadd.f32 %v2162_v59, %v2161_v40  ;;  %v2263_v6 = vadd.f32 %v2262_v20, %v2261_v46  ;;  %v3554_v11 = vpack.c.bf16 %v4701_v51, %v4701_v51 }
 0x1af   : > { %v3586_v43 = vpack.c.bf16 %v4711_v41, %v4711_v41  ;;  %v2855_v7 = vadd.f32 %v2854_v19, %v2853_v26  ;;  %v2954_v2 = vsel %vm336_vm0, %v2907_v23, 0.0  ;;  %v2956_v63 = vsel %vm336_vm0, %v2908_v1, 0.0  ;;  %v5419_v26 = vld [vmem:[#allocation18_spill] sm:$0xff] }
 0x1b0   : > { %2779 = vst.msk [vmem:[%s4074_s5 + $0x1d8] sm:$0xf] %vm674_vm1, %v3588_v55  ;;  %v1946_v0 = vpack.c.bf16 %v4713_v54, %v4689_v29  ;;  %v2265_v18 = vadd.f32 %v2264_v50, %v2263_v6  ;;  %v2955_v30 = vadd.f32 %v2954_v2, %v2953_v24  ;;  %2083 = vst.msk [vmem:[%s4074_s5 + $0x150] sm:$0xf] %vm674_vm1, %v3554_v11  ;;  %v2164_v42 = vsel %vm336_vm0, %v5095_v39, 0.0  ;;  %v5420_v2 = vld [vmem:[#allocation19_spill] sm:$0xff] }
 0x1b1   : > { %2777 = vst.msk [vmem:[%s4074_s5 + $0x1d0] sm:$0xf] %vm674_vm1, %v3586_v43  ;;  %v3557_v4 = vpack.c.bf16 %v4713_v54, %v4713_v54  ;;  %v2640_v22 = vpack.c.bf16 %v4719_v48, %v4699_v28  ;;  %v2857_v32 = vadd.f32 %v2856_v21, %v2855_v7  ;;  %v3589_v29 = vpack.c.bf16 %v4719_v48, %v4719_v48 }
 0x1b2   : > { %v2117_v56 = vunpack.c.l.bf16 %v1946_v0  ;;  %v5164_v59 = vunpack.c.h.bf16 %v1946_v0  ;;  %v2957_v50 = vadd.f32 %v2956_v63, %v2955_v30  ;;  %v1945_v54 = vpack.c.bf16 %v4721_v16, %v4701_v51  ;;  %v5421_v30 = vld [vmem:[#allocation20_spill] sm:$0xff] }
 0x1b3   : > { %2086 = vst.msk [vmem:[%s4074_s5 + $0x15c] sm:$0xf] %vm674_vm1, %v3557_v4  ;;  %v2811_v57 = vunpack.c.l.bf16 %v2640_v22  ;;  %v2858_v28 = vsel %vm336_vm0, %v5110_v3, 0.0  ;;  %v2958_v21 = vsel %vm336_vm0, %v2909_v44, 0.0  ;;  %2780 = vst.msk [vmem:[%s4074_s5 + $0x1dc] sm:$0xf] %vm674_vm1, %v3589_v29  ;;  %v5179_v48 = vunpack.c.h.bf16 %v2640_v22 }
 0x1b4   : > { %v2219_v36 = vmul.f32 %v2117_v56, %v2117_v56  ;;  %v2266_v39 = vsel %vm336_vm0, %v5118_v37, 0.0  ;;  %v2960_v31 = vsel %vm336_vm0, %v2910_v34, 0.0  ;;  %v2959_v9 = vadd.f32 %v2958_v21, %v2957_v50  ;;  %v5422_v22 = vld [vmem:[#allocation21_spill] sm:$0xff] }
 0x1b5   : > { %v2170_v45 = vsel %vm336_vm0, %v2117_v56, 0.0  ;;  %v2220_v51 = vmul.f32 %v5164_v59, %v5164_v59  ;;  %v2864_v3 = vsel %vm336_vm0, %v2811_v57, 0.0  ;;  %v2913_v44 = vmul.f32 %v2811_v57, %v2811_v57 }
 0x1b6   : > { %v3555_v33 = vpack.c.bf16 %v4721_v16, %v4721_v16  ;;  %v2272_v15 = vsel %vm336_vm0, %v2219_v36, 0.0  ;;  %v2115_v27 = vunpack.c.l.bf16 %v1945_v54  ;;  %v2116_v47 = vunpack.c.h.bf16 %v1945_v54 }
 0x1b7   : > { %v2165_v37 = vadd.f32 %v2164_v42, %v2163_v12  ;;  %v2914_v34 = vmul.f32 %v5179_v48, %v5179_v48  ;;  %v2267_v35 = vadd.f32 %v2266_v39, %v2265_v18  ;;  %v2639_v61 = vpack.c.bf16 %v5418_v14, %v4711_v41 }
 0x1b8   : > { %2084 = vst.msk [vmem:[%s4074_s5 + $0x154] sm:$0xf] %vm674_vm1, %v3555_v33  ;;  %v3587_v25 = vpack.c.bf16 %v5418_v14, %v5418_v14  ;;  %v2166_v62 = vsel %vm336_vm0, %v2115_v27, 0.0  ;;  %v2168_v16 = vsel %vm336_vm0, %v2116_v47, 0.0  ;;  %v2217_v38 = vmul.f32 %v2115_v27, %v2115_v27 }
 0x1b9   : > { %v2218_v20 = vmul.f32 %v2116_v47, %v2116_v47  ;;  %v2167_v24 = vadd.f32 %v2166_v62, %v2165_v37  ;;  %v2809_v13 = vunpack.c.l.bf16 %v2639_v61  ;;  %v2810_v40 = vunpack.c.h.bf16 %v2639_v61 }
 0x1ba   : > { %2778 = vst.msk [vmem:[%s4074_s5 + $0x1d4] sm:$0xf] %vm674_vm1, %v3587_v25  ;;  %v2859_v46 = vadd.f32 %v2858_v28, %v2857_v32  ;;  %v2268_v17 = vsel %vm336_vm0, %v2217_v38, 0.0  ;;  %v2961_v19 = vadd.f32 %v2960_v31, %v2959_v9  ;;  %v3560_v23 = vpack.c.bf16 %v5419_v26, %v5419_v26 }
 0x1bb   : > { %v2270_v41 = vsel %vm336_vm0, %v2218_v20, 0.0  ;;  %v2169_v1 = vadd.f32 %v2168_v16, %v2167_v24  ;;  %v2269_v55 = vadd.f32 %v2268_v17, %v2267_v35  ;;  %v2860_v12 = vsel %vm336_vm0, %v2809_v13, 0.0 }
 0x1bc   : > { %v2862_v6 = vsel %vm336_vm0, %v2810_v40, 0.0  ;;  %v2861_v11 = vadd.f32 %v2860_v12, %v2859_v46  ;;  %v2911_v43 = vmul.f32 %v2809_v13, %v2809_v13  ;;  %v2912_v7 = vmul.f32 %v2810_v40, %v2810_v40  ;;  %2089 = vst.msk [vmem:[%s4074_s5 + $0x168] sm:$0xf] %vm674_vm1, %v3560_v23 }
 0x1bd   : > { %v3592_v63 = vpack.c.bf16 %v5420_v2, %v5420_v2  ;;  %v2171_v0 = vadd.f32 %v2170_v45, %v2169_v1  ;;  %v2271_v18 = vadd.f32 %v2270_v41, %v2269_v55  ;;  %v3558_v4 = vpack.c.bf16 %v5421_v30, %v5421_v30 }
 0x1be   : > { %v3590_v32 = vpack.c.bf16 %v5422_v22, %v5422_v22  ;;  %v2863_v56 = vadd.f32 %v2862_v6, %v2861_v11  ;;  %v2962_v29 = vsel %vm336_vm0, %v2911_v43, 0.0  ;;  %v2964_v42 = vsel %vm336_vm0, %v2912_v7, 0.0 }
 0x1bf   : > { %2783 = vst.msk [vmem:[%s4074_s5 + $0x1e8] sm:$0xf] %vm674_vm1, %v3592_v63  ;;  %v1948_v50 = vpack.c.bf16 %v4765_v8, %v5419_v26  ;;  %v2273_v57 = vadd.f32 %v2272_v15, %v2271_v18  ;;  %v2963_v54 = vadd.f32 %v2962_v29, %v2961_v19  ;;  %2087 = vst.msk [vmem:[%s4074_s5 + $0x160] sm:$0xf] %vm674_vm1, %v3558_v4  ;;  %v2866_v27 = vsel %vm336_vm0, %v5179_v48, 0.0 }
 0x1c0   : > { %2781 = vst.msk [vmem:[%s4074_s5 + $0x1e0] sm:$0xf] %vm674_vm1, %v3590_v32  ;;  %v3561_v28 = vpack.c.bf16 %v4765_v8, %v4765_v8  ;;  %v2642_v21 = vpack.c.bf16 %v4769_v5, %v5420_v2  ;;  %v2865_v36 = vadd.f32 %v2864_v3, %v2863_v56  ;;  %v3593_v9 = vpack.c.bf16 %v4769_v5, %v4769_v5 }
 0x1c1   : > { %v2121_v39 = vunpack.c.l.bf16 %v1948_v50  ;;  %v5231_v31 = vunpack.c.h.bf16 %v1948_v50  ;;  %v2965_v45 = vadd.f32 %v2964_v42, %v2963_v54  ;;  %v1947_v15 = vpack.c.bf16 %v4771_v52, %v5421_v30  ;;  %v5423_v30 = vld [vmem:[#allocation22_spill] sm:$0xff]  ;;  %v5425_v50 = vld [vmem:[#allocation24_spill] sm:$0xff] }
 0x1c2   : > { %2090 = vst.msk [vmem:[%s4074_s5 + $0x16c] sm:$0xf] %vm674_vm1, %v3561_v28  ;;  %v2815_v33 = vunpack.c.l.bf16 %v2642_v21  ;;  %v2172_v8 = vsel %vm336_vm0, %v5164_v59, 0.0  ;;  %v2966_v3 = vsel %vm336_vm0, %v2913_v44, 0.0  ;;  %2784 = vst.msk [vmem:[%s4074_s5 + $0x1ec] sm:$0xf] %vm674_vm1, %v3593_v9  ;;  %v2816_v35 = vunpack.c.h.bf16 %v2642_v21 }
 0x1c3   : > { %v2274_v5 = vsel %vm336_vm0, %v2220_v51, 0.0  ;;  %v2968_v47 = vsel %vm336_vm0, %v2914_v34, 0.0  ;;  %v2967_v37 = vadd.f32 %v2966_v3, %v2965_v45  ;;  %v2178_v14 = vsel %vm336_vm0, %v2121_v39, 0.0 }
 0x1c4   : > { %v2223_v61 = vmul.f32 %v2121_v39, %v2121_v39  ;;  %v2224_v59 = vmul.f32 %v5231_v31, %v5231_v31  ;;  %v3559_v48 = vpack.c.bf16 %v4771_v52, %v4771_v52  ;;  %v2872_v44 = vsel %vm336_vm0, %v2815_v33, 0.0 }
 0x1c5   : > { %v2119_v25 = vunpack.c.l.bf16 %v1947_v15  ;;  %v2120_v62 = vunpack.c.h.bf16 %v1947_v15  ;;  %v2173_v16 = vadd.f32 %v2172_v8, %v2171_v0  ;;  %v2917_v51 = vmul.f32 %v2815_v33, %v2815_v33  ;;  %v5427_v8 = vld [vmem:[#allocation26_spill] sm:$0xff] }
 0x1c6   : > { %2088 = vst.msk [vmem:[%s4074_s5 + $0x164] sm:$0xf] %vm674_vm1, %v3559_v48  ;;  %v2275_v34 = vadd.f32 %v2274_v5, %v2273_v57  ;;  %v2641_v38 = vpack.c.bf16 %v4777_v53, %v5422_v22  ;;  %v3591_v20 = vpack.c.bf16 %v4777_v53, %v4777_v53  ;;  %v2867_v19 = vadd.f32 %v2866_v27, %v2865_v36  ;;  %v5424_v22 = vld [vmem:[#allocation23_spill] sm:$0xff]  ;;  %v5426_v36 = vld [vmem:[#allocation25_spill] sm:$0xff] }
 0x1c7   : > { %v2174_v24 = vsel %vm336_vm0, %v2119_v25, 0.0  ;;  %v2176_v13 = vsel %vm336_vm0, %v2120_v62, 0.0  ;;  %v2221_v52 = vmul.f32 %v2119_v25, %v2119_v25  ;;  %v2222_v40 = vmul.f32 %v2120_v62, %v2120_v62 }
 0x1c8   : > { %v2175_v46 = vadd.f32 %v2174_v24, %v2173_v16  ;;  %2782 = vst.msk [vmem:[%s4074_s5 + $0x1e4] sm:$0xf] %vm674_vm1, %v3591_v20  ;;  %v2813_v17 = vunpack.c.l.bf16 %v2641_v38  ;;  %v2814_v41 = vunpack.c.h.bf16 %v2641_v38  ;;  %v2969_v1 = vadd.f32 %v2968_v47, %v2967_v37 }
 0x1c9   : > { %v2276_v26 = vsel %vm336_vm0, %v2221_v52, 0.0  ;;  %v2278_v23 = vsel %vm336_vm0, %v2222_v40, 0.0  ;;  %v3564_v53 = vpack.c.bf16 %v4794_v58, %v4794_v58  ;;  %v3596_v63 = vpack.c.bf16 %v4804_v49, %v4804_v49 }
 0x1ca   : > { %v2177_v55 = vadd.f32 %v2176_v13, %v2175_v46  ;;  %v2277_v12 = vadd.f32 %v2276_v26, %v2275_v34  ;;  %v2868_v6 = vsel %vm336_vm0, %v2813_v17, 0.0  ;;  %v2870_v11 = vsel %vm336_vm0, %v2814_v41, 0.0 }
 0x1cb   : > { %v2869_v43 = vadd.f32 %v2868_v6, %v2867_v19  ;;  %v2915_v7 = vmul.f32 %v2813_v17, %v2813_v17  ;;  %v2916_v2 = vmul.f32 %v2814_v41, %v2814_v41  ;;  %2093 = vst.msk [vmem:[%s4074_s5 + $0x178] sm:$0xf] %vm674_vm1, %v3564_v53  ;;  %v3562_v4 = vpack.c.bf16 %v5423_v30, %v5423_v30 }
 0x1cc   : > { %v2179_v0 = vadd.f32 %v2178_v14, %v2177_v55  ;;  %v2279_v18 = vadd.f32 %v2278_v23, %v2277_v12  ;;  %v3594_v32 = vpack.c.bf16 %v5424_v22, %v5424_v22  ;;  %v2280_v56 = vsel %vm336_vm0, %v2223_v61, 0.0  ;;  %2787 = vst.msk [vmem:[%s4074_s5 + $0x1f8] sm:$0xf] %vm674_vm1, %v3596_v63 }
 0x1cd   : > { %v2871_v29 = vadd.f32 %v2870_v11, %v2869_v43  ;;  %v2970_v42 = vsel %vm336_vm0, %v2915_v7, 0.0  ;;  %v1950_v57 = vpack.c.bf16 %v5425_v50, %v4794_v58  ;;  %2091 = vst.msk [vmem:[%s4074_s5 + $0x170] sm:$0xf] %vm674_vm1, %v3562_v4  ;;  %v3565_v21 = vpack.c.bf16 %v5425_v50, %v5425_v50 }
 0x1ce   : > { %v2281_v54 = vadd.f32 %v2280_v56, %v2279_v18  ;;  %v2971_v28 = vadd.f32 %v2970_v42, %v2969_v1  ;;  %2785 = vst.msk [vmem:[%s4074_s5 + $0x1f0] sm:$0xf] %vm674_vm1, %v3594_v32  ;;  %v2644_v39 = vpack.c.bf16 %v5426_v36, %v4804_v49  ;;  %v2918_v9 = vmul.f32 %v2816_v35, %v2816_v35 }
 0x1cf   : > { %v2873_v45 = vadd.f32 %v2872_v44, %v2871_v29  ;;  %v2972_v33 = vsel %vm336_vm0, %v2916_v2, 0.0  ;;  %v3597_v15 = vpack.c.bf16 %v5426_v36, %v5426_v36  ;;  %2094 = vst.msk [vmem:[%s4074_s5 + $0x17c] sm:$0xf] %vm674_vm1, %v3565_v21  ;;  %v1949_v27 = vpack.c.bf16 %v5427_v8, %v5423_v30 }
 0x1d0   : > { %v2973_v58 = vadd.f32 %v2972_v33, %v2971_v28  ;;  %v2974_v3 = vsel %vm336_vm0, %v2917_v51, 0.0  ;;  %v2180_v49 = vsel %vm336_vm0, %v5231_v31, 0.0  ;;  %v2874_v5 = vsel %vm336_vm0, %v2816_v35, 0.0  ;;  %v5428_v35 = vld [vmem:[#allocation27_spill] sm:$0xff] }
 0x1d1   : > { %2788 = vst.msk [vmem:[%s4074_s5 + $0x1fc] sm:$0xf] %vm674_vm1, %v3597_v15  ;;  %v2125_v37 = vunpack.c.l.bf16 %v1950_v57  ;;  %v2282_v14 = vsel %vm336_vm0, %v2224_v59, 0.0  ;;  %v2976_v61 = vsel %vm336_vm0, %v2918_v9, 0.0  ;;  %v2126_v48 = vunpack.c.h.bf16 %v1950_v57 }
 0x1d2   : > { %v2975_v47 = vadd.f32 %v2974_v3, %v2973_v58  ;;  %v3563_v44 = vpack.c.bf16 %v5427_v8, %v5427_v8  ;;  %v2819_v25 = vunpack.c.l.bf16 %v2644_v39  ;;  %v2123_v62 = vunpack.c.l.bf16 %v1949_v27 }
 0x1d3   : > { %v2124_v16 = vunpack.c.h.bf16 %v1949_v27  ;;  %v2181_v51 = vadd.f32 %v2180_v49, %v2179_v0  ;;  %v2820_v34 = vunpack.c.h.bf16 %v2644_v39  ;;  %v2283_v31 = vadd.f32 %v2282_v14, %v2281_v54 }
 0x1d4   : > { %2092 = vst.msk [vmem:[%s4074_s5 + $0x174] sm:$0xf] %vm674_vm1, %v3563_v44  ;;  %v2643_v38 = vpack.c.bf16 %v5428_v35, %v5424_v22  ;;  %v3595_v59 = vpack.c.bf16 %v5428_v35, %v5428_v35  ;;  %v2186_v20 = vsel %vm336_vm0, %v2125_v37, 0.0  ;;  %v2182_v24 = vsel %vm336_vm0, %v2123_v62, 0.0 }
 0x1d5   : > { %v2225_v13 = vmul.f32 %v2123_v62, %v2123_v62  ;;  %v2226_v52 = vmul.f32 %v2124_v16, %v2124_v16  ;;  %v2183_v40 = vadd.f32 %v2182_v24, %v2181_v51  ;;  %v2875_v41 = vadd.f32 %v2874_v5, %v2873_v45 }
 0x1d6   : > { %2786 = vst.msk [vmem:[%s4074_s5 + $0x1f4] sm:$0xf] %vm674_vm1, %v3595_v59  ;;  %v2817_v46 = vunpack.c.l.bf16 %v2643_v38  ;;  %v2818_v17 = vunpack.c.h.bf16 %v2643_v38  ;;  %v2227_v19 = vmul.f32 %v2125_v37, %v2125_v37  ;;  %v2184_v26 = vsel %vm336_vm0, %v2124_v16, 0.0 }
 0x1d7   : > { %v2284_v23 = vsel %vm336_vm0, %v2225_v13, 0.0  ;;  %v2977_v1 = vadd.f32 %v2976_v61, %v2975_v47  ;;  %v2228_v53 = vmul.f32 %v2126_v48, %v2126_v48  ;;  %v2185_v55 = vadd.f32 %v2184_v26, %v2183_v40 }
 0x1d8   : > { %v2285_v12 = vadd.f32 %v2284_v23, %v2283_v31  ;;  %v2876_v6 = vsel %vm336_vm0, %v2817_v46, 0.0  ;;  %v2286_v11 = vsel %vm336_vm0, %v2226_v52, 0.0  ;;  %v2919_v7 = vmul.f32 %v2817_v46, %v2817_v46 }
 0x1d9   : > { %v2877_v43 = vadd.f32 %v2876_v6, %v2875_v41  ;;  %v2920_v2 = vmul.f32 %v2818_v17, %v2818_v17  ;;  %v2188_v63 = vsel %vm336_vm0, %v2126_v48, 0.0  ;;  %v2187_v0 = vadd.f32 %v2186_v20, %v2185_v55 }
 0x1da   : > { %v2287_v18 = vadd.f32 %v2286_v11, %v2285_v12  ;;  %v2878_v30 = vsel %vm336_vm0, %v2818_v17, 0.0  ;;  %v2288_v4 = vsel %vm336_vm0, %v2227_v19, 0.0  ;;  %v2921_v22 = vmul.f32 %v2819_v25, %v2819_v25 }
 0x1db   : > { %v2879_v32 = vadd.f32 %v2878_v30, %v2877_v43  ;;  %v2978_v56 = vsel %vm336_vm0, %v2919_v7, 0.0  ;;  %v2880_v29 = vsel %vm336_vm0, %v2819_v25, 0.0  ;;  %v2189_v42 = vadd.f32 %v2188_v63, %v2187_v0 }
 0x1dc   : > { %v2289_v50 = vadd.f32 %v2288_v4, %v2287_v18  ;;  %v2979_v57 = vadd.f32 %v2978_v56, %v2977_v1  ;;  %v2290_v54 = vsel %vm336_vm0, %v2228_v53, 0.0  ;;  %v2922_v28 = vmul.f32 %v2820_v34, %v2820_v34 }
 0x1dd   : > { %v2881_v21 = vadd.f32 %v2880_v29, %v2879_v32  ;;  %v2980_v36 = vsel %vm336_vm0, %v2920_v2, 0.0  ;;  %v2882_v39 = vsel %vm336_vm0, %v2820_v34, 0.0  ;;  %v2190_v9 = vrot.slane %v2189_v42, 4 }
 0x1de   : > { %v2291_v45 = vadd.f32 %v2290_v54, %v2289_v50  ;;  %v2981_v33 = vadd.f32 %v2980_v36, %v2979_v57  ;;  %v2982_v15 = vsel %vm336_vm0, %v2921_v22, 0.0  ;;  %v2984_v49 = vsel %vm336_vm0, %v2922_v28, 0.0 }
 0x1df   : > { %v2883_v58 = vadd.f32 %v2882_v39, %v2881_v21  ;;  %v2191_v8 = vadd.f32 %v2190_v9, %v2189_v42 }
 0x1e0   : > { %v2292_v27 = vrot.slane %v2291_v45, 4  ;;  %v2983_v3 = vadd.f32 %v2982_v15, %v2981_v33 }
 0x1e1   : > { %v2884_v5 = vrot.slane %v2883_v58, 4  ;;  %v2192_v47 = vrot.slane %v2191_v8, 2 }
 0x1e2   : > { %v2293_v37 = vadd.f32 %v2292_v27, %v2291_v45  ;;  %v2985_v14 = vadd.f32 %v2984_v49, %v2983_v3 }
 0x1e3   : > { %v2885_v61 = vadd.f32 %v2884_v5, %v2883_v58  ;;  %v2193_v48 = vadd.f32 %v2192_v47, %v2191_v8 }
 0x1e4   : > { %v2294_v44 = vrot.slane %v2293_v37, 2  ;;  %v2986_v25 = vrot.slane %v2985_v14, 4 }
 0x1e5   : > { %v2886_v62 = vrot.slane %v2885_v61, 2  ;;  %v2194_v16 = vrot.slane %v2193_v48, 1 }
 0x1e6   : > { %v2295_v51 = vadd.f32 %v2294_v44, %v2293_v37  ;;  %v2987_v34 = vadd.f32 %v2986_v25, %v2985_v14 }
 0x1e7   : > { %v2887_v31 = vadd.f32 %v2886_v62, %v2885_v61  ;;  %v2195_v35 = vadd.f32 %v2194_v16, %v2193_v48 }
 0x1e8   : > { %v2296_v38 = vrot.slane %v2295_v51, 1  ;;  %v2988_v59 = vrot.slane %v2987_v34, 2 }
 0x1e9   : > { %v2888_v20 = vrot.slane %v2887_v31, 1  ;;  %v2196_v24 = vadd.f32 %v2195_v35, %v4860_v60 }
 0x1ea   : > { %v2297_v13 = vadd.f32 %v2296_v38, %v2295_v51  ;;  %v2989_v52 = vadd.f32 %v2988_v59, %v2987_v34 }
 0x1eb   : > { %v2889_v40 = vadd.f32 %v2888_v20, %v2887_v31 }
 0x1ec   : > { %v2298_v46 = vadd.f32 %v2297_v13, %v4872_v10  ;;  %v2990_v17 = vrot.slane %v2989_v52, 1 }
 0x1ed   : > { %v2890_v41 = vadd.f32 %v2889_v40, %v2196_v24 }
 0x1ee   : > { %v2991_v19 = vadd.f32 %v2990_v17, %v2989_v52 }
 0x1ef   : > { %2994 = vst.msk [vmem:[%s211_s8] sm:$0x1] %vm2993_vm2, %v2890_v41 }
 0x1f0   : > { %v2992_v26 = vadd.f32 %v2991_v19, %v2298_v46 }
 0x1f2   : > { %2995 = vst.msk [vmem:[%s214_s11] sm:$0x1] %vm2993_vm2, %v2992_v26 }
 0x1f3 PF: > { %s15_s15 = sadd.s32 1, %s3884_s15  }
 0x1f4   : > { %p12_p4 = scmp.ge.s32.totalorder %s15_s15, 4  }
 0x1f6   :  { %14 = sbr.rel (!%p12_p4) target bundleno = 1 (0x1), region = 85 }

// kernel: forward.9
= control target key start
LH: loop header
LB: loop body
LE: loop exit
PB: predicated region body
PF: predicated region fallthrough
CT: control target
= control target key end

     0   :  { %s603_s12 = smov 0   ;;  %s690_s0 = inlined_call_operand.vmem [shape: bf16[256,128], index: 0, kind: input, shape index: {}]   ;;  %s691_s1 = inlined_call_operand.vmem [shape: f32[1,128], index: 1, kind: input, shape index: {}]   ;;  %s692_s2 = inlined_call_operand.vmem [shape: f32[1,128], index: 2, kind: input, shape index: {}]   ;;  %s693_s3 = inlined_call_operand.vmem [shape: bf16[256,128], index: 3, kind: output, shape index: {}]  }
   0x1 LB: > { %s436_s13 = sadd.s32 4294967295, %s581_s12   ;;  %p440_p0 = scmp.ge.s32.totalorder %s581_s12, 1  ;;  %s581_s12 = sphi %s603_s12, %s13_s12  }
   0x2   : > { %p138_p1 = scmp.lt.s32.totalorder %s581_s12, 3 }
   0x4   : > { %p139_p2 = pnand %p440_p0, %p138_p1 }
   0x5   : > { %s441_s14 = sshll.u32 (!%p139_p2), %s436_s13, 4  ;;  %v624_v0 = vld [vmem:[%s691_s1] ss:$0 sm:$0xff] (!%p139_p2) }
   0x6   : > { %142 = sbr.rel (%p139_p2) target bundleno = 49 (0x31), region = 32  ;;  %p163_p3 = scmp.lt.s32.totalorder (!%p139_p2), %s441_s14, 31  ;;  %v633_v9 = vld [vmem:[%s692_s2] ss:$0 sm:$0xff] (!%p139_p2) }
   0xd   : > { %s695_s14 = smov (!%p163_p3, %s441_s14), 31 }
   0xe   : > { %s442_s15 = sshll.u32 %s695_s14, 2 }
   0xf   : > { %s619_s18 = scalar_lea.vmem %s690_s0, %s442_s15  ;;  %s656_s25 = scalar_lea.vmem %s693_s3, %s442_s15 }
  0x10   : > { %v482_v1 = vld [vmem:[%s619_s18] sm:$0xff]   ;;  %v553_v2 = vld [vmem:[%s619_s18 + $0x8] sm:$0xff]   ;;  %v554_v3 = vld [vmem:[%s619_s18 + $0x10] sm:$0xff]  }
  0x11   : > { %v483_v4 = vunpack.c.l.bf16 %v482_v1  ;;  %v484_v5 = vunpack.c.h.bf16 %v482_v1  ;;  %v487_v6 = vunpack.c.l.bf16 %v553_v2  ;;  %v488_v7 = vunpack.c.h.bf16 %v553_v2  ;;  %v555_v8 = vld [vmem:[%s619_s18 + $0x18] sm:$0xff]   ;;  %v556_v36 = vld [vmem:[%s619_s18 + $0x20] sm:$0xff]   ;;  %v557_v41 = vld [vmem:[%s619_s18 + $0x28] sm:$0xff]  }
  0x12   : > { %v491_v10 = vunpack.c.l.bf16 %v554_v3  ;;  %v492_v11 = vunpack.c.h.bf16 %v554_v3  ;;  %v495_v12 = vunpack.c.l.bf16 %v555_v8  ;;  %v496_v13 = vunpack.c.h.bf16 %v555_v8  ;;  %v558_v52 = vld [vmem:[%s619_s18 + $0x30] sm:$0xff]   ;;  %v559_v53 = vld [vmem:[%s619_s18 + $0x38] sm:$0xff]  }
  0x13   : > { %v213_v14 = vmul.f32 %v483_v4, %v624_v0  ;;  %v214_v15 = vmul.f32 %v484_v5, %v624_v0  ;;  %v215_v16 = vmul.f32 %v487_v6, %v624_v0  ;;  %v216_v17 = vmul.f32 %v488_v7, %v624_v0 }
  0x14   : > { %v217_v18 = vmul.f32 %v491_v10, %v624_v0  ;;  %v218_v19 = vmul.f32 %v492_v11, %v624_v0  ;;  %v219_v20 = vmul.f32 %v495_v12, %v624_v0  ;;  %v220_v21 = vmul.f32 %v496_v13, %v624_v0 }
  0x15   : > { %v236_v22 = vadd.f32 %v633_v9, %v213_v14  ;;  %v237_v23 = vadd.f32 %v633_v9, %v214_v15  ;;  %v238_v24 = vadd.f32 %v633_v9, %v215_v16  ;;  %v239_v25 = vadd.f32 %v633_v9, %v216_v17 }
  0x16   : > { %v240_v26 = vadd.f32 %v633_v9, %v217_v18  ;;  %v241_v27 = vadd.f32 %v633_v9, %v218_v19  ;;  %v242_v28 = vadd.f32 %v633_v9, %v219_v20  ;;  %v243_v29 = vadd.f32 %v633_v9, %v220_v21 }
  0x17   : > { %vm252_vm0 = vcmp.ge.f32.partialorder %v236_v22, 0.0  ;;  %vm253_vm1 = vcmp.ge.f32.partialorder %v237_v23, 0.0  ;;  %v268_v30 = vmul.f32 0.1, %v236_v22  ;;  %v269_v31 = vmul.f32 0.1, %v237_v23 }
  0x18   : > { %vm254_vm2 = vcmp.ge.f32.partialorder %v238_v24, 0.0  ;;  %vm255_vm3 = vcmp.ge.f32.partialorder %v239_v25, 0.0  ;;  %v270_v32 = vmul.f32 0.1, %v238_v24  ;;  %v271_v33 = vmul.f32 0.1, %v239_v25 }
  0x19   : > { %v284_v34 = vsel %vm252_vm0, %v236_v22, %v268_v30  ;;  %v285_v35 = vsel %vm253_vm1, %v237_v23, %v269_v31  ;;  %vm256_vm4 = vcmp.ge.f32.partialorder %v240_v26, 0.0  ;;  %vm257_vm5 = vcmp.ge.f32.partialorder %v241_v27, 0.0 }
  0x1a   : > { %v516_v37 = vpack.c.bf16 %v285_v35, %v284_v34  ;;  %v286_v38 = vsel %vm254_vm2, %v238_v24, %v270_v32  ;;  %v287_v39 = vsel %vm255_vm3, %v239_v25, %v271_v33  ;;  %v272_v40 = vmul.f32 0.1, %v240_v26 }
  0x1b   : > { %v521_v42 = vpack.c.bf16 %v287_v39, %v286_v38  ;;  %v273_v43 = vmul.f32 0.1, %v241_v27  ;;  %vm258_vm6 = vcmp.ge.f32.partialorder %v242_v28, 0.0  ;;  %vm259_vm7 = vcmp.ge.f32.partialorder %v243_v29, 0.0 }
  0x1c   : > { %517 = vst [vmem:[%s656_s25] sm:$0xff] %v516_v37   ;;  %v288_v44 = vsel %vm256_vm4, %v240_v26, %v272_v40  ;;  %v274_v45 = vmul.f32 0.1, %v242_v28  ;;  %v275_v46 = vmul.f32 0.1, %v243_v29  ;;  %v499_v47 = vunpack.c.l.bf16 %v556_v36 }
  0x1d   : > { %560 = vst [vmem:[%s656_s25 + $0x8] sm:$0xff] %v521_v42   ;;  %v289_v48 = vsel %vm257_vm5, %v241_v27, %v273_v43  ;;  %v500_v49 = vunpack.c.h.bf16 %v556_v36  ;;  %v503_v50 = vunpack.c.l.bf16 %v557_v41  ;;  %v504_v51 = vunpack.c.h.bf16 %v557_v41 }
  0x1e   : > { %v526_v54 = vpack.c.bf16 %v289_v48, %v288_v44  ;;  %v290_v55 = vsel %vm258_vm6, %v242_v28, %v274_v45  ;;  %v291_v56 = vsel %vm259_vm7, %v243_v29, %v275_v46  ;;  %v221_v57 = vmul.f32 %v499_v47, %v624_v0 }
  0x1f   : > { %v531_v58 = vpack.c.bf16 %v291_v56, %v290_v55  ;;  %v222_v59 = vmul.f32 %v500_v49, %v624_v0  ;;  %v223_v60 = vmul.f32 %v503_v50, %v624_v0  ;;  %v224_v61 = vmul.f32 %v504_v51, %v624_v0 }
  0x20   : > { %561 = vst [vmem:[%s656_s25 + $0x10] sm:$0xff] %v526_v54   ;;  %v244_v62 = vadd.f32 %v633_v9, %v221_v57  ;;  %v507_v63 = vunpack.c.l.bf16 %v558_v52  ;;  %v508_v1 = vunpack.c.h.bf16 %v558_v52  ;;  %v511_v2 = vunpack.c.l.bf16 %v559_v53 }
  0x21   : > { %562 = vst [vmem:[%s656_s25 + $0x18] sm:$0xff] %v531_v58   ;;  %v245_v3 = vadd.f32 %v633_v9, %v222_v59  ;;  %v246_v4 = vadd.f32 %v633_v9, %v223_v60  ;;  %v247_v5 = vadd.f32 %v633_v9, %v224_v61  ;;  %v512_v6 = vunpack.c.h.bf16 %v559_v53 }
  0x22   : > { %vm260_vm8 = vcmp.ge.f32.partialorder %v244_v62, 0.0  ;;  %v276_v7 = vmul.f32 0.1, %v244_v62  ;;  %v225_v8 = vmul.f32 %v507_v63, %v624_v0  ;;  %v226_v10 = vmul.f32 %v508_v1, %v624_v0 }
  0x23   : > { %vm261_vm9 = vcmp.ge.f32.partialorder %v245_v3, 0.0  ;;  %v277_v11 = vmul.f32 0.1, %v245_v3  ;;  %vm262_vm10 = vcmp.ge.f32.partialorder %v246_v4, 0.0  ;;  %vm263_vm11 = vcmp.ge.f32.partialorder %v247_v5, 0.0 }
  0x24   : > { %v292_v12 = vsel %vm260_vm8, %v244_v62, %v276_v7  ;;  %v278_v13 = vmul.f32 0.1, %v246_v4  ;;  %v279_v14 = vmul.f32 0.1, %v247_v5  ;;  %v248_v15 = vadd.f32 %v633_v9, %v225_v8 }
  0x25   : > { %v293_v16 = vsel %vm261_vm9, %v245_v3, %v277_v11  ;;  %v249_v17 = vadd.f32 %v633_v9, %v226_v10  ;;  %v227_v18 = vmul.f32 %v511_v2, %v624_v0  ;;  %v228_v19 = vmul.f32 %v512_v6, %v624_v0 }
  0x26   : > { %v536_v20 = vpack.c.bf16 %v293_v16, %v292_v12  ;;  %v294_v21 = vsel %vm262_vm10, %v246_v4, %v278_v13  ;;  %v295_v22 = vsel %vm263_vm11, %v247_v5, %v279_v14  ;;  %vm264_vm12 = vcmp.ge.f32.partialorder %v248_v15, 0.0 }
  0x27   : > { %v541_v23 = vpack.c.bf16 %v295_v22, %v294_v21  ;;  %vm265_vm13 = vcmp.ge.f32.partialorder %v249_v17, 0.0  ;;  %v280_v24 = vmul.f32 0.1, %v248_v15  ;;  %v281_v25 = vmul.f32 0.1, %v249_v17 }
  0x28   : > { %563 = vst [vmem:[%s656_s25 + $0x20] sm:$0xff] %v536_v20   ;;  %v250_v26 = vadd.f32 %v633_v9, %v227_v18  ;;  %v251_v27 = vadd.f32 %v633_v9, %v228_v19 }
  0x29   : > { %564 = vst [vmem:[%s656_s25 + $0x28] sm:$0xff] %v541_v23   ;;  %v296_v28 = vsel %vm264_vm12, %v248_v15, %v280_v24  ;;  %v297_v29 = vsel %vm265_vm13, %v249_v17, %v281_v25 }
  0x2a   : > { %v546_v30 = vpack.c.bf16 %v297_v29, %v296_v28  ;;  %vm266_vm14 = vcmp.ge.f32.partialorder %v250_v26, 0.0  ;;  %vm267_vm15 = vcmp.ge.f32.partialorder %v251_v27, 0.0  ;;  %v282_v0 = vmul.f32 0.1, %v250_v26 }
  0x2b   : > { %v283_v31 = vmul.f32 0.1, %v251_v27 }
  0x2c   : > { %565 = vst [vmem:[%s656_s25 + $0x30] sm:$0xff] %v546_v30   ;;  %v298_v32 = vsel %vm266_vm14, %v250_v26, %v282_v0 }
  0x2d   : > { %v299_v33 = vsel %vm267_vm15, %v251_v27, %v283_v31 }
  0x2e   : > { %v551_v34 = vpack.c.bf16 %v299_v33, %v298_v32 }
  0x30   : > { %566 = vst [vmem:[%s656_s25 + $0x38] sm:$0xff] %v551_v34  }
  0x31 PF: > { %s13_s12 = sadd.s32 1, %s581_s12  }
  0x32   : > { %p10_p4 = scmp.ge.s32.totalorder %s13_s12, 4  }
  0x34   :  { %12 = sbr.rel (!%p10_p4) target bundleno = 1 (0x1), region = 62 }

// kernel: forward.11
= control target key start
LH: loop header
LB: loop body
LE: loop exit
PB: predicated region body
PF: predicated region fallthrough
CT: control target
= control target key end

     0   :  { %s369_s12 = smov 0   ;;  %s392_s0 = inlined_call_operand.vmem [shape: bf16[64,128], index: 0, kind: input, shape index: {}]   ;;  %s393_s1 = inlined_call_operand.vmem [shape: f32[1,128], index: 1, kind: input, shape index: {}]   ;;  %s394_s2 = inlined_call_operand.vmem [shape: f32[1,128], index: 2, kind: input, shape index: {}]   ;;  %s395_s3 = inlined_call_operand.vmem [shape: bf16[64,128], index: 3, kind: output, shape index: {}]  }
   0x1 LB: > { %s292_s13 = sadd.s32 4294967295, %s347_s12   ;;  %p296_p0 = scmp.ge.s32.totalorder %s347_s12, 1  ;;  %s347_s12 = sphi %s369_s12, %s13_s12  }
   0x2   : > { %p138_p1 = scmp.lt.s32.totalorder %s347_s12, 3 }
   0x4   : > { %p139_p2 = pnand %p296_p0, %p138_p1 }
   0x5   : > { %s297_s14 = sshll.u32 (!%p139_p2), %s292_s13, 2  ;;  %v301_v2 = vld [vmem:[%s393_s1] ss:$0 sm:$0xff] (!%p139_p2) }
   0x6   : > { %142 = sbr.rel (%p139_p2) target bundleno = 30 (0x1e), region = 32  ;;  %p163_p3 = scmp.lt.s32.totalorder (!%p139_p2), %s297_s14, 7  ;;  %v302_v7 = vld [vmem:[%s394_s2] ss:$0 sm:$0xff] (!%p139_p2) }
   0xd   : > { %s397_s14 = smov (!%p163_p3, %s297_s14), 7 }
   0xe   : > { %s298_s15 = sshll.u32 %s397_s14, 2 }
   0xf   : > { %s166_s18 = scalar_lea.vmem %s392_s0, %s298_s15  ;;  %s172_s25 = scalar_lea.vmem %s395_s3, %s298_s15 }
  0x10   : > { %v314_v0 = vld [vmem:[%s166_s18] sm:$0xff]   ;;  %v331_v1 = vld [vmem:[%s166_s18 + $0x8] sm:$0xff]  }
  0x11   : > { %v315_v3 = vunpack.c.l.bf16 %v314_v0  ;;  %v316_v4 = vunpack.c.h.bf16 %v314_v0  ;;  %v319_v5 = vunpack.c.l.bf16 %v331_v1  ;;  %v320_v6 = vunpack.c.h.bf16 %v331_v1 }
  0x13   : > { %v189_v8 = vmul.f32 %v315_v3, %v301_v2  ;;  %v190_v9 = vmul.f32 %v316_v4, %v301_v2  ;;  %v191_v10 = vmul.f32 %v319_v5, %v301_v2  ;;  %v192_v11 = vmul.f32 %v320_v6, %v301_v2 }
  0x15   : > { %v200_v12 = vadd.f32 %v302_v7, %v189_v8  ;;  %v201_v13 = vadd.f32 %v302_v7, %v190_v9  ;;  %v202_v14 = vadd.f32 %v302_v7, %v191_v10  ;;  %v203_v15 = vadd.f32 %v302_v7, %v192_v11 }
  0x17   : > { %vm204_vm0 = vcmp.ge.f32.partialorder %v200_v12, 0.0  ;;  %vm205_vm1 = vcmp.ge.f32.partialorder %v201_v13, 0.0  ;;  %v208_v16 = vmul.f32 0.1, %v200_v12  ;;  %v209_v17 = vmul.f32 0.1, %v201_v13 }
  0x18   : > { %vm206_vm2 = vcmp.ge.f32.partialorder %v202_v14, 0.0  ;;  %vm207_vm3 = vcmp.ge.f32.partialorder %v203_v15, 0.0  ;;  %v210_v18 = vmul.f32 0.1, %v202_v14  ;;  %v211_v19 = vmul.f32 0.1, %v203_v15 }
  0x19   : > { %v212_v20 = vsel %vm204_vm0, %v200_v12, %v208_v16  ;;  %v213_v21 = vsel %vm205_vm1, %v201_v13, %v209_v17 }
  0x1a   : > { %v324_v22 = vpack.c.bf16 %v213_v21, %v212_v20  ;;  %v214_v23 = vsel %vm206_vm2, %v202_v14, %v210_v18  ;;  %v215_v24 = vsel %vm207_vm3, %v203_v15, %v211_v19 }
  0x1b   : > { %v329_v25 = vpack.c.bf16 %v215_v24, %v214_v23 }
  0x1c   : > { %325 = vst [vmem:[%s172_s25] sm:$0xff] %v324_v22  }
  0x1d   : > { %332 = vst [vmem:[%s172_s25 + $0x8] sm:$0xff] %v329_v25  }
  0x1e PF: > { %s13_s12 = sadd.s32 1, %s347_s12  }
  0x1f   : > { %p10_p4 = scmp.ge.s32.totalorder %s13_s12, 4  }
  0x21   :  { %12 = sbr.rel (!%p10_p4) target bundleno = 1 (0x1), region = 62 }

// kernel: forward.10
= control target key start
LH: loop header
LB: loop body
LE: loop exit
PB: predicated region body
PF: predicated region fallthrough
CT: control target
= control target key end

     0   :  { %s3627_s15 = smov 0   ;;  %s4333_s0 = inlined_call_operand.vmem [shape: bf16[2,17,17,64], index: 0, kind: input, shape index: {}]   ;;  %s4334_s1 = inlined_call_operand.vmem [shape: bf16[4,64,16], index: 1, kind: input, shape index: {}]   ;;  %s4335_s2 = inlined_call_operand.vmem [shape: bf16[2,256,16], index: 2, kind: output, shape index: {0}]   ;;  %s4336_s3 = inlined_call_operand.vmem [shape: f32[2,1,16], index: 3, kind: output, shape index: {1}]   ;;  %s4337_s4 = inlined_call_operand.vmem [shape: f32[2,1,16], index: 4, kind: output, shape index: {2}]  }
   0x1 LB: > { %s2878_s16 = sadd.s32 4294967295, %s3600_s15   ;;  %p2882_p0 = scmp.ge.s32.totalorder %s3600_s15, 1  ;;  %s3600_s15 = sphi %s3627_s15, %s15_s15  }
   0x2   : > { %p167_p1 = scmp.lt.s32.totalorder %s3600_s15, 3 }
   0x4   : > { %p168_p2 = pnand %p2882_p0, %p167_p1 }
   0x5   : > { %v3546_v0 = vld [vmem:[%s4334_s1 + $0x20] sm:$0xff] (!%p168_p2)   ;;  %p199_p3 = scmp.lt.s32.totalorder (!%p168_p2), %s2878_s16, 1  ;;  %v3548_v2 = vld [vmem:[%s4334_s1 + $0x28] sm:$0xff] (!%p168_p2)   ;;  %v3550_v4 = vld [vmem:[%s4334_s1 + $0x30] sm:$0xff] (!%p168_p2)   ;;  %vm740_vm0 = vcmask (!%p168_p2), 523264   ;;  %vm2532_vm4 = vcmask (!%p168_p2), 125952  }
   0x6   : > { %171 = sbr.rel (%p168_p2) target bundleno = 409 (0x199), region = 28  ;;  %v3547_v1 = vld [vmem:[%s4334_s1 + $0x40] sm:$0xff] (!%p168_p2)   ;;  %3281 = vmatprep.subr.bf16.mxu1 (!%p168_p2), %v3546_v0  ;;  %v3549_v3 = vld [vmem:[%s4334_s1 + $0x48] sm:$0xff] (!%p168_p2)   ;;  %v3551_v5 = vld [vmem:[%s4334_s1 + $0x50] sm:$0xff] (!%p168_p2)   ;;  %vm272_vm1 = vsmask.f32 (!%p168_p2), 3328 }
   0x7   : > { %3361 = vmatprep.subr.bf16.mxu0 (!%p168_p2), %v3547_v1  ;;  %3282 = vmatpush3.bf16.msra.mxu1 (!%p168_p2), %v3546_v0  ;;  %v3552_v6 = vld [vmem:[%s4334_s1 + $0x38] sm:$0xff] (!%p168_p2)   ;;  %vm273_vm2 = vsmask.f32 (!%p168_p2), 7440  ;;  %v3683_v17 = vld [vmem:[%s4334_s1] sm:$0xff] (!%p168_p2)   ;;  %vm2597_vm5 = vcmask (!%p168_p2), 130048   ;;  %vm2770_vm6 = vcmask (!%p168_p2), 122880  }
   0x8   : > { %3362 = vmatpush3.bf16.msra.mxu0 (!%p168_p2), %v3547_v1  ;;  %3283 = vmatprep.subr.bf16.mxu1 (!%p168_p2), %v3548_v2  ;;  %v3553_v7 = vld [vmem:[%s4334_s1 + $0x58] sm:$0xff] (!%p168_p2)   ;;  %vm3688_vm3 = vmor (!%p168_p2), %vm272_vm1, %vm273_vm2  ;;  %v3557_v27 = vld [vmem:[%s4334_s1 + $0x60] sm:$0xff] (!%p168_p2)  }
   0x9   : > { %3363 = vmatprep.subr.bf16.mxu0 (!%p168_p2), %v3549_v3 }
   0xb   : > { %3284 = vmatpush3.bf16.msra.mxu1 (!%p168_p2), %v3548_v2 }
   0xc   : > { %3364 = vmatpush3.bf16.msra.mxu0 (!%p168_p2), %v3549_v3  ;;  %3285 = vmatprep.subr.bf16.mxu1 (!%p168_p2), %v3550_v4 }
   0xd   : > { %s4347_s16 = smov (!%p199_p3, %s2878_s16), 1  ;;  %3365 = vmatprep.subr.bf16.mxu0 %v3551_v5 }
   0xe   : > { %s3537_s27 = smul.u32 204, %s4347_s16  ;;  %s3168_s29 = sshll.u32 %s4347_s16, 7 }
   0xf   : > { %3286 = vmatpush3.bf16.msra.mxu1 %v3550_v4  ;;  %s4192_s6 = scalar_lea.vmem %s4335_s2, %s3168_s29  ;;  %s211_s9 = scalar_lea.vmem %s4336_s3, %s4347_s16 }
  0x10   : > { %s3662_s8 = scalar_lea.vmem %s4333_s0, %s3537_s27  ;;  %3366 = vmatpush3.bf16.msra.mxu0 %v3551_v5  ;;  %3287 = vmatprep.subr.bf16.mxu1 %v3552_v6  ;;  %s214_s12 = scalar_lea.vmem %s4337_s4, %s4347_s16 }
  0x11   : > { %v3554_v8 = vld [vmem:[%s3662_s8 + $0xc] sm:$0xff]   ;;  %v3669_v9 = vld [vmem:[%s3662_s8] sm:$0xf]  ;;  %v3672_v10 = vld [vmem:[%s3662_s8 + $0x4] sm:$0xf]  ;;  %3367 = vmatprep.subr.bf16.mxu0 %v3553_v7 }
  0x12   : > { %v256_v11 = vld [vmem:[%s3662_s8 + $0x8] sm:$0x1]  ;;  %3369 = vmatprep.mubr.msk.bf16.mxu0 %vm740_vm0, %v3554_v8  ;;  %v276_v12 = vshrl.u32 %v3669_v9, 16  ;;  %v279_v13 = vshll.u32 %v3669_v9, 16  ;;  %v285_v14 = vshll.u32 %v3672_v10, 16  ;;  %v289_v15 = vshrl.u32 %v3672_v10, 16 }
  0x13   : > { %v295_v16 = vshll.u32 %v256_v11, 16  ;;  %v2930_v18 = vcombine.low %v3669_v9, %v3672_v10  ;;  %v3556_v24 = vld [vmem:[%s3662_s8 + $0x18] sm:$0xff]   ;;  %3288 = vmatpush3.bf16.msra.mxu1 %v3552_v6  ;;  %v3697_v29 = vld [vmem:[%s3662_s8 + $0xc] sm:$0xf]  ;;  %v3700_v30 = vld [vmem:[%s3662_s8 + $0x10] sm:$0xf] }
  0x14   : > { %v278_v19 = vrot.slane %v276_v12, 4  ;;  %v281_v20 = vrot.slane %v279_v13, 5  ;;  %v287_v22 = vrot.slane %v285_v14, 5  ;;  %v291_v23 = vrot.slane %v289_v15, 4  ;;  %v257_v31 = vld [vmem:[%s3662_s8 + $0x14] sm:$0x1]  ;;  %3368 = vmatpush3.bf16.msra.mxu0 %v3553_v7  ;;  %3321 = vmatprep.subr.bf16.mxu1 %v3683_v17 }
  0x15   : > { %v297_v26 = vrot.slane %v295_v16, 5  ;;  %v300_v33 = vshrl.u32 %v3697_v29, 16  ;;  %v303_v34 = vshll.u32 %v3697_v29, 16  ;;  %v309_v35 = vshll.u32 %v3700_v30, 16  ;;  %3401 = vmatprep.subr.bf16.mxu0 %v3557_v27  ;;  %v3558_v39 = vld [vmem:[%s3662_s8 + $0x24] sm:$0xff]   ;;  %v3559_v59 = vld [vmem:[%s3662_s8 + $0x30] sm:$0xff]  }
  0x16   : > { %v282_v25 = vor.u32 %v281_v20, %v278_v19  ;;  %v292_v28 = vor.u32 %v291_v23, %v287_v22  ;;  %v313_v37 = vshrl.u32 %v3700_v30, 16  ;;  %v319_v38 = vshll.u32 %v257_v31, 16  ;;  %v3714_v45 = vld [vmem:[%s3662_s8 + $0x18] sm:$0xf]  ;;  %v3720_v49 = vld [vmem:[%s3662_s8 + $0x1c] sm:$0xf] }
  0x17   : > { %v2931_v40 = vcombine.low %v3697_v29, %v3700_v30  ;;  %v302_v42 = vrot.slane %v300_v33, 4  ;;  %v305_v43 = vrot.slane %v303_v34, 5  ;;  %v311_v44 = vrot.slane %v309_v35, 5  ;;  %3370 = vmatmul.mubr.msk.bf16.vlgmr.msra.gmra.mrb[0].mxu0 %vm740_vm0, %v3556_v24  ;;  %v258_v50 = vld [vmem:[%s3662_s8 + $0x20] sm:$0x1] }
  0x18   : > { %v283_v32 = vrot.slane %v282_v25, 4  ;;  %v293_v36 = vrot.slane %v292_v28, 4  ;;  %v315_v47 = vrot.slane %v313_v37, 4  ;;  %v321_v48 = vrot.slane %v319_v38, 5  ;;  %3402 = vmatpush3.bf16.msra.mxu0 %v3557_v27  ;;  %3373 = vmatprep.mubr.msk.bf16.mxu0 %vm740_vm0, %v3558_v39  ;;  %v3730_v60 = vld [vmem:[%s3662_s8 + $0x24] sm:$0xf] }
  0x19   : > { %v306_v52 = vor.u32 %v305_v43, %v302_v42  ;;  %v324_v53 = vshrl.u32 %v3714_v45, 16  ;;  %v327_v54 = vshll.u32 %v3714_v45, 16  ;;  %v333_v56 = vshll.u32 %v3720_v49, 16  ;;  %v3734_v0 = vld [vmem:[%s3662_s8 + $0x28] sm:$0xf]  ;;  %v3560_v2 = vld [vmem:[%s3662_s8 + $0x3c] sm:$0xff]  }
  0x1a   : > { %v288_v41 = vsel %vm3688_vm3, %v283_v32, %v287_v22  ;;  %v298_v46 = vsel %vm3688_vm3, %v293_v36, %v297_v26  ;;  %v316_v55 = vor.u32 %v315_v47, %v311_v44  ;;  %v337_v57 = vshrl.u32 %v3720_v49, 16  ;;  %v259_v7 = vld [vmem:[%s3662_s8 + $0x2c] sm:$0x1]  ;;  %v3747_v20 = vld [vmem:[%s3662_s8 + $0x30] sm:$0xf] }
  0x1b   : > { %v2894_v51 = vcombine.low %v288_v41, %v298_v46  ;;  %v343_v58 = vshll.u32 %v258_v50, 16  ;;  %v307_v61 = vrot.slane %v306_v52, 4  ;;  %v326_v62 = vrot.slane %v324_v53, 4  ;;  %v3750_v22 = vld [vmem:[%s3662_s8 + $0x34] sm:$0xf]  ;;  %v3561_v28 = vld [vmem:[%s4334_s1 + $0x8] sm:$0xff]  }
  0x1c   : > { %v329_v63 = vrot.slane %v327_v54, 5  ;;  %v348_v1 = vshrl.u32 %v3730_v60, 16  ;;  %v317_v3 = vrot.slane %v316_v55, 4  ;;  %v335_v4 = vrot.slane %v333_v56, 5  ;;  %v260_v27 = vld [vmem:[%s3662_s8 + $0x38] sm:$0x1] }
  0x1d   : > { %3289 = vmatprep.mubr.msk.bf16.mxu1 %vm740_vm0, %v2894_v51  ;;  %v339_v5 = vrot.slane %v337_v57, 4  ;;  %v345_v6 = vrot.slane %v343_v58, 5  ;;  %v312_v8 = vsel %vm3688_vm3, %v307_v61, %v311_v44  ;;  %v351_v13 = vshll.u32 %v3730_v60, 16  ;;  %v3563_v44 = vld [vmem:[%s4334_s1 + $0x68] sm:$0xff]   ;;  %v3778_v58 = vld [vmem:[%s3662_s8 + $0x3c] sm:$0xf] }
  0x1e   : > { %v330_v11 = vor.u32 %v329_v63, %v326_v62  ;;  %v350_v12 = vrot.slane %v348_v1, 4  ;;  %v322_v14 = vsel %vm3688_vm3, %v317_v3, %v321_v48  ;;  %v357_v16 = vshll.u32 %v3734_v0, 16  ;;  %v3562_v53 = vld [vmem:[%s3662_s8 + $0x48] sm:$0xff]   ;;  %3403 = vmatprep.subr.bf16.mxu0 %v3563_v44  ;;  %v3564_v61 = vld [vmem:[%s3662_s8 + $0x54] sm:$0xff]  }
  0x1f   : > { %v340_v15 = vor.u32 %v339_v5, %v335_v4  ;;  %v361_v19 = vshrl.u32 %v3734_v0, 16  ;;  %v2895_v23 = vcombine.low %v312_v8, %v322_v14  ;;  %v353_v25 = vrot.slane %v351_v13, 5  ;;  %3374 = vmatmul.mubr.msk.bf16.gmra.mrb[4].mxu0 %vm740_vm0, %v3559_v59  ;;  %v3781_v59 = vld [vmem:[%s3662_s8 + $0x40] sm:$0xf]  ;;  %v3567_v5 = vld [vmem:[%s4334_s1 + $0x10] sm:$0xff]  }
  0x20   : > { %v331_v24 = vrot.slane %v330_v11, 4  ;;  %v367_v26 = vshll.u32 %v259_v7, 16  ;;  %v359_v32 = vrot.slane %v357_v16, 5  ;;  %v372_v34 = vshrl.u32 %v3747_v20, 16  ;;  %3377 = vmatprep.mubr.msk.bf16.mxu0 %vm740_vm0, %v3560_v2  ;;  %3404 = vmatpush3.bf16.msra.mxu0 %v3563_v44  ;;  %v261_v2 = vld [vmem:[%s3662_s8 + $0x44] sm:$0x1] }
  0x21   : > { %v341_v31 = vrot.slane %v340_v15, 4  ;;  %v363_v33 = vrot.slane %v361_v19, 4  ;;  %3290 = vmatmul.mubr.msk.bf16.vlgmr.msra.gmra.mrb[0].mxu1 %vm740_vm0, %v2895_v23  ;;  %v354_v36 = vor.u32 %v353_v25, %v350_v12  ;;  %v375_v38 = vshll.u32 %v3747_v20, 16  ;;  %v3798_v16 = vld [vmem:[%s3662_s8 + $0x48] sm:$0xf] }
  0x22   : > { %v336_v35 = vsel %vm3688_vm3, %v331_v24, %v335_v4  ;;  %v369_v37 = vrot.slane %v367_v26, 5  ;;  %3322 = vmatpush3.bf16.msra.mxu1 %v3683_v17  ;;  %v374_v42 = vrot.slane %v372_v34, 4  ;;  %v381_v43 = vshll.u32 %v3750_v22, 16  ;;  %v3805_v25 = vld [vmem:[%s3662_s8 + $0x4c] sm:$0xf]  ;;  %v3565_v34 = vld [vmem:[%s3662_s8 + $0x60] sm:$0xff]  }
  0x23   : > { %v346_v39 = vsel %vm3688_vm3, %v341_v31, %v345_v6  ;;  %v364_v41 = vor.u32 %v363_v33, %v359_v32  ;;  %v355_v47 = vrot.slane %v354_v36, 4  ;;  %v377_v48 = vrot.slane %v375_v38, 5  ;;  %3323 = vmatprep.subr.bf16.mxu1 %v3561_v28  ;;  %v262_v26 = vld [vmem:[%s3662_s8 + $0x50] sm:$0x1]  ;;  %v3058_v29 = vld [vmem:[%s3662_s8 + $0x4c] sm:$0xf] }
  0x24   : > { %v2896_v46 = vcombine.low %v336_v35, %v346_v39  ;;  %v385_v50 = vshrl.u32 %v3750_v22, 16  ;;  %v383_v51 = vrot.slane %v381_v43, 5  ;;  %v391_v52 = vshll.u32 %v260_v27, 16  ;;  %v3566_v39 = vld [vmem:[%s3662_s8 + $0x6c] sm:$0xff]  }
  0x25   : > { %v365_v17 = vrot.slane %v364_v41, 4  ;;  %v360_v55 = vsel %vm3688_vm3, %v355_v47, %v359_v32  ;;  %v378_v56 = vor.u32 %v377_v48, %v374_v42  ;;  %v396_v3 = vshrl.u32 %v3778_v58, 16  ;;  %v3569_v41 = vld [vmem:[%s4334_s1 + $0x70] sm:$0xff]   ;;  %v3825_v48 = vld [vmem:[%s3662_s8 + $0x58] sm:$0xf] }
  0x26   : > { %3293 = vmatprep.mubr.msk.bf16.mxu1 %vm740_vm0, %v2896_v46  ;;  %v387_v57 = vrot.slane %v385_v50, 4  ;;  %v393_v1 = vrot.slane %v391_v52, 5  ;;  %v399_v4 = vshll.u32 %v3778_v58, 16  ;;  %3324 = vmatpush3.bf16.msra.mxu1 %v3561_v28  ;;  %v405_v11 = vshll.u32 %v3781_v59, 16  ;;  %v3822_v47 = vld [vmem:[%s3662_s8 + $0x54] sm:$0xf] }
  0x27   : > { %v370_v63 = vsel %vm3688_vm3, %v365_v17, %v369_v37  ;;  %v379_v7 = vrot.slane %v378_v56, 4  ;;  %3378 = vmatmul.mubr.msk.bf16.gmra.mrb[8].mxu0 %vm740_vm0, %v3562_v53  ;;  %v398_v12 = vrot.slane %v396_v3, 4  ;;  %v409_v14 = vshrl.u32 %v3781_v59, 16  ;;  %3325 = vmatprep.subr.bf16.mxu1 %v3567_v5  ;;  %v263_v53 = vld [vmem:[%s3662_s8 + $0x5c] sm:$0x1] }
  0x28   : > { %v2897_v6 = vcombine.low %v360_v55, %v370_v63  ;;  %v388_v8 = vor.u32 %v387_v57, %v383_v51  ;;  %v401_v13 = vrot.slane %v399_v4, 5  ;;  %v415_v15 = vshll.u32 %v261_v2, 16  ;;  %3381 = vmatprep.mubr.msk.bf16.mxu0 %vm740_vm0, %v3564_v61  ;;  %3405 = vmatprep.subr.bf16.mxu0 %v3569_v41  ;;  %v3835_v4 = vld [vmem:[%s3662_s8 + $0x60] sm:$0xf] }
  0x29   : > { %v384_v19 = vsel %vm3688_vm3, %v379_v7, %v383_v51  ;;  %v407_v24 = vrot.slane %v405_v11, 5  ;;  %v411_v31 = vrot.slane %v409_v14, 4  ;;  %v420_v33 = vshrl.u32 %v3798_v16, 16  ;;  %3406 = vmatpush3.bf16.msra.mxu0 %v3569_v41  ;;  %v3842_v11 = vld [vmem:[%s3662_s8 + $0x64] sm:$0xf] }
  0x2a   : > { %3294 = vmatmul.mubr.msk.bf16.gmra.mrb[4].mxu1 %vm740_vm0, %v2897_v6  ;;  %v389_v23 = vrot.slane %v388_v8, 4  ;;  %v402_v28 = vor.u32 %v401_v13, %v398_v12  ;;  %v417_v32 = vrot.slane %v415_v15, 5  ;;  %v423_v36 = vshll.u32 %v3798_v16, 16 }
  0x2b   : > { %3326 = vmatpush3.bf16.msra.mxu1 %v3567_v5  ;;  %v429_v37 = vshll.u32 %v3805_v25, 16  ;;  %v433_v38 = vshrl.u32 %v3805_v25, 16  ;;  %v412_v44 = vor.u32 %v411_v31, %v407_v24  ;;  %v422_v46 = vrot.slane %v420_v33, 4  ;;  %v3568_v31 = vld [vmem:[%s3662_s8 + $0x78] sm:$0xff]  }
  0x2c   : > { %v394_v35 = vsel %vm3688_vm3, %v389_v23, %v393_v1  ;;  %v403_v43 = vrot.slane %v402_v28, 4  ;;  %v425_v50 = vrot.slane %v423_v36, 5  ;;  %v439_v52 = vshll.u32 %v262_v26, 16 }
  0x2d   : > { %v2898_v42 = vcombine.low %v384_v19, %v394_v35  ;;  %v431_v17 = vrot.slane %v429_v37, 5  ;;  %v435_v51 = vrot.slane %v433_v38, 4  ;;  %v413_v56 = vrot.slane %v412_v44, 4  ;;  %v264_v19 = vld [vmem:[%s3662_s8 + $0x68] sm:$0x1] }
  0x2e   : > { %v408_v55 = vsel %vm3688_vm3, %v403_v43, %v407_v24  ;;  %v444_v57 = vshrl.u32 %v3822_v47, 16  ;;  %v447_v61 = vshll.u32 %v3822_v47, 16  ;;  %v426_v63 = vor.u32 %v425_v50, %v422_v46  ;;  %v3570_v37 = vld [vmem:[%s3662_s8 + $0x84] sm:$0xff]  }
  0x2f   : > { %3297 = vmatprep.mubr.msk.bf16.mxu1 %vm740_vm0, %v2898_v42  ;;  %v436_v1 = vor.u32 %v435_v51, %v431_v17  ;;  %v441_v2 = vrot.slane %v439_v52, 5  ;;  %v453_v3 = vshll.u32 %v3825_v48, 16  ;;  %v418_v5 = vsel %vm3688_vm3, %v413_v56, %v417_v32  ;;  %3382 = vmatmul.mubr.msk.bf16.gmra.mrb[12].mxu0 %vm740_vm0, %v3565_v34  ;;  %v3573_v32 = vld [vmem:[%s4334_s1 + $0x18] sm:$0xff]  }
  0x30   : > { %v446_v6 = vrot.slane %v444_v57, 4  ;;  %v449_v7 = vrot.slane %v447_v61, 5  ;;  %v457_v8 = vshrl.u32 %v3825_v48, 16  ;;  %v2899_v12 = vcombine.low %v408_v55, %v418_v5  ;;  %3385 = vmatprep.mubr.msk.bf16.mxu0 %vm740_vm0, %v3566_v39  ;;  %3327 = vmatprep.subr.bf16.mxu1 %v3573_v32  ;;  %v3867_v55 = vld [vmem:[%s3662_s8 + $0x70] sm:$0xf] }
  0x31   : > { %v427_v13 = vrot.slane %v426_v63, 4  ;;  %v437_v14 = vrot.slane %v436_v1, 4  ;;  %v455_v15 = vrot.slane %v453_v3, 5  ;;  %v463_v26 = vshll.u32 %v263_v53, 16  ;;  %3328 = vmatpush3.bf16.msra.mxu1 %v3573_v32  ;;  %v3864_v53 = vld [vmem:[%s3662_s8 + $0x6c] sm:$0xf] }
  0x32   : > { %v450_v23 = vor.u32 %v449_v7, %v446_v6  ;;  %v459_v24 = vrot.slane %v457_v8, 4  ;;  %v468_v28 = vshrl.u32 %v3835_v4, 16  ;;  %3298 = vmatmul.mubr.msk.bf16.gmra.mrb[8].mxu1 %vm740_vm0, %v2899_v12  ;;  %v471_v35 = vshll.u32 %v3835_v4, 16  ;;  %v265_v63 = vld [vmem:[%s3662_s8 + $0x74] sm:$0x1]  ;;  %v3575_v8 = vld [vmem:[%s4334_s1 + $0x78] sm:$0xff]  }
  0x33   : > { %v432_v33 = vsel %vm3688_vm3, %v427_v13, %v431_v17  ;;  %v442_v34 = vsel %vm3688_vm3, %v437_v14, %v441_v2  ;;  %v477_v36 = vshll.u32 %v3842_v11, 16  ;;  %v465_v42 = vrot.slane %v463_v26, 5  ;;  %3407 = vmatprep.subr.bf16.mxu0 %v3575_v8 }
  0x34   : > { %v2900_v38 = vcombine.low %v432_v33, %v442_v34  ;;  %v451_v39 = vrot.slane %v450_v23, 4  ;;  %v460_v41 = vor.u32 %v459_v24, %v455_v15  ;;  %v470_v43 = vrot.slane %v468_v28, 4  ;;  %v266_v34 = vld [vmem:[%s3662_s8 + $0x80] sm:$0x1]  ;;  %3408 = vmatpush3.bf16.msra.mxu0 %v3575_v8 }
  0x35   : > { %v473_v44 = vrot.slane %v471_v35, 5  ;;  %v479_v46 = vrot.slane %v477_v36, 5  ;;  %v481_v50 = vshrl.u32 %v3842_v11, 16  ;;  %v487_v52 = vshll.u32 %v264_v19, 16  ;;  %v3884_v19 = vld [vmem:[%s3662_s8 + $0x78] sm:$0xf] }
  0x36   : > { %3301 = vmatprep.mubr.msk.bf16.mxu1 %vm740_vm0, %v2900_v38  ;;  %v456_v17 = vsel %vm3688_vm3, %v451_v39, %v455_v15  ;;  %v461_v51 = vrot.slane %v460_v41, 4  ;;  %v492_v1 = vshrl.u32 %v3864_v53, 16  ;;  %v495_v2 = vshll.u32 %v3864_v53, 16 }
  0x37   : > { %v474_v57 = vor.u32 %v473_v44, %v470_v43  ;;  %v483_v61 = vrot.slane %v481_v50, 4  ;;  %v489_v5 = vrot.slane %v487_v52, 5  ;;  %3386 = vmatmul.mubr.msk.bf16.gmra.mrb[16].mxu0 %vm740_vm0, %v3568_v31  ;;  %v501_v6 = vshll.u32 %v3867_v55, 16  ;;  %v3887_v31 = vld [vmem:[%s3662_s8 + $0x7c] sm:$0xf] }
  0x38   : > { %v466_v3 = vsel %vm3688_vm3, %v461_v51, %v465_v42  ;;  %v505_v7 = vshrl.u32 %v3867_v55, 16  ;;  %v494_v15 = vrot.slane %v492_v1, 4  ;;  %3389 = vmatprep.mubr.msk.bf16.mxu0 %vm740_vm0, %v3570_v37  ;;  %v497_v23 = vrot.slane %v495_v2, 5  ;;  %v3571_v37 = vld [vmem:[%s3662_s8 + $0x90] sm:$0xff]   ;;  %v3572_v51 = vld [vmem:[%s3662_s8 + $0x9c] sm:$0xff]  }
  0x39   : > { %v2901_v12 = vcombine.low %v456_v17, %v466_v3  ;;  %v475_v13 = vrot.slane %v474_v57, 4  ;;  %v484_v14 = vor.u32 %v483_v61, %v479_v46  ;;  %v503_v24 = vrot.slane %v501_v6, 5  ;;  %v3901_v17 = vld [vmem:[%s3662_s8 + $0x84] sm:$0xf]  ;;  %v3905_v1 = vld [vmem:[%s3662_s8 + $0x88] sm:$0xf] }
  0x3a   : > { %v507_v26 = vrot.slane %v505_v7, 4  ;;  %v511_v28 = vshll.u32 %v265_v63, 16  ;;  %v516_v35 = vshrl.u32 %v3884_v19, 16  ;;  %v519_v36 = vshll.u32 %v3884_v19, 16  ;;  %v267_v7 = vld [vmem:[%s3662_s8 + $0x8c] sm:$0x1] }
  0x3b   : > { %3302 = vmatmul.mubr.msk.bf16.gmra.mrb[12].mxu1 %vm740_vm0, %v2901_v12  ;;  %v480_v32 = vsel %vm3688_vm3, %v475_v13, %v479_v46  ;;  %v485_v33 = vrot.slane %v484_v14, 4  ;;  %v498_v38 = vor.u32 %v497_v23, %v494_v15  ;;  %v525_v42 = vshll.u32 %v3887_v31, 16 }
  0x3c   : > { %v508_v39 = vor.u32 %v507_v26, %v503_v24  ;;  %v513_v41 = vrot.slane %v511_v28, 5  ;;  %v518_v44 = vrot.slane %v516_v35, 4  ;;  %v521_v46 = vrot.slane %v519_v36, 5 }
  0x3d   : > { %v490_v43 = vsel %vm3688_vm3, %v485_v33, %v489_v5  ;;  %v529_v50 = vshrl.u32 %v3887_v31, 16  ;;  %v499_v57 = vrot.slane %v498_v38, 4  ;;  %v527_v63 = vrot.slane %v525_v42, 5 }
  0x3e   : > { %v2902_v52 = vcombine.low %v480_v32, %v490_v43  ;;  %v509_v61 = vrot.slane %v508_v39, 4  ;;  %v522_v2 = vor.u32 %v521_v46, %v518_v44  ;;  %v535_v6 = vshll.u32 %v266_v34, 16  ;;  %v3919_v32 = vld [vmem:[%s3662_s8 + $0x90] sm:$0xf] }
  0x3f   : > { %v531_v3 = vrot.slane %v529_v50, 4  ;;  %v540_v5 = vshrl.u32 %v3901_v17, 16  ;;  %v504_v8 = vsel %vm3688_vm3, %v499_v57, %v503_v24  ;;  %3390 = vmatmul.mubr.msk.bf16.gmra.mrb[20].mxu0 %vm740_vm0, %v3571_v37  ;;  %v543_v13 = vshll.u32 %v3901_v17, 16  ;;  %v3922_v24 = vld [vmem:[%s3662_s8 + $0x94] sm:$0xf] }
  0x40   : > { %3305 = vmatprep.mubr.msk.bf16.mxu1 %vm740_vm0, %v2902_v52  ;;  %v514_v12 = vsel %vm3688_vm3, %v509_v61, %v513_v41  ;;  %v549_v14 = vshll.u32 %v3905_v1, 16  ;;  %v523_v23 = vrot.slane %v522_v2, 4  ;;  %v537_v28 = vrot.slane %v535_v6, 5  ;;  %3393 = vmatprep.mubr.msk.bf16.mxu0 %vm740_vm0, %v3572_v51  ;;  %v268_v37 = vld [vmem:[%s3662_s8 + $0x98] sm:$0x1]  ;;  %v3574_v51 = vld [vmem:[%s3662_s8 + $0xa8] sm:$0xff]  }
  0x41   : > { %v2903_v15 = vcombine.low %v504_v8, %v514_v12  ;;  %v532_v26 = vor.u32 %v531_v3, %v527_v63  ;;  %v542_v33 = vrot.slane %v540_v5, 4  ;;  %v545_v34 = vrot.slane %v543_v13, 5 }
  0x42   : > { %v551_v35 = vrot.slane %v549_v14, 5  ;;  %v553_v36 = vshrl.u32 %v3905_v1, 16  ;;  %v528_v38 = vsel %vm3688_vm3, %v523_v23, %v527_v63  ;;  %v559_v41 = vshll.u32 %v267_v7, 16  ;;  %v3576_v63 = vld [vmem:[%s3662_s8 + $0xb4] sm:$0xff]  }
  0x43   : > { %3306 = vmatmul.mubr.msk.bf16.gmra.mrb[16].mxu1 %vm740_vm0, %v2903_v15  ;;  %v533_v39 = vrot.slane %v532_v26, 4  ;;  %v564_v42 = vshrl.u32 %v3919_v32, 16  ;;  %v546_v43 = vor.u32 %v545_v34, %v542_v33  ;;  %v567_v46 = vshll.u32 %v3919_v32, 16  ;;  %v3947_v33 = vld [vmem:[%s3662_s8 + $0xa0] sm:$0xf] }
  0x44   : > { %v555_v44 = vrot.slane %v553_v36, 4  ;;  %v573_v50 = vshll.u32 %v3922_v24, 16  ;;  %v561_v57 = vrot.slane %v559_v41, 5  ;;  %v577_v2 = vshrl.u32 %v3922_v24, 16 }
  0x45   : > { %v538_v52 = vsel %vm3688_vm3, %v533_v39, %v537_v28  ;;  %v566_v61 = vrot.slane %v564_v42, 4  ;;  %v547_v6 = vrot.slane %v546_v43, 4  ;;  %v569_v5 = vrot.slane %v567_v46, 5  ;;  %v3944_v28 = vld [vmem:[%s3662_s8 + $0x9c] sm:$0xf] }
  0x46   : > { %v2904_v3 = vcombine.low %v528_v38, %v538_v52  ;;  %v556_v7 = vor.u32 %v555_v44, %v551_v35  ;;  %v575_v8 = vrot.slane %v573_v50, 5  ;;  %v579_v12 = vrot.slane %v577_v2, 4  ;;  %v269_v38 = vld [vmem:[%s3662_s8 + $0xa4] sm:$0x1] }
  0x47   : > { %v583_v13 = vshll.u32 %v268_v37, 16  ;;  %v552_v15 = vsel %vm3688_vm3, %v547_v6, %v551_v35  ;;  %v570_v26 = vor.u32 %v569_v5, %v566_v61  ;;  %3394 = vmatmul.mubr.msk.bf16.gmra.mrb[24].mxu0 %vm740_vm0, %v3574_v51  ;;  %v588_v39 = vshrl.u32 %v3944_v28, 16  ;;  %v3962_v6 = vld [vmem:[%s3662_s8 + $0xa8] sm:$0xf] }
  0x48   : > { %3309 = vmatprep.mubr.msk.bf16.mxu1 %vm740_vm0, %v2904_v3  ;;  %v557_v23 = vrot.slane %v556_v7, 4  ;;  %v580_v36 = vor.u32 %v579_v12, %v575_v8  ;;  %v591_v35 = vshll.u32 %v3944_v28, 16  ;;  %3397 = vmatprep.mubr.msk.bf16.mxu0 %vm740_vm0, %v3576_v63  ;;  %v597_v43 = vshll.u32 %v3947_v33, 16  ;;  %v3969_v12 = vld [vmem:[%s3662_s8 + $0xac] sm:$0xf] }
  0x49   : > { %v585_v37 = vrot.slane %v583_v13, 5  ;;  %v571_v42 = vrot.slane %v570_v26, 4  ;;  %v601_v44 = vshrl.u32 %v3947_v33, 16  ;;  %v590_v51 = vrot.slane %v588_v39, 4  ;;  %v270_v13 = vld [vmem:[%s3662_s8 + $0xb0] sm:$0x1] }
  0x4a   : > { %v562_v41 = vsel %vm3688_vm3, %v557_v23, %v561_v57  ;;  %v581_v50 = vrot.slane %v580_v36, 4  ;;  %v593_v52 = vrot.slane %v591_v35, 5  ;;  %v599_v2 = vrot.slane %v597_v43, 5  ;;  %v3577_v57 = vld [vmem:[%s3662_s8 + $0xc0] sm:$0xff]  }
  0x4b   : > { %v2905_v46 = vcombine.low %v552_v15, %v562_v41  ;;  %v576_v61 = vsel %vm3688_vm3, %v571_v42, %v575_v8  ;;  %v603_v3 = vrot.slane %v601_v44, 4  ;;  %v607_v63 = vshll.u32 %v269_v38, 16  ;;  %v3977_v42 = vld [vmem:[%s3662_s8 + $0xb4] sm:$0xf] }
  0x4c   : > { %v586_v7 = vsel %vm3688_vm3, %v581_v50, %v585_v37  ;;  %v594_v5 = vor.u32 %v593_v52, %v590_v51  ;;  %v612_v15 = vshrl.u32 %v3962_v6, 16  ;;  %v615_v8 = vshll.u32 %v3962_v6, 16  ;;  %v3982_v50 = vld [vmem:[%s3662_s8 + $0xb8] sm:$0xf] }
  0x4d   : > { %3310 = vmatmul.mubr.msk.bf16.gmra.mrb[20].mxu1 %vm740_vm0, %v2905_v46  ;;  %v2906_v23 = vcombine.low %v576_v61, %v586_v7  ;;  %v604_v26 = vor.u32 %v603_v3, %v599_v2  ;;  %v609_v36 = vrot.slane %v607_v63, 5  ;;  %v621_v38 = vshll.u32 %v3969_v12, 16  ;;  %v271_v63 = vld [vmem:[%s3662_s8 + $0xbc] sm:$0x1] }
  0x4e   : > { %v595_v39 = vrot.slane %v594_v5, 4  ;;  %v614_v35 = vrot.slane %v612_v15, 4  ;;  %v617_v41 = vrot.slane %v615_v8, 5  ;;  %v625_v37 = vshrl.u32 %v3969_v12, 16  ;;  %v3042_v5 = vld [vmem:[%s3662_s8 + $0xc] sm:$0xf] }
  0x4f   : > { %3313 = vmatprep.mubr.msk.bf16.mxu1 %vm740_vm0, %v2906_v23  ;;  %v605_v43 = vrot.slane %v604_v26, 4  ;;  %v623_v44 = vrot.slane %v621_v38, 5  ;;  %v631_v46 = vshll.u32 %v270_v13, 16  ;;  %3398 = vmatmul.mubr.msk.bf16.gmra.mrb[28].mxu0 %vm740_vm0, %v3577_v57  ;;  %v636_v51 = vshrl.u32 %v3977_v42, 16 }
  0x50   : > { %v600_v52 = vsel %vm3688_vm3, %v595_v39, %v599_v2  ;;  %v618_v61 = vor.u32 %v617_v41, %v614_v35  ;;  %v627_v3 = vrot.slane %v625_v37, 4  ;;  %v639_v7 = vshll.u32 %v3977_v42, 16  ;;  %v3043_v2 = vld [vmem:[%s3662_s8 + $0x10] sm:$0xf] }
  0x51   : > { %v610_v15 = vsel %vm3688_vm3, %v605_v43, %v609_v36  ;;  %v633_v13 = vrot.slane %v631_v46, 5  ;;  %v638_v57 = vrot.slane %v636_v51, 4  ;;  %v645_v8 = vshll.u32 %v3982_v50, 16  ;;  %v3044_v51 = vld [vmem:[%s3662_s8 + $0x14] sm:$0x1] }
  0x52   : > { %v2907_v23 = vcombine.low %v600_v52, %v610_v15  ;;  %v619_v26 = vrot.slane %v618_v61, 4  ;;  %v628_v38 = vor.u32 %v627_v3, %v623_v44  ;;  %v641_v34 = vrot.slane %v639_v7, 5 }
  0x53   : > { %v647_v39 = vrot.slane %v645_v8, 5  ;;  %v649_v35 = vshrl.u32 %v3982_v50, 16  ;;  %v655_v41 = vshll.u32 %v271_v63, 16  ;;  %v1699_v37 = vshrl.u32 %v3042_v5, 16  ;;  %v3045_v8 = vld [vmem:[%s3662_s8 + $0x18] sm:$0xf] }
  0x54   : > { %v624_v36 = vsel %vm3688_vm3, %v619_v26, %v623_v44  ;;  %v629_v43 = vrot.slane %v628_v38, 4  ;;  %v642_v46 = vor.u32 %v641_v34, %v638_v57  ;;  %v1702_v52 = vshll.u32 %v3042_v5, 16  ;;  %v3047_v38 = vld [vmem:[%s3662_s8 + $0x20] sm:$0x1] }
  0x55   : > { %3314 = vmatmul.mubr.msk.bf16.gmra.mrb[24].mxu1 %vm740_vm0, %v2907_v23  ;;  %v651_v61 = vrot.slane %v649_v35, 4  ;;  %v657_v3 = vrot.slane %v655_v41, 5  ;;  %v1701_v7 = vrot.slane %v1699_v37, 4  ;;  %v1708_v15 = vshll.u32 %v3043_v2, 16  ;;  %v3046_v23 = vld [vmem:[%s3662_s8 + $0x1c] sm:$0xf] }
  0x56   : > { %v634_v63 = vsel %vm3688_vm3, %v629_v43, %v633_v13  ;;  %v643_v14 = vrot.slane %v642_v46, 4  ;;  %v1704_v56 = vrot.slane %v1702_v52, 5  ;;  %v1712_v27 = vshrl.u32 %v3043_v2, 16 }
  0x57   : > { %v2908_v62 = vcombine.low %v624_v36, %v634_v63  ;;  %v652_v54 = vor.u32 %v651_v61, %v647_v39  ;;  %v1710_v44 = vrot.slane %v1708_v15, 5  ;;  %v1718_v34 = vshll.u32 %v3044_v51, 16  ;;  %v3048_v51 = vld [vmem:[%s3662_s8 + $0x24] sm:$0xf]  ;;  %v3049_v61 = vld [vmem:[%s3662_s8 + $0x28] sm:$0xf] }
  0x58   : > { %v648_v5 = vsel %vm3688_vm3, %v643_v14, %v647_v39  ;;  %v1705_v57 = vor.u32 %v1704_v56, %v1701_v7  ;;  %v1714_v26 = vrot.slane %v1712_v27, 4  ;;  %v1723_v35 = vshrl.u32 %v3045_v8, 16 }
  0x59   : > { %3317 = vmatprep.mubr.msk.bf16.mxu1 %vm740_vm0, %v2908_v62  ;;  %v653_v13 = vrot.slane %v652_v54, 4  ;;  %v1720_v41 = vrot.slane %v1718_v34, 5  ;;  %v1726_v37 = vshll.u32 %v3045_v8, 16  ;;  %v1732_v2 = vshll.u32 %v3046_v23, 16  ;;  %v3050_v34 = vld [vmem:[%s3662_s8 + $0x2c] sm:$0x1] }
  0x5a   : > { %v1706_v43 = vrot.slane %v1705_v57, 4  ;;  %v1715_v36 = vor.u32 %v1714_v26, %v1710_v44  ;;  %v1725_v46 = vrot.slane %v1723_v35, 4  ;;  %v1736_v52 = vshrl.u32 %v3046_v23, 16  ;;  %v3051_v35 = vld [vmem:[%s3662_s8 + $0x30] sm:$0xf] }
  0x5b   : > { %v658_v14 = vsel %vm3688_vm3, %v653_v13, %v657_v3  ;;  %v1728_v56 = vrot.slane %v1726_v37, 5  ;;  %v1734_v27 = vrot.slane %v1732_v2, 5  ;;  %v1742_v39 = vshll.u32 %v3047_v38, 16 }
  0x5c   : > { %v2909_v7 = vcombine.low %v648_v5, %v658_v14  ;;  %v1711_v54 = vsel %vm3688_vm3, %v1706_v43, %v1710_v44  ;;  %v1716_v62 = vrot.slane %v1715_v36, 4  ;;  %v1738_v15 = vrot.slane %v1736_v52, 4  ;;  %v3052_v43 = vld [vmem:[%s3662_s8 + $0x34] sm:$0xf] }
  0x5d   : > { %v1729_v8 = vor.u32 %v1728_v56, %v1725_v46  ;;  %v1744_v63 = vrot.slane %v1742_v39, 5  ;;  %v1747_v23 = vshrl.u32 %v3048_v51, 16  ;;  %v1750_v57 = vshll.u32 %v3048_v51, 16  ;;  %v3053_v56 = vld [vmem:[%s3662_s8 + $0x38] sm:$0x1] }
  0x5e   : > { %3318 = vmatmul.mubr.msk.bf16.gmra.mrb[28].mxu1 %vm740_vm0, %v2909_v7  ;;  %v1721_v3 = vsel %vm3688_vm3, %v1716_v62, %v1720_v41  ;;  %v1739_v26 = vor.u32 %v1738_v15, %v1734_v27  ;;  %v1756_v38 = vshll.u32 %v3049_v61, 16  ;;  %v1760_v5 = vshrl.u32 %v3049_v61, 16 }
  0x5f   : > { %v3098_v13 = vcombine.low %v1711_v54, %v1721_v3  ;;  %3329 = vmatprep.mubr.msk.bf16.mxu1 %vm740_vm0, %v2930_v18  ;;  %v1730_v44 = vrot.slane %v1729_v8, 4  ;;  %v1749_v37 = vrot.slane %v1747_v23, 4  ;;  %v1752_v2 = vrot.slane %v1750_v57, 5  ;;  %v3054_v54 = vld [vmem:[%s3662_s8 + $0x3c] sm:$0xf] }
  0x60   : > { %v1740_v36 = vrot.slane %v1739_v26, 4  ;;  %v1758_v46 = vrot.slane %v1756_v38, 5  ;;  %v1762_v52 = vrot.slane %v1760_v5, 4  ;;  %v1766_v41 = vshll.u32 %v3050_v34, 16  ;;  %v3055_v23 = vld [vmem:[%s3662_s8 + $0x40] sm:$0xf] }
  0x61   : > { %3409 = vmatprep.mubr.msk.bf16.mxu0 %vm740_vm0, %v3098_v13  ;;  %v1735_v51 = vsel %vm3688_vm3, %v1730_v44, %v1734_v27  ;;  %v1753_v14 = vor.u32 %v1752_v2, %v1749_v37  ;;  %v1771_v9 = vshrl.u32 %v3051_v35, 16  ;;  %v1774_v10 = vshll.u32 %v3051_v35, 16  ;;  %v3056_v5 = vld [vmem:[%s3662_s8 + $0x44] sm:$0x1] }
  0x62   : > { %v1745_v18 = vsel %vm3688_vm3, %v1740_v36, %v1744_v63  ;;  %v1763_v39 = vor.u32 %v1762_v52, %v1758_v46  ;;  %v1768_v61 = vrot.slane %v1766_v41, 5  ;;  %v1780_v7 = vshll.u32 %v3052_v43, 16  ;;  %v3057_v36 = vld [vmem:[%s3662_s8 + $0x48] sm:$0xf] }
  0x63   : > { %v3099_v62 = vcombine.low %v1735_v51, %v1745_v18  ;;  %v1754_v15 = vrot.slane %v1753_v14, 4  ;;  %v1773_v8 = vrot.slane %v1771_v9, 4  ;;  %v1776_v34 = vrot.slane %v1774_v10, 5 }
  0x64   : > { %v1764_v57 = vrot.slane %v1763_v39, 4  ;;  %v1782_v27 = vrot.slane %v1780_v7, 5  ;;  %v1784_v3 = vshrl.u32 %v3052_v43, 16  ;;  %v1790_v26 = vshll.u32 %v3053_v56, 16  ;;  %v3059_v39 = vld [vmem:[%s3662_s8 + $0x50] sm:$0x1] }
  0x65   : > { %3410 = vmatmul.mubr.msk.bf16.vlgmr.msra.gmra.mrb[0].mxu0 %vm740_vm0, %v3099_v62  ;;  %v1759_v63 = vsel %vm3688_vm3, %v1754_v15, %v1758_v46  ;;  %v1777_v38 = vor.u32 %v1776_v34, %v1773_v8  ;;  %v1795_v35 = vshrl.u32 %v3054_v54, 16  ;;  %v1798_v13 = vshll.u32 %v3054_v54, 16 }
  0x66   : > { %3330 = vmatmul.mubr.msk.bf16.vlgmr.msra.gmra.mrb[0].mxu1 %vm740_vm0, %v2931_v40  ;;  %v1769_v44 = vsel %vm3688_vm3, %v1764_v57, %v1768_v61  ;;  %v1786_v37 = vrot.slane %v1784_v3, 4  ;;  %v1792_v2 = vrot.slane %v1790_v26, 5  ;;  %v1804_v43 = vshll.u32 %v3055_v23, 16  ;;  %v3060_v57 = vld [vmem:[%s3662_s8 + $0x54] sm:$0xf] }
  0x67   : > { %v3100_v52 = vcombine.low %v1759_v63, %v1769_v44  ;;  %v4340_v46 = vcombine.low %v3714_v45, %v3720_v49  ;;  %v1778_v41 = vrot.slane %v1777_v38, 4  ;;  %v1797_v51 = vrot.slane %v1795_v35, 4  ;;  %v3061_v38 = vld [vmem:[%s3662_s8 + $0x58] sm:$0xf] }
  0x68   : > { %v1800_v14 = vrot.slane %v1798_v13, 5  ;;  %v1787_v30 = vor.u32 %v1786_v37, %v1782_v27  ;;  %v1806_v40 = vrot.slane %v1804_v43, 5  ;;  %v1808_v56 = vshrl.u32 %v3055_v23, 16  ;;  %v3062_v37 = vld [vmem:[%s3662_s8 + $0x5c] sm:$0x1] }
  0x69   : > { %3333 = vmatprep.mubr.msk.bf16.mxu1 %vm740_vm0, %v4340_v46  ;;  %v1814_v9 = vshll.u32 %v3056_v5, 16  ;;  %3413 = vmatprep.mubr.msk.bf16.mxu0 %vm740_vm0, %v3100_v52  ;;  %v1783_v10 = vsel %vm3688_vm3, %v1778_v41, %v1782_v27  ;;  %v1819_v45 = vshrl.u32 %v3057_v36, 16  ;;  %v1822_v49 = vshll.u32 %v3057_v36, 16 }
  0x6a   : > { %v1801_v18 = vor.u32 %v1800_v14, %v1797_v51  ;;  %v1788_v61 = vrot.slane %v1787_v30, 4  ;;  %v1810_v7 = vrot.slane %v1808_v56, 4  ;;  %v1828_v62 = vshll.u32 %v3058_v29, 16 }
  0x6b   : > { %v1816_v54 = vrot.slane %v1814_v9, 5  ;;  %v1821_v8 = vrot.slane %v1819_v45, 4  ;;  %v1824_v34 = vrot.slane %v1822_v49, 5  ;;  %v1832_v23 = vshrl.u32 %v3058_v29, 16 }
  0x6c   : > { %v1802_v15 = vrot.slane %v1801_v18, 4  ;;  %v1793_v3 = vsel %vm3688_vm3, %v1788_v61, %v1792_v2  ;;  %v1811_v26 = vor.u32 %v1810_v7, %v1806_v40  ;;  %v1830_v27 = vrot.slane %v1828_v62, 5  ;;  %v3065_v7 = vld [vmem:[%s3662_s8 + $0x68] sm:$0x1] }
  0x6d   : > { %v1838_v63 = vshll.u32 %v3059_v39, 16  ;;  %v3101_v5 = vcombine.low %v1783_v10, %v1793_v3  ;;  %v1825_v13 = vor.u32 %v1824_v34, %v1821_v8  ;;  %v1834_v44 = vrot.slane %v1832_v23, 4  ;;  %v3064_v10 = vld [vmem:[%s3662_s8 + $0x64] sm:$0xf]  ;;  %v3066_v23 = vld [vmem:[%s3662_s8 + $0x6c] sm:$0xf] }
  0x6e   : > { %v1807_v35 = vsel %vm3688_vm3, %v1802_v15, %v1806_v40  ;;  %v4341_v43 = vcombine.low %v3730_v60, %v3734_v0  ;;  %v1812_v36 = vrot.slane %v1811_v26, 4  ;;  %v1843_v52 = vshrl.u32 %v3060_v57, 16  ;;  %v3063_v60 = vld [vmem:[%s3662_s8 + $0x60] sm:$0xf] }
  0x6f   : > { %v1840_v2 = vrot.slane %v1838_v63, 5  ;;  %v1846_v46 = vshll.u32 %v3060_v57, 16  ;;  %3414 = vmatmul.mubr.msk.bf16.gmra.mrb[4].mxu0 %vm740_vm0, %v3101_v5  ;;  %v4342_v41 = vcombine.low %v3747_v20, %v3750_v22  ;;  %v1826_v51 = vrot.slane %v1825_v13, 4  ;;  %v3067_v63 = vld [vmem:[%s3662_s8 + $0x70] sm:$0xf] }
  0x70   : > { %3334 = vmatmul.mubr.msk.bf16.gmra.mrb[4].mxu1 %vm740_vm0, %v4341_v43  ;;  %v1835_v14 = vor.u32 %v1834_v44, %v1830_v27  ;;  %v1852_v29 = vshll.u32 %v3061_v38, 16  ;;  %v1856_v30 = vshrl.u32 %v3061_v38, 16  ;;  %v1817_v0 = vsel %vm3688_vm3, %v1812_v36, %v1816_v54 }
  0x71   : > { %3337 = vmatprep.mubr.msk.bf16.mxu1 %vm740_vm0, %v4342_v41  ;;  %v1845_v40 = vrot.slane %v1843_v52, 4  ;;  %v1848_v56 = vrot.slane %v1846_v46, 5  ;;  %v1862_v9 = vshll.u32 %v3062_v37, 16  ;;  %v3102_v18 = vcombine.low %v1807_v35, %v1817_v0  ;;  %v3069_v0 = vld [vmem:[%s3662_s8 + $0x78] sm:$0xf] }
  0x72   : > { %v1831_v20 = vsel %vm3688_vm3, %v1826_v51, %v1830_v27  ;;  %v1836_v22 = vrot.slane %v1835_v14, 4  ;;  %v1854_v39 = vrot.slane %v1852_v29, 5  ;;  %v1858_v49 = vrot.slane %v1856_v30, 4 }
  0x73   : > { %v1849_v45 = vor.u32 %v1848_v56, %v1845_v40  ;;  %v1864_v61 = vrot.slane %v1862_v9, 5  ;;  %v1867_v62 = vshrl.u32 %v3063_v60, 16  ;;  %3417 = vmatprep.mubr.msk.bf16.mxu0 %vm740_vm0, %v3102_v18  ;;  %v1870_v15 = vshll.u32 %v3063_v60, 16 }
  0x74   : > { %v1841_v54 = vsel %vm3688_vm3, %v1836_v22, %v1840_v2  ;;  %v1876_v8 = vshll.u32 %v3064_v10, 16  ;;  %v1880_v34 = vshrl.u32 %v3064_v10, 16  ;;  %v1859_v26 = vor.u32 %v1858_v49, %v1854_v39  ;;  %v3070_v22 = vld [vmem:[%s3662_s8 + $0x7c] sm:$0xf]  ;;  %v3071_v49 = vld [vmem:[%s3662_s8 + $0x80] sm:$0x1] }
  0x75   : > { %v3103_v57 = vcombine.low %v1831_v20, %v1841_v54  ;;  %v1850_v3 = vrot.slane %v1849_v45, 4  ;;  %v1869_v27 = vrot.slane %v1867_v62, 4  ;;  %v1872_v38 = vrot.slane %v1870_v15, 5 }
  0x76   : > { %v1878_v5 = vrot.slane %v1876_v8, 5  ;;  %v1882_v35 = vrot.slane %v1880_v34, 4  ;;  %v1886_v13 = vshll.u32 %v3065_v7, 16  ;;  %v4343_v44 = vcombine.low %v3778_v58, %v3781_v59  ;;  %v3068_v58 = vld [vmem:[%s3662_s8 + $0x74] sm:$0x1] }
  0x77   : > { %v1855_v37 = vsel %vm3688_vm3, %v1850_v3, %v1854_v39  ;;  %v1860_v43 = vrot.slane %v1859_v26, 4  ;;  %v1891_v36 = vshrl.u32 %v3066_v23, 16  ;;  %v1894_v2 = vshll.u32 %v3066_v23, 16  ;;  %3418 = vmatmul.mubr.msk.bf16.gmra.mrb[8].mxu0 %vm740_vm0, %v3103_v57  ;;  %v3072_v34 = vld [vmem:[%s3662_s8 + $0x84] sm:$0xf] }
  0x78   : > { %3338 = vmatmul.mubr.msk.bf16.gmra.mrb[8].mxu1 %vm740_vm0, %v4343_v44  ;;  %v4344_v52 = vcombine.low %v3798_v16, %v3805_v25  ;;  %v1873_v46 = vor.u32 %v1872_v38, %v1869_v27  ;;  %v1883_v41 = vor.u32 %v1882_v35, %v1878_v5  ;;  %v1888_v51 = vrot.slane %v1886_v13, 5  ;;  %v3073_v3 = vld [vmem:[%s3662_s8 + $0x88] sm:$0xf] }
  0x79   : > { %v1900_v59 = vshll.u32 %v3067_v63, 16  ;;  %v1865_v14 = vsel %vm3688_vm3, %v1860_v43, %v1864_v61  ;;  %v1893_v29 = vrot.slane %v1891_v36, 4  ;;  %v1896_v30 = vrot.slane %v1894_v2, 5 }
  0x7a   : > { %3341 = vmatprep.mubr.msk.bf16.mxu1 %vm740_vm0, %v4344_v52  ;;  %v1904_v60 = vshrl.u32 %v3067_v63, 16  ;;  %v3104_v40 = vcombine.low %v1855_v37, %v1865_v14  ;;  %v1874_v56 = vrot.slane %v1873_v46, 4  ;;  %v1884_v9 = vrot.slane %v1883_v41, 4  ;;  %v3075_v52 = vld [vmem:[%s3662_s8 + $0x90] sm:$0xf] }
  0x7b   : > { %v1902_v16 = vrot.slane %v1900_v59, 5  ;;  %v1897_v25 = vor.u32 %v1896_v30, %v1893_v29  ;;  %v1910_v18 = vshll.u32 %v3068_v58, 16  ;;  %v2938_v20 = vcombine.low %v3835_v4, %v3842_v11  ;;  %v3076_v29 = vld [vmem:[%s3662_s8 + $0x94] sm:$0xf] }
  0x7c   : > { %v1906_v10 = vrot.slane %v1904_v60, 4  ;;  %3421 = vmatprep.mubr.msk.bf16.mxu0 %vm740_vm0, %v3104_v40  ;;  %v1879_v39 = vsel %vm3688_vm3, %v1874_v56, %v1878_v5  ;;  %v1889_v45 = vsel %vm3688_vm3, %v1884_v9, %v1888_v51  ;;  %v1915_v61 = vshrl.u32 %v3069_v0, 16 }
  0x7d   : > { %v1918_v7 = vshll.u32 %v3069_v0, 16  ;;  %v3105_v62 = vcombine.low %v1879_v39, %v1889_v45  ;;  %v1898_v54 = vrot.slane %v1897_v25, 4  ;;  %v1912_v8 = vrot.slane %v1910_v18, 5  ;;  %v3077_v25 = vld [vmem:[%s3662_s8 + $0x98] sm:$0x1] }
  0x7e   : > { %v1907_v15 = vor.u32 %v1906_v10, %v1902_v16  ;;  %v1917_v4 = vrot.slane %v1915_v61, 4  ;;  %v1924_v23 = vshll.u32 %v3070_v22, 16  ;;  %v1928_v57 = vshrl.u32 %v3070_v22, 16  ;;  %v3078_v45 = vld [vmem:[%s3662_s8 + $0x9c] sm:$0xf] }
  0x7f   : > { %v1920_v11 = vrot.slane %v1918_v7, 5  ;;  %v4345_v26 = vcombine.low %v3822_v47, %v3825_v48  ;;  %v1903_v27 = vsel %vm3688_vm3, %v1898_v54, %v1902_v16  ;;  %v1934_v38 = vshll.u32 %v3071_v49, 16  ;;  %3422 = vmatmul.mubr.msk.bf16.gmra.mrb[12].mxu0 %vm740_vm0, %v3105_v62  ;;  %v3074_v47 = vld [vmem:[%s3662_s8 + $0x8c] sm:$0x1]  ;;  %v3079_v7 = vld [vmem:[%s3662_s8 + $0xa0] sm:$0xf] }
  0x80   : > { %v1908_v63 = vrot.slane %v1907_v15, 4  ;;  %v2939_v5 = vcombine.low %v3864_v53, %v3867_v55  ;;  %v1926_v13 = vrot.slane %v1924_v23, 5  ;;  %v1930_v44 = vrot.slane %v1928_v57, 4 }
  0x81   : > { %3342 = vmatmul.mubr.msk.bf16.gmra.mrb[12].mxu1 %vm740_vm0, %v4345_v26  ;;  %v1921_v35 = vor.u32 %v1920_v11, %v1917_v4  ;;  %v1939_v48 = vshrl.u32 %v3072_v34, 16  ;;  %v1936_v43 = vrot.slane %v1934_v38, 5  ;;  %v1942_v36 = vshll.u32 %v3072_v34, 16  ;;  %v3080_v26 = vld [vmem:[%s3662_s8 + $0xa4] sm:$0x1] }
  0x82   : > { %3345 = vmatprep.mubr.msk.bf16.mxu1 %vm740_vm0, %v2938_v20  ;;  %v1913_v37 = vsel %vm3688_vm3, %v1908_v63, %v1912_v8  ;;  %v1948_v2 = vshll.u32 %v3073_v3, 16  ;;  %v1931_v53 = vor.u32 %v1930_v44, %v1926_v13  ;;  %v1952_v59 = vshrl.u32 %v3073_v3, 16 }
  0x83   : > { %v3106_v46 = vcombine.low %v1903_v27, %v1913_v37  ;;  %v1922_v41 = vrot.slane %v1921_v35, 4  ;;  %v1941_v55 = vrot.slane %v1939_v48, 4  ;;  %v1944_v51 = vrot.slane %v1942_v36, 5  ;;  %v3081_v35 = vld [vmem:[%s3662_s8 + $0xa8] sm:$0xf] }
  0x84   : > { %v1950_v58 = vrot.slane %v1948_v2, 5  ;;  %v1958_v14 = vshll.u32 %v3074_v47, 16  ;;  %v1932_v60 = vrot.slane %v1931_v53, 4  ;;  %v2940_v0 = vcombine.low %v3884_v19, %v3887_v31  ;;  %v3082_v37 = vld [vmem:[%s3662_s8 + $0xac] sm:$0xf] }
  0x85   : > { %3425 = vmatprep.mubr.msk.bf16.mxu0 %vm740_vm0, %v3106_v46  ;;  %v1927_v30 = vsel %vm3688_vm3, %v1922_v41, %v1926_v13  ;;  %v1963_v40 = vshrl.u32 %v3075_v52, 16  ;;  %v1945_v56 = vor.u32 %v1944_v51, %v1941_v55  ;;  %v1954_v9 = vrot.slane %v1952_v59, 4  ;;  %v3083_v53 = vld [vmem:[%s3662_s8 + $0xb0] sm:$0x1] }
  0x86   : > { %v1960_v16 = vrot.slane %v1958_v14, 5  ;;  %v1966_v10 = vshll.u32 %v3075_v52, 16  ;;  %v1937_v18 = vsel %vm3688_vm3, %v1932_v60, %v1936_v43  ;;  %v1972_v22 = vshll.u32 %v3076_v29, 16 }
  0x87   : > { %v1965_v20 = vrot.slane %v1963_v40, 4  ;;  %v1976_v39 = vshrl.u32 %v3076_v29, 16  ;;  %v3107_v49 = vcombine.low %v1927_v30, %v1937_v18  ;;  %v1946_v61 = vrot.slane %v1945_v56, 4  ;;  %v3084_v30 = vld [vmem:[%s3662_s8 + $0xb4] sm:$0xf] }
  0x88   : > { %v1955_v19 = vor.u32 %v1954_v9, %v1950_v58  ;;  %v1968_v31 = vrot.slane %v1966_v10, 5  ;;  %v1974_v62 = vrot.slane %v1972_v22, 5  ;;  %v1982_v15 = vshll.u32 %v3077_v25, 16  ;;  %v3085_v40 = vld [vmem:[%s3662_s8 + $0xb8] sm:$0xf] }
  0x89   : > { %3346 = vmatmul.mubr.msk.bf16.gmra.mrb[16].mxu1 %vm740_vm0, %v2939_v5  ;;  %v1978_v54 = vrot.slane %v1976_v39, 4  ;;  %v2941_v8 = vcombine.low %v3901_v17, %v3905_v1  ;;  %3426 = vmatmul.mubr.msk.bf16.gmra.mrb[16].mxu0 %vm740_vm0, %v3107_v49  ;;  %v1951_v34 = vsel %vm3688_vm3, %v1946_v61, %v1950_v58  ;;  %v1987_v23 = vshrl.u32 %v3078_v45, 16  ;;  %v3086_v22 = vld [vmem:[%s3662_s8 + $0xbc] sm:$0x1] }
  0x8a   : > { %3349 = vmatprep.mubr.msk.bf16.mxu1 %vm740_vm0, %v2940_v0  ;;  %v1956_v4 = vrot.slane %v1955_v19, 4  ;;  %v1969_v11 = vor.u32 %v1968_v31, %v1965_v20  ;;  %v1984_v3 = vrot.slane %v1982_v15, 5  ;;  %v1990_v27 = vshll.u32 %v3078_v45, 16  ;;  %v3087_v31 = vld [vmem:[%s3662_s8 + $0xc0] sm:$0xf] }
  0x8b   : > { %v1979_v57 = vor.u32 %v1978_v54, %v1974_v62  ;;  %v1996_v63 = vshll.u32 %v3079_v7, 16  ;;  %v1989_v17 = vrot.slane %v1987_v23, 4  ;;  %v2000_v1 = vshrl.u32 %v3079_v7, 16 }
  0x8c   : > { %v1961_v38 = vsel %vm3688_vm3, %v1956_v4, %v1960_v16  ;;  %v1970_v5 = vrot.slane %v1969_v11, 4  ;;  %v1992_v47 = vrot.slane %v1990_v27, 5  ;;  %v2006_v2 = vshll.u32 %v3080_v26, 16  ;;  %v3088_v4 = vld [vmem:[%s3662_s8 + $0xc4] sm:$0xf] }
  0x8d   : > { %v3108_v13 = vcombine.low %v1951_v34, %v1961_v38  ;;  %v1980_v44 = vrot.slane %v1979_v57, 4  ;;  %v1998_v48 = vrot.slane %v1996_v63, 5  ;;  %v2002_v36 = vrot.slane %v2000_v1, 4  ;;  %v3089_v38 = vld [vmem:[%s3662_s8 + $0xc8] sm:$0x1] }
  0x8e   : > { %v1975_v43 = vsel %vm3688_vm3, %v1970_v5, %v1974_v62  ;;  %v2942_v52 = vcombine.low %v3919_v32, %v3922_v24  ;;  %v1993_v41 = vor.u32 %v1992_v47, %v1989_v17  ;;  %v2011_v55 = vshrl.u32 %v3081_v35, 16 }
  0x8f   : > { %3429 = vmatprep.mubr.msk.bf16.mxu0 %vm740_vm0, %v3108_v13  ;;  %v1985_v46 = vsel %vm3688_vm3, %v1980_v44, %v1984_v3  ;;  %v2014_v51 = vshll.u32 %v3081_v35, 16  ;;  %v2003_v59 = vor.u32 %v2002_v36, %v1998_v48  ;;  %v2008_v14 = vrot.slane %v2006_v2, 5 }
  0x90   : > { %v3109_v58 = vcombine.low %v1975_v43, %v1985_v46  ;;  %v2020_v29 = vshll.u32 %v3082_v37, 16  ;;  %v1994_v60 = vrot.slane %v1993_v41, 4  ;;  %v2013_v32 = vrot.slane %v2011_v55, 4 }
  0x91   : > { %3350 = vmatmul.mubr.msk.bf16.gmra.mrb[20].mxu1 %vm740_vm0, %v2941_v8  ;;  %v2016_v24 = vrot.slane %v2014_v51, 5  ;;  %v2024_v0 = vshrl.u32 %v3082_v37, 16  ;;  %v2004_v56 = vrot.slane %v2003_v59, 4  ;;  %v2030_v16 = vshll.u32 %v3083_v53, 16 }
  0x92   : > { %3353 = vmatprep.mubr.msk.bf16.mxu1 %vm740_vm0, %v2942_v52  ;;  %3430 = vmatmul.mubr.msk.bf16.gmra.mrb[20].mxu0 %vm740_vm0, %v3109_v58  ;;  %v2022_v9 = vrot.slane %v2020_v29, 5  ;;  %v2943_v25 = vcombine.low %v3944_v28, %v3947_v33  ;;  %v1999_v10 = vsel %vm3688_vm3, %v1994_v60, %v1998_v48  ;;  %v2035_v39 = vshrl.u32 %v3084_v30, 16 }
  0x93   : > { %v2017_v18 = vor.u32 %v2016_v24, %v2013_v32  ;;  %v2026_v20 = vrot.slane %v2024_v0, 4  ;;  %v2009_v45 = vsel %vm3688_vm3, %v2004_v56, %v2008_v14  ;;  %v2032_v49 = vrot.slane %v2030_v16, 5 }
  0x94   : > { %v2038_v61 = vshll.u32 %v3084_v30, 16  ;;  %v2044_v19 = vshll.u32 %v3085_v40, 16  ;;  %v3110_v7 = vcombine.low %v1999_v10, %v2009_v45  ;;  %v2037_v28 = vrot.slane %v2035_v39, 4 }
  0x95   : > { %v2018_v62 = vrot.slane %v2017_v18, 4  ;;  %v2027_v54 = vor.u32 %v2026_v20, %v2022_v9  ;;  %v2048_v8 = vshrl.u32 %v3085_v40, 16  ;;  %v2054_v34 = vshll.u32 %v3086_v22, 16 }
  0x96   : > { %v2040_v33 = vrot.slane %v2038_v61, 5  ;;  %v2046_v15 = vrot.slane %v2044_v19, 5  ;;  %3433 = vmatprep.mubr.msk.bf16.mxu0 %vm740_vm0, %v3110_v7  ;;  %v2944_v57 = vcombine.low %v3962_v6, %v3969_v12  ;;  %v2059_v3 = vshrl.u32 %v3087_v31, 16 }
  0x97   : > { %v2023_v11 = vsel %vm3688_vm3, %v2018_v62, %v2022_v9  ;;  %v2028_v23 = vrot.slane %v2027_v54, 4  ;;  %v2050_v27 = vrot.slane %v2048_v8, 4  ;;  %v2056_v63 = vrot.slane %v2054_v34, 5 }
  0x98   : > { %v2041_v26 = vor.u32 %v2040_v33, %v2037_v28  ;;  %v2062_v5 = vshll.u32 %v3087_v31, 16  ;;  %v2061_v1 = vrot.slane %v2059_v3, 4  ;;  %v2068_v35 = vshll.u32 %v3088_v4, 16 }
  0x99   : > { %3354 = vmatmul.mubr.msk.bf16.gmra.mrb[24].mxu1 %vm740_vm0, %v2943_v25  ;;  %v2033_v17 = vsel %vm3688_vm3, %v2028_v23, %v2032_v49  ;;  %v2072_v13 = vshrl.u32 %v3088_v4, 16  ;;  %v2051_v48 = vor.u32 %v2050_v27, %v2046_v15  ;;  %v2078_v43 = vshll.u32 %v3089_v38, 16 }
  0x9a   : > { %3357 = vmatprep.mubr.msk.bf16.mxu1 %vm740_vm0, %v2944_v57  ;;  %v3111_v44 = vcombine.low %v2023_v11, %v2033_v17  ;;  %v2042_v47 = vrot.slane %v2041_v26, 4  ;;  %v2064_v6 = vrot.slane %v2062_v5, 5  ;;  %v2070_v12 = vrot.slane %v2068_v35, 5 }
  0x9b   : > { %v2074_v37 = vrot.slane %v2072_v13, 4  ;;  %v2052_v2 = vrot.slane %v2051_v48, 4  ;;  %v2945_v46 = vcombine.low %v3977_v42, %v3982_v50  ;;  %v2080_v53 = vrot.slane %v2078_v43, 5 }
  0x9c   : > { %3434 = vmatmul.mubr.msk.bf16.gmra.mrb[24].mxu0 %vm740_vm0, %v3111_v44  ;;  %v2047_v36 = vsel %vm3688_vm3, %v2042_v47, %v2046_v15  ;;  %v2065_v52 = vor.u32 %v2064_v6, %v2061_v1 }
  0x9d   : > { %v2075_v41 = vor.u32 %v2074_v37, %v2070_v12  ;;  %v2057_v55 = vsel %vm3688_vm3, %v2052_v2, %v2056_v63 }
  0x9e   : > { %v2066_v51 = vrot.slane %v2065_v52, 4  ;;  %v3112_v58 = vcombine.low %v2047_v36, %v2057_v55 }
  0x9f   : > { %v2076_v59 = vrot.slane %v2075_v41, 4 }
  0xa0   : > { %v2071_v14 = vsel %vm3688_vm3, %v2066_v51, %v2070_v12  ;;  %3437 = vmatprep.mubr.msk.bf16.mxu0 %vm740_vm0, %v3112_v58 }
  0xa1   : > { %3358 = vmatmul.mubr.msk.bf16.gmra.mrb[28].mxu1 %vm740_vm0, %v2945_v46  ;;  %v2081_v29 = vsel %vm3688_vm3, %v2076_v59, %v2080_v53 }
  0xa2   : > { %v3113_v30 = vcombine.low %v2071_v14, %v2081_v29 }
  0xa4   : > { %3438 = vmatmul.mubr.msk.bf16.gmra.mrb[28].mxu0 %vm740_vm0, %v3113_v30 }
 0x138   : > { %v3411_v42 = vpop.f32.mrb[0].mxu0 }
 0x139   : > { %v3331_v50 = vpop.f32.mrb[0].mxu1  ;;  %v2245_v60 = vpop.f32.mrb[1].mxu0 }
 0x13a   : > { %v3441_v32 = vadd.f32 %v3411_v42, %v3331_v50  ;;  %v1136_v24 = vpop.f32.mrb[1].mxu1  ;;  %v3412_v0 = vpop.f32.mrb[2].mxu0 }
 0x13b   : > { %v3442_v21 = vadd.f32 %v2245_v60, %v1136_v24  ;;  %v3332_v40 = vpop.f32.mrb[2].mxu1  ;;  %v2248_v56 = vpop.f32.mrb[3].mxu0 }
 0x13c   : > { %v3171_v9 = vpack.c.bf16 %v3441_v32, %v3441_v32  ;;  %v3443_v16 = vadd.f32 %v3412_v0, %v3332_v40  ;;  %v1139_v25 = vpop.f32.mrb[3].mxu1 }
 0x13d   : > { %v3169_v10 = vpack.c.bf16 %v3442_v21, %v3442_v21  ;;  %v3444_v18 = vadd.f32 %v2248_v56, %v1139_v25 }
 0x13e   : > { %2535 = vst.msk [vmem:[%s4192_s6 + $0x8] sm:$0xf] %vm2532_vm4, %v3171_v9  ;;  %v2405_v20 = vpack.c.bf16 %v3443_v16, %v3441_v32  ;;  %v3172_v22 = vpack.c.bf16 %v3443_v16, %v3443_v16 }
 0x13f   : > { %2533 = vst.msk [vmem:[%s4192_s6] sm:$0xf] %vm2532_vm4, %v3169_v10  ;;  %v2404_v39 = vpack.c.bf16 %v3444_v18, %v3442_v21  ;;  %v3170_v45 = vpack.c.bf16 %v3444_v18, %v3444_v18 }
 0x140   : > { %2536 = vst.msk [vmem:[%s4192_s6 + $0xc] sm:$0xf] %vm2532_vm4, %v3172_v22  ;;  %v2567_v49 = vunpack.c.l.bf16 %v2405_v20  ;;  %v2568_v61 = vunpack.c.h.bf16 %v2405_v20 }
 0x141   : > { %2534 = vst.msk [vmem:[%s4192_s6 + $0x4] sm:$0xf] %vm2532_vm4, %v3170_v45  ;;  %v2565_v19 = vunpack.c.l.bf16 %v2404_v39  ;;  %v2566_v31 = vunpack.c.h.bf16 %v2404_v39 }
 0x142   : > { %v2601_v62 = vsel %vm2597_vm5, %v2567_v49, 0.0  ;;  %v2670_v54 = vmul.f32 %v2567_v49, %v2567_v49  ;;  %v3415_v28 = vpop.f32.mrb[4].mxu0  ;;  %v2603_v57 = vsel %vm2597_vm5, %v2568_v61, 0.0  ;;  %v2671_v3 = vmul.f32 %v2568_v61, %v2568_v61 }
 0x143   : > { %v3335_v7 = vpop.f32.mrb[4].mxu1  ;;  %v2598_v15 = vsel %vm2597_vm5, %v2565_v19, 0.0  ;;  %v2599_v8 = vsel %vm2597_vm5, %v2566_v31, 0.0  ;;  %v2668_v34 = vmul.f32 %v2565_v19, %v2565_v19  ;;  %v2669_v4 = vmul.f32 %v2566_v31, %v2566_v31  ;;  %v2261_v11 = vpop.f32.mrb[5].mxu0 }
 0x144   : > { %v1152_v33 = vpop.f32.mrb[5].mxu1  ;;  %v2600_v26 = vadd.f32 %v2599_v8, %v2598_v15  ;;  %v3445_v27 = vadd.f32 %v3415_v28, %v3335_v7  ;;  %v3416_v63 = vpop.f32.mrb[6].mxu0  ;;  %v2703_v12 = vsel %vm2597_vm5, %v2670_v54, 0.0  ;;  %v2705_v53 = vsel %vm2597_vm5, %v2671_v3, 0.0 }
 0x145   : > { %v3336_v23 = vpop.f32.mrb[6].mxu1  ;;  %v2700_v5 = vsel %vm2597_vm5, %v2668_v34, 0.0  ;;  %v2701_v17 = vsel %vm2597_vm5, %v2669_v4, 0.0  ;;  %v3446_v1 = vadd.f32 %v2261_v11, %v1152_v33  ;;  %v2264_v13 = vpop.f32.mrb[7].mxu0 }
 0x146   : > { %v1155_v38 = vpop.f32.mrb[7].mxu1  ;;  %v3447_v35 = vadd.f32 %v3416_v63, %v3336_v23  ;;  %v2602_v44 = vadd.f32 %v2601_v62, %v2600_v26  ;;  %v2702_v47 = vadd.f32 %v2701_v17, %v2700_v5  ;;  %v3175_v48 = vpack.c.bf16 %v3445_v27, %v3445_v27 }
 0x147   : > { %v3448_v6 = vadd.f32 %v2264_v13, %v1155_v38  ;;  %v3173_v37 = vpack.c.bf16 %v3446_v1, %v3446_v1 }
 0x148   : > { %v2407_v43 = vpack.c.bf16 %v3447_v35, %v3445_v27  ;;  %v3176_v36 = vpack.c.bf16 %v3447_v35, %v3447_v35  ;;  %v2704_v2 = vadd.f32 %v2703_v12, %v2702_v47  ;;  %2539 = vst.msk [vmem:[%s4192_s6 + $0x18] sm:$0xf] %vm2532_vm4, %v3175_v48  ;;  %v2604_v41 = vadd.f32 %v2603_v57, %v2602_v44 }
 0x149   : > { %v2406_v52 = vpack.c.bf16 %v3448_v6, %v3446_v1  ;;  %v3174_v46 = vpack.c.bf16 %v3448_v6, %v3448_v6  ;;  %2537 = vst.msk [vmem:[%s4192_s6 + $0x10] sm:$0xf] %vm2532_vm4, %v3173_v37 }
 0x14a   : > { %2540 = vst.msk [vmem:[%s4192_s6 + $0x1c] sm:$0xf] %vm2532_vm4, %v3176_v36  ;;  %v2571_v55 = vunpack.c.l.bf16 %v2407_v43  ;;  %v2572_v51 = vunpack.c.h.bf16 %v2407_v43  ;;  %v2706_v29 = vadd.f32 %v2705_v53, %v2704_v2  ;;  %v3419_v30 = vpop.f32.mrb[8].mxu0 }
 0x14b   : > { %v3339_v58 = vpop.f32.mrb[8].mxu1  ;;  %2538 = vst.msk [vmem:[%s4192_s6 + $0x14] sm:$0xf] %vm2532_vm4, %v3174_v46  ;;  %v2569_v59 = vunpack.c.l.bf16 %v2406_v52  ;;  %v2570_v14 = vunpack.c.h.bf16 %v2406_v52  ;;  %v2277_v50 = vpop.f32.mrb[9].mxu0 }
 0x14c   : > { %v1168_v42 = vpop.f32.mrb[9].mxu1  ;;  %v2609_v32 = vsel %vm2597_vm5, %v2571_v55, 0.0  ;;  %v3420_v40 = vpop.f32.mrb[10].mxu0  ;;  %v2674_v9 = vmul.f32 %v2571_v55, %v2571_v55  ;;  %v2675_v16 = vmul.f32 %v2572_v51, %v2572_v51  ;;  %v3449_v10 = vadd.f32 %v3419_v30, %v3339_v58 }
 0x14d   : > { %v3340_v60 = vpop.f32.mrb[10].mxu1  ;;  %v2605_v24 = vsel %vm2597_vm5, %v2569_v59, 0.0  ;;  %v2672_v0 = vmul.f32 %v2569_v59, %v2569_v59  ;;  %v2673_v21 = vmul.f32 %v2570_v14, %v2570_v14  ;;  %v2280_v18 = vpop.f32.mrb[11].mxu0  ;;  %v2607_v20 = vsel %vm2597_vm5, %v2570_v14, 0.0 }
 0x14e   : > { %v1171_v56 = vpop.f32.mrb[11].mxu1  ;;  %v2606_v25 = vadd.f32 %v2605_v24, %v2604_v41  ;;  %v3450_v39 = vadd.f32 %v2277_v50, %v1168_v42  ;;  %v3451_v45 = vadd.f32 %v3420_v40, %v3340_v60  ;;  %v3179_v19 = vpack.c.bf16 %v3449_v10, %v3449_v10 }
 0x14f   : > { %v2707_v22 = vsel %vm2597_vm5, %v2672_v0, 0.0  ;;  %v3452_v31 = vadd.f32 %v2280_v18, %v1171_v56  ;;  %v2709_v7 = vsel %vm2597_vm5, %v2673_v21, 0.0  ;;  %v2611_v11 = vsel %vm2597_vm5, %v2572_v51, 0.0 }
 0x150   : > { %v2608_v49 = vadd.f32 %v2607_v20, %v2606_v25  ;;  %v2708_v61 = vadd.f32 %v2707_v22, %v2706_v29  ;;  %v3177_v62 = vpack.c.bf16 %v3450_v39, %v3450_v39  ;;  %v2409_v54 = vpack.c.bf16 %v3451_v45, %v3449_v10  ;;  %2543 = vst.msk [vmem:[%s4192_s6 + $0x28] sm:$0xf] %vm2532_vm4, %v3179_v19 }
 0x151   : > { %v3180_v28 = vpack.c.bf16 %v3451_v45, %v3451_v45  ;;  %v2408_v8 = vpack.c.bf16 %v3452_v31, %v3450_v39  ;;  %v3178_v34 = vpack.c.bf16 %v3452_v31, %v3452_v31  ;;  %v2711_v23 = vsel %vm2597_vm5, %v2674_v9, 0.0 }
 0x152   : > { %v2610_v33 = vadd.f32 %v2609_v32, %v2608_v49  ;;  %v2710_v15 = vadd.f32 %v2709_v7, %v2708_v61  ;;  %2541 = vst.msk [vmem:[%s4192_s6 + $0x20] sm:$0xf] %vm2532_vm4, %v3177_v62  ;;  %v2575_v57 = vunpack.c.l.bf16 %v2409_v54  ;;  %v3423_v3 = vpop.f32.mrb[12].mxu0  ;;  %v2713_v35 = vsel %vm2597_vm5, %v2675_v16, 0.0 }
 0x153   : > { %2544 = vst.msk [vmem:[%s4192_s6 + $0x2c] sm:$0xf] %vm2532_vm4, %v3180_v28  ;;  %2542 = vst.msk [vmem:[%s4192_s6 + $0x24] sm:$0xf] %vm2532_vm4, %v3178_v34  ;;  %v2573_v63 = vunpack.c.l.bf16 %v2408_v8  ;;  %v2574_v38 = vunpack.c.h.bf16 %v2408_v8  ;;  %v2293_v17 = vpop.f32.mrb[13].mxu0  ;;  %v2576_v47 = vunpack.c.h.bf16 %v2409_v54 }
 0x154   : > { %v3343_v4 = vpop.f32.mrb[12].mxu1  ;;  %v2712_v27 = vadd.f32 %v2711_v23, %v2710_v15  ;;  %v2612_v5 = vadd.f32 %v2611_v11, %v2610_v33  ;;  %v3424_v13 = vpop.f32.mrb[14].mxu0  ;;  %v2617_v43 = vsel %vm2597_vm5, %v2575_v57, 0.0  ;;  %v2678_v36 = vmul.f32 %v2575_v57, %v2575_v57 }
 0x155   : > { %v1184_v26 = vpop.f32.mrb[13].mxu1  ;;  %v2613_v48 = vsel %vm2597_vm5, %v2573_v63, 0.0  ;;  %v2676_v6 = vmul.f32 %v2573_v63, %v2573_v63  ;;  %v2677_v12 = vmul.f32 %v2574_v38, %v2574_v38  ;;  %v2296_v37 = vpop.f32.mrb[15].mxu0  ;;  %v2615_v46 = vsel %vm2597_vm5, %v2574_v38, 0.0 }
 0x156   : > { %v3344_v1 = vpop.f32.mrb[14].mxu1  ;;  %v2614_v2 = vadd.f32 %v2613_v48, %v2612_v5  ;;  %v2714_v52 = vadd.f32 %v2713_v35, %v2712_v27  ;;  %v3453_v53 = vadd.f32 %v3423_v3, %v3343_v4  ;;  %v3454_v55 = vadd.f32 %v2293_v17, %v1184_v26 }
 0x157   : > { %v1187_v44 = vpop.f32.mrb[15].mxu1  ;;  %v2715_v41 = vsel %vm2597_vm5, %v2676_v6, 0.0  ;;  %v3455_v59 = vadd.f32 %v3424_v13, %v3344_v1  ;;  %v2679_v29 = vmul.f32 %v2576_v47, %v2576_v47  ;;  %v2717_v30 = vsel %vm2597_vm5, %v2677_v12, 0.0 }
 0x158   : > { %v2616_v51 = vadd.f32 %v2615_v46, %v2614_v2  ;;  %v2716_v58 = vadd.f32 %v2715_v41, %v2714_v52  ;;  %v3456_v14 = vadd.f32 %v2296_v37, %v1187_v44  ;;  %v3183_v42 = vpack.c.bf16 %v3453_v53, %v3453_v53 }
 0x159   : > { %v3181_v50 = vpack.c.bf16 %v3454_v55, %v3454_v55  ;;  %v2411_v0 = vpack.c.bf16 %v3455_v59, %v3453_v53  ;;  %v3184_v21 = vpack.c.bf16 %v3455_v59, %v3455_v59  ;;  %v2619_v56 = vsel %vm2597_vm5, %v2576_v47, 0.0 }
 0x15a   : > { %v2618_v32 = vadd.f32 %v2617_v43, %v2616_v51  ;;  %v2718_v24 = vadd.f32 %v2717_v30, %v2716_v58  ;;  %v2719_v9 = vsel %vm2597_vm5, %v2678_v36, 0.0  ;;  %2547 = vst.msk [vmem:[%s4192_s6 + $0x38] sm:$0xf] %vm2532_vm4, %v3183_v42  ;;  %v2410_v16 = vpack.c.bf16 %v3456_v14, %v3454_v55 }
 0x15b   : > { %2545 = vst.msk [vmem:[%s4192_s6 + $0x30] sm:$0xf] %vm2532_vm4, %v3181_v50  ;;  %v3182_v25 = vpack.c.bf16 %v3456_v14, %v3456_v14  ;;  %2548 = vst.msk [vmem:[%s4192_s6 + $0x3c] sm:$0xf] %vm2532_vm4, %v3184_v21  ;;  %v2579_v22 = vunpack.c.l.bf16 %v2411_v0  ;;  %v2721_v54 = vsel %vm2597_vm5, %v2679_v29, 0.0  ;;  %v2580_v28 = vunpack.c.h.bf16 %v2411_v0 }
 0x15c   : > { %v3347_v60 = vpop.f32.mrb[16].mxu1  ;;  %v3427_v10 = vpop.f32.mrb[16].mxu0  ;;  %v2720_v20 = vadd.f32 %v2719_v9, %v2718_v24  ;;  %v2620_v39 = vadd.f32 %v2619_v56, %v2618_v32  ;;  %v2577_v61 = vunpack.c.l.bf16 %v2410_v16  ;;  %v2578_v19 = vunpack.c.h.bf16 %v2410_v16 }
 0x15d   : > { %v1200_v40 = vpop.f32.mrb[17].mxu1  ;;  %v2309_v45 = vpop.f32.mrb[17].mxu0  ;;  %2546 = vst.msk [vmem:[%s4192_s6 + $0x34] sm:$0xf] %vm2532_vm4, %v3182_v25  ;;  %v3457_v31 = vadd.f32 %v3427_v10, %v3347_v60  ;;  %v2682_v15 = vmul.f32 %v2579_v22, %v2579_v22  ;;  %v2625_v11 = vsel %vm2597_vm5, %v2579_v22, 0.0  ;;  %v2627_v44 = vsel %vm2597_vm5, %v2580_v28, 0.0 }
 0x15e   : > { %v3348_v18 = vpop.f32.mrb[18].mxu1  ;;  %v3458_v7 = vadd.f32 %v2309_v45, %v1200_v40  ;;  %v3428_v62 = vpop.f32.mrb[18].mxu0  ;;  %v2621_v8 = vsel %vm2597_vm5, %v2577_v61, 0.0  ;;  %v2680_v34 = vmul.f32 %v2577_v61, %v2577_v61  ;;  %v2681_v4 = vmul.f32 %v2578_v19, %v2578_v19 }
 0x15f   : > { %v1203_v49 = vpop.f32.mrb[19].mxu1  ;;  %v2312_v33 = vpop.f32.mrb[19].mxu0  ;;  %v2622_v23 = vadd.f32 %v2621_v8, %v2620_v39  ;;  %v2722_v57 = vadd.f32 %v2721_v54, %v2720_v20  ;;  %v2623_v3 = vsel %vm2597_vm5, %v2578_v19, 0.0  ;;  %v3187_v27 = vpack.c.bf16 %v3457_v31, %v3457_v31 }
 0x160   : > { %v2723_v26 = vsel %vm2597_vm5, %v2680_v34, 0.0  ;;  %v3185_v63 = vpack.c.bf16 %v3458_v7, %v3458_v7  ;;  %v3459_v1 = vadd.f32 %v3428_v62, %v3348_v18  ;;  %v3460_v35 = vadd.f32 %v2312_v33, %v1203_v49 }
 0x161   : > { %v2624_v5 = vadd.f32 %v2623_v3, %v2622_v23  ;;  %v2724_v17 = vadd.f32 %v2723_v26, %v2722_v57  ;;  %v2683_v47 = vmul.f32 %v2580_v28, %v2580_v28  ;;  %v2727_v48 = vsel %vm2597_vm5, %v2682_v15, 0.0  ;;  %2551 = vst.msk [vmem:[%s4192_s6 + $0x48] sm:$0xf] %vm2532_vm4, %v3187_v27 }
 0x162   : > { %v2725_v6 = vsel %vm2597_vm5, %v2681_v4, 0.0  ;;  %2549 = vst.msk [vmem:[%s4192_s6 + $0x40] sm:$0xf] %vm2532_vm4, %v3185_v63  ;;  %v2413_v2 = vpack.c.bf16 %v3459_v1, %v3457_v31  ;;  %v3188_v52 = vpack.c.bf16 %v3459_v1, %v3459_v1  ;;  %v2412_v53 = vpack.c.bf16 %v3460_v35, %v3458_v7 }
 0x163   : > { %v2626_v43 = vadd.f32 %v2625_v11, %v2624_v5  ;;  %v2726_v36 = vadd.f32 %v2725_v6, %v2724_v17  ;;  %v3186_v55 = vpack.c.bf16 %v3460_v35, %v3460_v35  ;;  %v2729_v21 = vsel %vm2597_vm5, %v2683_v47, 0.0 }
 0x164   : > { %v3351_v38 = vpop.f32.mrb[20].mxu1  ;;  %2552 = vst.msk [vmem:[%s4192_s6 + $0x4c] sm:$0xf] %vm2532_vm4, %v3188_v52  ;;  %v2583_v29 = vunpack.c.l.bf16 %v2413_v2  ;;  %v2584_v30 = vunpack.c.h.bf16 %v2413_v2  ;;  %v2581_v60 = vunpack.c.l.bf16 %v2412_v53  ;;  %v2582_v32 = vunpack.c.h.bf16 %v2412_v53 }
 0x165   : > { %v1216_v13 = vpop.f32.mrb[21].mxu1  ;;  %v3431_v12 = vpop.f32.mrb[20].mxu0  ;;  %v2728_v14 = vadd.f32 %v2727_v48, %v2726_v36  ;;  %v2628_v42 = vadd.f32 %v2627_v44, %v2626_v43  ;;  %2550 = vst.msk [vmem:[%s4192_s6 + $0x44] sm:$0xf] %vm2532_vm4, %v3186_v55 }
 0x166   : > { %v3352_v37 = vpop.f32.mrb[22].mxu1  ;;  %v2325_v46 = vpop.f32.mrb[21].mxu0  ;;  %v3461_v51 = vadd.f32 %v3431_v12, %v3351_v38  ;;  %v2633_v40 = vsel %vm2597_vm5, %v2583_v29, 0.0  ;;  %v2629_v56 = vsel %vm2597_vm5, %v2581_v60, 0.0  ;;  %v2684_v9 = vmul.f32 %v2581_v60, %v2581_v60 }
 0x167   : > { %v1219_v41 = vpop.f32.mrb[23].mxu1  ;;  %v3462_v58 = vadd.f32 %v2325_v46, %v1216_v13  ;;  %v3432_v59 = vpop.f32.mrb[22].mxu0  ;;  %v2685_v16 = vmul.f32 %v2582_v32, %v2582_v32  ;;  %v2635_v10 = vsel %vm2597_vm5, %v2584_v30, 0.0  ;;  %v2686_v18 = vmul.f32 %v2583_v29, %v2583_v29 }
 0x168   : > { %v2328_v50 = vpop.f32.mrb[23].mxu0  ;;  %v3191_v24 = vpack.c.bf16 %v3461_v51, %v3461_v51  ;;  %v2630_v20 = vadd.f32 %v2629_v56, %v2628_v42  ;;  %v2730_v22 = vadd.f32 %v2729_v21, %v2728_v14  ;;  %v2631_v45 = vsel %vm2597_vm5, %v2582_v32, 0.0 }
 0x169   : > { %v3189_v0 = vpack.c.bf16 %v3462_v58, %v3462_v58  ;;  %v2731_v49 = vsel %vm2597_vm5, %v2684_v9, 0.0  ;;  %v3463_v61 = vadd.f32 %v3432_v59, %v3352_v37  ;;  %v3464_v19 = vadd.f32 %v2328_v50, %v1219_v41 }
 0x16a   : > { %2555 = vst.msk [vmem:[%s4192_s6 + $0x58] sm:$0xf] %vm2532_vm4, %v3191_v24  ;;  %v2687_v7 = vmul.f32 %v2584_v30, %v2584_v30  ;;  %v2632_v62 = vadd.f32 %v2631_v45, %v2630_v20  ;;  %v2732_v54 = vadd.f32 %v2731_v49, %v2730_v22  ;;  %v2733_v28 = vsel %vm2597_vm5, %v2685_v16, 0.0 }
 0x16b   : > { %2553 = vst.msk [vmem:[%s4192_s6 + $0x50] sm:$0xf] %vm2532_vm4, %v3189_v0  ;;  %v2415_v15 = vpack.c.bf16 %v3463_v61, %v3461_v51  ;;  %v3192_v8 = vpack.c.bf16 %v3463_v61, %v3463_v61  ;;  %v2414_v34 = vpack.c.bf16 %v3464_v19, %v3462_v58  ;;  %v3190_v4 = vpack.c.bf16 %v3464_v19, %v3464_v19 }
 0x16c   : > { %v3355_v25 = vpop.f32.mrb[24].mxu1  ;;  %v2735_v23 = vsel %vm2597_vm5, %v2686_v18, 0.0  ;;  %v2634_v57 = vadd.f32 %v2633_v40, %v2632_v62  ;;  %v2734_v3 = vadd.f32 %v2733_v28, %v2732_v54  ;;  %v2737_v6 = vsel %vm2597_vm5, %v2687_v7, 0.0 }
 0x16d   : > { %v1232_v39 = vpop.f32.mrb[25].mxu1  ;;  %2556 = vst.msk [vmem:[%s4192_s6 + $0x5c] sm:$0xf] %vm2532_vm4, %v3192_v8  ;;  %v2587_v63 = vunpack.c.l.bf16 %v2415_v15  ;;  %v2588_v38 = vunpack.c.h.bf16 %v2415_v15  ;;  %2554 = vst.msk [vmem:[%s4192_s6 + $0x54] sm:$0xf] %vm2532_vm4, %v3190_v4  ;;  %v2585_v5 = vunpack.c.l.bf16 %v2414_v34  ;;  %v2586_v17 = vunpack.c.h.bf16 %v2414_v34 }
 0x16e   : > { %v3356_v31 = vpop.f32.mrb[26].mxu1  ;;  %v2736_v35 = vadd.f32 %v2735_v23, %v2734_v3  ;;  %v2636_v13 = vadd.f32 %v2635_v10, %v2634_v57 }
 0x16f   : > { %v1235_v33 = vpop.f32.mrb[27].mxu1  ;;  %v3435_v11 = vpop.f32.mrb[24].mxu0  ;;  %v2641_v37 = vsel %vm2597_vm5, %v2587_v63, 0.0  ;;  %v2637_v43 = vsel %vm2597_vm5, %v2585_v5, 0.0  ;;  %v2688_v36 = vmul.f32 %v2585_v5, %v2585_v5  ;;  %v2689_v2 = vmul.f32 %v2586_v17, %v2586_v17 }
 0x170   : > { %v3465_v26 = vadd.f32 %v3435_v11, %v3355_v25  ;;  %v2341_v27 = vpop.f32.mrb[25].mxu0  ;;  %v2643_v46 = vsel %vm2597_vm5, %v2588_v38, 0.0  ;;  %v2690_v41 = vmul.f32 %v2587_v63, %v2587_v63  ;;  %v2638_v53 = vadd.f32 %v2637_v43, %v2636_v13 }
 0x171   : > { %v3436_v1 = vpop.f32.mrb[26].mxu0  ;;  %v3466_v47 = vadd.f32 %v2341_v27, %v1232_v39  ;;  %v2738_v55 = vadd.f32 %v2737_v6, %v2736_v35  ;;  %v2639_v58 = vsel %vm2597_vm5, %v2586_v17, 0.0  ;;  %v2739_v59 = vsel %vm2597_vm5, %v2688_v36, 0.0 }
 0x172   : > { %v3195_v44 = vpack.c.bf16 %v3465_v26, %v3465_v26  ;;  %v2344_v48 = vpop.f32.mrb[27].mxu0  ;;  %v3467_v29 = vadd.f32 %v3436_v1, %v3356_v31  ;;  %v2691_v42 = vmul.f32 %v2588_v38, %v2588_v38  ;;  %v2640_v50 = vadd.f32 %v2639_v58, %v2638_v53 }
 0x173   : > { %v3193_v14 = vpack.c.bf16 %v3466_v47, %v3466_v47  ;;  %v2740_v60 = vadd.f32 %v2739_v59, %v2738_v55  ;;  %v3468_v32 = vadd.f32 %v2344_v48, %v1235_v33  ;;  %v2741_v0 = vsel %vm2597_vm5, %v2689_v2, 0.0 }
 0x174   : > { %v3359_v12 = vpop.f32.mrb[28].mxu1  ;;  %2559 = vst.msk [vmem:[%s4192_s6 + $0x68] sm:$0xf] %vm2532_vm4, %v3195_v44  ;;  %v2417_v21 = vpack.c.bf16 %v3467_v29, %v3465_v26  ;;  %v3196_v40 = vpack.c.bf16 %v3467_v29, %v3467_v29  ;;  %v2642_v16 = vadd.f32 %v2641_v37, %v2640_v50  ;;  %v2743_v22 = vsel %vm2597_vm5, %v2690_v41, 0.0 }
 0x175   : > { %v1248_v52 = vpop.f32.mrb[29].mxu1  ;;  %2557 = vst.msk [vmem:[%s4192_s6 + $0x60] sm:$0xf] %vm2532_vm4, %v3193_v14  ;;  %v2742_v25 = vadd.f32 %v2741_v0, %v2740_v60  ;;  %v2416_v10 = vpack.c.bf16 %v3468_v32, %v3466_v47  ;;  %v3194_v18 = vpack.c.bf16 %v3468_v32, %v3468_v32  ;;  %v2745_v54 = vsel %vm2597_vm5, %v2691_v42, 0.0 }
 0x176   : > { %v3360_v51 = vpop.f32.mrb[30].mxu1  ;;  %2560 = vst.msk [vmem:[%s4192_s6 + $0x6c] sm:$0xf] %vm2532_vm4, %v3196_v40  ;;  %v2591_v39 = vunpack.c.l.bf16 %v2417_v21  ;;  %v2644_v62 = vadd.f32 %v2643_v46, %v2642_v16  ;;  %v2592_v28 = vunpack.c.h.bf16 %v2417_v21 }
 0x177   : > { %v1251_v30 = vpop.f32.mrb[31].mxu1  ;;  %v3439_v24 = vpop.f32.mrb[28].mxu0  ;;  %v2744_v19 = vadd.f32 %v2743_v22, %v2742_v25  ;;  %2558 = vst.msk [vmem:[%s4192_s6 + $0x64] sm:$0xf] %vm2532_vm4, %v3194_v18  ;;  %v2589_v31 = vunpack.c.l.bf16 %v2416_v10  ;;  %v2590_v7 = vunpack.c.h.bf16 %v2416_v10 }
 0x178   : > { %v3469_v56 = vadd.f32 %v3439_v24, %v3359_v12  ;;  %v2357_v9 = vpop.f32.mrb[29].mxu0  ;;  %v2694_v34 = vmul.f32 %v2591_v39, %v2591_v39  ;;  %v2649_v27 = vsel %vm2597_vm5, %v2591_v39, 0.0  ;;  %v2695_v17 = vmul.f32 %v2592_v28, %v2592_v28 }
 0x179   : > { %v3440_v20 = vpop.f32.mrb[30].mxu0  ;;  %v3470_v49 = vadd.f32 %v2357_v9, %v1248_v52  ;;  %v2645_v33 = vsel %vm2597_vm5, %v2589_v31, 0.0  ;;  %v2692_v15 = vmul.f32 %v2589_v31, %v2589_v31  ;;  %v2693_v8 = vmul.f32 %v2590_v7, %v2590_v7 }
 0x17a   : > { %v3199_v45 = vpack.c.bf16 %v3469_v56, %v3469_v56  ;;  %v2360_v61 = vpop.f32.mrb[31].mxu0  ;;  %v2646_v4 = vadd.f32 %v2645_v33, %v2644_v62  ;;  %v2746_v11 = vadd.f32 %v2745_v54, %v2744_v19  ;;  %v2647_v23 = vsel %vm2597_vm5, %v2590_v7, 0.0 }
 0x17b   : > { %v2747_v57 = vsel %vm2597_vm5, %v2692_v15, 0.0  ;;  %v3197_v3 = vpack.c.bf16 %v3470_v49, %v3470_v49  ;;  %v3471_v26 = vadd.f32 %v3440_v20, %v3360_v51  ;;  %v3472_v5 = vadd.f32 %v2360_v61, %v1251_v30 }
 0x17c   : > { %2563 = vst.msk [vmem:[%s4192_s6 + $0x78] sm:$0xf] %vm2532_vm4, %v3199_v45  ;;  %v2648_v63 = vadd.f32 %v2647_v23, %v2646_v4  ;;  %v2748_v38 = vadd.f32 %v2747_v57, %v2746_v11  ;;  %v2749_v1 = vsel %vm2597_vm5, %v2693_v8, 0.0  ;;  %v2651_v12 = vsel %vm2597_vm5, %v2592_v28, 0.0 }
 0x17d   : > { %2561 = vst.msk [vmem:[%s4192_s6 + $0x70] sm:$0xf] %vm2532_vm4, %v3197_v3  ;;  %v2419_v35 = vpack.c.bf16 %v3471_v26, %v3469_v56  ;;  %v3200_v13 = vpack.c.bf16 %v3471_v26, %v3471_v26  ;;  %v2418_v48 = vpack.c.bf16 %v3472_v5, %v3470_v49  ;;  %v3198_v6 = vpack.c.bf16 %v3472_v5, %v3472_v5 }
 0x17e   : > { %v2650_v44 = vadd.f32 %v2649_v27, %v2648_v63  ;;  %v2750_v47 = vadd.f32 %v2749_v1, %v2748_v38  ;;  %v2751_v37 = vsel %vm2597_vm5, %v2694_v34, 0.0  ;;  %v2753_v41 = vsel %vm2597_vm5, %v2695_v17, 0.0 }
 0x17f   : > { %2564 = vst.msk [vmem:[%s4192_s6 + $0x7c] sm:$0xf] %vm2532_vm4, %v3200_v13  ;;  %v2595_v43 = vunpack.c.l.bf16 %v2419_v35  ;;  %2562 = vst.msk [vmem:[%s4192_s6 + $0x74] sm:$0xf] %vm2532_vm4, %v3198_v6  ;;  %v2593_v2 = vunpack.c.l.bf16 %v2418_v48  ;;  %v2594_v52 = vunpack.c.h.bf16 %v2418_v48  ;;  %v2596_v53 = vunpack.c.h.bf16 %v2419_v35 }
 0x180   : > { %v2752_v36 = vadd.f32 %v2751_v37, %v2750_v47  ;;  %v2652_v46 = vadd.f32 %v2651_v12, %v2650_v44 }
 0x181   : > { %v2653_v55 = vsel %vm2597_vm5, %v2593_v2, 0.0  ;;  %v2696_v51 = vmul.f32 %v2593_v2, %v2593_v2  ;;  %v2697_v58 = vmul.f32 %v2594_v52, %v2594_v52  ;;  %v2698_v29 = vmul.f32 %v2595_v43, %v2595_v43 }
 0x182   : > { %v2654_v59 = vadd.f32 %v2653_v55, %v2652_v46  ;;  %v2754_v14 = vadd.f32 %v2753_v41, %v2752_v36  ;;  %v2655_v30 = vsel %vm2597_vm5, %v2594_v52, 0.0  ;;  %v2657_v32 = vsel %vm2597_vm5, %v2595_v43, 0.0 }
 0x183   : > { %v2755_v42 = vsel %vm2597_vm5, %v2696_v51, 0.0  ;;  %v2699_v24 = vmul.f32 %v2596_v53, %v2596_v53  ;;  %v2757_v0 = vsel %vm2597_vm5, %v2697_v58, 0.0  ;;  %v2659_v56 = vsel %vm2597_vm5, %v2596_v53, 0.0 }
 0x184   : > { %v2656_v50 = vadd.f32 %v2655_v30, %v2654_v59  ;;  %v2756_v60 = vadd.f32 %v2755_v42, %v2754_v14  ;;  %v2759_v9 = vsel %vm2597_vm5, %v2698_v29, 0.0 }
 0x185   : > { %v2761_v10 = vsel %vm2597_vm5, %v2699_v24, 0.0 }
 0x186   : > { %v2658_v21 = vadd.f32 %v2657_v32, %v2656_v50  ;;  %v2758_v40 = vadd.f32 %v2757_v0, %v2756_v60 }
 0x188   : > { %v2660_v16 = vadd.f32 %v2659_v56, %v2658_v21  ;;  %v2760_v25 = vadd.f32 %v2759_v9, %v2758_v40 }
 0x18a   : > { %v2661_v18 = vrot.slane %v2660_v16, 4  ;;  %v2762_v20 = vadd.f32 %v2761_v10, %v2760_v25 }
 0x18c   : > { %v2662_v22 = vadd.f32 %v2661_v18, %v2660_v16  ;;  %v2763_v39 = vrot.slane %v2762_v20, 4 }
 0x18e   : > { %v2663_v45 = vrot.slane %v2662_v22, 2  ;;  %v2764_v49 = vadd.f32 %v2763_v39, %v2762_v20 }
 0x190   : > { %v2664_v61 = vadd.f32 %v2663_v45, %v2662_v22  ;;  %v2765_v19 = vrot.slane %v2764_v49, 2 }
 0x192   : > { %v2665_v31 = vrot.slane %v2664_v61, 1  ;;  %v2766_v7 = vadd.f32 %v2765_v19, %v2764_v49 }
 0x194   : > { %v2666_v62 = vadd.f32 %v2665_v31, %v2664_v61  ;;  %v2767_v54 = vrot.slane %v2766_v7, 1 }
 0x196   : > { %v2768_v28 = vadd.f32 %v2767_v54, %v2766_v7  ;;  %2771 = vst.msk [vmem:[%s211_s9] sm:$0x1] %vm2770_vm6, %v2666_v62 }
 0x198   : > { %2772 = vst.msk [vmem:[%s214_s12] sm:$0x1] %vm2770_vm6, %v2768_v28 }
 0x199 PF: > { %s15_s15 = sadd.s32 1, %s3600_s15  }
 0x19a   : > { %p12_p4 = scmp.ge.s32.totalorder %s15_s15, 4  }
 0x19c   :  { %14 = sbr.rel (!%p12_p4) target bundleno = 1 (0x1), region = 86 }

// kernel: forward.12
= control target key start
LH: loop header
LB: loop body
LE: loop exit
PB: predicated region body
PF: predicated region fallthrough
CT: control target
= control target key end

     0   :  { %s1523_s15 = smov 0   ;;  %s1776_s0 = inlined_call_operand.vmem [shape: bf16[2,9,9,64], index: 0, kind: input, shape index: {}]   ;;  %s1777_s1 = inlined_call_operand.vmem [shape: bf16[4,64,32], index: 1, kind: input, shape index: {}]   ;;  %s1778_s2 = inlined_call_operand.vmem [shape: bf16[2,64,32], index: 2, kind: output, shape index: {0}]   ;;  %s1779_s3 = inlined_call_operand.vmem [shape: f32[2,1,32], index: 3, kind: output, shape index: {1}]   ;;  %s1780_s4 = inlined_call_operand.vmem [shape: f32[2,1,32], index: 4, kind: output, shape index: {2}]  }
   0x1 LB: > { %s1214_s16 = sadd.s32 4294967295, %s1496_s15   ;;  %p1218_p0 = scmp.ge.s32.totalorder %s1496_s15, 1  ;;  %s1496_s15 = sphi %s1523_s15, %s15_s15  }
   0x2   : > { %p167_p1 = scmp.lt.s32.totalorder %s1496_s15, 3 }
   0x4   : > { %p168_p2 = pnand %p1218_p0, %p167_p1 }
   0x5   : > { %v1466_v0 = vld [vmem:[%s1777_s1 + $0x20] sm:$0xff] (!%p168_p2)   ;;  %p199_p3 = scmp.lt.s32.totalorder (!%p168_p2), %s1214_s16, 1  ;;  %v1468_v2 = vld [vmem:[%s1777_s1 + $0x28] sm:$0xff] (!%p168_p2)   ;;  %v1470_v4 = vld [vmem:[%s1777_s1 + $0x30] sm:$0xff] (!%p168_p2)   ;;  %vm400_vm0 = vcmask (!%p168_p2), 523264   ;;  %vm1036_vm4 = vcmask (!%p168_p2), 257024  }
   0x6   : > { %171 = sbr.rel (%p168_p2) target bundleno = 309 (0x135), region = 28  ;;  %v1467_v1 = vld [vmem:[%s1777_s1 + $0x40] sm:$0xff] (!%p168_p2)   ;;  %1369 = vmatprep.subr.bf16.mxu1 (!%p168_p2), %v1466_v0  ;;  %v1469_v3 = vld [vmem:[%s1777_s1 + $0x48] sm:$0xff] (!%p168_p2)   ;;  %v1471_v5 = vld [vmem:[%s1777_s1 + $0x50] sm:$0xff] (!%p168_p2)   ;;  %vm240_vm1 = vsmask.f32 (!%p168_p2), 3328 }
   0x7   : > { %1401 = vmatprep.subr.bf16.mxu0 (!%p168_p2), %v1467_v1  ;;  %1370 = vmatpush3.bf16.msra.mxu1 (!%p168_p2), %v1466_v0  ;;  %v1472_v6 = vld [vmem:[%s1777_s1 + $0x38] sm:$0xff] (!%p168_p2)   ;;  %vm241_vm2 = vsmask.f32 (!%p168_p2), 7440  ;;  %v1580_v19 = vld [vmem:[%s1777_s1] sm:$0xff] (!%p168_p2)   ;;  %v1479_v51 = vld [vmem:[%s1777_s1 + $0x68] sm:$0xff] (!%p168_p2)   ;;  %vm1053_vm5 = vcmask (!%p168_p2), 261120  }
   0x8   : > { %1402 = vmatpush3.bf16.msra.mxu0 (!%p168_p2), %v1467_v1  ;;  %1371 = vmatprep.subr.bf16.mxu1 (!%p168_p2), %v1468_v2  ;;  %v1473_v7 = vld [vmem:[%s1777_s1 + $0x58] sm:$0xff] (!%p168_p2)   ;;  %v1477_v20 = vld [vmem:[%s1777_s1 + $0x60] sm:$0xff] (!%p168_p2)   ;;  %vm1587_vm3 = vmor (!%p168_p2), %vm240_vm1, %vm241_vm2  ;;  %vm1106_vm6 = vcmask (!%p168_p2), 253952  }
   0x9   : > { %1403 = vmatprep.subr.bf16.mxu0 (!%p168_p2), %v1469_v3 }
   0xb   : > { %1372 = vmatpush3.bf16.msra.mxu1 (!%p168_p2), %v1468_v2 }
   0xc   : > { %1404 = vmatpush3.bf16.msra.mxu0 (!%p168_p2), %v1469_v3  ;;  %1373 = vmatprep.subr.bf16.mxu1 (!%p168_p2), %v1470_v4 }
   0xd   : > { %s1784_s16 = smov (!%p199_p3, %s1214_s16), 1  ;;  %1405 = vmatprep.subr.bf16.mxu0 %v1471_v5 }
   0xe   : > { %s1457_s27 = smul.u32 72, %s1784_s16  ;;  %s1328_s29 = sshll.u32 %s1784_s16, 5 }
   0xf   : > { %1374 = vmatpush3.bf16.msra.mxu1 %v1470_v4  ;;  %s1731_s6 = scalar_lea.vmem %s1778_s2, %s1328_s29  ;;  %s211_s9 = scalar_lea.vmem %s1779_s3, %s1784_s16 }
  0x10   : > { %s1558_s8 = scalar_lea.vmem %s1776_s0, %s1457_s27  ;;  %1406 = vmatpush3.bf16.msra.mxu0 %v1471_v5  ;;  %1375 = vmatprep.subr.bf16.mxu1 %v1472_v6  ;;  %v1478_v5 = vld [vmem:[%s1777_s1 + $0x8] sm:$0xff]   ;;  %s214_s12 = scalar_lea.vmem %s1780_s4, %s1784_s16 }
  0x11   : > { %v1474_v8 = vld [vmem:[%s1558_s8 + $0x8] ss:$8 sps:$4 sm:$0xff]   ;;  %v1565_v9 = vld [vmem:[%s1558_s8] sm:$0xf]  ;;  %v232_v11 = vld [vmem:[%s1558_s8 + $0x4] sm:$0x1]  ;;  %1407 = vmatprep.subr.bf16.mxu0 %v1473_v7 }
  0x12   : > { %v1568_v10 = vld [vmem:[%s1558_s8 + $0x8] sm:$0xf]  ;;  %1409 = vmatprep.mubr.msk.bf16.mxu0 %vm400_vm0, %v1474_v8  ;;  %v233_v12 = vld [vmem:[%s1558_s8 + $0xc] sm:$0x1]  ;;  %v244_v13 = vshrl.u32 %v1565_v9, 16  ;;  %v247_v14 = vshll.u32 %v1565_v9, 16 }
  0x13   : > { %v253_v15 = vshll.u32 %v232_v11, 16  ;;  %v258_v16 = vshrl.u32 %v1568_v10, 16  ;;  %v261_v17 = vshll.u32 %v1568_v10, 16  ;;  %v267_v18 = vshll.u32 %v233_v12, 16  ;;  %v1476_v28 = vld [vmem:[%s1558_s8 + $0x18] ss:$8 sps:$4 sm:$0xff]   ;;  %1376 = vmatpush3.bf16.msra.mxu1 %v1472_v6 }
  0x14   : > { %v246_v21 = vrot.slane %v244_v13, 4  ;;  %v249_v22 = vrot.slane %v247_v14, 5  ;;  %v1593_v30 = vld [vmem:[%s1558_s8 + $0x10] sm:$0xf]  ;;  %1408 = vmatpush3.bf16.msra.mxu0 %v1473_v7  ;;  %1385 = vmatprep.subr.bf16.mxu1 %v1580_v19  ;;  %v1597_v32 = vld [vmem:[%s1558_s8 + $0x18] sm:$0xf] }
  0x15   : > { %v255_v23 = vrot.slane %v253_v15, 5  ;;  %v260_v24 = vrot.slane %v258_v16, 4  ;;  %v263_v26 = vrot.slane %v261_v17, 5  ;;  %v269_v27 = vrot.slane %v267_v18, 5  ;;  %v234_v33 = vld [vmem:[%s1558_s8 + $0x14] sm:$0x1]  ;;  %1417 = vmatprep.subr.bf16.mxu0 %v1477_v20 }
  0x16   : > { %v250_v29 = vor.u32 %v249_v22, %v246_v21  ;;  %v235_v34 = vld [vmem:[%s1558_s8 + $0x1c] sm:$0x1]  ;;  %v272_v36 = vshrl.u32 %v1593_v30, 16  ;;  %v275_v37 = vshll.u32 %v1593_v30, 16  ;;  %v281_v38 = vshll.u32 %v234_v33, 16  ;;  %v1483_v15 = vld [vmem:[%s1777_s1 + $0x70] sm:$0xff]  }
  0x17   : > { %v264_v31 = vor.u32 %v263_v26, %v260_v24  ;;  %v286_v40 = vshrl.u32 %v1597_v32, 16  ;;  %v289_v41 = vshll.u32 %v1597_v32, 16  ;;  %v295_v42 = vshll.u32 %v235_v34, 16  ;;  %1410 = vmatmul.mubr.msk.bf16.vlgmr.msra.gmra.mrb[0].mxu0 %vm400_vm0, %v1476_v28  ;;  %v1480_v54 = vld [vmem:[%s1558_s8 + $0x28] ss:$8 sps:$4 sm:$0xff]  }
  0x18   : > { %v251_v35 = vrot.slane %v250_v29, 4  ;;  %v274_v44 = vrot.slane %v272_v36, 4  ;;  %v277_v45 = vrot.slane %v275_v37, 5  ;;  %v283_v46 = vrot.slane %v281_v38, 5  ;;  %1418 = vmatpush3.bf16.msra.mxu0 %v1477_v20  ;;  %v1615_v56 = vld [vmem:[%s1558_s8 + $0x20] sm:$0xf]  ;;  %1413 = vmatprep.mubr.msk.bf16.mxu0 %vm400_vm0, %v1480_v54 }
  0x19   : > { %v265_v39 = vrot.slane %v264_v31, 4  ;;  %v288_v48 = vrot.slane %v286_v40, 4  ;;  %v291_v49 = vrot.slane %v289_v41, 5  ;;  %v297_v50 = vrot.slane %v295_v42, 5  ;;  %1419 = vmatprep.subr.bf16.mxu0 %v1479_v51  ;;  %v1618_v57 = vld [vmem:[%s1558_s8 + $0x28] sm:$0xf] }
  0x1a   : > { %v256_v43 = vsel %vm1587_vm3, %v251_v35, %v255_v23  ;;  %v278_v53 = vor.u32 %v277_v45, %v274_v44  ;;  %v236_v58 = vld [vmem:[%s1558_s8 + $0x24] sm:$0x1]  ;;  %v237_v60 = vld [vmem:[%s1558_s8 + $0x2c] sm:$0x1]  ;;  %v300_v61 = vshrl.u32 %v1615_v56, 16  ;;  %v303_v62 = vshll.u32 %v1615_v56, 16 }
  0x1b   : > { %v270_v47 = vsel %vm1587_vm3, %v265_v39, %v269_v27  ;;  %v292_v55 = vor.u32 %v291_v49, %v288_v48  ;;  %v309_v63 = vshll.u32 %v236_v58, 16  ;;  %v314_v1 = vshrl.u32 %v1618_v57, 16  ;;  %v1482_v18 = vld [vmem:[%s1558_s8 + $0x38] ss:$8 sps:$4 sm:$0xff]   ;;  %v1640_v21 = vld [vmem:[%s1558_s8 + $0x30] sm:$0xf] }
  0x1c   : > { %v1230_v52 = vcombine.low %v256_v43, %v270_v47  ;;  %v279_v59 = vrot.slane %v278_v53, 4  ;;  %1420 = vmatpush3.bf16.msra.mxu0 %v1479_v51  ;;  %v317_v2 = vshll.u32 %v1618_v57, 16  ;;  %v323_v3 = vshll.u32 %v237_v60, 16  ;;  %v1643_v22 = vld [vmem:[%s1558_s8 + $0x38] sm:$0xf]  ;;  %v1481_v35 = vld [vmem:[%s1777_s1 + $0x10] sm:$0xff]  }
  0x1d   : > { %v293_v0 = vrot.slane %v292_v55, 4  ;;  %v302_v6 = vrot.slane %v300_v61, 4  ;;  %v305_v7 = vrot.slane %v303_v62, 5  ;;  %v311_v8 = vrot.slane %v309_v63, 5  ;;  %1421 = vmatprep.subr.bf16.mxu0 %v1483_v15  ;;  %v238_v24 = vld [vmem:[%s1558_s8 + $0x34] sm:$0x1] }
  0x1e   : > { %1377 = vmatprep.mubr.msk.bf16.mxu1 %vm400_vm0, %v1230_v52  ;;  %v284_v4 = vsel %vm1587_vm3, %v279_v59, %v283_v46  ;;  %v316_v12 = vrot.slane %v314_v1, 4  ;;  %v319_v13 = vrot.slane %v317_v2, 5  ;;  %v325_v14 = vrot.slane %v323_v3, 5  ;;  %v239_v26 = vld [vmem:[%s1558_s8 + $0x3c] sm:$0x1] }
  0x1f   : > { %v298_v11 = vsel %vm1587_vm3, %v293_v0, %v297_v50  ;;  %v306_v17 = vor.u32 %v305_v7, %v302_v6  ;;  %1414 = vmatmul.mubr.msk.bf16.gmra.mrb[4].mxu0 %vm400_vm0, %v1482_v18  ;;  %v328_v27 = vshrl.u32 %v1640_v21, 16  ;;  %v331_v29 = vshll.u32 %v1640_v21, 16  ;;  %v1485_v42 = vld [vmem:[%s1777_s1 + $0x78] sm:$0xff]   ;;  %v1282_v46 = vld [vmem:[%s1558_s8 + $0x8] sm:$0xf] }
  0x20   : > { %v1231_v16 = vcombine.low %v284_v4, %v298_v11  ;;  %v320_v20 = vor.u32 %v319_v13, %v316_v12  ;;  %v337_v31 = vshll.u32 %v238_v24, 16  ;;  %v342_v33 = vshrl.u32 %v1643_v22, 16  ;;  %1422 = vmatpush3.bf16.msra.mxu0 %v1483_v15  ;;  %v1283_v49 = vld [vmem:[%s1558_s8 + $0xc] sm:$0x1]  ;;  %v1284_v50 = vld [vmem:[%s1558_s8 + $0x10] sm:$0xf] }
  0x21   : > { %v307_v23 = vrot.slane %v306_v17, 4  ;;  %v330_v36 = vrot.slane %v328_v27, 4  ;;  %v351_v37 = vshll.u32 %v239_v26, 16  ;;  %v333_v39 = vrot.slane %v331_v29, 5  ;;  %1423 = vmatprep.subr.bf16.mxu0 %v1485_v42  ;;  %v1285_v51 = vld [vmem:[%s1558_s8 + $0x14] sm:$0x1] }
  0x22   : > { %1378 = vmatmul.mubr.msk.bf16.vlgmr.msra.gmra.mrb[0].mxu1 %vm400_vm0, %v1231_v16  ;;  %v321_v28 = vrot.slane %v320_v20, 4  ;;  %v339_v40 = vrot.slane %v337_v31, 5  ;;  %v344_v41 = vrot.slane %v342_v33, 4  ;;  %v1242_v47 = vcombine.low %v1565_v9, %v1568_v10  ;;  %v1484_v9 = vld [vmem:[%s1777_s1 + $0x18] sm:$0xff]   ;;  %v1290_v24 = vld [vmem:[%s1558_s8 + $0x28] sm:$0xf] }
  0x23   : > { %1386 = vmatpush3.bf16.msra.mxu1 %v1580_v19  ;;  %v312_v34 = vsel %vm1587_vm3, %v307_v23, %v311_v8  ;;  %v345_v19 = vshll.u32 %v1643_v22, 16  ;;  %v353_v45 = vrot.slane %v351_v37, 5  ;;  %v334_v48 = vor.u32 %v333_v39, %v330_v36  ;;  %v1286_v59 = vld [vmem:[%s1558_s8 + $0x18] sm:$0xf]  ;;  %v1287_v0 = vld [vmem:[%s1558_s8 + $0x1c] sm:$0x1] }
  0x24   : > { %1387 = vmatprep.subr.bf16.mxu1 %v1478_v5  ;;  %v326_v38 = vsel %vm1587_vm3, %v321_v28, %v325_v14  ;;  %v1243_v52 = vcombine.low %v1593_v30, %v1597_v32  ;;  %v1244_v53 = vcombine.low %v1615_v56, %v1618_v57  ;;  %v763_v10 = vshrl.u32 %v1282_v46, 16  ;;  %1424 = vmatpush3.bf16.msra.mxu0 %v1485_v42  ;;  %v1289_v14 = vld [vmem:[%s1558_s8 + $0x24] sm:$0x1]  ;;  %v1291_v31 = vld [vmem:[%s1558_s8 + $0x2c] sm:$0x1] }
  0x25   : > { %v1232_v43 = vcombine.low %v312_v34, %v326_v38  ;;  %v347_v44 = vrot.slane %v345_v19, 5  ;;  %v766_v55 = vshll.u32 %v1282_v46, 16  ;;  %v772_v58 = vshll.u32 %v1283_v49, 16  ;;  %v1292_v39 = vld [vmem:[%s1558_s8 + $0x30] sm:$0xf] }
  0x26   : > { %v335_v60 = vrot.slane %v334_v48, 4  ;;  %v777_v61 = vshrl.u32 %v1284_v50, 16  ;;  %v780_v62 = vshll.u32 %v1284_v50, 16  ;;  %v786_v63 = vshll.u32 %v1285_v51, 16  ;;  %v1294_v46 = vld [vmem:[%s1558_s8 + $0x38] sm:$0xf] }
  0x27   : > { %1388 = vmatpush3.bf16.msra.mxu1 %v1478_v5  ;;  %1381 = vmatprep.mubr.msk.bf16.mxu1 %vm400_vm0, %v1232_v43  ;;  %v348_v54 = vor.u32 %v347_v44, %v344_v41  ;;  %v765_v2 = vrot.slane %v763_v10, 4  ;;  %v768_v3 = vrot.slane %v766_v55, 5  ;;  %v774_v4 = vrot.slane %v772_v58, 5  ;;  %v1288_v5 = vld [vmem:[%s1558_s8 + $0x20] sm:$0xf] }
  0x28   : > { %1389 = vmatprep.subr.bf16.mxu1 %v1481_v35  ;;  %v340_v6 = vsel %vm1587_vm3, %v335_v60, %v339_v40  ;;  %v779_v7 = vrot.slane %v777_v61, 4  ;;  %v782_v8 = vrot.slane %v780_v62, 5  ;;  %v788_v11 = vrot.slane %v786_v63, 5  ;;  %v1293_v40 = vld [vmem:[%s1558_s8 + $0x34] sm:$0x1] }
  0x29   : > { %v349_v1 = vrot.slane %v348_v54, 4  ;;  %v769_v13 = vor.u32 %v768_v3, %v765_v2  ;;  %v791_v15 = vshrl.u32 %v1286_v59, 16  ;;  %v794_v16 = vshll.u32 %v1286_v59, 16  ;;  %v1295_v55 = vld [vmem:[%s1558_s8 + $0x3c] sm:$0x1] }
  0x2a   : > { %v783_v18 = vor.u32 %v782_v8, %v779_v7  ;;  %v800_v20 = vshll.u32 %v1287_v0, 16  ;;  %v805_v23 = vshrl.u32 %v1288_v5, 16  ;;  %v808_v29 = vshll.u32 %v1288_v5, 16  ;;  %v1296_v61 = vld [vmem:[%s1558_s8 + $0x40] sm:$0xf] }
  0x2b   : > { %1390 = vmatpush3.bf16.msra.mxu1 %v1481_v35  ;;  %v354_v12 = vsel %vm1587_vm3, %v349_v1, %v353_v45  ;;  %v770_v26 = vrot.slane %v769_v13, 4  ;;  %v793_v27 = vrot.slane %v791_v15, 4  ;;  %v796_v28 = vrot.slane %v794_v16, 5  ;;  %v1297_v2 = vld [vmem:[%s1558_s8 + $0x44] sm:$0x1] }
  0x2c   : > { %1391 = vmatprep.subr.bf16.mxu1 %v1484_v9  ;;  %v1233_v17 = vcombine.low %v340_v6, %v354_v12  ;;  %v784_v33 = vrot.slane %v783_v18, 4  ;;  %v802_v34 = vrot.slane %v800_v20, 5  ;;  %v807_v35 = vrot.slane %v805_v23, 4 }
  0x2d   : > { %v814_v36 = vshll.u32 %v1289_v14, 16  ;;  %v775_v19 = vsel %vm1587_vm3, %v770_v26, %v774_v4  ;;  %v797_v37 = vor.u32 %v796_v28, %v793_v27  ;;  %v810_v38 = vrot.slane %v808_v29, 5 }
  0x2e   : > { %1382 = vmatmul.mubr.msk.bf16.gmra.mrb[4].mxu1 %vm400_vm0, %v1233_v17  ;;  %v819_v41 = vshrl.u32 %v1290_v24, 16  ;;  %v789_v42 = vsel %vm1587_vm3, %v784_v33, %v788_v11  ;;  %v822_v44 = vshll.u32 %v1290_v24, 16  ;;  %v828_v45 = vshll.u32 %v1291_v31, 16 }
  0x2f   : > { %1392 = vmatpush3.bf16.msra.mxu1 %v1484_v9  ;;  %1393 = vmatprep.mubr.msk.bf16.mxu1 %vm400_vm0, %v1242_v47  ;;  %v816_v43 = vrot.slane %v814_v36, 5  ;;  %v1306_v48 = vcombine.low %v775_v19, %v789_v42  ;;  %v798_v49 = vrot.slane %v797_v37, 4  ;;  %v811_v50 = vor.u32 %v810_v38, %v807_v35 }
  0x30   : > { %v821_v51 = vrot.slane %v819_v41, 4  ;;  %v824_v47 = vrot.slane %v822_v44, 5  ;;  %v830_v54 = vrot.slane %v828_v45, 5  ;;  %v833_v9 = vshrl.u32 %v1292_v39, 16 }
  0x31   : > { %v836_v10 = vshll.u32 %v1292_v39, 16  ;;  %1425 = vmatprep.mubr.msk.bf16.mxu0 %vm400_vm0, %v1306_v48  ;;  %v803_v58 = vsel %vm1587_vm3, %v798_v49, %v802_v34  ;;  %v812_v59 = vrot.slane %v811_v50, 4  ;;  %v842_v60 = vshll.u32 %v1293_v40, 16 }
  0x32   : > { %v847_v62 = vshrl.u32 %v1294_v46, 16  ;;  %v825_v63 = vor.u32 %v824_v47, %v821_v51  ;;  %v835_v0 = vrot.slane %v833_v9, 4  ;;  %v850_v3 = vshll.u32 %v1294_v46, 16 }
  0x33   : > { %v838_v1 = vrot.slane %v836_v10, 5  ;;  %v817_v4 = vsel %vm1587_vm3, %v812_v59, %v816_v43  ;;  %v844_v5 = vrot.slane %v842_v60, 5  ;;  %v856_v7 = vshll.u32 %v1295_v55, 16 }
  0x34   : > { %v849_v6 = vrot.slane %v847_v62, 4  ;;  %v1307_v8 = vcombine.low %v803_v58, %v817_v4  ;;  %v826_v11 = vrot.slane %v825_v63, 4  ;;  %v852_v13 = vrot.slane %v850_v3, 5 }
  0x35   : > { %v839_v12 = vor.u32 %v838_v1, %v835_v0  ;;  %v861_v14 = vshrl.u32 %v1296_v61, 16  ;;  %v864_v15 = vshll.u32 %v1296_v61, 16  ;;  %v870_v16 = vshll.u32 %v1297_v2, 16 }
  0x36   : > { %1394 = vmatmul.mubr.msk.bf16.vlgmr.msra.gmra.mrb[0].mxu1 %vm400_vm0, %v1243_v52  ;;  %1426 = vmatmul.mubr.msk.bf16.vlgmr.msra.gmra.mrb[0].mxu0 %vm400_vm0, %v1307_v8  ;;  %v831_v17 = vsel %vm1587_vm3, %v826_v11, %v830_v54  ;;  %v853_v30 = vor.u32 %v852_v13, %v849_v6  ;;  %v858_v32 = vrot.slane %v856_v7, 5  ;;  %v1245_v57 = vcombine.low %v1640_v21, %v1643_v22 }
  0x37   : > { %1397 = vmatprep.mubr.msk.bf16.mxu1 %vm400_vm0, %v1244_v53  ;;  %v840_v18 = vrot.slane %v839_v12, 4  ;;  %v863_v52 = vrot.slane %v861_v14, 4  ;;  %v866_v20 = vrot.slane %v864_v15, 5  ;;  %v872_v26 = vrot.slane %v870_v16, 5 }
  0x38   : > { %v854_v56 = vrot.slane %v853_v30, 4 }
  0x39   : > { %v845_v23 = vsel %vm1587_vm3, %v840_v18, %v844_v5  ;;  %v867_v24 = vor.u32 %v866_v20, %v863_v52 }
  0x3a   : > { %v1308_v53 = vcombine.low %v831_v17, %v845_v23  ;;  %v859_v27 = vsel %vm1587_vm3, %v854_v56, %v858_v32 }
  0x3b   : > { %v868_v28 = vrot.slane %v867_v24, 4 }
  0x3c   : > { %1429 = vmatprep.mubr.msk.bf16.mxu0 %vm400_vm0, %v1308_v53 }
  0x3d   : > { %v873_v29 = vsel %vm1587_vm3, %v868_v28, %v872_v26 }
  0x3e   : > { %1398 = vmatmul.mubr.msk.bf16.gmra.mrb[4].mxu1 %vm400_vm0, %v1245_v57  ;;  %v1309_v31 = vcombine.low %v859_v27, %v873_v29 }
  0x40   : > { %1430 = vmatmul.mubr.msk.bf16.gmra.mrb[4].mxu0 %vm400_vm0, %v1309_v31 }
 0x109   : > { %v1395_v33 = vpop.f32.mrb[0].mxu1  ;;  %v1427_v22 = vpop.f32.mrb[0].mxu0 }
 0x10a   : > { %v568_v21 = vpop.f32.mrb[1].mxu1  ;;  %v1433_v35 = vadd.f32 %v1427_v22, %v1395_v33  ;;  %v965_v36 = vpop.f32.mrb[1].mxu0 }
 0x10b   : > { %v1396_v34 = vpop.f32.mrb[2].mxu1  ;;  %v1434_v25 = vadd.f32 %v965_v36, %v568_v21  ;;  %v1428_v37 = vpop.f32.mrb[2].mxu0 }
 0x10c   : > { %v571_v19 = vpop.f32.mrb[3].mxu1  ;;  %v1331_v38 = vpack.c.bf16 %v1433_v35, %v1433_v35  ;;  %v1435_v39 = vadd.f32 %v1428_v37, %v1396_v34  ;;  %v968_v40 = vpop.f32.mrb[3].mxu0 }
 0x10d   : > { %v1329_v41 = vpack.c.bf16 %v1434_v25, %v1434_v25  ;;  %v1436_v42 = vadd.f32 %v968_v40, %v571_v19 }
 0x10e   : > { %1039 = vst.msk [vmem:[%s1731_s6 + $0x8] sm:$0xf] %vm1036_vm4, %v1331_v38  ;;  %v1005_v43 = vpack.c.bf16 %v1435_v39, %v1433_v35  ;;  %v1332_v44 = vpack.c.bf16 %v1435_v39, %v1435_v39 }
 0x10f   : > { %1037 = vst.msk [vmem:[%s1731_s6] sm:$0xf] %vm1036_vm4, %v1329_v41  ;;  %v1004_v45 = vpack.c.bf16 %v1436_v42, %v1434_v25  ;;  %v1330_v46 = vpack.c.bf16 %v1436_v42, %v1436_v42 }
 0x110   : > { %1040 = vst.msk [vmem:[%s1731_s6 + $0xc] sm:$0xf] %vm1036_vm4, %v1332_v44  ;;  %v1047_v49 = vunpack.c.l.bf16 %v1005_v43  ;;  %v1048_v51 = vunpack.c.h.bf16 %v1005_v43 }
 0x111   : > { %v1399_v48 = vpop.f32.mrb[4].mxu1  ;;  %1038 = vst.msk [vmem:[%s1731_s6 + $0x4] sm:$0xf] %vm1036_vm4, %v1330_v46  ;;  %v1045_v47 = vunpack.c.l.bf16 %v1004_v45  ;;  %v1046_v54 = vunpack.c.h.bf16 %v1004_v45 }
 0x112   : > { %v584_v50 = vpop.f32.mrb[5].mxu1  ;;  %v1078_v10 = vmul.f32 %v1047_v49, %v1047_v49  ;;  %v1057_v63 = vsel %vm1053_vm5, %v1047_v49, 0.0  ;;  %v1079_v3 = vmul.f32 %v1048_v51, %v1048_v51  ;;  %v1059_v15 = vsel %vm1053_vm5, %v1048_v51, 0.0 }
 0x113   : > { %v1400_v9 = vpop.f32.mrb[6].mxu1  ;;  %v1054_v58 = vsel %vm1053_vm5, %v1045_v47, 0.0  ;;  %v1055_v59 = vsel %vm1053_vm5, %v1046_v54, 0.0  ;;  %v1076_v60 = vmul.f32 %v1045_v47, %v1045_v47  ;;  %v1077_v61 = vmul.f32 %v1046_v54, %v1046_v54  ;;  %v1431_v62 = vpop.f32.mrb[4].mxu0 }
 0x114   : > { %v587_v55 = vpop.f32.mrb[7].mxu1  ;;  %v1056_v0 = vadd.f32 %v1055_v59, %v1054_v58  ;;  %v1437_v1 = vadd.f32 %v1431_v62, %v1399_v48  ;;  %v981_v2 = vpop.f32.mrb[5].mxu0  ;;  %v1087_v16 = vsel %vm1053_vm5, %v1078_v10, 0.0  ;;  %v1089_v23 = vsel %vm1053_vm5, %v1079_v3, 0.0 }
 0x115   : > { %v1084_v4 = vsel %vm1053_vm5, %v1076_v60, 0.0  ;;  %v1085_v5 = vsel %vm1053_vm5, %v1077_v61, 0.0  ;;  %v1438_v6 = vadd.f32 %v981_v2, %v584_v50  ;;  %v1432_v7 = vpop.f32.mrb[6].mxu0 }
 0x116   : > { %v1058_v8 = vadd.f32 %v1057_v63, %v1056_v0  ;;  %v1086_v11 = vadd.f32 %v1085_v5, %v1084_v4  ;;  %v1335_v12 = vpack.c.bf16 %v1437_v1, %v1437_v1  ;;  %v1439_v13 = vadd.f32 %v1432_v7, %v1400_v9  ;;  %v984_v14 = vpop.f32.mrb[7].mxu0 }
 0x117   : > { %v1333_v17 = vpack.c.bf16 %v1438_v6, %v1438_v6  ;;  %v1440_v18 = vadd.f32 %v984_v14, %v587_v55 }
 0x118   : > { %v1088_v30 = vadd.f32 %v1087_v16, %v1086_v11  ;;  %1043 = vst.msk [vmem:[%s1731_s6 + $0x18] sm:$0xf] %vm1036_vm4, %v1335_v12  ;;  %v1007_v32 = vpack.c.bf16 %v1439_v13, %v1437_v1  ;;  %v1336_v52 = vpack.c.bf16 %v1439_v13, %v1439_v13  ;;  %v1060_v20 = vadd.f32 %v1059_v15, %v1058_v8 }
 0x119   : > { %1041 = vst.msk [vmem:[%s1731_s6 + $0x10] sm:$0xf] %vm1036_vm4, %v1333_v17  ;;  %v1006_v56 = vpack.c.bf16 %v1440_v18, %v1438_v6  ;;  %v1334_v57 = vpack.c.bf16 %v1440_v18, %v1440_v18 }
 0x11a   : > { %1044 = vst.msk [vmem:[%s1731_s6 + $0x1c] sm:$0xf] %vm1036_vm4, %v1336_v52  ;;  %v1090_v53 = vadd.f32 %v1089_v23, %v1088_v30  ;;  %v1051_v24 = vunpack.c.l.bf16 %v1007_v32  ;;  %v1052_v28 = vunpack.c.h.bf16 %v1007_v32 }
 0x11b   : > { %1042 = vst.msk [vmem:[%s1731_s6 + $0x14] sm:$0xf] %vm1036_vm4, %v1334_v57  ;;  %v1049_v26 = vunpack.c.l.bf16 %v1006_v56  ;;  %v1050_v27 = vunpack.c.h.bf16 %v1006_v56 }
 0x11c   : > { %v1082_v22 = vmul.f32 %v1051_v24, %v1051_v24  ;;  %v1065_v25 = vsel %vm1053_vm5, %v1051_v24, 0.0  ;;  %v1083_v37 = vmul.f32 %v1052_v28, %v1052_v28  ;;  %v1067_v41 = vsel %vm1053_vm5, %v1052_v28, 0.0 }
 0x11d   : > { %v1061_v29 = vsel %vm1053_vm5, %v1049_v26, 0.0  ;;  %v1080_v31 = vmul.f32 %v1049_v26, %v1049_v26  ;;  %v1081_v33 = vmul.f32 %v1050_v27, %v1050_v27  ;;  %v1063_v34 = vsel %vm1053_vm5, %v1050_v27, 0.0 }
 0x11e   : > { %v1062_v21 = vadd.f32 %v1061_v29, %v1060_v20  ;;  %v1095_v42 = vsel %vm1053_vm5, %v1082_v22, 0.0  ;;  %v1097_v45 = vsel %vm1053_vm5, %v1083_v37, 0.0 }
 0x11f   : > { %v1091_v35 = vsel %vm1053_vm5, %v1080_v31, 0.0  ;;  %v1093_v38 = vsel %vm1053_vm5, %v1081_v33, 0.0 }
 0x120   : > { %v1064_v36 = vadd.f32 %v1063_v34, %v1062_v21  ;;  %v1092_v19 = vadd.f32 %v1091_v35, %v1090_v53 }
 0x122   : > { %v1066_v39 = vadd.f32 %v1065_v25, %v1064_v36  ;;  %v1094_v40 = vadd.f32 %v1093_v38, %v1092_v19 }
 0x124   : > { %v1068_v43 = vadd.f32 %v1067_v41, %v1066_v39  ;;  %v1096_v44 = vadd.f32 %v1095_v42, %v1094_v40 }
 0x126   : > { %v1069_v46 = vrot.slane %v1068_v43, 4  ;;  %v1098_v48 = vadd.f32 %v1097_v45, %v1096_v44 }
 0x128   : > { %v1070_v49 = vadd.f32 %v1069_v46, %v1068_v43  ;;  %v1099_v50 = vrot.slane %v1098_v48, 4 }
 0x12a   : > { %v1071_v51 = vrot.slane %v1070_v49, 2  ;;  %v1100_v47 = vadd.f32 %v1099_v50, %v1098_v48 }
 0x12c   : > { %v1072_v54 = vadd.f32 %v1071_v51, %v1070_v49  ;;  %v1101_v9 = vrot.slane %v1100_v47, 2 }
 0x12e   : > { %v1073_v10 = vrot.slane %v1072_v54, 1  ;;  %v1102_v55 = vadd.f32 %v1101_v9, %v1100_v47 }
 0x130   : > { %v1074_v58 = vadd.f32 %v1073_v10, %v1072_v54  ;;  %v1103_v59 = vrot.slane %v1102_v55, 1 }
 0x132   : > { %v1104_v60 = vadd.f32 %v1103_v59, %v1102_v55  ;;  %1107 = vst.msk [vmem:[%s211_s9] sm:$0x1] %vm1106_vm6, %v1074_v58 }
 0x134   : > { %1108 = vst.msk [vmem:[%s214_s12] sm:$0x1] %vm1106_vm6, %v1104_v60 }
 0x135 PF: > { %s15_s15 = sadd.s32 1, %s1496_s15  }
 0x136   : > { %p12_p4 = scmp.ge.s32.totalorder %s15_s15, 4  }
 0x138   :  { %14 = sbr.rel (!%p12_p4) target bundleno = 1 (0x1), region = 86 }

// kernel: forward.13
= control target key start
LH: loop header
LB: loop body
LE: loop exit
PB: predicated region body
PF: predicated region fallthrough
CT: control target
= control target key end

     0   :  { %s330_s12 = smov 0   ;;  %s353_s0 = inlined_call_operand.vmem [shape: bf16[32,128], index: 0, kind: input, shape index: {}]   ;;  %s354_s1 = inlined_call_operand.vmem [shape: f32[1,128], index: 1, kind: input, shape index: {}]   ;;  %s355_s2 = inlined_call_operand.vmem [shape: f32[1,128], index: 2, kind: input, shape index: {}]   ;;  %s356_s3 = inlined_call_operand.vmem [shape: bf16[32,128], index: 3, kind: output, shape index: {}]  }
   0x1 LB: > { %s268_s13 = sadd.s32 4294967295, %s308_s12   ;;  %p272_p0 = scmp.ge.s32.totalorder %s308_s12, 1  ;;  %s308_s12 = sphi %s330_s12, %s13_s12  }
   0x2   : > { %p138_p1 = scmp.lt.s32.totalorder %s308_s12, 3 }
   0x4   : > { %p139_p2 = pnand %p272_p0, %p138_p1 }
   0x5   : > { %s273_s14 = sshll.u32 (!%p139_p2), %s268_s13, 1  ;;  %v277_v1 = vld [vmem:[%s354_s1] ss:$0 sm:$0xff] (!%p139_p2) }
   0x6   : > { %142 = sbr.rel (%p139_p2) target bundleno = 29 (0x1d), region = 32  ;;  %p163_p3 = scmp.lt.s32.totalorder (!%p139_p2), %s273_s14, 3  ;;  %v278_v4 = vld [vmem:[%s355_s2] ss:$0 sm:$0xff] (!%p139_p2) }
   0xd   : > { %s358_s14 = smov (!%p163_p3, %s273_s14), 3 }
   0xe   : > { %s274_s15 = sshll.u32 %s358_s14, 2 }
   0xf   : > { %s166_s18 = scalar_lea.vmem %s353_s0, %s274_s15  ;;  %s172_s25 = scalar_lea.vmem %s356_s3, %s274_s15 }
  0x10   : > { %v286_v0 = vld [vmem:[%s166_s18] sm:$0xff]  }
  0x11   : > { %v287_v2 = vunpack.c.l.bf16 %v286_v0  ;;  %v288_v3 = vunpack.c.h.bf16 %v286_v0 }
  0x13   : > { %v185_v5 = vmul.f32 %v287_v2, %v277_v1  ;;  %v186_v6 = vmul.f32 %v288_v3, %v277_v1 }
  0x15   : > { %v194_v7 = vadd.f32 %v278_v4, %v185_v5  ;;  %v195_v8 = vadd.f32 %v278_v4, %v186_v6 }
  0x17   : > { %vm196_vm0 = vcmp.ge.f32.partialorder %v194_v7, 0.0  ;;  %vm197_vm1 = vcmp.ge.f32.partialorder %v195_v8, 0.0  ;;  %v198_v9 = vmul.f32 0.1, %v194_v7  ;;  %v199_v10 = vmul.f32 0.1, %v195_v8 }
  0x19   : > { %v200_v11 = vsel %vm196_vm0, %v194_v7, %v198_v9  ;;  %v201_v12 = vsel %vm197_vm1, %v195_v8, %v199_v10 }
  0x1a   : > { %v292_v13 = vpack.c.bf16 %v201_v12, %v200_v11 }
  0x1c   : > { %293 = vst [vmem:[%s172_s25] sm:$0xff] %v292_v13  }
  0x1d PF: > { %s13_s12 = sadd.s32 1, %s308_s12  }
  0x1e   : > { %p10_p4 = scmp.ge.s32.totalorder %s13_s12, 4  }
  0x20   :  { %12 = sbr.rel (!%p10_p4) target bundleno = 1 (0x1), region = 62 }

// kernel: forward.15
= control target key start
LH: loop header
LB: loop body
LE: loop exit
PB: predicated region body
PF: predicated region fallthrough
CT: control target
= control target key end

     0   :  { %s75_s0 = inlined_call_operand.vmem [shape: bf16[8,128], index: 0, kind: input, shape index: {}]   ;;  %s76_s1 = inlined_call_operand.vmem [shape: f32[1,128], index: 1, kind: input, shape index: {}]   ;;  %s77_s2 = inlined_call_operand.vmem [shape: f32[1,128], index: 2, kind: input, shape index: {}]   ;;  %s78_s3 = inlined_call_operand.vmem [shape: bf16[8,128], index: 3, kind: output, shape index: {}]  }
   0x1   :  { %v14_v0 = vld [vmem:[%s75_s0] sm:$0xf] }
   0x2   :  { %v41_v1 = vld [vmem:[%s76_s1] ss:$0 sm:$0xff]  ;;  %v15_v2 = vunpack.c.l.bf16 %v14_v0 }
   0x3   :  { %v42_v3 = vld [vmem:[%s77_s2] ss:$0 sm:$0xff] }
   0x4   :  { %v23_v4 = vmul.f32 %v41_v1, %v15_v2 }
   0x6   :  { %v31_v5 = vadd.f32 %v42_v3, %v23_v4 }
   0x8   :  { %vm32_vm0 = vcmp.ge.f32.partialorder %v31_v5, 0.0  ;;  %v33_v6 = vmul.f32 0.1, %v31_v5 }
   0xa   :  { %v34_v7 = vsel %vm32_vm0, %v31_v5, %v33_v6 }
   0xb   :  { %v35_v8 = vpack.c.bf16 %v34_v7, %v34_v7 }
   0xd   :  { %36 = vst [vmem:[%s78_s3] sm:$0xf] %v35_v8 }

// kernel: forward.14
= control target key start
LH: loop header
LB: loop body
LE: loop exit
PB: predicated region body
PF: predicated region fallthrough
CT: control target
= control target key end

     0   :  { %s1400_s15 = smov 0   ;;  %s1619_s0 = inlined_call_operand.vmem [shape: bf16[2,5,5,128], index: 0, kind: input, shape index: {}]   ;;  %s1620_s1 = inlined_call_operand.vmem [shape: bf16[4,128,32], index: 1, kind: input, shape index: {}]   ;;  %s1621_s2 = inlined_call_operand.vmem [shape: bf16[2,16,32], index: 2, kind: output, shape index: {0}]   ;;  %s1622_s3 = inlined_call_operand.vmem [shape: f32[2,1,32], index: 3, kind: output, shape index: {1}]   ;;  %s1623_s4 = inlined_call_operand.vmem [shape: f32[2,1,32], index: 4, kind: output, shape index: {2}]  }
   0x1 LB: > { %s1075_s16 = sadd.s32 4294967295, %s1370_s15   ;;  %p1079_p0 = scmp.ge.s32.totalorder %s1370_s15, 1  ;;  %s1370_s15 = sphi %s1400_s15, %s15_s15  }
   0x2   : > { %p167_p1 = scmp.lt.s32.totalorder %s1370_s15, 3 }
   0x4   : > { %p168_p2 = pnand %p1079_p0, %p167_p1 }
   0x5   : > { %v1324_v0 = vld [vmem:[%s1620_s1 + $0x40] sm:$0xff] (!%p168_p2)   ;;  %v1372_v1 = vmov (!%p168_p2), 0.0   ;;  %v1326_v3 = vld [vmem:[%s1620_s1 + $0x48] sm:$0xff] (!%p168_p2)   ;;  %vm1373_vm0 = vmmov (!%p168_p2), 0   ;;  %p199_p3 = scmp.lt.s32.totalorder (!%p168_p2), %s1075_s16, 1  ;;  %v1328_v5 = vld [vmem:[%s1620_s1 + $0x50] sm:$0xff] (!%p168_p2)   ;;  %v361_v9 = vlaneseq (!%p168_p2) }
   0x6   : > { %171 = sbr.rel (%p168_p2) target bundleno = 310 (0x136), region = 28  ;;  %1222 = vmatprep.subr.bf16.mxu1 (!%p168_p2), %v1372_v1  ;;  %1262 = vmatprep.subr.bf16.mxu0 (!%p168_p2), %v1372_v1  ;;  %v1325_v2 = vld [vmem:[%s1620_s1 + $0x80] sm:$0xff] (!%p168_p2)   ;;  %v1327_v4 = vld [vmem:[%s1620_s1 + $0x88] sm:$0xff] (!%p168_p2)   ;;  %v1329_v6 = vld [vmem:[%s1620_s1 + $0x90] sm:$0xff] (!%p168_p2)   ;;  %vm276_vm1 = vsmask.f32 (!%p168_p2), 1280 }
   0x7   : > { %1223 = vmatpush3.bf16.msra.mxu1 (!%p168_p2), %v1324_v0  ;;  %1238 = vmatprep.mubr.msk.bf16.mxu1 (!%p168_p2), %vm1373_vm0, %v1372_v1  ;;  %v1330_v7 = vld [vmem:[%s1620_s1 + $0x58] sm:$0xff] (!%p168_p2)   ;;  %v1332_v10 = vld [vmem:[%s1620_s1 + $0x60] sm:$0xff] (!%p168_p2)   ;;  %v1459_v12 = vshrl.u32 (!%p168_p2), %v361_v9, 7  ;;  %v1334_v13 = vld [vmem:[%s1620_s1 + $0x68] sm:$0xff] (!%p168_p2)   ;;  %vm277_vm2 = vsmask.f32 (!%p168_p2), 3336 }
   0x8   : > { %1263 = vmatpush3.bf16.msra.mxu0 (!%p168_p2), %v1325_v2  ;;  %1224 = vmatprep.subr.bf16.mxu1 (!%p168_p2), %v1372_v1  ;;  %v1331_v8 = vld [vmem:[%s1620_s1 + $0x98] sm:$0xff] (!%p168_p2)   ;;  %v1333_v11 = vld [vmem:[%s1620_s1 + $0xa0] sm:$0xff] (!%p168_p2)   ;;  %v1335_v15 = vld [vmem:[%s1620_s1 + $0xa8] sm:$0xff] (!%p168_p2)   ;;  %vm279_vm3 = vsmask.f32 (!%p168_p2), 5392  ;;  %vm939_vm8 = vcmask (!%p168_p2), 257024  }
   0x9   : > { %1264 = vmatprep.subr.bf16.mxu0 (!%p168_p2), %v1372_v1  ;;  %1278 = vmatprep.mubr.msk.bf16.mxu0 (!%p168_p2), %vm1373_vm0, %v1372_v1  ;;  %vm278_vm4 = vmor (!%p168_p2), %vm276_vm1, %vm277_vm2  ;;  %vm281_vm5 = vsmask.f32 (!%p168_p2), 7448  ;;  %v1336_v22 = vld [vmem:[%s1620_s1 + $0x70] sm:$0xff] (!%p168_p2)   ;;  %v1338_v49 = vld [vmem:[%s1620_s1 + $0x78] sm:$0xff] (!%p168_p2)   ;;  %v1374_v57 = vmov (!%p168_p2), 1983009808  }
   0xa   : > { %v1337_v27 = vld [vmem:[%s1620_s1 + $0xb0] sm:$0xff] (!%p168_p2)   ;;  %vm1481_vm6 = vmor (!%p168_p2), %vm278_vm4, %vm279_vm3  ;;  %v1339_v50 = vld [vmem:[%s1620_s1 + $0xb8] sm:$0xff] (!%p168_p2)   ;;  %v359_v58 = vunpack.c.l.s4 (!%p168_p2), %v1374_v57  ;;  %vm944_vm9 = vcmask (!%p168_p2), 261120   ;;  %vm967_vm10 = vcmask (!%p168_p2), 253952  }
   0xb   : > { %1225 = vmatpush3.bf16.msra.mxu1 (!%p168_p2), %v1326_v3  ;;  %vm1490_vm7 = vmor (!%p168_p2), %vm1481_vm6, %vm281_vm5  ;;  %v1357_v45 = vld [vmem:[%s1620_s1 + $0xf8] sm:$0xff] (!%p168_p2)  }
   0xc   : > { %1265 = vmatpush3.bf16.msra.mxu0 (!%p168_p2), %v1327_v4  ;;  %1226 = vmatprep.subr.bf16.mxu1 (!%p168_p2), %v1372_v1  ;;  %v360_v3 = vunpack.c.0.s8 (!%p168_p2), %v359_v58 }
   0xd   : > { %s1629_s16 = smov (!%p199_p3, %s1075_s16), 1  ;;  %1266 = vmatprep.subr.bf16.mxu0 %v1372_v1 }
   0xe   : > { %s1312_s29 = smul.u32 20, %s1629_s16  ;;  %s1183_s12 = sshll.u32 %s1629_s16, 3 }
   0xf   : > { %1227 = vmatpush3.bf16.msra.mxu1 %v1328_v5  ;;  %s208_s17 = scalar_lea.vmem %s1621_s2, %s1183_s12  ;;  %s211_s20 = scalar_lea.vmem %s1622_s3, %s1629_s16 }
  0x10   : > { %1267 = vmatpush3.bf16.msra.mxu0 %v1329_v6  ;;  %1228 = vmatprep.subr.bf16.mxu1 %v1372_v1  ;;  %s1450_s10 = scalar_lea.vmem %s1619_s0, %s1312_s29  ;;  %s214_s23 = scalar_lea.vmem %s1623_s4, %s1629_s16 }
  0x11   : > { %1268 = vmatprep.subr.bf16.mxu0 %v1372_v1  ;;  %v1083_v14 = vld.sshfl [vmem:[%s1450_s10] sm:$0x13 pattern:$0x76325410] }
  0x12   : > { %v1084_v16 = vld.sshfl [vmem:[%s1450_s10 + $0x4] sm:$0x13 pattern:$0x76325410]  ;;  %v251_v17 = vcombine.high %v1083_v14, %v1083_v14  ;;  %v284_v24 = vshrl.u32 %v1083_v14, 16  ;;  %v287_v25 = vshll.u32 %v1083_v14, 16 }
  0x13   : > { %1229 = vmatpush3.bf16.msra.mxu1 %v1330_v7  ;;  %v1085_v18 = vld.sshfl [vmem:[%s1450_s10 + $0x8] sm:$0x13 pattern:$0x76325410]  ;;  %v259_v19 = vcombine.high %v1084_v16, %v1084_v16  ;;  %v298_v28 = vshrl.u32 %v1084_v16, 16  ;;  %v301_v29 = vshll.u32 %v1084_v16, 16  ;;  %v1517_v7 = vsub.s32 %v360_v3, %v1459_v12 }
  0x14   : > { %1269 = vmatpush3.bf16.msra.mxu0 %v1331_v8  ;;  %1230 = vmatprep.subr.bf16.mxu1 %v1372_v1  ;;  %v1086_v20 = vld.sshfl [vmem:[%s1450_s10 + $0xc] sm:$0x13 pattern:$0x76325410]  ;;  %v267_v21 = vcombine.high %v1085_v18, %v1085_v18  ;;  %v293_v26 = vshll.u32 %v251_v17, 16  ;;  %v312_v31 = vshrl.u32 %v1085_v18, 16 }
  0x15   : > { %1270 = vmatprep.subr.bf16.mxu0 %v1372_v1  ;;  %v275_v23 = vcombine.high %v1086_v20, %v1086_v20  ;;  %v307_v30 = vshll.u32 %v259_v19, 16  ;;  %v286_v33 = vrot.slane %v284_v24, 6  ;;  %v289_v34 = vrot.slane %v287_v25, 7  ;;  %v1340_v12 = vld [vmem:[%s1620_s1] sm:$0xff]   ;;  %v1345_v16 = vld [vmem:[%s1620_s1 + $0xc8] sm:$0xff]  }
  0x16   : > { %v295_v35 = vrot.slane %v293_v26, 7  ;;  %v315_v36 = vshll.u32 %v1085_v18, 16  ;;  %v300_v37 = vrot.slane %v298_v28, 6  ;;  %v303_v38 = vrot.slane %v301_v29, 7  ;;  %v1344_v17 = vld [vmem:[%s1620_s1 + $0x8] sm:$0xff]   ;;  %v1347_v18 = vld [vmem:[%s1620_s1 + $0xd0] sm:$0xff]  }
  0x17   : > { %1231 = vmatpush3.bf16.msra.mxu1 %v1332_v10  ;;  %v309_v39 = vrot.slane %v307_v30, 7  ;;  %v314_v40 = vrot.slane %v312_v31, 6  ;;  %v290_v41 = vor.u32 %v289_v34, %v286_v33  ;;  %v321_v43 = vshll.u32 %v267_v21, 16  ;;  %v1348_v28 = vld [vmem:[%s1620_s1 + $0x18] sm:$0xff]   ;;  %v1351_v29 = vld [vmem:[%s1620_s1 + $0xe0] sm:$0xff]   ;;  %v1353_v34 = vld [vmem:[%s1620_s1 + $0xe8] sm:$0xff]  }
  0x18   : > { %1271 = vmatpush3.bf16.msra.mxu0 %v1333_v11  ;;  %1232 = vmatprep.subr.bf16.mxu1 %v1372_v1  ;;  %v317_v42 = vrot.slane %v315_v36, 7  ;;  %v326_v44 = vshrl.u32 %v1086_v20, 16  ;;  %v304_v46 = vor.u32 %v303_v38, %v300_v37  ;;  %v329_v47 = vshll.u32 %v1086_v20, 16  ;;  %v1343_v11 = vld [vmem:[%s1620_s1 + $0xc0] sm:$0xff]   ;;  %v1346_v20 = vld [vmem:[%s1620_s1 + $0x10] sm:$0xff]   ;;  %v1352_v36 = vld [vmem:[%s1620_s1 + $0x28] sm:$0xff]  }
  0x19   : > { %1272 = vmatprep.subr.bf16.mxu0 %v1372_v1  ;;  %v335_v48 = vshll.u32 %v275_v23, 16  ;;  %v291_v51 = vrot.slane %v290_v41, 2  ;;  %v323_v53 = vrot.slane %v321_v43, 7  ;;  %v1349_v23 = vld [vmem:[%s1620_s1 + $0xd8] sm:$0xff]   ;;  %v1350_v33 = vld [vmem:[%s1620_s1 + $0x20] sm:$0xff]  }
  0x1a   : > { %v318_v52 = vor.u32 %v317_v42, %v314_v40  ;;  %v328_v54 = vrot.slane %v326_v44, 6  ;;  %v305_v55 = vrot.slane %v304_v46, 2  ;;  %v331_v56 = vrot.slane %v329_v47, 7  ;;  %v1354_v42 = vld [vmem:[%s1620_s1 + $0x30] sm:$0xff]   ;;  %v1356_v46 = vld [vmem:[%s1620_s1 + $0x38] sm:$0xff]  }
  0x1b   : > { %1233 = vmatpush3.bf16.msra.mxu1 %v1334_v13  ;;  %v1360_v59 = vld.sshfl [vmem:[%s1450_s10 + $0x4] sm:$0xf pattern:$0x76325410]  ;;  %v296_v61 = vsel %vm1490_vm7, %v291_v51, %v295_v35  ;;  %v337_v63 = vrot.slane %v335_v48, 7 }
  0x1c   : > { %1273 = vmatpush3.bf16.msra.mxu0 %v1335_v15  ;;  %1234 = vmatprep.subr.bf16.mxu1 %v1372_v1  ;;  %v1361_v60 = vld.sshfl [vmem:[%s1450_s10 + $0xc] sm:$0xf pattern:$0x76325410]  ;;  %v319_v62 = vrot.slane %v318_v52, 2  ;;  %v1508_v0 = vsel %vm1490_vm7, %v305_v55, %v309_v39  ;;  %v332_v2 = vor.u32 %v331_v56, %v328_v54 }
  0x1d   : > { %1274 = vmatprep.subr.bf16.mxu0 %v1372_v1  ;;  %v356_v4 = vcombine.low %v296_v61, %v1508_v0  ;;  %v616_v13 = vcombine.low %v1360_v59, %v1361_v60  ;;  %v1154_v19 = vld.sshfl [vmem:[%s1450_s10 + $0x10] sm:$0x13 pattern:$0x76325410] }
  0x1e   : > { %v1514_v5 = vsel %vm1490_vm7, %v319_v62, %v323_v53  ;;  %v333_v6 = vrot.slane %v332_v2, 2  ;;  %v748_v21 = vcombine.high %v1154_v19, %v1154_v19  ;;  %v795_v24 = vshll.u32 %v1154_v19, 16  ;;  %v1355_v39 = vld [vmem:[%s1620_s1 + $0xf0] sm:$0xff]  }
  0x1f   : > { %1235 = vmatpush3.bf16.msra.mxu1 %v1336_v22  ;;  %v364_v10 = vrot.slane %v356_v4, %v1517_v7  ;;  %v792_v22 = vshrl.u32 %v1154_v19, 16  ;;  %v822_v37 = vcombine.low %v1508_v0, %v1514_v5  ;;  %v1362_v40 = vld.sshfl [vmem:[%s1450_s10] sm:$0xf pattern:$0x76325410] }
  0x20   : > { %1275 = vmatpush3.bf16.msra.mxu0 %v1337_v27  ;;  %1236 = vmatprep.subr.bf16.mxu1 %v1372_v1  ;;  %v1522_v8 = vsel %vm1490_vm7, %v333_v6, %v337_v63  ;;  %v801_v26 = vshll.u32 %v748_v21, 16  ;;  %v797_v27 = vrot.slane %v795_v24, 7  ;;  %v1363_v41 = vld.sshfl [vmem:[%s1450_s10 + $0x8] sm:$0xf pattern:$0x76325410] }
  0x21   : > { %1276 = vmatprep.subr.bf16.mxu0 %v1372_v1  ;;  %v357_v9 = vcombine.low %v1514_v5, %v1522_v8  ;;  %v794_v25 = vrot.slane %v792_v22, 6  ;;  %v830_v43 = vrot.slane %v822_v37, %v1517_v7  ;;  %v483_v48 = vcombine.low %v1362_v40, %v1363_v41 }
  0x22   : > { %v803_v31 = vrot.slane %v801_v26, 7 }
  0x23   : > { %1237 = vmatpush3.bf16.msra.mxu1 %v1338_v49  ;;  %v371_v14 = vrot.slane %v357_v9, %v1517_v7  ;;  %v798_v30 = vor.u32 %v797_v27, %v794_v25 }
  0x24   : > { %1277 = vmatpush3.bf16.msra.mxu0 %v1339_v50  ;;  %1242 = vmatprep.subr.bf16.mxu1 %v1372_v1 }
  0x25   : > { %1282 = vmatprep.subr.bf16.mxu0 %v1372_v1  ;;  %v372_v15 = vcombine.low %v364_v10, %v371_v14  ;;  %v799_v32 = vrot.slane %v798_v30, 2 }
  0x27   : > { %1279 = vmatmul.mubr.bf16.vlgmr.msra.gmra.mrb[0].mxu0 %v616_v13  ;;  %1239 = vmatmul.mubr.bf16.vlgmr.msra.gmra.mrb[0].mxu1 %v372_v15  ;;  %v804_v35 = vsel %vm1490_vm7, %v799_v32, %v803_v31 }
  0x28   : > { %1283 = vmatpush3.bf16.msra.mxu0 %v1343_v11  ;;  %1298 = vmatprep.mubr.msk.bf16.mxu0 %vm1373_vm0, %v1372_v1  ;;  %v823_v38 = vcombine.low %v1522_v8, %v804_v35 }
  0x29   : > { %1284 = vmatprep.subr.bf16.mxu0 %v1372_v1  ;;  %1243 = vmatpush3.bf16.msra.mxu1 %v1340_v12 }
  0x2a   : > { %1258 = vmatprep.mubr.msk.bf16.mxu1 %vm1373_vm0, %v1372_v1  ;;  %1244 = vmatprep.subr.bf16.mxu1 %v1372_v1  ;;  %v837_v44 = vrot.slane %v823_v38, %v1517_v7 }
  0x2c   : > { %1285 = vmatpush3.bf16.msra.mxu0 %v1345_v16  ;;  %v838_v47 = vcombine.low %v830_v43, %v837_v44 }
  0x2d   : > { %1286 = vmatprep.subr.bf16.mxu0 %v1372_v1  ;;  %1245 = vmatpush3.bf16.msra.mxu1 %v1344_v17 }
  0x2e   : > { %1246 = vmatprep.subr.bf16.mxu1 %v1372_v1 }
  0x30   : > { %1287 = vmatpush3.bf16.msra.mxu0 %v1347_v18 }
  0x31   : > { %1288 = vmatprep.subr.bf16.mxu0 %v1372_v1  ;;  %1247 = vmatpush3.bf16.msra.mxu1 %v1346_v20 }
  0x32   : > { %1248 = vmatprep.subr.bf16.mxu1 %v1372_v1 }
  0x34   : > { %1289 = vmatpush3.bf16.msra.mxu0 %v1349_v23 }
  0x35   : > { %1290 = vmatprep.subr.bf16.mxu0 %v1372_v1  ;;  %1249 = vmatpush3.bf16.msra.mxu1 %v1348_v28 }
  0x36   : > { %1250 = vmatprep.subr.bf16.mxu1 %v1372_v1 }
  0x38   : > { %1291 = vmatpush3.bf16.msra.mxu0 %v1351_v29 }
  0x39   : > { %1292 = vmatprep.subr.bf16.mxu0 %v1372_v1  ;;  %1251 = vmatpush3.bf16.msra.mxu1 %v1350_v33 }
  0x3a   : > { %1252 = vmatprep.subr.bf16.mxu1 %v1372_v1 }
  0x3c   : > { %1293 = vmatpush3.bf16.msra.mxu0 %v1353_v34 }
  0x3d   : > { %1294 = vmatprep.subr.bf16.mxu0 %v1372_v1  ;;  %1253 = vmatpush3.bf16.msra.mxu1 %v1352_v36 }
  0x3e   : > { %1254 = vmatprep.subr.bf16.mxu1 %v1372_v1 }
  0x40   : > { %1295 = vmatpush3.bf16.msra.mxu0 %v1355_v39 }
  0x41   : > { %1296 = vmatprep.subr.bf16.mxu0 %v1372_v1  ;;  %1255 = vmatpush3.bf16.msra.mxu1 %v1354_v42 }
  0x42   : > { %1256 = vmatprep.subr.bf16.mxu1 %v1372_v1 }
  0x44   : > { %1297 = vmatpush3.bf16.msra.mxu0 %v1357_v45 }
  0x45   : > { %1257 = vmatpush3.bf16.msra.mxu1 %v1356_v46 }
  0x47   : > { %1299 = vmatmul.mubr.bf16.vlgmr.msra.gmra.mrb[0].mxu0 %v838_v47 }
  0x48   : > { %1259 = vmatmul.mubr.bf16.vlgmr.msra.gmra.mrb[0].mxu1 %v483_v48 }
 0x11a   : > { %v922_v49 = vpop.f32.mrb[0].mxu0 }
 0x11b   : > { %v1300_v50 = vpop.f32.mrb[1].mxu0  ;;  %v567_v52 = vpop.f32.mrb[0].mxu1 }
 0x11c   : > { %v925_v51 = vpop.f32.mrb[2].mxu0  ;;  %v1302_v54 = vadd.f32 %v922_v49, %v567_v52  ;;  %v1260_v55 = vpop.f32.mrb[1].mxu1 }
 0x11d   : > { %v1301_v53 = vpop.f32.mrb[3].mxu0  ;;  %v570_v56 = vpop.f32.mrb[2].mxu1 }
 0x11e   : > { %v1184_v1 = vpack.c.bf16 %v1302_v54, %v1302_v54  ;;  %v1303_v57 = vadd.f32 %v925_v51, %v570_v56  ;;  %v1261_v58 = vpop.f32.mrb[3].mxu1 }
 0x120   : > { %940 = vst.msk [vmem:[%s208_s17] sm:$0xf] %vm939_vm8, %v1184_v1  ;;  %v931_v59 = vpack.c.bf16 %v1303_v57, %v1302_v54  ;;  %v1185_v60 = vpack.c.bf16 %v1303_v57, %v1303_v57 }
 0x122   : > { %941 = vst.msk [vmem:[%s208_s17 + $0x4] sm:$0xf] %vm939_vm8, %v1185_v60  ;;  %v942_v61 = vunpack.c.l.bf16 %v931_v59  ;;  %v943_v62 = vunpack.c.h.bf16 %v931_v59 }
 0x124   : > { %v945_v63 = vsel %vm944_vm9, %v942_v61, 0.0  ;;  %v946_v0 = vsel %vm944_vm9, %v943_v62, 0.0  ;;  %v955_v2 = vmul.f32 %v942_v61, %v942_v61  ;;  %v956_v3 = vmul.f32 %v943_v62, %v943_v62 }
 0x125   : > { %v947_v4 = vadd.f32 %v946_v0, %v945_v63 }
 0x126   : > { %v957_v5 = vsel %vm944_vm9, %v955_v2, 0.0  ;;  %v958_v6 = vsel %vm944_vm9, %v956_v3, 0.0 }
 0x127   : > { %v948_v7 = vrot.slane %v947_v4, 4  ;;  %v959_v8 = vadd.f32 %v958_v6, %v957_v5 }
 0x129   : > { %v949_v9 = vadd.f32 %v948_v7, %v947_v4  ;;  %v960_v10 = vrot.slane %v959_v8, 4 }
 0x12b   : > { %v950_v11 = vrot.slane %v949_v9, 2  ;;  %v961_v13 = vadd.f32 %v960_v10, %v959_v8 }
 0x12d   : > { %v951_v14 = vadd.f32 %v950_v11, %v949_v9  ;;  %v962_v12 = vrot.slane %v961_v13, 2 }
 0x12f   : > { %v952_v15 = vrot.slane %v951_v14, 1  ;;  %v963_v16 = vadd.f32 %v962_v12, %v961_v13 }
 0x131   : > { %v953_v17 = vadd.f32 %v952_v15, %v951_v14  ;;  %v964_v18 = vrot.slane %v963_v16, 1 }
 0x133   : > { %v965_v19 = vadd.f32 %v964_v18, %v963_v16  ;;  %968 = vst.msk [vmem:[%s211_s20] sm:$0x1] %vm967_vm10, %v953_v17 }
 0x135   : > { %969 = vst.msk [vmem:[%s214_s23] sm:$0x1] %vm967_vm10, %v965_v19 }
 0x136 PF: > { %s15_s15 = sadd.s32 1, %s1370_s15  }
 0x137   : > { %p12_p4 = scmp.ge.s32.totalorder %s15_s15, 4  }
 0x139   :  { %14 = sbr.rel (!%p12_p4) target bundleno = 1 (0x1), region = 86 }

</bundles_post_ra>
